<compile_context>
chip_gen: v7x
topology: tpu7x:2x2x1
jax: 0.10.0
libtpu: 0.0.40
codegen_flags: <defaults>
</compile_context>

<pallas_src>
import functools

import jax
import jax.numpy as jnp
from jax.experimental import pallas as pl
from jax.experimental.pallas import tpu as pltpu


# ----------------------------- Pallas kernel --------------------------------


def _frh_kernel(W, C, HW, HWP, PAD0,
                fw1_ref,                 # SMEM (1,)      fuse weight 1
                res_ref, xup_ref,        # (1,HW,CinP), (1,HW,CP)
                prew_ref,                # (CinP,CP)      pre_conv (fuse0 folded)
                postw_ref,               # (9,CP,CP)      post_conv (BN scale folded)
                scw_ref,                 # (CP,CP)        shortcut (BN scale folded)
                caw_ref,                 # (CP,CP)        SE squeeze@excite folded
                paw_ref,                 # (9,1,CP)       pa depthwise taps
                pjw_ref,                 # (9,1,CP)       proj dw taps (BN scale folded)
                pjpw_ref,                # (CP,CP)        proj pointwise
                bias_ref,                # (4,CP)         [post_b, sc_b, pa_b, pj_b@pj_pw]
                out_ref,                 # (1,HW,CP)
                buf_ref):                # VMEM scratch (HWP, CP)
    f32 = jnp.float32

    # Zero only the halo rows.  The interior [PAD0, PAD0+HW) is fully
    # overwritten before each conv reads it, and the halos are never written,
    # so the zeros stay valid for all three convs in this step.  Kept
    # per-step (not behind pl.when) so "parallel" megacore sharding is safe.
    buf_ref[pl.ds(0, PAD0), :] = jnp.zeros((PAD0, C), f32)
    buf_ref[pl.ds(PAD0 + HW, HWP - PAD0 - HW), :] = (
        jnp.zeros((HWP - PAD0 - HW, C), f32))

    # In-kernel left/right image-border masks (computed once, full lane width).
    col = jax.lax.broadcasted_iota(jnp.int32, (HW, C), 0) % W
    lm = (col != 0).astype(f32)       # 0 where w == 0     -> kills dx = -1 wrap
    rm = (col != W - 1).astype(f32)   # 0 where w == W - 1 -> kills dx = +1 wrap

    def tap(dy, dx):
        # shifted read aligned to output positions (static offsets)
        return buf_ref[pl.ds(PAD0 + dy * W + dx, HW), :]

    def conv3x3_mm(w_ref):
        """Full 3x3 conv of the buffer contents: 9 shifted MXU matmuls."""
        def group(dx):
            acc = None
            for dy in (-1, 0, 1):
                k = (dy + 1) * 3 + (dx + 1)
                d = jnp.dot(tap(dy, dx), w_ref[k], preferred_element_type=f32)
                acc = d if acc is None else acc + d
            return acc
        return group(0) + lm * group(-1) + rm * group(1)

    def conv3x3_dw(w_ref):
        """Depthwise 3x3 of the buffer contents: 9 per-channel FMAs on the VPU."""
        def group(dx):
            acc = None
            for dy in (-1, 0, 1):
                k = (dy + 1) * 3 + (dx + 1)
                d = tap(dy, dx) * w_ref[k]
                acc = d if acc is None else acc + d
            return acc
        return group(0) + lm * group(-1) + rm * group(1)

    biases = bias_ref[...]
    post_b, sc_b, pa_b, pj_b = (biases[0:1], biases[1:2], biases[2:3], biases[3:4])

    res = res_ref[0].astype(f32)          # (HW, CinP)
    xup = xup_ref[0].astype(f32)          # (HW, CP)

    # weighted fusion: fuse_w[0] is already folded into prew
    x = jnp.dot(res, prew_ref[...], preferred_element_type=f32) + fw1_ref[0] * xup

    # post_conv: 3x3 conv (BN scale folded) -> +bias -> ReLU6
    buf_ref[pl.ds(PAD0, HW), :] = x
    xpost = jnp.clip(conv3x3_mm(postw_ref) + post_b, 0.0, 6.0)

    # shortcut: 1x1 conv (BN scale folded) -> +bias
    shortcut = jnp.dot(xpost, scw_ref[...], preferred_element_type=f32) + sc_b

    # pa: depthwise 3x3 (+bias) -> sigmoid gate
    buf_ref[pl.ds(PAD0, HW), :] = xpost
    pa = jax.nn.sigmoid(conv3x3_dw(paw_ref) + pa_b) * xpost

    # ca: global SE (avg + max pool -> folded squeeze@excite -> sigmoid gate)
    z = (jnp.mean(xpost, axis=0, keepdims=True)
         + jnp.max(xpost, axis=0, keepdims=True))                    # (1, CP)
    ca = jax.nn.sigmoid(jnp.dot(z, caw_ref[...], preferred_element_type=f32)) * xpost

    y = pa + ca

    # proj: depthwise 3x3 (BN scale folded) -> 1x1 pointwise -> +folded BN bias
    buf_ref[pl.ds(PAD0, HW), :] = y
    proj = (jnp.dot(conv3x3_dw(pjw_ref), pjpw_ref[...],
                    preferred_element_type=f32) + pj_b)

    out_ref[0] = jnp.clip(proj + shortcut, 0.0, 6.0).astype(out_ref.dtype)


# ------------------------------ JAX wrapper ----------------------------------


def upsample2x_bilinear_nhwc(x):
    """Exact PyTorch F.interpolate(scale_factor=2, mode='bilinear',
    align_corners=False) semantics (half-pixel centers, clamp at borders)."""
    _, h, w, _ = x.shape

    def axis_idx(n_in):
        n_out = 2 * n_in
        src = (jnp.arange(n_out, dtype=jnp.float32) + 0.5) / 2.0 - 0.5
        src = jnp.maximum(src, 0.0)
        i0 = jnp.minimum(jnp.floor(src).astype(jnp.int32), n_in - 1)
        i1 = jnp.minimum(i0 + 1, n_in - 1)
        t = src - i0.astype(jnp.float32)
        return i0, i1, t

    i0, i1, th = axis_idx(h)
    x = x[:, i0] * (1.0 - th)[None, :, None, None] + x[:, i1] * th[None, :, None, None]
    j0, j1, tw = axis_idx(w)
    x = x[:, :, j0] * (1.0 - tw)[None, None, :, None] + x[:, :, j1] * tw[None, None, :, None]
    return x


def feature_refinement_head(x_nchw, res_nchw, p):
    x = jnp.transpose(x_nchw, (0, 2, 3, 1)).astype(jnp.float32)
    res = jnp.transpose(res_nchw, (0, 2, 3, 1)).astype(jnp.float32)
    xup = upsample2x_bilinear_nhwc(x)
    N, H, W, C = xup.shape
    Cin = res.shape[-1]
    HW = H * W

    LANE = 128
    CP = -(-C // LANE) * LANE          # lane-dense channel padding
    CinP = -(-Cin // LANE) * LANE

    def pad_last(a, n):
        return jnp.pad(a, [(0, 0)] * (a.ndim - 1) + [(0, n - a.shape[-1])])

    def pad_last2(a, n2, n1):
        return jnp.pad(a, [(0, 0)] * (a.ndim - 2)
                       + [(0, n2 - a.shape[-2]), (0, n1 - a.shape[-1])])

    # fuse_weights = relu(w) / (sum(relu(w)) + eps) ; fold fw0 into pre_conv
    w = jax.nn.relu(p['fuse_w'])
    fuse = (w / (jnp.sum(w) + 1e-8)).astype(jnp.float32)
    fw1 = fuse[1:]                                         # (1,) SMEM scalar

    # ---- host-side weight folds (all pure weight-side transforms) ----
    prew = pad_last2(p['pre_w'] * fuse[0], CinP, CP)                   # (CinP,CP)
    postw = pad_last2(p['post_w'] * p['post_s'], CP, CP)               # (9,CP,CP)
    scw = pad_last2(p['sc_w'] * p['sc_s'], CP, CP)                     # (CP,CP)
    caw = pad_last2(p['ca_sq'] @ p['ca_ex'], CP, CP)                   # (CP,CP)
    paw = pad_last(p['pa_w'].reshape(9, 1, C), CP)                     # (9,1,CP)
    pjw = pad_last((p['pj_dw'] * p['pj_s']).reshape(9, 1, C), CP)      # (9,1,CP)
    pjpw = pad_last2(p['pj_pw'], CP, CP)                               # (CP,CP)
    pj_bias = p['pj_b'] @ p['pj_pw']                                   # (1,C)
    biases = pad_last(jnp.concatenate(
        [p['post_b'], p['sc_b'], p['pa_b'], pj_bias], axis=0), CP)     # (4,CP)

    # flat, lane-padded activations
    res_f = pad_last(res.reshape(N, HW, Cin), CinP)
    xup_f = pad_last(xup.reshape(N, HW, C), CP)

    # zero-halo column-buffer geometry (PAD0 8-aligned, >= W + 1)
    PAD0 = ((W + 1 + 7) // 8) * 8
    HWP = ((PAD0 + HW + W + 1 + 7) // 8) * 8

    # VMEM budget per generation (v5e/v6e 128 MiB, v7x 64 MiB physical)
    try:
        vmem_cap = pltpu.get_tpu_info().vmem_capacity_bytes
    except Exception:
        vmem_cap = 64 * 1024 * 1024
    vmem_limit = min(int(vmem_cap * 3 // 4), 100 * 1024 * 1024)

    kernel = functools.partial(_frh_kernel, W, CP, HW, HWP, PAD0)

    def full(shape):
        return pl.BlockSpec(shape, lambda b: (0,) * len(shape))

    in_specs = [
        pl.BlockSpec(memory_space=pltpu.MemorySpace.SMEM),     # fw1
        pl.BlockSpec((1, HW, CinP), lambda b: (b, 0, 0)),      # res (flat, padded)
        pl.BlockSpec((1, HW, CP), lambda b: (b, 0, 0)),        # upsampled x
        full((CinP, CP)),                                      # pre_conv
        full((9, CP, CP)),                                     # post_conv taps
        full((CP, CP)),                                        # shortcut
        full((CP, CP)),                                        # SE folded
        full((9, 1, CP)),                                      # pa depthwise taps
        full((9, 1, CP)),                                      # proj depthwise taps
        full((CP, CP)),                                        # proj pointwise
        full((4, CP)),                                         # packed biases
    ]

    out = pl.pallas_call(
        kernel,
        out_shape=jax.ShapeDtypeStruct((N, HW, CP), jnp.float32),
        grid=(N,),
        in_specs=in_specs,
        out_specs=pl.BlockSpec((1, HW, CP), lambda b: (b, 0, 0)),
        scratch_shapes=[pltpu.VMEM((HWP, CP), jnp.float32)],
        compiler_params=pltpu.CompilerParams(
            dimension_semantics=("parallel",),
            vmem_limit_bytes=vmem_limit),
    )(fw1, res_f, xup_f, prew, postw, scw, caw, paw, pjw, pjpw, biases)

    out = out[:, :, :C].reshape(N, H, W, C)
    return jnp.transpose(out, (0, 3, 1, 2))


# --------------------------- deterministic params ----------------------------


def init_params(key, Cin, C):
    ks = jax.random.split(key, 12)

    def conv_w(k, shape, scale=0.2):
        return scale * jax.random.normal(k, shape, jnp.float32)

    def bn(k):
        k1, k2, k3, k4 = jax.random.split(k, 4)
        gamma = 1.0 + 0.1 * jax.random.normal(k1, (C,), jnp.float32)
        beta = 0.1 * jax.random.normal(k2, (C,), jnp.float32)
        mean = 0.1 * jax.random.normal(k3, (C,), jnp.float32)
        var = jax.random.uniform(k4, (C,), jnp.float32, 0.5, 1.5)
        scale = gamma * jax.lax.rsqrt(var + 1e-5)
        bias = beta - mean * scale
        return scale.reshape(1, C), bias.reshape(1, C)

    p = dict(
        fuse_w=jnp.ones((2,), jnp.float32),       # nn.Parameter(torch.ones(2))
        pre_w=conv_w(ks[0], (Cin, C)),            # 1x1 conv weight, (Cin, Cout)
        post_w=conv_w(ks[1], (9, C, C)),          # 3x3 conv weight, (ky*kx, Cin, Cout)
        pa_w=conv_w(ks[2], (9, C)),               # depthwise 3x3, (ky*kx, C)
        pa_b=conv_w(ks[3], (1, C), 0.1),          # pa conv bias
        sc_w=conv_w(ks[4], (C, C)),               # shortcut 1x1
        ca_sq=conv_w(ks[5], (C, C // 2)),         # SE squeeze 1x1
        ca_ex=conv_w(ks[6], (C // 2, C)),         # SE excite 1x1
        pj_dw=conv_w(ks[7], (9, C)),              # proj depthwise 3x3
        pj_pw=conv_w(ks[8], (C, C)),              # proj pointwise 1x1
    )
    p['post_s'], p['post_b'] = bn(ks[9])
    p['sc_s'], p['sc_b'] = bn(ks[10])
    p['pj_s'], p['pj_b'] = bn(ks[11])
    return p


# ------------------------------ pure-JAX reference ---------------------------


def ref_forward(x_nchw, res_nchw, p):
    x = jnp.transpose(x_nchw, (0, 2, 3, 1)).astype(jnp.float32)
    res = jnp.transpose(res_nchw, (0, 2, 3, 1)).astype(jnp.float32)
    xup = upsample2x_bilinear_nhwc(x)
    N, H, W, C = xup.shape

    w = jax.nn.relu(p['fuse_w'])
    fuse = w / (jnp.sum(w) + 1e-8)

    def conv3x3(x, w9):
        xp = jnp.pad(x, ((0, 0), (1, 1), (1, 1), (0, 0)))
        out = jnp.zeros((N, H, W, w9.shape[-1]), jnp.float32)
        k = 0
        for dy in range(3):
            for dx in range(3):
                out = out + jnp.einsum('nhwc,cd->nhwd',
                                       xp[:, dy:dy + H, dx:dx + W, :], w9[k])
                k += 1
        return out

    def dw3x3(x, w9):
        xp = jnp.pad(x, ((0, 0), (1, 1), (1, 1), (0, 0)))
        out = jnp.zeros_like(x)
        k = 0
        for dy in range(3):
            for dx in range(3):
                out = out + xp[:, dy:dy + H, dx:dx + W, :] * w9[k].reshape(1, 1, 1, -1)
                k += 1
        return out

    def bcast(v):
        return v.reshape(1, 1, 1, C)

    pre = jnp.einsum('nhwc,cd->nhwd', res, p['pre_w'])
    xf = fuse[0] * pre + fuse[1] * xup
    xpost = jnp.clip(conv3x3(xf, p['post_w']) * bcast(p['post_s']) + bcast(p['post_b']), 0.0, 6.0)
    shortcut = jnp.einsum('nhwc,cd->nhwd', xpost, p['sc_w']) * bcast(p['sc_s']) + bcast(p['sc_b'])
    pa = jax.nn.sigmoid(dw3x3(xpost, p['pa_w']) + bcast(p['pa_b'])) * xpost
    z = jnp.mean(xpost, axis=(1, 2), keepdims=True) + jnp.max(xpost, axis=(1, 2), keepdims=True)
    z = jnp.einsum('nhwc,cd->nhwd', z, p['ca_sq'])
    z = jnp.einsum('nhwc,cd->nhwd', z, p['ca_ex'])
    ca = jax.nn.sigmoid(z) * xpost
    y = pa + ca
    dw = dw3x3(y, p['pj_dw']) * bcast(p['pj_s']) + bcast(p['pj_b'])
    proj = jnp.einsum('nhwc,cd->nhwd', dw, p['pj_pw'])
    out = jnp.clip(proj + shortcut, 0.0, 6.0)
    return jnp.transpose(out, (0, 3, 1, 2))


# ----------------------------------- main -------------------------------------


def _check(key, N, Cin, C, H, W):
    k1, k2, k3 = jax.random.split(key, 3)
    x = jax.random.normal(k1, (N, C, H // 2, W // 2), jnp.float32)   # NCHW
    res = jax.random.normal(k2, (N, Cin, H, W), jnp.float32)         # NCHW
    params = init_params(k3, Cin, C)

    out = jax.block_until_ready(feature_refinement_head(x, res, params))
    ref = jax.block_until_ready(ref_forward(x, res, params))

    assert out.shape == (N, C, H, W), out.shape
    max_err = float(jnp.max(jnp.abs(out - ref)))
    if not (max_err < 1e-2):
        raise AssertionError(f"kernel/reference mismatch, max abs err = {max_err}")


if __name__ == "__main__":
    key = jax.random.PRNGKey(0)
    k_a, k_b = jax.random.split(key, 2)

    # primary small test: in_channels=4, decode_channels=4, 16x16 output
    _check(k_a, N=2, Cin=4, C=4, H=16, W=16)
    # rectangular test with Cin != C (exercises halo/mask logic off the square path)
    _check(k_b, N=1, Cin=12, C=8, H=24, W=16)

    print("KERNEL_OK")
</pallas_src>

<mosaic_0001>
module attributes {stable_mosaic.version = 11 : i64} {
  func.func @_frh_kernel(%arg0: i32, %arg1: memref<1xf32, #tpu.memory_space<smem>>, %arg2: memref<1x256x128xf32, #tpu.memory_space<vmem>>, %arg3: memref<1x256x128xf32, #tpu.memory_space<vmem>>, %arg4: memref<128x128xf32, #tpu.memory_space<vmem>>, %arg5: memref<9x128x128xf32, #tpu.memory_space<vmem>>, %arg6: memref<128x128xf32, #tpu.memory_space<vmem>>, %arg7: memref<128x128xf32, #tpu.memory_space<vmem>>, %arg8: memref<9x1x128xf32, #tpu.memory_space<vmem>>, %arg9: memref<9x1x128xf32, #tpu.memory_space<vmem>>, %arg10: memref<128x128xf32, #tpu.memory_space<vmem>>, %arg11: memref<4x128xf32, #tpu.memory_space<vmem>>, %arg12: memref<1x256x128xf32, #tpu.memory_space<vmem>>, %arg13: memref<304x128xf32, #tpu.memory_space<vmem>>) attributes {dimension_semantics = [#tpu.dimension_semantics<parallel>], iteration_bounds = array<i64: 2>, scalar_prefetch = 0 : i64, scratch_operands = 1 : i64, tpu.core_type = #tpu.core_type<tc>, window_params = [{transform_indices = @transform_0, window_bounds = array<i64: 1>}, {transform_indices = @transform_1, window_bounds = array<i64: 1, 256, 128>}, {transform_indices = @transform_2, window_bounds = array<i64: 1, 256, 128>}, {pipeline_mode = #tpu.pipeline_mode<synchronous>, transform_indices = @transform_3, window_bounds = array<i64: 128, 128>}, {pipeline_mode = #tpu.pipeline_mode<synchronous>, transform_indices = @transform_4, window_bounds = array<i64: 9, 128, 128>}, {pipeline_mode = #tpu.pipeline_mode<synchronous>, transform_indices = @transform_5, window_bounds = array<i64: 128, 128>}, {pipeline_mode = #tpu.pipeline_mode<synchronous>, transform_indices = @transform_6, window_bounds = array<i64: 128, 128>}, {pipeline_mode = #tpu.pipeline_mode<synchronous>, transform_indices = @transform_7, window_bounds = array<i64: 9, 1, 128>}, {pipeline_mode = #tpu.pipeline_mode<synchronous>, transform_indices = @transform_8, window_bounds = array<i64: 9, 1, 128>}, {pipeline_mode = #tpu.pipeline_mode<synchronous>, transform_indices = @transform_9, window_bounds = array<i64: 128, 128>}, {pipeline_mode = #tpu.pipeline_mode<synchronous>, transform_indices = @transform_10, window_bounds = array<i64: 4, 128>}, {transform_indices = @transform_11, window_bounds = array<i64: 1, 256, 128>}]} {
    %cst = arith.constant 0.000000e+00 : f32
    %0 = vector.broadcast %cst : f32 to vector<24x128xf32>
    %c0 = arith.constant 0 : index
    %c0_0 = arith.constant 0 : index
    %1 = vector.load %arg13[%c0, %c0_0] : memref<304x128xf32, #tpu.memory_space<vmem>>, vector<24x128xf32>
    tpu.vector_store %arg13[%c0, %c0_0], %0 {strides = array<i32>} : memref<304x128xf32, #tpu.memory_space<vmem>>, vector<24x128xf32>,
    %cst_1 = arith.constant 0.000000e+00 : f32
    %2 = vector.broadcast %cst_1 : f32 to vector<24x128xf32>
    %c280 = arith.constant 280 : index
    %c0_2 = arith.constant 0 : index
    %3 = vector.load %arg13[%c280, %c0_2] : memref<304x128xf32, #tpu.memory_space<vmem>>, vector<24x128xf32>
    tpu.vector_store %arg13[%c280, %c0_2], %2 {strides = array<i32>} : memref<304x128xf32, #tpu.memory_space<vmem>>, vector<24x128xf32>,
    %4 = tpu.iota {dimensions = array<i32: 0>} : vector<256x128xi32>
    %c16_i32 = arith.constant 16 : i32
    %c0_i32 = arith.constant 0 : i32
    %5 = arith.cmpi eq, %c16_i32, %c0_i32 : i32
    %c1_i32 = arith.constant 1 : i32
    %6 = arith.select %5, %c1_i32, %c16_i32 : i32
    %7 = vector.broadcast %6 : i32 to vector<256x128xi32>
    %8 = arith.remsi %4, %7 : vector<256x128xi32>
    %c0_i32_3 = arith.constant 0 : i32
    %9 = vector.broadcast %c0_i32_3 : i32 to vector<256x128xi32>
    %10 = arith.cmpi ne, %8, %9 : vector<256x128xi32>
    %c0_i32_4 = arith.constant 0 : i32
    %11 = vector.broadcast %c0_i32_4 : i32 to vector<256x128xi32>
    %12 = arith.cmpi slt, %8, %11 : vector<256x128xi32>
    %c0_i32_5 = arith.constant 0 : i32
    %13 = arith.cmpi slt, %6, %c0_i32_5 : i32
    %14 = vector.broadcast %13 : i1 to vector<256x128xi1>
    %15 = vector.broadcast %14 : vector<256x128xi1> to vector<256x128xi1>
    %16 = arith.xori %12, %15 : vector<256x128xi1>
    %17 = arith.andi %16, %10 : vector<256x128xi1>
    %18 = vector.broadcast %6 : i32 to vector<256x128xi32>
    %19 = arith.addi %8, %18 : vector<256x128xi32>
    %20 = arith.select %17, %19, %8 : vector<256x128xi1>, vector<256x128xi32>
    %c0_i32_6 = arith.constant 0 : i32
    %21 = vector.broadcast %c0_i32_6 : i32 to vector<256x128xi32>
    %22 = arith.cmpi ne, %20, %21 : vector<256x128xi32>
    %23 = arith.extui %22 : vector<256x128xi1> to vector<256x128xi32>
    %24 = arith.sitofp %23 : vector<256x128xi32> to vector<256x128xf32>
    %c15_i32 = arith.constant 15 : i32
    %25 = vector.broadcast %c15_i32 : i32 to vector<256x128xi32>
    %26 = arith.cmpi ne, %20, %25 : vector<256x128xi32>
    %27 = arith.extui %26 : vector<256x128xi1> to vector<256x128xi32>
    %28 = arith.sitofp %27 : vector<256x128xi32> to vector<256x128xf32>
    %c0_7 = arith.constant 0 : index
    %c0_8 = arith.constant 0 : index
    %29 = vector.load %arg11[%c0_7, %c0_8] : memref<4x128xf32, #tpu.memory_space<vmem>>, vector<4x128xf32>
    %30 = vector.extract_strided_slice %29 {offsets = [0, 0], sizes = [1, 128], strides = [1, 1]} : vector<4x128xf32> to vector<1x128xf32>
    %31 = vector.extract_strided_slice %29 {offsets = [1, 0], sizes = [1, 128], strides = [1, 1]} : vector<4x128xf32> to vector<1x128xf32>
    %32 = vector.extract_strided_slice %29 {offsets = [2, 0], sizes = [1, 128], strides = [1, 1]} : vector<4x128xf32> to vector<1x128xf32>
    %33 = vector.extract_strided_slice %29 {offsets = [3, 0], sizes = [1, 128], strides = [1, 1]} : vector<4x128xf32> to vector<1x128xf32>
    %c0_9 = arith.constant 0 : index
    %c0_10 = arith.constant 0 : index
    %c0_11 = arith.constant 0 : index
    %34 = vector.load %arg2[%c0_9, %c0_10, %c0_11] : memref<1x256x128xf32, #tpu.memory_space<vmem>>, vector<1x256x128xf32>
    %35 = vector.shape_cast %34 : vector<1x256x128xf32> to vector<256x128xf32>
    %c0_12 = arith.constant 0 : index
    %c0_13 = arith.constant 0 : index
    %c0_14 = arith.constant 0 : index
    %36 = vector.load %arg3[%c0_12, %c0_13, %c0_14] : memref<1x256x128xf32, #tpu.memory_space<vmem>>, vector<1x256x128xf32>
    %37 = vector.shape_cast %36 : vector<1x256x128xf32> to vector<256x128xf32>
    %c0_15 = arith.constant 0 : index
    %c0_16 = arith.constant 0 : index
    %38 = vector.load %arg4[%c0_15, %c0_16] : memref<128x128xf32, #tpu.memory_space<vmem>>, vector<128x128xf32>
    %cst_17 = arith.constant dense<0.000000e+00> : vector<256x128xf32>
    %39 = tpu.matmul %35, %38, %cst_17 {dimension_numbers = #tpu.dot_dimension_numbers<[1], [0], [0], [1], [0, 0, 1, 1], [], []>} : vector<256x128xf32>, vector<128x128xf32>, vector<256x128xf32> -> vector<256x128xf32>
    %c0_18 = arith.constant 0 : index
    %40 = memref.load %arg1[%c0_18] : memref<1xf32, #tpu.memory_space<smem>>
    %41 = vector.broadcast %40 : f32 to vector<256x128xf32>
    %42 = arith.mulf %41, %37 : vector<256x128xf32>
    %43 = arith.addf %39, %42 : vector<256x128xf32>
    %c24 = arith.constant 24 : index
    %c0_19 = arith.constant 0 : index
    %44 = vector.load %arg13[%c24, %c0_19] : memref<304x128xf32, #tpu.memory_space<vmem>>, vector<256x128xf32>
    tpu.vector_store %arg13[%c24, %c0_19], %43 {strides = array<i32>} : memref<304x128xf32, #tpu.memory_space<vmem>>, vector<256x128xf32>,
    %c8 = arith.constant 8 : index
    %c0_20 = arith.constant 0 : index
    %45 = vector.load %arg13[%c8, %c0_20] : memref<304x128xf32, #tpu.memory_space<vmem>>, vector<256x128xf32>
    %c1 = arith.constant 1 : index
    %c0_21 = arith.constant 0 : index
    %c0_22 = arith.constant 0 : index
    %46 = vector.load %arg5[%c1, %c0_21, %c0_22] : memref<9x128x128xf32, #tpu.memory_space<vmem>>, vector<1x128x128xf32>
    %47 = vector.shape_cast %46 : vector<1x128x128xf32> to vector<128x128xf32>
    %cst_23 = arith.constant dense<0.000000e+00> : vector<256x128xf32>
    %48 = tpu.matmul %45, %47, %cst_23 {dimension_numbers = #tpu.dot_dimension_numbers<[1], [0], [0], [1], [0, 0, 1, 1], [], []>} : vector<256x128xf32>, vector<128x128xf32>, vector<256x128xf32> -> vector<256x128xf32>
    %c24_24 = arith.constant 24 : index
    %c0_25 = arith.constant 0 : index
    %49 = vector.load %arg13[%c24_24, %c0_25] : memref<304x128xf32, #tpu.memory_space<vmem>>, vector<256x128xf32>
    %c4 = arith.constant 4 : index
    %c0_26 = arith.constant 0 : index
    %c0_27 = arith.constant 0 : index
    %50 = vector.load %arg5[%c4, %c0_26, %c0_27] : memref<9x128x128xf32, #tpu.memory_space<vmem>>, vector<1x128x128xf32>
    %51 = vector.shape_cast %50 : vector<1x128x128xf32> to vector<128x128xf32>
    %cst_28 = arith.constant dense<0.000000e+00> : vector<256x128xf32>
    %52 = tpu.matmul %49, %51, %cst_28 {dimension_numbers = #tpu.dot_dimension_numbers<[1], [0], [0], [1], [0, 0, 1, 1], [], []>} : vector<256x128xf32>, vector<128x128xf32>, vector<256x128xf32> -> vector<256x128xf32>
    %53 = arith.addf %48, %52 : vector<256x128xf32>
    %c40 = arith.constant 40 : index
    %c0_29 = arith.constant 0 : index
    %54 = vector.load %arg13[%c40, %c0_29] : memref<304x128xf32, #tpu.memory_space<vmem>>, vector<256x128xf32>
    %c7 = arith.constant 7 : index
    %c0_30 = arith.constant 0 : index
    %c0_31 = arith.constant 0 : index
    %55 = vector.load %arg5[%c7, %c0_30, %c0_31] : memref<9x128x128xf32, #tpu.memory_space<vmem>>, vector<1x128x128xf32>
    %56 = vector.shape_cast %55 : vector<1x128x128xf32> to vector<128x128xf32>
    %cst_32 = arith.constant dense<0.000000e+00> : vector<256x128xf32>
    %57 = tpu.matmul %54, %56, %cst_32 {dimension_numbers = #tpu.dot_dimension_numbers<[1], [0], [0], [1], [0, 0, 1, 1], [], []>} : vector<256x128xf32>, vector<128x128xf32>, vector<256x128xf32> -> vector<256x128xf32>
    %58 = arith.addf %53, %57 : vector<256x128xf32>
    %c7_33 = arith.constant 7 : index
    %c0_34 = arith.constant 0 : index
    %59 = vector.load %arg13[%c7_33, %c0_34] : memref<304x128xf32, #tpu.memory_space<vmem>>, vector<256x128xf32>
    %c0_35 = arith.constant 0 : index
    %c0_36 = arith.constant 0 : index
    %c0_37 = arith.constant 0 : index
    %60 = vector.load %arg5[%c0_35, %c0_36, %c0_37] : memref<9x128x128xf32, #tpu.memory_space<vmem>>, vector<1x128x128xf32>
    %61 = vector.shape_cast %60 : vector<1x128x128xf32> to vector<128x128xf32>
    %cst_38 = arith.constant dense<0.000000e+00> : vector<256x128xf32>
    %62 = tpu.matmul %59, %61, %cst_38 {dimension_numbers = #tpu.dot_dimension_numbers<[1], [0], [0], [1], [0, 0, 1, 1], [], []>} : vector<256x128xf32>, vector<128x128xf32>, vector<256x128xf32> -> vector<256x128xf32>
    %c23 = arith.constant 23 : index
    %c0_39 = arith.constant 0 : index
    %63 = vector.load %arg13[%c23, %c0_39] : memref<304x128xf32, #tpu.memory_space<vmem>>, vector<256x128xf32>
    %c3 = arith.constant 3 : index
    %c0_40 = arith.constant 0 : index
    %c0_41 = arith.constant 0 : index
    %64 = vector.load %arg5[%c3, %c0_40, %c0_41] : memref<9x128x128xf32, #tpu.memory_space<vmem>>, vector<1x128x128xf32>
    %65 = vector.shape_cast %64 : vector<1x128x128xf32> to vector<128x128xf32>
    %cst_42 = arith.constant dense<0.000000e+00> : vector<256x128xf32>
    %66 = tpu.matmul %63, %65, %cst_42 {dimension_numbers = #tpu.dot_dimension_numbers<[1], [0], [0], [1], [0, 0, 1, 1], [], []>} : vector<256x128xf32>, vector<128x128xf32>, vector<256x128xf32> -> vector<256x128xf32>
    %67 = arith.addf %62, %66 : vector<256x128xf32>
    %c39 = arith.constant 39 : index
    %c0_43 = arith.constant 0 : index
    %68 = vector.load %arg13[%c39, %c0_43] : memref<304x128xf32, #tpu.memory_space<vmem>>, vector<256x128xf32>
    %c6 = arith.constant 6 : index
    %c0_44 = arith.constant 0 : index
    %c0_45 = arith.constant 0 : index
    %69 = vector.load %arg5[%c6, %c0_44, %c0_45] : memref<9x128x128xf32, #tpu.memory_space<vmem>>, vector<1x128x128xf32>
    %70 = vector.shape_cast %69 : vector<1x128x128xf32> to vector<128x128xf32>
    %cst_46 = arith.constant dense<0.000000e+00> : vector<256x128xf32>
    %71 = tpu.matmul %68, %70, %cst_46 {dimension_numbers = #tpu.dot_dimension_numbers<[1], [0], [0], [1], [0, 0, 1, 1], [], []>} : vector<256x128xf32>, vector<128x128xf32>, vector<256x128xf32> -> vector<256x128xf32>
    %72 = arith.addf %67, %71 : vector<256x128xf32>
    %73 = arith.mulf %24, %72 : vector<256x128xf32>
    %74 = arith.addf %58, %73 : vector<256x128xf32>
    %c9 = arith.constant 9 : index
    %c0_47 = arith.constant 0 : index
    %75 = vector.load %arg13[%c9, %c0_47] : memref<304x128xf32, #tpu.memory_space<vmem>>, vector<256x128xf32>
    %c2 = arith.constant 2 : index
    %c0_48 = arith.constant 0 : index
    %c0_49 = arith.constant 0 : index
    %76 = vector.load %arg5[%c2, %c0_48, %c0_49] : memref<9x128x128xf32, #tpu.memory_space<vmem>>, vector<1x128x128xf32>
    %77 = vector.shape_cast %76 : vector<1x128x128xf32> to vector<128x128xf32>
    %cst_50 = arith.constant dense<0.000000e+00> : vector<256x128xf32>
    %78 = tpu.matmul %75, %77, %cst_50 {dimension_numbers = #tpu.dot_dimension_numbers<[1], [0], [0], [1], [0, 0, 1, 1], [], []>} : vector<256x128xf32>, vector<128x128xf32>, vector<256x128xf32> -> vector<256x128xf32>
    %c25 = arith.constant 25 : index
    %c0_51 = arith.constant 0 : index
    %79 = vector.load %arg13[%c25, %c0_51] : memref<304x128xf32, #tpu.memory_space<vmem>>, vector<256x128xf32>
    %c5 = arith.constant 5 : index
    %c0_52 = arith.constant 0 : index
    %c0_53 = arith.constant 0 : index
    %80 = vector.load %arg5[%c5, %c0_52, %c0_53] : memref<9x128x128xf32, #tpu.memory_space<vmem>>, vector<1x128x128xf32>
    %81 = vector.shape_cast %80 : vector<1x128x128xf32> to vector<128x128xf32>
    %cst_54 = arith.constant dense<0.000000e+00> : vector<256x128xf32>
    %82 = tpu.matmul %79, %81, %cst_54 {dimension_numbers = #tpu.dot_dimension_numbers<[1], [0], [0], [1], [0, 0, 1, 1], [], []>} : vector<256x128xf32>, vector<128x128xf32>, vector<256x128xf32> -> vector<256x128xf32>
    %83 = arith.addf %78, %82 : vector<256x128xf32>
    %c41 = arith.constant 41 : index
    %c0_55 = arith.constant 0 : index
    %84 = vector.load %arg13[%c41, %c0_55] : memref<304x128xf32, #tpu.memory_space<vmem>>, vector<256x128xf32>
    %c8_56 = arith.constant 8 : index
    %c0_57 = arith.constant 0 : index
    %c0_58 = arith.constant 0 : index
    %85 = vector.load %arg5[%c8_56, %c0_57, %c0_58] : memref<9x128x128xf32, #tpu.memory_space<vmem>>, vector<1x128x128xf32>
    %86 = vector.shape_cast %85 : vector<1x128x128xf32> to vector<128x128xf32>
    %cst_59 = arith.constant dense<0.000000e+00> : vector<256x128xf32>
    %87 = tpu.matmul %84, %86, %cst_59 {dimension_numbers = #tpu.dot_dimension_numbers<[1], [0], [0], [1], [0, 0, 1, 1], [], []>} : vector<256x128xf32>, vector<128x128xf32>, vector<256x128xf32> -> vector<256x128xf32>
    %88 = arith.addf %83, %87 : vector<256x128xf32>
    %89 = arith.mulf %28, %88 : vector<256x128xf32>
    %90 = arith.addf %74, %89 : vector<256x128xf32>
    %91 = vector.broadcast %30 : vector<1x128xf32> to vector<256x128xf32>
    %92 = arith.addf %90, %91 : vector<256x128xf32>
    %cst_60 = arith.constant 0.000000e+00 : f32
    %cst_61 = arith.constant 6.000000e+00 : f32
    %93 = vector.broadcast %cst_60 : f32 to vector<256x128xf32>
    %94 = arith.maximumf %93, %92 : vector<256x128xf32>
    %95 = vector.broadcast %cst_61 : f32 to vector<256x128xf32>
    %96 = arith.minimumf %95, %94 : vector<256x128xf32>
    %c0_62 = arith.constant 0 : index
    %c0_63 = arith.constant 0 : index
    %97 = vector.load %arg6[%c0_62, %c0_63] : memref<128x128xf32, #tpu.memory_space<vmem>>, vector<128x128xf32>
    %cst_64 = arith.constant dense<0.000000e+00> : vector<256x128xf32>
    %98 = tpu.matmul %96, %97, %cst_64 {dimension_numbers = #tpu.dot_dimension_numbers<[1], [0], [0], [1], [0, 0, 1, 1], [], []>} : vector<256x128xf32>, vector<128x128xf32>, vector<256x128xf32> -> vector<256x128xf32>
    %99 = vector.broadcast %31 : vector<1x128xf32> to vector<256x128xf32>
    %100 = arith.addf %98, %99 : vector<256x128xf32>
    %c24_65 = arith.constant 24 : index
    %c0_66 = arith.constant 0 : index
    %101 = vector.load %arg13[%c24_65, %c0_66] : memref<304x128xf32, #tpu.memory_space<vmem>>, vector<256x128xf32>
    tpu.vector_store %arg13[%c24_65, %c0_66], %96 {strides = array<i32>} : memref<304x128xf32, #tpu.memory_space<vmem>>, vector<256x128xf32>,
    %c8_67 = arith.constant 8 : index
    %c0_68 = arith.constant 0 : index
    %102 = vector.load %arg13[%c8_67, %c0_68] : memref<304x128xf32, #tpu.memory_space<vmem>>, vector<256x128xf32>
    %c1_69 = arith.constant 1 : index
    %c0_70 = arith.constant 0 : index
    %c0_71 = arith.constant 0 : index
    %103 = vector.load %arg8[%c1_69, %c0_70, %c0_71] : memref<9x1x128xf32, #tpu.memory_space<vmem>>, vector<1x1x128xf32>
    %104 = vector.shape_cast %103 : vector<1x1x128xf32> to vector<1x128xf32>
    %105 = vector.broadcast %104 : vector<1x128xf32> to vector<256x128xf32>
    %106 = arith.mulf %102, %105 : vector<256x128xf32>
    %c24_72 = arith.constant 24 : index
    %c0_73 = arith.constant 0 : index
    %107 = vector.load %arg13[%c24_72, %c0_73] : memref<304x128xf32, #tpu.memory_space<vmem>>, vector<256x128xf32>
    %c4_74 = arith.constant 4 : index
    %c0_75 = arith.constant 0 : index
    %c0_76 = arith.constant 0 : index
    %108 = vector.load %arg8[%c4_74, %c0_75, %c0_76] : memref<9x1x128xf32, #tpu.memory_space<vmem>>, vector<1x1x128xf32>
    %109 = vector.shape_cast %108 : vector<1x1x128xf32> to vector<1x128xf32>
    %110 = vector.broadcast %109 : vector<1x128xf32> to vector<256x128xf32>
    %111 = arith.mulf %107, %110 : vector<256x128xf32>
    %112 = arith.addf %106, %111 : vector<256x128xf32>
    %c40_77 = arith.constant 40 : index
    %c0_78 = arith.constant 0 : index
    %113 = vector.load %arg13[%c40_77, %c0_78] : memref<304x128xf32, #tpu.memory_space<vmem>>, vector<256x128xf32>
    %c7_79 = arith.constant 7 : index
    %c0_80 = arith.constant 0 : index
    %c0_81 = arith.constant 0 : index
    %114 = vector.load %arg8[%c7_79, %c0_80, %c0_81] : memref<9x1x128xf32, #tpu.memory_space<vmem>>, vector<1x1x128xf32>
    %115 = vector.shape_cast %114 : vector<1x1x128xf32> to vector<1x128xf32>
    %116 = vector.broadcast %115 : vector<1x128xf32> to vector<256x128xf32>
    %117 = arith.mulf %113, %116 : vector<256x128xf32>
    %118 = arith.addf %112, %117 : vector<256x128xf32>
    %c7_82 = arith.constant 7 : index
    %c0_83 = arith.constant 0 : index
    %119 = vector.load %arg13[%c7_82, %c0_83] : memref<304x128xf32, #tpu.memory_space<vmem>>, vector<256x128xf32>
    %c0_84 = arith.constant 0 : index
    %c0_85 = arith.constant 0 : index
    %c0_86 = arith.constant 0 : index
    %120 = vector.load %arg8[%c0_84, %c0_85, %c0_86] : memref<9x1x128xf32, #tpu.memory_space<vmem>>, vector<1x1x128xf32>
    %121 = vector.shape_cast %120 : vector<1x1x128xf32> to vector<1x128xf32>
    %122 = vector.broadcast %121 : vector<1x128xf32> to vector<256x128xf32>
    %123 = arith.mulf %119, %122 : vector<256x128xf32>
    %c23_87 = arith.constant 23 : index
    %c0_88 = arith.constant 0 : index
    %124 = vector.load %arg13[%c23_87, %c0_88] : memref<304x128xf32, #tpu.memory_space<vmem>>, vector<256x128xf32>
    %c3_89 = arith.constant 3 : index
    %c0_90 = arith.constant 0 : index
    %c0_91 = arith.constant 0 : index
    %125 = vector.load %arg8[%c3_89, %c0_90, %c0_91] : memref<9x1x128xf32, #tpu.memory_space<vmem>>, vector<1x1x128xf32>
    %126 = vector.shape_cast %125 : vector<1x1x128xf32> to vector<1x128xf32>
    %127 = vector.broadcast %126 : vector<1x128xf32> to vector<256x128xf32>
    %128 = arith.mulf %124, %127 : vector<256x128xf32>
    %129 = arith.addf %123, %128 : vector<256x128xf32>
    %c39_92 = arith.constant 39 : index
    %c0_93 = arith.constant 0 : index
    %130 = vector.load %arg13[%c39_92, %c0_93] : memref<304x128xf32, #tpu.memory_space<vmem>>, vector<256x128xf32>
    %c6_94 = arith.constant 6 : index
    %c0_95 = arith.constant 0 : index
    %c0_96 = arith.constant 0 : index
    %131 = vector.load %arg8[%c6_94, %c0_95, %c0_96] : memref<9x1x128xf32, #tpu.memory_space<vmem>>, vector<1x1x128xf32>
    %132 = vector.shape_cast %131 : vector<1x1x128xf32> to vector<1x128xf32>
    %133 = vector.broadcast %132 : vector<1x128xf32> to vector<256x128xf32>
    %134 = arith.mulf %130, %133 : vector<256x128xf32>
    %135 = arith.addf %129, %134 : vector<256x128xf32>
    %136 = arith.mulf %24, %135 : vector<256x128xf32>
    %137 = arith.addf %118, %136 : vector<256x128xf32>
    %c9_97 = arith.constant 9 : index
    %c0_98 = arith.constant 0 : index
    %138 = vector.load %arg13[%c9_97, %c0_98] : memref<304x128xf32, #tpu.memory_space<vmem>>, vector<256x128xf32>
    %c2_99 = arith.constant 2 : index
    %c0_100 = arith.constant 0 : index
    %c0_101 = arith.constant 0 : index
    %139 = vector.load %arg8[%c2_99, %c0_100, %c0_101] : memref<9x1x128xf32, #tpu.memory_space<vmem>>, vector<1x1x128xf32>
    %140 = vector.shape_cast %139 : vector<1x1x128xf32> to vector<1x128xf32>
    %141 = vector.broadcast %140 : vector<1x128xf32> to vector<256x128xf32>
    %142 = arith.mulf %138, %141 : vector<256x128xf32>
    %c25_102 = arith.constant 25 : index
    %c0_103 = arith.constant 0 : index
    %143 = vector.load %arg13[%c25_102, %c0_103] : memref<304x128xf32, #tpu.memory_space<vmem>>, vector<256x128xf32>
    %c5_104 = arith.constant 5 : index
    %c0_105 = arith.constant 0 : index
    %c0_106 = arith.constant 0 : index
    %144 = vector.load %arg8[%c5_104, %c0_105, %c0_106] : memref<9x1x128xf32, #tpu.memory_space<vmem>>, vector<1x1x128xf32>
    %145 = vector.shape_cast %144 : vector<1x1x128xf32> to vector<1x128xf32>
    %146 = vector.broadcast %145 : vector<1x128xf32> to vector<256x128xf32>
    %147 = arith.mulf %143, %146 : vector<256x128xf32>
    %148 = arith.addf %142, %147 : vector<256x128xf32>
    %c41_107 = arith.constant 41 : index
    %c0_108 = arith.constant 0 : index
    %149 = vector.load %arg13[%c41_107, %c0_108] : memref<304x128xf32, #tpu.memory_space<vmem>>, vector<256x128xf32>
    %c8_109 = arith.constant 8 : index
    %c0_110 = arith.constant 0 : index
    %c0_111 = arith.constant 0 : index
    %150 = vector.load %arg8[%c8_109, %c0_110, %c0_111] : memref<9x1x128xf32, #tpu.memory_space<vmem>>, vector<1x1x128xf32>
    %151 = vector.shape_cast %150 : vector<1x1x128xf32> to vector<1x128xf32>
    %152 = vector.broadcast %151 : vector<1x128xf32> to vector<256x128xf32>
    %153 = arith.mulf %149, %152 : vector<256x128xf32>
    %154 = arith.addf %148, %153 : vector<256x128xf32>
    %155 = arith.mulf %28, %154 : vector<256x128xf32>
    %156 = arith.addf %137, %155 : vector<256x128xf32>
    %157 = vector.broadcast %32 : vector<1x128xf32> to vector<256x128xf32>
    %158 = arith.addf %156, %157 : vector<256x128xf32>
    %159 = arith.negf %158 : vector<256x128xf32>
    %160 = math.exp %159 : vector<256x128xf32>
    %cst_112 = arith.constant 1.000000e+00 : f32
    %161 = vector.broadcast %cst_112 : f32 to vector<256x128xf32>
    %162 = arith.addf %161, %160 : vector<256x128xf32>
    %163 = arith.divf %161, %162 : vector<256x128xf32>
    %164 = arith.mulf %163, %96 : vector<256x128xf32>
    %cst_113 = arith.constant dense<0.000000e+00> : vector<128xf32>
    %165 = vector.multi_reduction <add>, %96, %cst_113 [0] : vector<256x128xf32> to vector<128xf32>
    %166 = vector.shape_cast %165 : vector<128xf32> to vector<1x128xf32>
    %cst_114 = arith.constant 2.560000e+02 : f32
    %167 = vector.broadcast %cst_114 : f32 to vector<1x128xf32>
    %168 = arith.divf %166, %167 : vector<1x128xf32>
    %cst_115 = arith.constant dense<0xFF800000> : vector<128xf32>
    %169 = vector.multi_reduction <maximumf>, %96, %cst_115 [0] : vector<256x128xf32> to vector<128xf32>
    %170 = vector.shape_cast %169 : vector<128xf32> to vector<1x128xf32>
    %171 = arith.addf %168, %170 : vector<1x128xf32>
    %c0_116 = arith.constant 0 : index
    %c0_117 = arith.constant 0 : index
    %172 = vector.load %arg7[%c0_116, %c0_117] : memref<128x128xf32, #tpu.memory_space<vmem>>, vector<128x128xf32>
    %cst_118 = arith.constant dense<0.000000e+00> : vector<1x128xf32>
    %173 = tpu.matmul %171, %172, %cst_118 {dimension_numbers = #tpu.dot_dimension_numbers<[1], [0], [0], [1], [0, 0, 1, 1], [], []>} : vector<1x128xf32>, vector<128x128xf32>, vector<1x128xf32> -> vector<1x128xf32>
    %174 = arith.negf %173 : vector<1x128xf32>
    %175 = math.exp %174 : vector<1x128xf32>
    %cst_119 = arith.constant 1.000000e+00 : f32
    %176 = vector.broadcast %cst_119 : f32 to vector<1x128xf32>
    %177 = arith.addf %176, %175 : vector<1x128xf32>
    %178 = arith.divf %176, %177 : vector<1x128xf32>
    %179 = vector.broadcast %178 : vector<1x128xf32> to vector<256x128xf32>
    %180 = arith.mulf %179, %96 : vector<256x128xf32>
    %181 = arith.addf %164, %180 : vector<256x128xf32>
    %c24_120 = arith.constant 24 : index
    %c0_121 = arith.constant 0 : index
    %182 = vector.load %arg13[%c24_120, %c0_121] : memref<304x128xf32, #tpu.memory_space<vmem>>, vector<256x128xf32>
    tpu.vector_store %arg13[%c24_120, %c0_121], %181 {strides = array<i32>} : memref<304x128xf32, #tpu.memory_space<vmem>>, vector<256x128xf32>,
    %c8_122 = arith.constant 8 : index
    %c0_123 = arith.constant 0 : index
    %183 = vector.load %arg13[%c8_122, %c0_123] : memref<304x128xf32, #tpu.memory_space<vmem>>, vector<256x128xf32>
    %c1_124 = arith.constant 1 : index
    %c0_125 = arith.constant 0 : index
    %c0_126 = arith.constant 0 : index
    %184 = vector.load %arg9[%c1_124, %c0_125, %c0_126] : memref<9x1x128xf32, #tpu.memory_space<vmem>>, vector<1x1x128xf32>
    %185 = vector.shape_cast %184 : vector<1x1x128xf32> to vector<1x128xf32>
    %186 = vector.broadcast %185 : vector<1x128xf32> to vector<256x128xf32>
    %187 = arith.mulf %183, %186 : vector<256x128xf32>
    %c24_127 = arith.constant 24 : index
    %c0_128 = arith.constant 0 : index
    %188 = vector.load %arg13[%c24_127, %c0_128] : memref<304x128xf32, #tpu.memory_space<vmem>>, vector<256x128xf32>
    %c4_129 = arith.constant 4 : index
    %c0_130 = arith.constant 0 : index
    %c0_131 = arith.constant 0 : index
    %189 = vector.load %arg9[%c4_129, %c0_130, %c0_131] : memref<9x1x128xf32, #tpu.memory_space<vmem>>, vector<1x1x128xf32>
    %190 = vector.shape_cast %189 : vector<1x1x128xf32> to vector<1x128xf32>
    %191 = vector.broadcast %190 : vector<1x128xf32> to vector<256x128xf32>
    %192 = arith.mulf %188, %191 : vector<256x128xf32>
    %193 = arith.addf %187, %192 : vector<256x128xf32>
    %c40_132 = arith.constant 40 : index
    %c0_133 = arith.constant 0 : index
    %194 = vector.load %arg13[%c40_132, %c0_133] : memref<304x128xf32, #tpu.memory_space<vmem>>, vector<256x128xf32>
    %c7_134 = arith.constant 7 : index
    %c0_135 = arith.constant 0 : index
    %c0_136 = arith.constant 0 : index
    %195 = vector.load %arg9[%c7_134, %c0_135, %c0_136] : memref<9x1x128xf32, #tpu.memory_space<vmem>>, vector<1x1x128xf32>
    %196 = vector.shape_cast %195 : vector<1x1x128xf32> to vector<1x128xf32>
    %197 = vector.broadcast %196 : vector<1x128xf32> to vector<256x128xf32>
    %198 = arith.mulf %194, %197 : vector<256x128xf32>
    %199 = arith.addf %193, %198 : vector<256x128xf32>
    %c7_137 = arith.constant 7 : index
    %c0_138 = arith.constant 0 : index
    %200 = vector.load %arg13[%c7_137, %c0_138] : memref<304x128xf32, #tpu.memory_space<vmem>>, vector<256x128xf32>
    %c0_139 = arith.constant 0 : index
    %c0_140 = arith.constant 0 : index
    %c0_141 = arith.constant 0 : index
    %201 = vector.load %arg9[%c0_139, %c0_140, %c0_141] : memref<9x1x128xf32, #tpu.memory_space<vmem>>, vector<1x1x128xf32>
    %202 = vector.shape_cast %201 : vector<1x1x128xf32> to vector<1x128xf32>
    %203 = vector.broadcast %202 : vector<1x128xf32> to vector<256x128xf32>
    %204 = arith.mulf %200, %203 : vector<256x128xf32>
    %c23_142 = arith.constant 23 : index
    %c0_143 = arith.constant 0 : index
    %205 = vector.load %arg13[%c23_142, %c0_143] : memref<304x128xf32, #tpu.memory_space<vmem>>, vector<256x128xf32>
    %c3_144 = arith.constant 3 : index
    %c0_145 = arith.constant 0 : index
    %c0_146 = arith.constant 0 : index
    %206 = vector.load %arg9[%c3_144, %c0_145, %c0_146] : memref<9x1x128xf32, #tpu.memory_space<vmem>>, vector<1x1x128xf32>
    %207 = vector.shape_cast %206 : vector<1x1x128xf32> to vector<1x128xf32>
    %208 = vector.broadcast %207 : vector<1x128xf32> to vector<256x128xf32>
    %209 = arith.mulf %205, %208 : vector<256x128xf32>
    %210 = arith.addf %204, %209 : vector<256x128xf32>
    %c39_147 = arith.constant 39 : index
    %c0_148 = arith.constant 0 : index
    %211 = vector.load %arg13[%c39_147, %c0_148] : memref<304x128xf32, #tpu.memory_space<vmem>>, vector<256x128xf32>
    %c6_149 = arith.constant 6 : index
    %c0_150 = arith.constant 0 : index
    %c0_151 = arith.constant 0 : index
    %212 = vector.load %arg9[%c6_149, %c0_150, %c0_151] : memref<9x1x128xf32, #tpu.memory_space<vmem>>, vector<1x1x128xf32>
    %213 = vector.shape_cast %212 : vector<1x1x128xf32> to vector<1x128xf32>
    %214 = vector.broadcast %213 : vector<1x128xf32> to vector<256x128xf32>
    %215 = arith.mulf %211, %214 : vector<256x128xf32>
    %216 = arith.addf %210, %215 : vector<256x128xf32>
    %217 = arith.mulf %24, %216 : vector<256x128xf32>
    %218 = arith.addf %199, %217 : vector<256x128xf32>
    %c9_152 = arith.constant 9 : index
    %c0_153 = arith.constant 0 : index
    %219 = vector.load %arg13[%c9_152, %c0_153] : memref<304x128xf32, #tpu.memory_space<vmem>>, vector<256x128xf32>
    %c2_154 = arith.constant 2 : index
    %c0_155 = arith.constant 0 : index
    %c0_156 = arith.constant 0 : index
    %220 = vector.load %arg9[%c2_154, %c0_155, %c0_156] : memref<9x1x128xf32, #tpu.memory_space<vmem>>, vector<1x1x128xf32>
    %221 = vector.shape_cast %220 : vector<1x1x128xf32> to vector<1x128xf32>
    %222 = vector.broadcast %221 : vector<1x128xf32> to vector<256x128xf32>
    %223 = arith.mulf %219, %222 : vector<256x128xf32>
    %c25_157 = arith.constant 25 : index
    %c0_158 = arith.constant 0 : index
    %224 = vector.load %arg13[%c25_157, %c0_158] : memref<304x128xf32, #tpu.memory_space<vmem>>, vector<256x128xf32>
    %c5_159 = arith.constant 5 : index
    %c0_160 = arith.constant 0 : index
    %c0_161 = arith.constant 0 : index
    %225 = vector.load %arg9[%c5_159, %c0_160, %c0_161] : memref<9x1x128xf32, #tpu.memory_space<vmem>>, vector<1x1x128xf32>
    %226 = vector.shape_cast %225 : vector<1x1x128xf32> to vector<1x128xf32>
    %227 = vector.broadcast %226 : vector<1x128xf32> to vector<256x128xf32>
    %228 = arith.mulf %224, %227 : vector<256x128xf32>
    %229 = arith.addf %223, %228 : vector<256x128xf32>
    %c41_162 = arith.constant 41 : index
    %c0_163 = arith.constant 0 : index
    %230 = vector.load %arg13[%c41_162, %c0_163] : memref<304x128xf32, #tpu.memory_space<vmem>>, vector<256x128xf32>
    %c8_164 = arith.constant 8 : index
    %c0_165 = arith.constant 0 : index
    %c0_166 = arith.constant 0 : index
    %231 = vector.load %arg9[%c8_164, %c0_165, %c0_166] : memref<9x1x128xf32, #tpu.memory_space<vmem>>, vector<1x1x128xf32>
    %232 = vector.shape_cast %231 : vector<1x1x128xf32> to vector<1x128xf32>
    %233 = vector.broadcast %232 : vector<1x128xf32> to vector<256x128xf32>
    %234 = arith.mulf %230, %233 : vector<256x128xf32>
    %235 = arith.addf %229, %234 : vector<256x128xf32>
    %236 = arith.mulf %28, %235 : vector<256x128xf32>
    %237 = arith.addf %218, %236 : vector<256x128xf32>
    %c0_167 = arith.constant 0 : index
    %c0_168 = arith.constant 0 : index
    %238 = vector.load %arg10[%c0_167, %c0_168] : memref<128x128xf32, #tpu.memory_space<vmem>>, vector<128x128xf32>
    %cst_169 = arith.constant dense<0.000000e+00> : vector<256x128xf32>
    %239 = tpu.matmul %237, %238, %cst_169 {dimension_numbers = #tpu.dot_dimension_numbers<[1], [0], [0], [1], [0, 0, 1, 1], [], []>} : vector<256x128xf32>, vector<128x128xf32>, vector<256x128xf32> -> vector<256x128xf32>
    %240 = vector.broadcast %33 : vector<1x128xf32> to vector<256x128xf32>
    %241 = arith.addf %239, %240 : vector<256x128xf32>
    %242 = arith.addf %241, %100 : vector<256x128xf32>
    %cst_170 = arith.constant 0.000000e+00 : f32
    %cst_171 = arith.constant 6.000000e+00 : f32
    %243 = vector.broadcast %cst_170 : f32 to vector<256x128xf32>
    %244 = arith.maximumf %243, %242 : vector<256x128xf32>
    %245 = vector.broadcast %cst_171 : f32 to vector<256x128xf32>
    %246 = arith.minimumf %245, %244 : vector<256x128xf32>
    %c0_172 = arith.constant 0 : index
    %c0_173 = arith.constant 0 : index
    %c0_174 = arith.constant 0 : index
    %247 = vector.load %arg12[%c0_172, %c0_173, %c0_174] : memref<1x256x128xf32, #tpu.memory_space<vmem>>, vector<1x256x128xf32>
    %248 = vector.shape_cast %247 : vector<1x256x128xf32> to vector<256x128xf32>
    %249 = vector.shape_cast %246 : vector<256x128xf32> to vector<1x256x128xf32>
    tpu.vector_store %arg12[%c0_172, %c0_173, %c0_174], %249 {strides = array<i32>} : memref<1x256x128xf32, #tpu.memory_space<vmem>>, vector<1x256x128xf32>,
    return
  }
  func.func @transform_0(%arg0: i32) -> i32 {
    %c0_i32 = arith.constant 0 : i32
    %c0_i32_0 = arith.constant 0 : i32
    return %c0_i32 : i32
  }
  func.func @transform_1(%arg0: i32) -> (i32, i32, i32) {
    %c0_i32 = arith.constant 0 : i32
    %c0_i32_0 = arith.constant 0 : i32
    %c0_i32_1 = arith.constant 0 : i32
    return %arg0, %c0_i32, %c0_i32_0 : i32, i32, i32
  }
  func.func @transform_2(%arg0: i32) -> (i32, i32, i32) {
    %c0_i32 = arith.constant 0 : i32
    %c0_i32_0 = arith.constant 0 : i32
    %c0_i32_1 = arith.constant 0 : i32
    return %arg0, %c0_i32, %c0_i32_0 : i32, i32, i32
  }
  func.func @transform_3(%arg0: i32) -> (i32, i32) {
    %c0_i32 = arith.constant 0 : i32
    %c0_i32_0 = arith.constant 0 : i32
    %c0_i32_1 = arith.constant 0 : i32
    return %c0_i32, %c0_i32_0 : i32, i32
  }
  func.func @transform_4(%arg0: i32) -> (i32, i32, i32) {
    %c0_i32 = arith.constant 0 : i32
    %c0_i32_0 = arith.constant 0 : i32
    %c0_i32_1 = arith.constant 0 : i32
    %c0_i32_2 = arith.constant 0 : i32
    return %c0_i32, %c0_i32_0, %c0_i32_1 : i32, i32, i32
  }
  func.func @transform_5(%arg0: i32) -> (i32, i32) {
    %c0_i32 = arith.constant 0 : i32
    %c0_i32_0 = arith.constant 0 : i32
    %c0_i32_1 = arith.constant 0 : i32
    return %c0_i32, %c0_i32_0 : i32, i32
  }
  func.func @transform_6(%arg0: i32) -> (i32, i32) {
    %c0_i32 = arith.constant 0 : i32
    %c0_i32_0 = arith.constant 0 : i32
    %c0_i32_1 = arith.constant 0 : i32
    return %c0_i32, %c0_i32_0 : i32, i32
  }
  func.func @transform_7(%arg0: i32) -> (i32, i32, i32) {
    %c0_i32 = arith.constant 0 : i32
    %c0_i32_0 = arith.constant 0 : i32
    %c0_i32_1 = arith.constant 0 : i32
    %c0_i32_2 = arith.constant 0 : i32
    return %c0_i32, %c0_i32_0, %c0_i32_1 : i32, i32, i32
  }
  func.func @transform_8(%arg0: i32) -> (i32, i32, i32) {
    %c0_i32 = arith.constant 0 : i32
    %c0_i32_0 = arith.constant 0 : i32
    %c0_i32_1 = arith.constant 0 : i32
    %c0_i32_2 = arith.constant 0 : i32
    return %c0_i32, %c0_i32_0, %c0_i32_1 : i32, i32, i32
  }
  func.func @transform_9(%arg0: i32) -> (i32, i32) {
    %c0_i32 = arith.constant 0 : i32
    %c0_i32_0 = arith.constant 0 : i32
    %c0_i32_1 = arith.constant 0 : i32
    return %c0_i32, %c0_i32_0 : i32, i32
  }
  func.func @transform_10(%arg0: i32) -> (i32, i32) {
    %c0_i32 = arith.constant 0 : i32
    %c0_i32_0 = arith.constant 0 : i32
    %c0_i32_1 = arith.constant 0 : i32
    return %c0_i32, %c0_i32_0 : i32, i32
  }
  func.func @transform_11(%arg0: i32) -> (i32, i32, i32) {
    %c0_i32 = arith.constant 0 : i32
    %c0_i32_0 = arith.constant 0 : i32
    %c0_i32_1 = arith.constant 0 : i32
    return %arg0, %c0_i32, %c0_i32_0 : i32, i32, i32
  }
}

</mosaic_0001>

<bundles_post_ra>
// kernel: tpu_custom_call.1
= control target key start
LH: loop header
LB: loop body
LE: loop exit
PB: predicated region body
PF: predicated region fallthrough
CT: control target
= control target key end

     0   :  { %s13793_s0 = inlined_call_operand.<no memory space> [shape: f32[1], index: 0, kind: input, shape index: {}]   ;;  %s13794_s1 = inlined_call_operand.hbm [shape: f32[2,256,128], index: 1, kind: input, shape index: {}]   ;;  %s13795_s2 = inlined_call_operand.hbm [shape: f32[2,256,128], index: 2, kind: input, shape index: {}]   ;;  %s13796_s3 = inlined_call_operand.hbm [shape: f32[128,128], index: 3, kind: input, shape index: {}]   ;;  %s13797_s4 = inlined_call_operand.hbm [shape: f32[9,128,128], index: 4, kind: input, shape index: {}]   ;;  %s13798_s5 = inlined_call_operand.hbm [shape: f32[128,128], index: 5, kind: input, shape index: {}]   ;;  %s13799_s6 = inlined_call_operand.hbm [shape: f32[128,128], index: 6, kind: input, shape index: {}]   ;;  %s13800_s7 = inlined_call_operand.vmem [shape: f32[9,1,128], index: 7, kind: input, shape index: {}]   ;;  %s13801_s8 = inlined_call_operand.vmem [shape: f32[9,1,128], index: 8, kind: input, shape index: {}]   ;;  %s13802_s9 = inlined_call_operand.hbm [shape: f32[128,128], index: 9, kind: input, shape index: {}]   ;;  %s13803_s10 = inlined_call_operand.vmem [shape: f32[4,128], index: 10, kind: input, shape index: {}]   ;;  %s13804_s11 = inlined_call_operand.hbm [shape: f32[2,256,128], index: 11, kind: output, shape index: {}]  }
   0x1   :  { %13958 = sst [smem:[#allocation109_spill]] %s13794_s1 }
   0x2   :  { %13959 = sst [smem:[#allocation110_spill]] %s13796_s3 }
   0x3   :  { %13960 = sst [smem:[#allocation111_spill]] %s13797_s4 }
   0x4   :  { %13961 = sst [smem:[#allocation112_spill]] %s13798_s5 }
   0x5   :  { %13962 = sst [smem:[#allocation113_spill]] %s13799_s6 }
   0x6   :  { %13963 = sst [smem:[#allocation114_spill]] %s13801_s8 }
   0x7   :  { %13964 = sst [smem:[#allocation115_spill]] %s13802_s9 }
   0x8   :  { %13965 = sst [smem:[#allocation116_spill]] %s13804_s11 }
   0x9   :  { %16 = sst [smem:[#allocation3]] %s13793_s0 }
   0xa   :  { %17 = vsyncpa [#allocation5], 0 }
   0xb   :  { %19 = vsyncpa [#allocation5 + $0x1], 0 }
   0xc   :  { %20 = vsyncpa [#allocation8], 0 }
   0xd   :  { %22 = vsyncpa [#allocation8 + $0x1], 0 }
   0xe   :  { %23 = vsyncpa [#allocation11], 0 }
   0xf   :  { %24 = vsyncpa [#allocation14], 0 }
  0x10   :  { %25 = vsyncpa [#allocation6], 0 }
  0x11   :  { %27 = vsyncpa [#allocation6 + $0x1], 0  ;;  %s10198_s19 = smov 0   ;;  %s10200_s20 = smov 0  }
  0x12   :  { %s10202_s21 = smov 0   ;;  %s10204_s22 = smov 0  }
  0x13 LB: > { %s10120_s0 = smov [#allocation9]   ;;  %s10219_s24 = sadd.s32 4294967295, %s10118_s22   ;;  %s10118_s22 = sphi %s10204_s22, %s14323_s22   ;;  %s10114_s21 = sphi %s10202_s21, %s14322_s21   ;;  %s10110_s20 = sphi %s10200_s20, %s14321_s20   ;;  %s10106_s19 = sphi %s10198_s19, %s14320_s19  }
  0x14   : > { %s320_s23 = sshll.u32 %s10120_s0, 4  ;;  %p7115_p0 = scmp.ge.s32.totalorder %s10118_s22, 1  ;;  %s10224_s23 = int_to_ptr.vmem [resolvable:$true] %s320_s23 }
  0x15   : > { %p13807_p1 = scmp.eq.s32.totalorder %s10219_s24, 0  ;;  %p305_p2 = scmp.lt.s32.totalorder %s10118_s22, 3 }
  0x16   : > { %s10121_s26 = smov [#allocation10]   ;;  %s10122_s29 = smov [#allocation13]  }
  0x17   : > { %p10226_p3 = pnand %p7115_p0, %p305_p2  ;;  %s333_s27 = sshll.u32 %s10121_s26, 4  ;;  %s10239_s27 = int_to_ptr.vmem [resolvable:$true] %s333_s27 }
  0x18   : > { %s359_s30 = sshll.u32 %s10122_s29, 4  ;;  %s13968_s3 = sld [smem:[#allocation110_spill]]  ;;  %s10241_s30 = int_to_ptr.vmem [resolvable:$true] %s359_s30 }
  0x19   : > { %s13966_s25 = scalar_select %p10226_p3, 1, 0 }
  0x1a   : > { %p9554_p5 = pneg %p10226_p3 }
  0x1c   : > { %p10235_p6 = pnand %p9554_p5, %p13807_p1 }
  0x1e   : > { %s9836_s14 = scalar_lea.hbm %s13968_s3, 2048  ;;  %p10251_p8 = pneg %p10235_p6 }
  0x1f   : > { %p9837_p7 = scmp.ne.s32.totalorder %s13968_s3, %s9836_s14  ;;  %p9843_p11 = scmp.lt.u32.totalorder %s9836_s14, %s13968_s3 }
  0x21   : > { %p9839_p9 = pnand %p10251_p8, %p9837_p7 }
  0x23   : > { %p9840_p10 = pneg %p9839_p9 }
  0x25   : > { %p9845_p12 = pnand %p9843_p11, %p9840_p10 }
  0x27   : > { %9848 = shalt.err (!%p9845_p12)
}
  0x28   : > { %s9849_s26 = scalar_lea.vmem %s10224_s23, 2048  ;;  %p9857_p5 = scmp.lt.s32.totalorder %s10224_s23, %s10224_s23 }
  0x29   : > { %p9850_p13 = scmp.ne.s32.totalorder %s10224_s23, %s9849_s26  ;;  %p9858_p4 = scmp.lt.s32.totalorder %s9849_s26, %s9849_s26 }
  0x2b   : > { %p9852_p0 = pnand %p9850_p13, %p10251_p8  ;;  %p9859_p7 = por %p9858_p4, %p9857_p5 }
  0x2d   : > { %p9853_p2 = pneg %p9852_p0 }
  0x2f   : > { %p9860_p9 = pnand %p9859_p7, %p9853_p2 }
  0x31   : > { %9863 = shalt.err (!%p9860_p9)
}
  0x32   : > { %s13809_s29 = smov 128   ;;  %s13811_s12 = smov 8  }
  0x33   : > { %9557 = dma.hbm_to_vmem [thread:$0]  (!%p10235_p6), %s13968_s3, 2048, %s10224_s23, [#allocation8], %s13809_s29, %s13809_s29, %s13811_s12  }
  0x34   : > { %s13970_s4 = sld [smem:[#allocation111_spill]] }
  0x3a   : > { %s9864_s18 = scalar_lea.hbm %s13970_s4, 18432 }
  0x3b   : > { %p9865_p4 = scmp.ne.s32.totalorder %s13970_s4, %s9864_s18  ;;  %p9871_p12 = scmp.lt.u32.totalorder %s9864_s18, %s13970_s4 }
  0x3d   : > { %p9867_p10 = pnand %p9865_p4, %p10251_p8 }
  0x3f   : > { %p9868_p11 = pneg %p9867_p10 }
  0x41   : > { %p9873_p13 = pnand %p9871_p12, %p9868_p11 }
  0x43   : > { %9876 = shalt.err (!%p9873_p13)
}
  0x44   : > { %s9877_s23 = scalar_lea.vmem %s10239_s27, 18432  ;;  %p9885_p7 = scmp.lt.s32.totalorder %s10239_s27, %s10239_s27 }
  0x45   : > { %p9878_p0 = scmp.ne.s32.totalorder %s10239_s27, %s9877_s23  ;;  %p9886_p9 = scmp.lt.s32.totalorder %s9877_s23, %s9877_s23 }
  0x47   : > { %p9880_p2 = pnand %p9878_p0, %p10251_p8  ;;  %p9887_p4 = por %p9886_p9, %p9885_p7 }
  0x49   : > { %p9881_p5 = pneg %p9880_p2 }
  0x4b   : > { %p9888_p10 = pnand %p9887_p4, %p9881_p5 }
  0x4d   : > { %9891 = shalt.err (!%p9888_p10)
}
  0x4e   : > { %9560 = dma.hbm_to_vmem [thread:$0]  (!%p10235_p6), %s13970_s4, 18432, %s10239_s27, [#allocation11], %s13809_s29, %s13809_s29, %s13811_s12  }
  0x4f   : > { %s13971_s6 = sld [smem:[#allocation113_spill]] }
  0x55   : > { %s9892_s15 = scalar_lea.hbm %s13971_s6, 2048 }
  0x56   : > { %p9893_p11 = scmp.ne.s32.totalorder %s13971_s6, %s9892_s15  ;;  %p9899_p0 = scmp.lt.u32.totalorder %s9892_s15, %s13971_s6 }
  0x58   : > { %p9895_p12 = pnand %p9893_p11, %p10251_p8 }
  0x5a   : > { %p9896_p13 = pneg %p9895_p12 }
  0x5c   : > { %p9901_p2 = pnand %p9899_p0, %p9896_p13 }
  0x5e   : > { %9904 = shalt.err (!%p9901_p2)
}
  0x5f   : > { %s9905_s27 = scalar_lea.vmem %s10241_s30, 2048  ;;  %p9913_p4 = scmp.lt.s32.totalorder %s10241_s30, %s10241_s30 }
  0x60   : > { %p9906_p5 = scmp.ne.s32.totalorder %s10241_s30, %s9905_s27  ;;  %p9914_p10 = scmp.lt.s32.totalorder %s9905_s27, %s9905_s27 }
  0x62   : > { %p9908_p7 = pnand %p9906_p5, %p10251_p8  ;;  %p9915_p11 = por %p9914_p10, %p9913_p4 }
  0x64   : > { %p9909_p9 = pneg %p9908_p7 }
  0x66   : > { %p9916_p12 = pnand %p9915_p11, %p9909_p9 }
  0x68   : > { %9919 = shalt.err (!%p9916_p12)
}
  0x69   : > { %9566 = dma.hbm_to_vmem [thread:$0]  (!%p10235_p6), %s13971_s6, 2048, %s10241_s30, [#allocation14], %s13809_s29, %s13809_s29, %s13811_s12  }
  0x6a   : > { %s10125_s11 = smov [#allocation12]   ;;  %s10126_s14 = smov [#allocation15]  }
  0x6b   : > { %s346_s13 = sshll.u32 %s10125_s11, 4  ;;  %s378_s15 = sshll.u32 %s10126_s14, 4  ;;  %s347_s13 = int_to_ptr.vmem [resolvable:$true] %s346_s13  ;;  %s379_s15 = int_to_ptr.vmem [resolvable:$true] %s378_s15 }
  0x6c   : > { %s13972_s5 = sld [smem:[#allocation112_spill]] }
  0x72   : > { %s9920_s0 = scalar_lea.hbm %s13972_s5, 2048 }
  0x73   : > { %p9921_p13 = scmp.ne.s32.totalorder %s13972_s5, %s9920_s0  ;;  %p9927_p5 = scmp.lt.u32.totalorder %s9920_s0, %s13972_s5 }
  0x75   : > { %p9923_p0 = pnand %p9921_p13, %p10251_p8 }
  0x77   : > { %p9924_p2 = pneg %p9923_p0 }
  0x79   : > { %p9929_p7 = pnand %p9927_p5, %p9924_p2 }
  0x7b   : > { %9932 = shalt.err (!%p9929_p7)
}
  0x7c   : > { %s9933_s30 = scalar_lea.vmem %s347_s13, 2048  ;;  %p9941_p11 = scmp.lt.s32.totalorder %s347_s13, %s347_s13 }
  0x7d   : > { %p9934_p9 = scmp.ne.s32.totalorder %s347_s13, %s9933_s30  ;;  %p9942_p12 = scmp.lt.s32.totalorder %s9933_s30, %s9933_s30 }
  0x7f   : > { %p9936_p4 = pnand %p9934_p9, %p10251_p8  ;;  %p9943_p1 = por %p9942_p12, %p9941_p11 }
  0x81   : > { %p9937_p10 = pneg %p9936_p4 }
  0x83   : > { %p9944_p3 = pnand %p9943_p1, %p9937_p10 }
  0x85   : > { %9947 = shalt.err (!%p9944_p3)
}
  0x86   : > { %9563 = dma.hbm_to_vmem [thread:$0]  (!%p10235_p6), %s13972_s5, 2048, %s347_s13, [#allocation11], %s13809_s29, %s13809_s29, %s13811_s12  }
  0x87   : > { %s13973_s9 = sld [smem:[#allocation115_spill]] }
  0x8d   : > { %s9948_s16 = scalar_lea.hbm %s13973_s9, 2048 }
  0x8e   : > { %p9949_p1 = scmp.ne.s32.totalorder %s13973_s9, %s9948_s16  ;;  %p9955_p0 = scmp.lt.u32.totalorder %s9948_s16, %s13973_s9 }
  0x90   : > { %p9951_p3 = pnand %p9949_p1, %p10251_p8 }
  0x92   : > { %p9952_p13 = pneg %p9951_p3 }
  0x94   : > { %p9957_p2 = pnand %p9955_p0, %p9952_p13 }
  0x96   : > { %9960 = shalt.err (!%p9957_p2)
}
  0x97   : > { %s9961_s23 = scalar_lea.vmem %s379_s15, 2048  ;;  %p9969_p4 = scmp.lt.s32.totalorder %s379_s15, %s379_s15 }
  0x98   : > { %p9962_p5 = scmp.ne.s32.totalorder %s379_s15, %s9961_s23  ;;  %p9970_p10 = scmp.lt.s32.totalorder %s9961_s23, %s9961_s23 }
  0x9a   : > { %p9964_p7 = pnand %p9962_p5, %p10251_p8  ;;  %p9971_p11 = por %p9970_p10, %p9969_p4 }
  0x9c   : > { %p9965_p9 = pneg %p9964_p7 }
  0x9e   : > { %p9972_p12 = pnand %p9971_p11, %p9965_p9 }
  0xa0   : > { %9975 = shalt.err (!%p9972_p12)
}
  0xa1   : > { %9569 = dma.hbm_to_vmem [thread:$0]  (!%p10235_p6), %s13973_s9, 2048, %s379_s15, [#allocation14], %s13809_s29, %s13809_s29, %s13811_s12  }
  0xa2   : > { %s7114_s28 = sadd.s32 4294967294, %s10118_s22   ;;  %s10371_s17 = sadd.s32 1, %s10118_s22  }
  0xa3   : > { %s61_s3 = sadd.s32 1, %s10114_s21  ;;  %s58_s8 = ssub.s32 %s10118_s22, %s10371_s17 }
  0xa4   : > { %p68_p8 = scmp.ne.s32.totalorder %s10114_s21, %s10110_s20  ;;  %p59_p1 = scmp.eq.s32.totalorder %s58_s8, 0 }
  0xa5   : > { %p69_p3 = scmp.eq.s32.totalorder %s10118_s22, 0  ;;  %p74_p13 = scmp.ne.s32.totalorder %s10110_s20, %s10106_s19 }
  0xa6   : > { %p292_p0 = scmp.eq.s32.totalorder %s10219_s24, 1  ;;  %p13975_p5 = scmp.eq.s32.totalorder %s10219_s24, 0 }
  0xa7   : > { %s10383_s11 = scalar_select %p59_p1, %s10114_s21, %s61_s3  }
  0xa8   : > { %p70_p2 = por %p69_p3, %p68_p8  ;;  %p10387_p7 = por %p13975_p5, %p74_p13 }
  0xa9   : > { %13974 = sst [smem:[#allocation23_spill]] %s10383_s11  ;;  %p10391_p6 = por %p292_p0, %p68_p8 }
  0xaa   : > { %p298_p9 = scmp.eq.s32.totalorder %s7114_s28, 1  ;;  %p9586_p4 = scmp.lt.s32.totalorder %s10118_s22, 2 }
  0xab   : > { %s13977_s15 = scalar_select %p10391_p6, 1, 0 }
  0xac   : > { %s395_s16 = sand.u32 1, %s10114_s21   ;;  %p10397_p10 = por %p298_p9, %p74_p13 }
  0xad   : > { %s10401_s0 = sshll.u32 %s395_s16, 8  ;;  %s7241_s26 = sshll.u32 %s10118_s22, 12 }
  0xae   : > { %s13978_s18 = scalar_select %p10397_p10, 1, 0 }
  0xaf   : > { %s13979_s1 = sld [smem:[#allocation109_spill]]  ;;  %s399_s30 = scalar_lea.vmem [#allocation4], %s10401_s0 }
  0xb0   : > { %s406_s28 = sshll.u32 %s399_s30, 4  ;;  %p10410_p11 = pnand %p9586_p4, %p70_p2  ;;  %s10414_s28 = int_to_ptr.vmem [resolvable:$true] %s406_s28 }
  0xb1   : > { %s10419_s27 = scalar_lea.hbm %s13795_s2, %s7241_s26  ;;  %s10421_s23 = scalar_lea.sflag [#allocation5], %s395_s16 }
  0xb2   : > { %p9978_p8 = pneg %p10410_p11 }
  0xb5   : > { %s10407_s13 = scalar_lea.hbm %s13979_s1, %s7241_s26  ;;  %s9981_s5 = scalar_lea.hbm %s13979_s1, 8192 }
  0xb6   : > { %s9976_s12 = scalar_lea.hbm %s10407_s13, 4096  ;;  %p9982_p13 = scmp.lt.u32.totalorder %s10407_s13, %s13979_s1 }
  0xb7   : > { %p9977_p12 = scmp.ne.s32.totalorder %s10407_s13, %s9976_s12  ;;  %p9983_p0 = scmp.lt.u32.totalorder %s9981_s5, %s9976_s12 }
  0xb8   : > { %p9985_p5 = scmp.lt.u32.totalorder %s9976_s12, %s10407_s13 }
  0xb9   : > { %p9979_p1 = pnand %p9978_p8, %p9977_p12  ;;  %p9984_p2 = por %p9983_p0, %p9982_p13 }
  0xbb   : > { %p9980_p3 = pneg %p9979_p1  ;;  %p9986_p9 = por %p9985_p5, %p9984_p2 }
  0xbd   : > { %p9987_p4 = pnand %p9986_p9, %p9980_p3 }
  0xbf   : > { %9990 = shalt.err (!%p9987_p4)
}
  0xc0   : > { %s9991_s29 = scalar_lea.vmem %s10414_s28, 4096  ;;  %s10127_s4 = smov [#allocation4]  }
  0xc1   : > { %p9992_p12 = scmp.ne.s32.totalorder %s10414_s28, %s9991_s29  ;;  %s9996_s16 = sshll.u32 %s10127_s4, 4  ;;  %s9997_s16 = int_to_ptr.vmem [resolvable:$false] %s9996_s16 }
  0xc2   : > { %s9998_s6 = scalar_lea.vmem %s9997_s16, 8192  ;;  %p9999_p6 = scmp.lt.s32.totalorder %s10414_s28, %s9997_s16 }
  0xc3   : > { %p9994_p1 = pnand %p9992_p12, %p9978_p8  ;;  %p10000_p13 = scmp.lt.s32.totalorder %s9998_s6, %s9991_s29 }
  0xc5   : > { %p9995_p10 = pneg %p9994_p1  ;;  %p10001_p0 = por %p10000_p13, %p9999_p6 }
  0xc7   : > { %p10002_p2 = pnand %p10001_p0, %p9995_p10 }
  0xc9   : > { %10005 = shalt.err (!%p10002_p2)
}
  0xca   : > { %s13981_s5 = smov 8   ;;  %s13982_s9 = smov 128  }
  0xcb   : > { %9573 = dma.hbm_to_vmem [thread:$0]  (!%p10410_p11), %s10407_s13, 4096, %s10414_s28, %s10421_s23, %s13982_s9, %s13982_s9, %s13981_s5  }
  0xcc   : > { %s420_s12 = scalar_lea.vmem [#allocation7], %s10401_s0  ;;  %s416_s8 = sand.u32 1, %s10118_s22  }
  0xcd   : > { %s427_s26 = sshll.u32 %s420_s12, 4  ;;  %s10456_s30 = scalar_lea.sflag [#allocation8], %s416_s8  ;;  %s10454_s26 = int_to_ptr.vmem [resolvable:$true] %s427_s26 }
  0xce   : > { %s10006_s29 = scalar_lea.hbm %s10419_s27, 4096  ;;  %s10011_s6 = scalar_lea.hbm %s13795_s2, 8192 }
  0xcf   : > { %p10007_p6 = scmp.ne.s32.totalorder %s10419_s27, %s10006_s29  ;;  %p10012_p5 = scmp.lt.u32.totalorder %s10419_s27, %s13795_s2 }
  0xd0   : > { %p10013_p9 = scmp.lt.u32.totalorder %s10011_s6, %s10006_s29  ;;  %p10015_p12 = scmp.lt.u32.totalorder %s10006_s29, %s10419_s27 }
  0xd1   : > { %p10009_p10 = pnand %p10007_p6, %p9978_p8 }
  0xd2   : > { %p10014_p4 = por %p10013_p9, %p10012_p5 }
  0xd3   : > { %p10010_p3 = pneg %p10009_p10 }
  0xd4   : > { %p10016_p1 = por %p10015_p12, %p10014_p4 }
  0xd6   : > { %p10017_p13 = pnand %p10016_p1, %p10010_p3 }
  0xd8   : > { %10020 = shalt.err (!%p10017_p13)
}
  0xd9   : > { %s10021_s0 = scalar_lea.vmem %s10454_s26, 4096  ;;  %s10128_s13 = smov [#allocation7]  }
  0xda   : > { %p10022_p0 = scmp.ne.s32.totalorder %s10454_s26, %s10021_s0  ;;  %s10026_s28 = sshll.u32 %s10128_s13, 4  ;;  %s10027_s28 = int_to_ptr.vmem [resolvable:$false] %s10026_s28 }
  0xdb   : > { %s10028_s1 = scalar_lea.vmem %s10027_s28, 8192  ;;  %p10029_p10 = scmp.lt.s32.totalorder %s10454_s26, %s10027_s28 }
  0xdc   : > { %p10024_p2 = pnand %p10022_p0, %p9978_p8  ;;  %p10030_p5 = scmp.lt.s32.totalorder %s10028_s1, %s10021_s0 }
  0xde   : > { %p10025_p6 = pneg %p10024_p2  ;;  %p10031_p9 = por %p10030_p5, %p10029_p10 }
  0xe0   : > { %p10032_p4 = pnand %p10031_p9, %p10025_p6 }
  0xe2   : > { %10035 = shalt.err (!%p10032_p4)
}
  0xe3   : > { %9576 = dma.hbm_to_vmem [thread:$0]  (!%p10410_p11), %s10419_s27, 4096, %s10454_s26, %s10456_s30, %s13982_s9, %s13982_s9, %s13981_s5  }
  0xe4   : > { %p13983_p8 = scmp.ne.s32.totalorder %s13966_s25, 0 }
  0xe6   : > { %439 = sbr.rel (%p13983_p8) target bundleno = 1808 (0x710), region = 64 }
  0xed   : > { %s10488_s11 = sand.u32 1, %s10110_s20  }
  0xee   : > { %s10491_s23 = sshll.u32 %s10488_s11, 8  ;;  %s442_s3 = scalar_lea.sflag [#allocation5], %s10488_s11 }
  0xef   : > { %s10495_s12 = scalar_lea.vmem [#allocation4], %s10491_s23 }
  0xf0   : > { %10081 = dma.done.wait (%p10387_p7), %s442_s3, 4096  }
  0xf1   : > { %10083 = vsyncadd (%p10387_p7), %s442_s3, 4294963200  ;;  %s450_s25 = sand.u32 1, %s10219_s24   ;;  %s10503_s5 = scalar_lea.vmem [#allocation7], %s10491_s23 }
  0xf2   : > { %s451_s27 = scalar_lea.sflag [#allocation8], %s450_s25 }
  0xf3   : > { %10085 = dma.done.wait (%p10387_p7), %s451_s27, 4096  }
  0xf4   : > { %10087 = vsyncadd (%p10387_p7), %s451_s27, 4294963200  ;;  %p13984_p11 = scmp.eq.s32.totalorder %s10219_s24, 0 }
  0xf6   : > { %10089 = dma.done.wait (%p13984_p11), [#allocation8], 2048   ;;  %p13985_p3 = pmov %p13984_p11 }
  0xf8   : > { %10091 = vsyncadd (%p13985_p3), [#allocation8], 4294965248  ;;  %p13986_p12 = pmov %p13985_p3 }
  0xf9   : > { %p13987_p1 = pmov %p13985_p3 }
  0xfa   : > { %10093 = dma.done.wait (%p13986_p12), [#allocation11], 20480  }
  0xfb   : > { %10095 = vsyncadd (%p13987_p1), [#allocation11], 4294946816  ;;  %p13988_p13 = pmov %p13987_p1 }
  0xfc   : > { %p13989_p0 = pmov %p13987_p1 }
  0xfd   : > { %10097 = dma.done.wait (%p13988_p13), [#allocation14], 4096  }
  0xfe   : > { %10099 = vsyncadd (%p13989_p0), [#allocation14], 4294963200  ;;  %v1198_v0 = vld [vmem:[#allocation9] sm:$0xff]  ;;  %v1199_v1 = vld [vmem:[#allocation9 + $0x8] sm:$0xff]  ;;  %s1214_s14 = sld [smem:[#allocation3]]  ;;  %s14253_s29 = sld [smem:[#allocation114_spill]] }
  0xff   : > { %v1200_v2 = vld [vmem:[#allocation9 + $0x10] sm:$0xff]  ;;  %v8832_v3 = vpack.c.bf16 %v1199_v1, %v1198_v0  ;;  %v1201_v4 = vld [vmem:[#allocation9 + $0x18] sm:$0xff]  ;;  %v1202_v6 = vld [vmem:[#allocation9 + $0x20] sm:$0xff]  ;;  %s13678_s6 = scalar_lea.vmem [#allocation16], %s10491_s23  ;;  %s7243_s23 = sshll.u32 %s10219_s24, 12 }
 0x100   : > { %v8836_v5 = vpack.c.bf16 %v1201_v4, %v1200_v2  ;;  %v1203_v7 = vld [vmem:[#allocation9 + $0x28] sm:$0xff]  ;;  %v1134_v9 = vld [vmem:[%s10495_s12] sm:$0xff]  ;;  %v1204_v10 = vld [vmem:[#allocation9 + $0x30] sm:$0xff]  ;;  %s6971_s0 = sshll.u32 %s13678_s6, 4  ;;  %s14315_s1 = sld [smem:[#allocation116_spill]]  ;;  %s13747_s0 = int_to_ptr.vmem [resolvable:$true] %s6971_s0 }
 0x101   : > { %8833 = vmatprep.subr.bf16.mxu0 %v8832_v3  ;;  %v8840_v8 = vpack.c.bf16 %v1203_v7, %v1202_v6  ;;  %v1205_v11 = vld [vmem:[#allocation9 + $0x38] sm:$0xff]  ;;  %7869 = vmatprep.mubr.f32.mxu0 %v1134_v9  ;;  %v1206_v13 = vld [vmem:[#allocation9 + $0x40] sm:$0xff]  ;;  %v1207_v14 = vld [vmem:[#allocation9 + $0x48] sm:$0xff]  ;;  %s10036_s25 = scalar_lea.vmem %s13747_s0, 4096  ;;  %p14316_p2 = scmp.ne.s32.totalorder %s13977_s15, 0 }
 0x102   : > { %8835 = vmatpush3.bf16.msra.mxu0 %v8832_v3  ;;  %v8844_v12 = vpack.c.bf16 %v1205_v11, %v1204_v10  ;;  %v8848_v15 = vpack.c.bf16 %v1207_v14, %v1206_v13  ;;  %v1208_v16 = vld [vmem:[#allocation9 + $0x50] sm:$0xff]  ;;  %v1209_v17 = vld [vmem:[#allocation9 + $0x58] sm:$0xff]  ;;  %v1557_v18 = vld [vmem:[#allocation10 + $0x200] sm:$0xff]  ;;  %p10037_p7 = scmp.ne.s32.totalorder %s13747_s0, %s10036_s25  ;;  %s10132_s24 = smov [#allocation16]  }
 0x103   : > { %8837 = vmatprep.subr.bf16.mxu0 %v8836_v5  ;;  %v1558_v19 = vld [vmem:[#allocation10 + $0x208] sm:$0xff]  ;;  %v8852_v20 = vpack.c.bf16 %v1209_v17, %v1208_v16  ;;  %v1559_v22 = vld [vmem:[#allocation10 + $0x210] sm:$0xff]  ;;  %v1560_v23 = vld [vmem:[#allocation10 + $0x218] sm:$0xff]  ;;  %s10040_s27 = sshll.u32 %s10132_s24, 4  ;;  %s10041_s27 = int_to_ptr.vmem [resolvable:$false] %s10040_s27 }
 0x104   : > { %v8864_v21 = vpack.c.bf16 %v1558_v19, %v1557_v18  ;;  %v1210_v24 = vld [vmem:[#allocation9 + $0x60] sm:$0xff]  ;;  %v1211_v25 = vld [vmem:[#allocation9 + $0x68] sm:$0xff]  ;;  %v8868_v26 = vpack.c.bf16 %v1560_v23, %v1559_v22  ;;  %v1212_v30 = vld [vmem:[#allocation9 + $0x70] sm:$0xff]  ;;  %p10038_p6 = pnand %p10037_p7, %p14316_p2  ;;  %p10043_p5 = scmp.lt.s32.totalorder %s13747_s0, %s10041_s27 }
 0x105   : > { %v1561_v27 = vld [vmem:[#allocation10 + $0x220] sm:$0xff]  ;;  %v1562_v28 = vld [vmem:[#allocation10 + $0x228] sm:$0xff]  ;;  %v8856_v29 = vpack.c.bf16 %v1211_v25, %v1210_v24  ;;  %v1213_v32 = vld [vmem:[#allocation9 + $0x78] sm:$0xff] }
 0x106   : > { %8839 = vmatpush3.bf16.msra.mxu0 %v8836_v5  ;;  %8865 = vmatprep.subr.bf16.mxu1 %v8864_v21  ;;  %v8872_v31 = vpack.c.bf16 %v1562_v28, %v1561_v27  ;;  %v1563_v33 = vld [vmem:[#allocation10 + $0x230] sm:$0xff]  ;;  %v1564_v34 = vld [vmem:[#allocation10 + $0x238] sm:$0xff]  ;;  %v8860_v35 = vpack.c.bf16 %v1213_v32, %v1212_v30  ;;  %v2380_v36 = vld [vmem:[#allocation10 + $0x180] sm:$0xff]  ;;  %s13745_s3 = scalar_lea.hbm %s14315_s1, %s7243_s23  ;;  %p10039_p10 = pneg %p10038_p6 }
 0x107   : > { %8841 = vmatprep.subr.bf16.mxu0 %v8840_v8  ;;  %8867 = vmatpush3.bf16.msra.mxu1 %v8864_v21  ;;  %v8876_v37 = vpack.c.bf16 %v1564_v34, %v1563_v33  ;;  %v2381_v38 = vld [vmem:[#allocation10 + $0x188] sm:$0xff]  ;;  %v1565_v39 = vld [vmem:[#allocation10 + $0x240] sm:$0xff]  ;;  %v2382_v43 = vld [vmem:[#allocation10 + $0x190] sm:$0xff] }
 0x108   : > { %8869 = vmatprep.subr.bf16.mxu1 %v8868_v26  ;;  %v1566_v40 = vld [vmem:[#allocation10 + $0x248] sm:$0xff]  ;;  %v8960_v41 = vpack.c.bf16 %v2381_v38, %v2380_v36  ;;  %v2383_v44 = vld [vmem:[#allocation10 + $0x198] sm:$0xff]  ;;  %v1136_v46 = vld [vmem:[%s10495_s12 + $0x10] sm:$0xff] }
 0x109   : > { %v8880_v42 = vpack.c.bf16 %v1566_v40, %v1565_v39  ;;  %v1135_v45 = vld [vmem:[%s10495_s12 + $0x8] sm:$0xff]  ;;  %v8964_v47 = vpack.c.bf16 %v2383_v44, %v2382_v43  ;;  %v2384_v48 = vld [vmem:[#allocation10 + $0x1a0] sm:$0xff]  ;;  %v1137_v50 = vld [vmem:[%s10495_s12 + $0x18] sm:$0xff] }
 0x10a   : > { %8843 = vmatpush3.bf16.msra.mxu0 %v8840_v8  ;;  %v2385_v49 = vld [vmem:[#allocation10 + $0x1a8] sm:$0xff]  ;;  %v1138_v51 = vld [vmem:[%s10495_s12 + $0x20] sm:$0xff]  ;;  %v2386_v53 = vld [vmem:[#allocation10 + $0x1b0] sm:$0xff] }
 0x10b   : > { %8845 = vmatprep.subr.bf16.mxu0 %v8844_v12  ;;  %8871 = vmatpush3.bf16.msra.mxu1 %v8868_v26  ;;  %v8968_v52 = vpack.c.bf16 %v2385_v49, %v2384_v48  ;;  %v2387_v54 = vld [vmem:[#allocation10 + $0x1b8] sm:$0xff]  ;;  %v1139_v55 = vld [vmem:[%s10495_s12 + $0x28] sm:$0xff]  ;;  %v1140_v56 = vld [vmem:[%s10495_s12 + $0x30] sm:$0xff]  ;;  %v10563_v48 = vstv %s1214_s14 }
 0x10c   : > { %8873 = vmatprep.subr.bf16.mxu1 %v8872_v31  ;;  %v8972_v57 = vpack.c.bf16 %v2387_v54, %v2386_v53  ;;  %v2388_v58 = vld [vmem:[#allocation10 + $0x1c0] sm:$0xff]  ;;  %v2389_v59 = vld [vmem:[#allocation10 + $0x1c8] sm:$0xff]  ;;  %v1141_v60 = vld [vmem:[%s10495_s12 + $0x38] sm:$0xff] }
 0x10d   : > { %v1142_v61 = vld [vmem:[%s10495_s12 + $0x40] sm:$0xff]  ;;  %v8976_v62 = vpack.c.bf16 %v2389_v59, %v2388_v58  ;;  %v1143_v63 = vld [vmem:[%s10495_s12 + $0x48] sm:$0xff]  ;;  %v1144_v0 = vld [vmem:[%s10495_s12 + $0x50] sm:$0xff] }
 0x10e   : > { %8847 = vmatpush3.bf16.msra.mxu0 %v8844_v12  ;;  %v1145_v1 = vld [vmem:[%s10495_s12 + $0x58] sm:$0xff]  ;;  %v1146_v2 = vld [vmem:[%s10495_s12 + $0x60] sm:$0xff]  ;;  %v1147_v3 = vld [vmem:[%s10495_s12 + $0x68] sm:$0xff] }
 0x10f   : > { %8849 = vmatprep.subr.bf16.mxu0 %v8848_v15  ;;  %8875 = vmatpush3.bf16.msra.mxu1 %v8872_v31  ;;  %v1148_v4 = vld [vmem:[%s10495_s12 + $0x70] sm:$0xff]  ;;  %v1149_v5 = vld [vmem:[%s10495_s12 + $0x78] sm:$0xff]  ;;  %v1150_v6 = vld [vmem:[%s10495_s12 + $0x80] sm:$0xff] }
 0x110   : > { %8877 = vmatprep.subr.bf16.mxu1 %v8876_v37  ;;  %v1151_v7 = vld [vmem:[%s10495_s12 + $0x88] sm:$0xff]  ;;  %v1152_v8 = vld [vmem:[%s10495_s12 + $0x90] sm:$0xff]  ;;  %v1153_v9 = vld [vmem:[%s10495_s12 + $0x98] sm:$0xff] }
 0x111   : > { %v1154_v10 = vld [vmem:[%s10495_s12 + $0xa0] sm:$0xff]  ;;  %v1155_v11 = vld [vmem:[%s10495_s12 + $0xa8] sm:$0xff]  ;;  %v1156_v12 = vld [vmem:[%s10495_s12 + $0xb0] sm:$0xff] }
 0x112   : > { %8851 = vmatpush3.bf16.msra.mxu0 %v8848_v15  ;;  %v1157_v13 = vld [vmem:[%s10495_s12 + $0xb8] sm:$0xff]  ;;  %v1158_v14 = vld [vmem:[%s10495_s12 + $0xc0] sm:$0xff]  ;;  %v1159_v15 = vld [vmem:[%s10495_s12 + $0xc8] sm:$0xff] }
 0x113   : > { %8853 = vmatprep.subr.bf16.mxu0 %v8852_v20  ;;  %8879 = vmatpush3.bf16.msra.mxu1 %v8876_v37  ;;  %v1160_v16 = vld [vmem:[%s10495_s12 + $0xd0] sm:$0xff]  ;;  %v1161_v17 = vld [vmem:[%s10495_s12 + $0xd8] sm:$0xff]  ;;  %v1162_v18 = vld [vmem:[%s10495_s12 + $0xe0] sm:$0xff]  ;;  %v13814_v37 = vmov 0.0  }
 0x114   : > { %8881 = vmatprep.subr.bf16.mxu1 %v8880_v42  ;;  %v1163_v19 = vld [vmem:[%s10495_s12 + $0xe8] sm:$0xff]  ;;  %v1165_v21 = vld [vmem:[%s10495_s12 + $0xf8] sm:$0xff]  ;;  %v1567_v22 = vld [vmem:[#allocation10 + $0x250] sm:$0xff]  ;;  %520 = vst [vmem:[#allocation2 + $0x10] sm:$0xff] %v13814_v37 }
 0x115   : > { %v1568_v23 = vld [vmem:[#allocation10 + $0x258] sm:$0xff]  ;;  %v1569_v25 = vld [vmem:[#allocation10 + $0x260] sm:$0xff]  ;;  %v1570_v26 = vld [vmem:[#allocation10 + $0x268] sm:$0xff]  ;;  %518 = vst [vmem:[#allocation2] sm:$0xff] %v13814_v37 }
 0x116   : > { %8855 = vmatpush3.bf16.msra.mxu0 %v8852_v20  ;;  %v1164_v20 = vld [vmem:[%s10495_s12 + $0xf0] sm:$0xff]  ;;  %v8884_v24 = vpack.c.bf16 %v1568_v23, %v1567_v22  ;;  %v8888_v27 = vpack.c.bf16 %v1570_v26, %v1569_v25  ;;  %v1572_v32 = vld [vmem:[#allocation10 + $0x278] sm:$0xff]  ;;  %v2392_v34 = vld [vmem:[#allocation10 + $0x1e0] sm:$0xff]  ;;  %519 = vst [vmem:[#allocation2 + $0x8] sm:$0xff] %v13814_v37  ;;  %s6958_s12 = scalar_lea.sflag [#allocation6], %s10488_s11 }
 0x117   : > { %8857 = vmatprep.subr.bf16.mxu0 %v8856_v29  ;;  %8883 = vmatpush3.bf16.msra.mxu1 %v8880_v42  ;;  %v2390_v28 = vld [vmem:[#allocation10 + $0x1d0] sm:$0xff]  ;;  %521 = vst [vmem:[#allocation2 + $0x118] sm:$0xff] %v13814_v37  ;;  %522 = vst [vmem:[#allocation2 + $0x120] sm:$0xff] %v13814_v37  ;;  %v2395_v39 = vld [vmem:[#allocation10 + $0x1f8] sm:$0xff] }
 0x118   : > { %8885 = vmatprep.subr.bf16.mxu1 %v8884_v24  ;;  %v1571_v30 = vld [vmem:[#allocation10 + $0x270] sm:$0xff]  ;;  %523 = vst [vmem:[#allocation2 + $0x128] sm:$0xff] %v13814_v37  ;;  %v1539_v42 = vld [vmem:[#allocation10 + $0x88] sm:$0xff]  ;;  %v2361_v44 = vld [vmem:[#allocation10] sm:$0xff] }
 0x119   : > { %v8892_v33 = vpack.c.bf16 %v1572_v32, %v1571_v30  ;;  %v2394_v38 = vld [vmem:[#allocation10 + $0x1f0] sm:$0xff]  ;;  %v1166_v49 = vld [vmem:[%s10503_s5] sm:$0xff]  ;;  %v1175_v22 = vld [vmem:[%s10503_s5 + $0x48] sm:$0xff] }
 0x11a   : > { %8859 = vmatpush3.bf16.msra.mxu0 %v8856_v29  ;;  %v2391_v29 = vld [vmem:[#allocation10 + $0x1d8] sm:$0xff]  ;;  %v8988_v40 = vpack.c.bf16 %v2395_v39, %v2394_v38  ;;  %v1168_v53 = vld [vmem:[%s10503_s5 + $0x10] sm:$0xff]  ;;  %v1174_v23 = vld [vmem:[%s10503_s5 + $0x40] sm:$0xff] }
 0x11b   : > { %8861 = vmatprep.subr.bf16.mxu0 %v8860_v35  ;;  %8887 = vmatpush3.bf16.msra.mxu1 %v8884_v24  ;;  %v8980_v31 = vpack.c.bf16 %v2391_v29, %v2390_v28  ;;  %v1547_v30 = vld [vmem:[#allocation10 + $0xc8] sm:$0xff]  ;;  %v1224_v38 = vmul.f32 %v10563_v48, %v1174_v23  ;;  %v1177_v39 = vld [vmem:[%s10503_s5 + $0x58] sm:$0xff]  ;;  %v1552_v23 = vld [vmem:[#allocation10 + $0xf0] sm:$0xff] }
 0x11c   : > { %8889 = vmatprep.subr.bf16.mxu1 %v8888_v27  ;;  %v2366_v32 = vld [vmem:[#allocation10 + $0x28] sm:$0xff] }
 0x11e   : > { %8863 = vmatpush3.bf16.msra.mxu0 %v8860_v35  ;;  %v2393_v35 = vld [vmem:[#allocation10 + $0x1e8] sm:$0xff] }
 0x11f   : > { %8961 = vmatprep.subr.bf16.mxu0 %v8960_v41  ;;  %8891 = vmatpush3.bf16.msra.mxu1 %v8888_v27  ;;  %v8984_v36 = vpack.c.bf16 %v2393_v35, %v2392_v34  ;;  %v1546_v27 = vld [vmem:[#allocation10 + $0xc0] sm:$0xff]  ;;  %v1225_v35 = vmul.f32 %v10563_v48, %v1175_v22  ;;  %v2372_v22 = vld [vmem:[#allocation10 + $0x58] sm:$0xff] }
 0x120   : > { %8893 = vmatprep.subr.bf16.mxu1 %v8892_v33 }
 0x121   : > { %7870 = vmatmul.mubr.f32.vlgmr.msra.gmra.mrb[0].mxu0 %v1135_v45  ;;  %v2362_v45 = vld [vmem:[#allocation10 + $0x8] sm:$0xff] }
 0x122   : > { %7872 = vmatprep.mubr.f32.mxu0 %v1136_v46  ;;  %8963 = vmatpush3.bf16.msra.mxu0 %v8960_v41  ;;  %v1538_v41 = vld [vmem:[#allocation10 + $0x80] sm:$0xff]  ;;  %v10559_v46 = vpack.c.bf16 %v2362_v45, %v2361_v44  ;;  %v1548_v44 = vld [vmem:[#allocation10 + $0xd0] sm:$0xff] }
 0x123   : > { %8965 = vmatprep.subr.bf16.mxu0 %v8964_v47  ;;  %8895 = vmatpush3.bf16.msra.mxu1 %v8892_v33  ;;  %v8896_v43 = vpack.c.bf16 %v1539_v42, %v1538_v41 }
 0x125   : > { %7873 = vmatmul.mubr.f32.gmra.mrb[2].mxu0 %v1137_v50  ;;  %8897 = vmatprep.subr.bf16.mxu1 %v8896_v43 }
 0x126   : > { %7875 = vmatprep.mubr.f32.mxu0 %v1138_v51  ;;  %8967 = vmatpush3.bf16.msra.mxu0 %v8964_v47  ;;  %v1167_v47 = vld [vmem:[%s10503_s5 + $0x8] sm:$0xff]  ;;  %v1216_v51 = vmul.f32 %v10563_v48, %v1166_v49  ;;  %v2367_v49 = vld [vmem:[#allocation10 + $0x30] sm:$0xff] }
 0x127   : > { %8969 = vmatprep.subr.bf16.mxu0 %v8968_v52  ;;  %v1217_v50 = vmul.f32 %v10563_v48, %v1167_v47 }
 0x129   : > { %7876 = vmatmul.mubr.f32.gmra.mrb[4].mxu0 %v1139_v55  ;;  %v1540_v55 = vld [vmem:[#allocation10 + $0x90] sm:$0xff] }
 0x12a   : > { %7878 = vmatprep.mubr.f32.mxu0 %v1140_v56  ;;  %8971 = vmatpush3.bf16.msra.mxu0 %v8968_v52  ;;  %v1169_v52 = vld [vmem:[%s10503_s5 + $0x18] sm:$0xff] }
 0x12b   : > { %8973 = vmatprep.subr.bf16.mxu0 %v8972_v57  ;;  %v1541_v56 = vld [vmem:[#allocation10 + $0x98] sm:$0xff]  ;;  %v1219_v59 = vmul.f32 %v10563_v48, %v1169_v52 }
 0x12d   : > { %7879 = vmatmul.mubr.f32.gmra.mrb[6].mxu0 %v1141_v60 }
 0x12e   : > { %7881 = vmatprep.mubr.f32.mxu0 %v1142_v61  ;;  %8975 = vmatpush3.bf16.msra.mxu0 %v8972_v57  ;;  %v1218_v61 = vmul.f32 %v10563_v48, %v1168_v53  ;;  %v1227_v53 = vmul.f32 %v10563_v48, %v1177_v39 }
 0x12f   : > { %8977 = vmatprep.subr.bf16.mxu0 %v8976_v62 }
 0x131   : > { %7882 = vmatmul.mubr.f32.gmra.mrb[8].mxu0 %v1143_v63  ;;  %v1170_v63 = vld [vmem:[%s10503_s5 + $0x20] sm:$0xff] }
 0x132   : > { %7884 = vmatprep.mubr.f32.mxu0 %v1144_v0  ;;  %8979 = vmatpush3.bf16.msra.mxu0 %v8976_v62  ;;  %v1171_v62 = vld [vmem:[%s10503_s5 + $0x28] sm:$0xff]  ;;  %v8900_v0 = vpack.c.bf16 %v1541_v56, %v1540_v55 }
 0x133   : > { %8981 = vmatprep.subr.bf16.mxu0 %v8980_v31  ;;  %v1179_v56 = vld [vmem:[%s10503_s5 + $0x68] sm:$0xff] }
 0x135   : > { %7885 = vmatmul.mubr.f32.gmra.mrb[10].mxu0 %v1145_v1 }
 0x136   : > { %7887 = vmatprep.mubr.f32.mxu0 %v1146_v2  ;;  %8983 = vmatpush3.bf16.msra.mxu0 %v8980_v31  ;;  %v1542_v2 = vld [vmem:[#allocation10 + $0xa0] sm:$0xff] }
 0x137   : > { %8985 = vmatprep.subr.bf16.mxu0 %v8984_v36  ;;  %v2365_v31 = vld [vmem:[#allocation10 + $0x20] sm:$0xff] }
 0x138   : > { %v9000_v45 = vpack.c.bf16 %v2366_v32, %v2365_v31  ;;  %v1183_v32 = vld [vmem:[%s10503_s5 + $0x88] sm:$0xff] }
 0x139   : > { %7888 = vmatmul.mubr.f32.gmra.mrb[12].mxu0 %v1147_v3  ;;  %v1543_v3 = vld [vmem:[#allocation10 + $0xa8] sm:$0xff] }
 0x13a   : > { %7890 = vmatprep.mubr.f32.mxu0 %v1148_v4  ;;  %8987 = vmatpush3.bf16.msra.mxu0 %v8984_v36 }
 0x13b   : > { %8989 = vmatprep.subr.bf16.mxu0 %v8988_v40 }
 0x13d   : > { %7891 = vmatmul.mubr.f32.gmra.mrb[14].mxu0 %v1149_v5 }
 0x13e   : > { %7893 = vmatprep.mubr.f32.mxu0 %v1150_v6  ;;  %8991 = vmatpush3.bf16.msra.mxu0 %v8988_v40  ;;  %v1221_v6 = vmul.f32 %v10563_v48, %v1171_v62  ;;  %v1176_v40 = vld [vmem:[%s10503_s5 + $0x50] sm:$0xff] }
 0x13f   : > { %8993 = vmatprep.subr.bf16.mxu0 %v10559_v46  ;;  %v1226_v55 = vmul.f32 %v10563_v48, %v1176_v40 }
 0x141   : > { %7894 = vmatmul.mubr.f32.gmra.mrb[16].mxu0 %v1151_v7 }
 0x142   : > { %7896 = vmatprep.mubr.f32.mxu0 %v1152_v8  ;;  %v1220_v8 = vmul.f32 %v10563_v48, %v1170_v63 }
 0x145   : > { %7897 = vmatmul.mubr.f32.gmra.mrb[18].mxu0 %v1153_v9  ;;  %v1173_v9 = vld [vmem:[%s10503_s5 + $0x38] sm:$0xff] }
 0x146   : > { %7899 = vmatprep.mubr.f32.mxu0 %v1154_v10  ;;  %v1172_v10 = vld [vmem:[%s10503_s5 + $0x30] sm:$0xff] }
 0x149   : > { %7900 = vmatmul.mubr.f32.gmra.mrb[20].mxu0 %v1155_v11  ;;  %v8904_v11 = vpack.c.bf16 %v1543_v3, %v1542_v2  ;;  %v1551_v2 = vld [vmem:[#allocation10 + $0xe8] sm:$0xff]  ;;  %v2369_v3 = vld [vmem:[#allocation10 + $0x40] sm:$0xff] }
 0x14a   : > { %7902 = vmatprep.mubr.f32.mxu0 %v1156_v12  ;;  %v1544_v12 = vld [vmem:[#allocation10 + $0xb0] sm:$0xff] }
 0x14d   : > { %7903 = vmatmul.mubr.f32.gmra.mrb[22].mxu0 %v1157_v13 }
 0x14e   : > { %7905 = vmatprep.mubr.f32.mxu0 %v1158_v14  ;;  %v1545_v14 = vld [vmem:[#allocation10 + $0xb8] sm:$0xff] }
 0x14f   : > { %v8908_v26 = vpack.c.bf16 %v1545_v14, %v1544_v12  ;;  %v1181_v12 = vld [vmem:[%s10503_s5 + $0x78] sm:$0xff] }
 0x151   : > { %7906 = vmatmul.mubr.f32.gmra.mrb[24].mxu0 %v1159_v15  ;;  %v2363_v15 = vld [vmem:[#allocation10 + $0x10] sm:$0xff] }
 0x152   : > { %7908 = vmatprep.mubr.f32.mxu0 %v1160_v16  ;;  %v2364_v16 = vld [vmem:[#allocation10 + $0x18] sm:$0xff] }
 0x153   : > { %v8996_v28 = vpack.c.bf16 %v2364_v16, %v2363_v15 }
 0x155   : > { %7909 = vmatmul.mubr.f32.gmra.mrb[26].mxu0 %v1161_v17 }
 0x156   : > { %7911 = vmatprep.mubr.f32.mxu0 %v1162_v18 }
 0x159   : > { %7912 = vmatmul.mubr.f32.gmra.mrb[28].mxu0 %v1163_v19  ;;  %v1223_v19 = vmul.f32 %v10563_v48, %v1173_v9  ;;  %v1229_v9 = vmul.f32 %v10563_v48, %v1179_v56  ;;  %v1185_v56 = vld [vmem:[%s10503_s5 + $0x98] sm:$0xff] }
 0x15a   : > { %7914 = vmatprep.mubr.f32.mxu0 %v1164_v20 }
 0x15d   : > { %7915 = vmatmul.mubr.f32.gmra.mrb[30].mxu0 %v1165_v21  ;;  %v1222_v21 = vmul.f32 %v10563_v48, %v1172_v10 }
 0x1f4   : > { %v7871_v54 = vpop.f32.mrb[0].mxu0 }
 0x1f5   : > { %v10570_v57 = vadd.f32 %v7871_v54, %v1217_v50  ;;  %v1314_v58 = vpop.f32.mrb[1].mxu0  ;;  %v2368_v50 = vld [vmem:[#allocation10 + $0x38] sm:$0xff] }
 0x1f6   : > { %v10573_v60 = vadd.f32 %v1314_v58, %v1216_v51  ;;  %v1178_v58 = vld [vmem:[%s10503_s5 + $0x60] sm:$0xff]  ;;  %v9004_v63 = vpack.c.bf16 %v2368_v50, %v2367_v49 }
 0x1f7   : > { %1474 = vst [vmem:[#allocation2 + $0x20] sm:$0xff] %v10570_v57 }
 0x1f8   : > { %1473 = vst [vmem:[#allocation2 + $0x18] sm:$0xff] %v10573_v60  ;;  %v7874_v1 = vpop.f32.mrb[2].mxu0  ;;  %7949 = vmatprep.mubr.f32.mxu1 %v10573_v60 }
 0x1f9   : > { %v10581_v4 = vadd.f32 %v7874_v1, %v1219_v59  ;;  %v1324_v5 = vpop.f32.mrb[3].mxu0  ;;  %7950 = vmatmul.mubr.f32.vlgmr.msra.gmra.mrb[0].mxu1 %v10570_v57 }
 0x1fa   : > { %v10585_v7 = vadd.f32 %v1324_v5, %v1218_v61  ;;  %8899 = vmatpush3.bf16.msra.mxu1 %v8896_v43  ;;  %v8912_v43 = vpack.c.bf16 %v1547_v30, %v1546_v27  ;;  %v2370_v5 = vld [vmem:[#allocation10 + $0x48] sm:$0xff] }
 0x1fb   : > { %1476 = vst [vmem:[#allocation2 + $0x30] sm:$0xff] %v10581_v4  ;;  %8901 = vmatprep.subr.bf16.mxu1 %v8900_v0 }
 0x1fc   : > { %1475 = vst [vmem:[#allocation2 + $0x28] sm:$0xff] %v10585_v7  ;;  %v7877_v13 = vpop.f32.mrb[4].mxu0  ;;  %7952 = vmatprep.mubr.f32.mxu1 %v10585_v7 }
 0x1fd   : > { %v10593_v17 = vadd.f32 %v7877_v13, %v1221_v6  ;;  %v1334_v18 = vpop.f32.mrb[5].mxu0  ;;  %7953 = vmatmul.mubr.f32.gmra.mrb[2].mxu1 %v10581_v4  ;;  %v1180_v13 = vld [vmem:[%s10503_s5 + $0x70] sm:$0xff] }
 0x1fe   : > { %v10597_v20 = vadd.f32 %v1334_v18, %v1220_v8  ;;  %8903 = vmatpush3.bf16.msra.mxu1 %v8900_v0  ;;  %v1550_v0 = vld [vmem:[#allocation10 + $0xe0] sm:$0xff]  ;;  %v9008_v18 = vpack.c.bf16 %v2370_v5, %v2369_v3  ;;  %v1230_v31 = vmul.f32 %v10563_v48, %v1180_v13  ;;  %v2375_v3 = vld [vmem:[#allocation10 + $0x70] sm:$0xff]  ;;  %v2376_v5 = vld [vmem:[#allocation10 + $0x78] sm:$0xff] }
 0x1ff   : > { %1478 = vst [vmem:[#allocation2 + $0x40] sm:$0xff] %v10593_v17  ;;  %v10603_v24 = vld [vmem:[#allocation2 + $0x17] sm:$0xff]  ;;  %v10605_v25 = vld [vmem:[#allocation2 + $0x1f] sm:$0xff]  ;;  %8905 = vmatprep.subr.bf16.mxu1 %v8904_v11  ;;  %v8920_v16 = vpack.c.bf16 %v1551_v2, %v1550_v0 }
 0x200   : > { %1477 = vst [vmem:[#allocation2 + $0x38] sm:$0xff] %v10597_v20  ;;  %v7880_v29 = vpop.f32.mrb[6].mxu0  ;;  %8189 = vmatprep.mubr.f32.mxu0 %v10603_v24  ;;  %7955 = vmatprep.mubr.f32.mxu1 %v10597_v20 }
 0x201   : > { %v10610_v33 = vadd.f32 %v7880_v29, %v1223_v19  ;;  %v1344_v34 = vpop.f32.mrb[7].mxu0  ;;  %8190 = vmatmul.mubr.f32.vlgmr.msra.gmra.mrb[32].mxu0 %v10605_v25  ;;  %7956 = vmatmul.mubr.f32.gmra.mrb[4].mxu1 %v10593_v17  ;;  %v2371_v19 = vld [vmem:[#allocation10 + $0x50] sm:$0xff]  ;;  %v1231_v29 = vmul.f32 %v10563_v48, %v1181_v12 }
 0x202   : > { %v10615_v36 = vadd.f32 %v1344_v34, %v1222_v21  ;;  %8907 = vmatpush3.bf16.msra.mxu1 %v8904_v11  ;;  %8995 = vmatpush3.bf16.msra.mxu0 %v10559_v46  ;;  %v1549_v46 = vld [vmem:[#allocation10 + $0xd8] sm:$0xff]  ;;  %v1228_v11 = vmul.f32 %v10563_v48, %v1178_v58  ;;  %v1182_v34 = vld [vmem:[%s10503_s5 + $0x80] sm:$0xff]  ;;  %v9012_v39 = vpack.c.bf16 %v2372_v22, %v2371_v19 }
 0x203   : > { %1480 = vst [vmem:[#allocation2 + $0x50] sm:$0xff] %v10610_v33  ;;  %v10622_v41 = vld [vmem:[#allocation2 + $0x27] sm:$0xff]  ;;  %v10624_v42 = vld [vmem:[#allocation2 + $0x2f] sm:$0xff]  ;;  %8909 = vmatprep.subr.bf16.mxu1 %v8908_v26  ;;  %8997 = vmatprep.subr.bf16.mxu0 %v8996_v28  ;;  %v8916_v62 = vpack.c.bf16 %v1549_v46, %v1548_v44  ;;  %v2057_v46 = vld [vmem:[#allocation10 + $0x388] sm:$0xff]  ;;  %v9020_v22 = vpack.c.bf16 %v2376_v5, %v2375_v3 }
 0x204   : > { %1479 = vst [vmem:[#allocation2 + $0x48] sm:$0xff] %v10615_v36  ;;  %v7883_v47 = vpop.f32.mrb[8].mxu0  ;;  %8192 = vmatprep.mubr.f32.mxu0 %v10622_v41  ;;  %7958 = vmatprep.mubr.f32.mxu1 %v10615_v36  ;;  %v1190_v5 = vld [vmem:[%s10503_s5 + $0xc0] sm:$0xff] }
 0x205   : > { %v10629_v51 = vadd.f32 %v7883_v47, %v1225_v35  ;;  %v1354_v52 = vpop.f32.mrb[9].mxu0  ;;  %8193 = vmatmul.mubr.f32.gmra.mrb[34].mxu0 %v10624_v42  ;;  %7959 = vmatmul.mubr.f32.gmra.mrb[6].mxu1 %v10610_v33  ;;  %v2056_v47 = vld [vmem:[#allocation10 + $0x380] sm:$0xff] }
 0x206   : > { %v10634_v54 = vadd.f32 %v1354_v52, %v1224_v38  ;;  %8911 = vmatpush3.bf16.msra.mxu1 %v8908_v26  ;;  %8999 = vmatpush3.bf16.msra.mxu0 %v8996_v28  ;;  %v1553_v26 = vld [vmem:[#allocation10 + $0xf8] sm:$0xff]  ;;  %v1233_v52 = vmul.f32 %v10563_v48, %v1183_v32 }
 0x207   : > { %1482 = vst [vmem:[#allocation2 + $0x60] sm:$0xff] %v10629_v51  ;;  %v10640_v59 = vld [vmem:[#allocation2 + $0x37] sm:$0xff]  ;;  %v10642_v61 = vld [vmem:[#allocation2 + $0x3f] sm:$0xff]  ;;  %8913 = vmatprep.subr.bf16.mxu1 %v8912_v43  ;;  %9001 = vmatprep.subr.bf16.mxu0 %v9000_v45  ;;  %v8924_v40 = vpack.c.bf16 %v1553_v26, %v1552_v23 }
 0x208   : > { %1481 = vst [vmem:[#allocation2 + $0x58] sm:$0xff] %v10634_v54  ;;  %v7886_v1 = vpop.f32.mrb[10].mxu0  ;;  %8195 = vmatprep.mubr.f32.mxu0 %v10640_v59  ;;  %7961 = vmatprep.mubr.f32.mxu1 %v10634_v54  ;;  %v2879_v26 = vld [vmem:[#allocation10 + $0x300] sm:$0xff] }
 0x209   : > { %v10647_v6 = vadd.f32 %v7886_v1, %v1227_v53  ;;  %v1364_v8 = vpop.f32.mrb[11].mxu0  ;;  %8196 = vmatmul.mubr.f32.gmra.mrb[36].mxu0 %v10642_v61  ;;  %7962 = vmatmul.mubr.f32.gmra.mrb[8].mxu1 %v10629_v51  ;;  %v10698_v1 = vpack.c.bf16 %v2057_v46, %v2056_v47 }
 0x20a   : > { %v10652_v10 = vadd.f32 %v1364_v8, %v1226_v55  ;;  %8915 = vmatpush3.bf16.msra.mxu1 %v8912_v43  ;;  %9003 = vmatpush3.bf16.msra.mxu0 %v9000_v45  ;;  %v2373_v43 = vld [vmem:[#allocation10 + $0x60] sm:$0xff]  ;;  %v2374_v45 = vld [vmem:[#allocation10 + $0x68] sm:$0xff]  ;;  %v1232_v55 = vmul.f32 %v10563_v48, %v1182_v34 }
 0x20b   : > { %1484 = vst [vmem:[#allocation2 + $0x70] sm:$0xff] %v10647_v6  ;;  %v10658_v14 = vld [vmem:[#allocation2 + $0x47] sm:$0xff]  ;;  %v10660_v15 = vld [vmem:[#allocation2 + $0x4f] sm:$0xff]  ;;  %8917 = vmatprep.subr.bf16.mxu1 %v8916_v62  ;;  %9005 = vmatprep.subr.bf16.mxu0 %v9004_v63  ;;  %v9016_v0 = vpack.c.bf16 %v2374_v45, %v2373_v43 }
 0x20c   : > { %1483 = vst [vmem:[#allocation2 + $0x68] sm:$0xff] %v10652_v10  ;;  %v7889_v21 = vpop.f32.mrb[12].mxu0  ;;  %8198 = vmatprep.mubr.f32.mxu0 %v10658_v14  ;;  %7964 = vmatprep.mubr.f32.mxu1 %v10652_v10  ;;  %v1188_v45 = vld [vmem:[%s10503_s5 + $0xb0] sm:$0xff] }
 0x20d   : > { %v10665_v27 = vadd.f32 %v7889_v21, %v1229_v9  ;;  %v1374_v28 = vpop.f32.mrb[13].mxu0  ;;  %8199 = vmatmul.mubr.f32.gmra.mrb[38].mxu0 %v10660_v15  ;;  %7965 = vmatmul.mubr.f32.gmra.mrb[10].mxu1 %v10647_v6  ;;  %v1186_v21 = vld [vmem:[%s10503_s5 + $0xa0] sm:$0xff] }
 0x20e   : > { %v10670_v30 = vadd.f32 %v1374_v28, %v1228_v11  ;;  %8919 = vmatpush3.bf16.msra.mxu1 %v8916_v62  ;;  %9007 = vmatpush3.bf16.msra.mxu0 %v9004_v63  ;;  %v1184_v63 = vld [vmem:[%s10503_s5 + $0x90] sm:$0xff]  ;;  %v1235_v11 = vmul.f32 %v10563_v48, %v1185_v56  ;;  %v2880_v28 = vld [vmem:[#allocation10 + $0x308] sm:$0xff] }
 0x20f   : > { %1486 = vst [vmem:[#allocation2 + $0x80] sm:$0xff] %v10665_v27  ;;  %v10676_v35 = vld [vmem:[#allocation2 + $0x57] sm:$0xff]  ;;  %v10678_v38 = vld [vmem:[#allocation2 + $0x5f] sm:$0xff]  ;;  %8921 = vmatprep.subr.bf16.mxu1 %v8920_v16  ;;  %9009 = vmatprep.subr.bf16.mxu0 %v9008_v18  ;;  %v1234_v13 = vmul.f32 %v10563_v48, %v1184_v63  ;;  %v10737_v47 = vpack.c.bf16 %v2880_v28, %v2879_v26 }
 0x210   : > { %1485 = vst [vmem:[#allocation2 + $0x78] sm:$0xff] %v10670_v30  ;;  %v7892_v44 = vpop.f32.mrb[14].mxu0  ;;  %8201 = vmatprep.mubr.f32.mxu0 %v10676_v35  ;;  %7967 = vmatprep.mubr.f32.mxu1 %v10670_v30  ;;  %v1238_v63 = vmul.f32 %v10563_v48, %v1188_v45 }
 0x211   : > { %v10683_v49 = vadd.f32 %v7892_v44, %v1231_v29  ;;  %v1384_v50 = vpop.f32.mrb[15].mxu0  ;;  %8202 = vmatmul.mubr.f32.gmra.mrb[40].mxu0 %v10678_v38  ;;  %7968 = vmatmul.mubr.f32.gmra.mrb[12].mxu1 %v10665_v27 }
 0x212   : > { %v10688_v53 = vadd.f32 %v1384_v50, %v1230_v31  ;;  %8923 = vmatpush3.bf16.msra.mxu1 %v8920_v16  ;;  %9011 = vmatpush3.bf16.msra.mxu0 %v9008_v18  ;;  %v1187_v16 = vld [vmem:[%s10503_s5 + $0xa8] sm:$0xff] }
 0x213   : > { %1488 = vst [vmem:[#allocation2 + $0x90] sm:$0xff] %v10683_v49  ;;  %v10693_v58 = vld [vmem:[#allocation2 + $0x67] sm:$0xff]  ;;  %v10695_v62 = vld [vmem:[#allocation2 + $0x6f] sm:$0xff]  ;;  %9013 = vmatprep.subr.bf16.mxu0 %v9012_v39  ;;  %8925 = vmatprep.subr.bf16.mxu1 %v8924_v40  ;;  %v1237_v32 = vmul.f32 %v10563_v48, %v1187_v16 }
 0x214   : > { %1487 = vst [vmem:[#allocation2 + $0x88] sm:$0xff] %v10688_v53  ;;  %v7895_v2 = vpop.f32.mrb[16].mxu0  ;;  %8204 = vmatprep.mubr.f32.mxu0 %v10693_v58  ;;  %7970 = vmatprep.mubr.f32.mxu1 %v10688_v53 }
 0x215   : > { %v10703_v8 = vadd.f32 %v7895_v2, %v1233_v52  ;;  %v1394_v9 = vpop.f32.mrb[17].mxu0  ;;  %8205 = vmatmul.mubr.f32.gmra.mrb[42].mxu0 %v10695_v62  ;;  %7971 = vmatmul.mubr.f32.gmra.mrb[14].mxu1 %v10683_v49 }
 0x216   : > { %v10708_v12 = vadd.f32 %v1394_v9, %v1232_v55  ;;  %9015 = vmatpush3.bf16.msra.mxu0 %v9012_v39  ;;  %8927 = vmatpush3.bf16.msra.mxu1 %v8924_v40  ;;  %v1236_v39 = vmul.f32 %v10563_v48, %v1186_v21  ;;  %v1189_v40 = vld [vmem:[%s10503_s5 + $0xb8] sm:$0xff] }
 0x217   : > { %1490 = vst [vmem:[#allocation2 + $0xa0] sm:$0xff] %v10703_v8  ;;  %v10713_v18 = vld [vmem:[#allocation2 + $0x77] sm:$0xff]  ;;  %v10715_v19 = vld [vmem:[#allocation2 + $0x7f] sm:$0xff]  ;;  %9017 = vmatprep.subr.bf16.mxu0 %v9016_v0  ;;  %8929 = vmatprep.subr.bf16.mxu1 %v10698_v1  ;;  %v1239_v55 = vmul.f32 %v10563_v48, %v1189_v40 }
 0x218   : > { %1489 = vst [vmem:[#allocation2 + $0x98] sm:$0xff] %v10708_v12  ;;  %v7898_v23 = vpop.f32.mrb[18].mxu0  ;;  %8207 = vmatprep.mubr.f32.mxu0 %v10713_v18  ;;  %7973 = vmatprep.mubr.f32.mxu1 %v10708_v12 }
 0x219   : > { %v10722_v29 = vadd.f32 %v7898_v23, %v1235_v11  ;;  %v1404_v31 = vpop.f32.mrb[19].mxu0  ;;  %8208 = vmatmul.mubr.f32.gmra.mrb[44].mxu0 %v10715_v19  ;;  %7974 = vmatmul.mubr.f32.gmra.mrb[16].mxu1 %v10703_v8  ;;  %v1193_v23 = vld [vmem:[%s10503_s5 + $0xd8] sm:$0xff] }
 0x21a   : > { %v10727_v34 = vadd.f32 %v1404_v31, %v1234_v13  ;;  %9019 = vmatpush3.bf16.msra.mxu0 %v9016_v0  ;;  %v1191_v0 = vld [vmem:[%s10503_s5 + $0xc8] sm:$0xff]  ;;  %v1192_v31 = vld [vmem:[%s10503_s5 + $0xd0] sm:$0xff]  ;;  %v1243_v45 = vmul.f32 %v10563_v48, %v1193_v23 }
 0x21b   : > { %1492 = vst [vmem:[#allocation2 + $0xb0] sm:$0xff] %v10722_v29  ;;  %v10732_v43 = vld [vmem:[#allocation2 + $0x87] sm:$0xff]  ;;  %v10734_v44 = vld [vmem:[#allocation2 + $0x8f] sm:$0xff]  ;;  %9021 = vmatprep.subr.bf16.mxu0 %v9020_v22  ;;  %v1241_v16 = vmul.f32 %v10563_v48, %v1191_v0 }
 0x21c   : > { %1491 = vst [vmem:[#allocation2 + $0xa8] sm:$0xff] %v10727_v34  ;;  %v7901_v46 = vpop.f32.mrb[20].mxu0  ;;  %8210 = vmatprep.mubr.f32.mxu0 %v10732_v43  ;;  %7976 = vmatprep.mubr.f32.mxu1 %v10727_v34 }
 0x21d   : > { %v10742_v50 = vadd.f32 %v7901_v46, %v1237_v32  ;;  %v1414_v52 = vpop.f32.mrb[21].mxu0  ;;  %8211 = vmatmul.mubr.f32.gmra.mrb[46].mxu0 %v10734_v44  ;;  %7977 = vmatmul.mubr.f32.gmra.mrb[18].mxu1 %v10722_v29 }
 0x21e   : > { %v10747_v56 = vadd.f32 %v1414_v52, %v1236_v39  ;;  %9023 = vmatpush3.bf16.msra.mxu0 %v9020_v22  ;;  %v1240_v22 = vmul.f32 %v10563_v48, %v1190_v5  ;;  %v1242_v52 = vmul.f32 %v10563_v48, %v1192_v31  ;;  %v1194_v5 = vld [vmem:[%s10503_s5 + $0xe0] sm:$0xff] }
 0x21f   : > { %1494 = vst [vmem:[#allocation2 + $0xc0] sm:$0xff] %v10742_v50  ;;  %v10752_v2 = vld [vmem:[#allocation2 + $0x97] sm:$0xff]  ;;  %v10754_v3 = vld [vmem:[#allocation2 + $0x9f] sm:$0xff]  ;;  %9025 = vmatprep.subr.bf16.mxu0 %v10737_v47  ;;  %v1244_v31 = vmul.f32 %v10563_v48, %v1194_v5 }
 0x220   : > { %1493 = vst [vmem:[#allocation2 + $0xb8] sm:$0xff] %v10747_v56  ;;  %v7904_v9 = vpop.f32.mrb[22].mxu0  ;;  %8213 = vmatprep.mubr.f32.mxu0 %v10752_v2  ;;  %7979 = vmatprep.mubr.f32.mxu1 %v10747_v56 }
 0x221   : > { %v10761_v11 = vadd.f32 %v7904_v9, %v1239_v55  ;;  %v1424_v13 = vpop.f32.mrb[23].mxu0  ;;  %8214 = vmatmul.mubr.f32.gmra.mrb[48].mxu0 %v10754_v3  ;;  %7980 = vmatmul.mubr.f32.gmra.mrb[20].mxu1 %v10742_v50  ;;  %v1195_v55 = vld [vmem:[%s10503_s5 + $0xe8] sm:$0xff] }
 0x222   : > { %v10766_v21 = vadd.f32 %v1424_v13, %v1238_v63 }
 0x223   : > { %1496 = vst [vmem:[#allocation2 + $0xd0] sm:$0xff] %v10761_v11  ;;  %v10771_v26 = vld [vmem:[#allocation2 + $0xa7] sm:$0xff]  ;;  %v10773_v28 = vld [vmem:[#allocation2 + $0xaf] sm:$0xff] }
 0x224   : > { %1495 = vst [vmem:[#allocation2 + $0xc8] sm:$0xff] %v10766_v21  ;;  %v7907_v32 = vpop.f32.mrb[24].mxu0  ;;  %8216 = vmatprep.mubr.f32.mxu0 %v10771_v26  ;;  %7982 = vmatprep.mubr.f32.mxu1 %v10766_v21 }
 0x225   : > { %v10779_v39 = vadd.f32 %v7907_v32, %v1241_v16  ;;  %v1434_v40 = vpop.f32.mrb[25].mxu0  ;;  %8217 = vmatmul.mubr.f32.gmra.mrb[50].mxu0 %v10773_v28  ;;  %7983 = vmatmul.mubr.f32.gmra.mrb[22].mxu1 %v10761_v11  ;;  %v1197_v32 = vld [vmem:[%s10503_s5 + $0xf8] sm:$0xff] }
 0x226   : > { %v10784_v46 = vadd.f32 %v1434_v40, %v1240_v22  ;;  %v1245_v22 = vmul.f32 %v10563_v48, %v1195_v55  ;;  %v1247_v5 = vmul.f32 %v10563_v48, %v1197_v32 }
 0x227   : > { %13990 = vst [vmem:[#allocation24_spill] sm:$0xff] %v10779_v39  ;;  %1498 = vst [vmem:[#allocation2 + $0xe0] sm:$0xff] %v10779_v39  ;;  %v10789_v63 = vld [vmem:[#allocation2 + $0xb7] sm:$0xff]  ;;  %v10791_v0 = vld [vmem:[#allocation2 + $0xbf] sm:$0xff] }
 0x228   : > { %13991 = vst [vmem:[#allocation25_spill] sm:$0xff] %v10791_v0  ;;  %1497 = vst [vmem:[#allocation2 + $0xd8] sm:$0xff] %v10784_v46  ;;  %v7910_v9 = vpop.f32.mrb[26].mxu0  ;;  %8219 = vmatprep.mubr.f32.mxu0 %v10789_v63  ;;  %7985 = vmatprep.mubr.f32.mxu1 %v10784_v46 }
 0x229   : > { %v10797_v13 = vadd.f32 %v7910_v9, %v1243_v45  ;;  %v1444_v16 = vpop.f32.mrb[27].mxu0  ;;  %8220 = vmatmul.mubr.f32.gmra.mrb[52].mxu0 %v10791_v0  ;;  %7986 = vmatmul.mubr.f32.gmra.mrb[24].mxu1 %v10779_v39  ;;  %v1196_v45 = vld [vmem:[%s10503_s5 + $0xf0] sm:$0xff]  ;;  %s10042_s5 = scalar_lea.vmem %s10041_s27, 8192 }
 0x22a   : > { %v10802_v23 = vadd.f32 %v1444_v16, %v1242_v52  ;;  %v1246_v39 = vmul.f32 %v10563_v48, %v1196_v45  ;;  %p10044_p9 = scmp.lt.s32.totalorder %s10042_s5, %s10036_s25 }
 0x22b   : > { %1500 = vst [vmem:[#allocation2 + $0xf0] sm:$0xff] %v10797_v13  ;;  %v10807_v40 = vld [vmem:[#allocation2 + $0xc7] sm:$0xff]  ;;  %v10809_v37 = vld [vmem:[#allocation2 + $0xcf] sm:$0xff] }
 0x22c   : > { %13992 = vst [vmem:[#allocation26_spill] sm:$0xff] %v10807_v40  ;;  %1499 = vst [vmem:[#allocation2 + $0xe8] sm:$0xff] %v10802_v23  ;;  %v7913_v9 = vpop.f32.mrb[28].mxu0  ;;  %8222 = vmatprep.mubr.f32.mxu0 %v10807_v40  ;;  %7988 = vmatprep.mubr.f32.mxu1 %v10802_v23  ;;  %p10045_p4 = por %p10044_p9, %p10043_p5 }
 0x22d   : > { %v10815_v55 = vadd.f32 %v7913_v9, %v1245_v22  ;;  %v1454_v52 = vpop.f32.mrb[29].mxu0  ;;  %8223 = vmatmul.mubr.f32.gmra.mrb[54].mxu0 %v10809_v37  ;;  %7989 = vmatmul.mubr.f32.gmra.mrb[26].mxu1 %v10797_v13 }
 0x22e   : > { %v10820_v16 = vadd.f32 %v1454_v52, %v1244_v31  ;;  %v2058_v52 = vld [vmem:[#allocation10 + $0x390] sm:$0xff]  ;;  %p10046_p8 = pnand %p10045_p4, %p10039_p10 }
 0x22f   : > { %13993 = vst [vmem:[#allocation27_spill] sm:$0xff] %v10815_v55  ;;  %1502 = vst [vmem:[#allocation2 + $0x100] sm:$0xff] %v10815_v55  ;;  %v10824_v0 = vld [vmem:[#allocation2 + $0xd7] sm:$0xff]  ;;  %v10826_v40 = vld [vmem:[#allocation2 + $0xdf] sm:$0xff] }
 0x230   : > { %13994 = vst [vmem:[#allocation28_spill] sm:$0xff] %v10820_v16  ;;  %13995 = vst [vmem:[#allocation29_spill] sm:$0xff] %v10824_v0  ;;  %v7916_v22 = vpop.f32.mrb[30].mxu0  ;;  %8225 = vmatprep.mubr.f32.mxu0 %v10824_v0  ;;  %7991 = vmatprep.mubr.f32.mxu1 %v10820_v16 }
 0x231   : > { %13996 = vst [vmem:[#allocation30_spill] sm:$0xff] %v10826_v40  ;;  %1501 = vst [vmem:[#allocation2 + $0xf8] sm:$0xff] %v10820_v16  ;;  %v10831_v32 = vadd.f32 %v7916_v22, %v1247_v5  ;;  %v1464_v9 = vpop.f32.mrb[31].mxu0  ;;  %8226 = vmatmul.mubr.f32.gmra.mrb[56].mxu0 %v10826_v40  ;;  %7992 = vmatmul.mubr.f32.gmra.mrb[28].mxu1 %v10815_v55  ;;  %v2059_v5 = vld [vmem:[#allocation10 + $0x398] sm:$0xff]  ;;  %v2064_v16 = vld [vmem:[#allocation10 + $0x3c0] sm:$0xff] }
 0x232   : > { %v10835_v48 = vadd.f32 %v1464_v9, %v1246_v39  ;;  %v14001_v39 = vmov 0.0   ;;  %v8932_v55 = vpack.c.bf16 %v2059_v5, %v2058_v52  ;;  %v2329_v40 = vld [vmem:[#allocation2 + $0x7] sm:$0xff] }
 0x233   : > { %13997 = vst [vmem:[#allocation31_spill] sm:$0xff] %v10831_v32  ;;  %1504 = vst [vmem:[#allocation2 + $0x110] sm:$0xff] %v10831_v32  ;;  %v10838_v31 = vld [vmem:[#allocation2 + $0xe7] sm:$0xff]  ;;  %v10840_v45 = vld [vmem:[#allocation2 + $0xef] sm:$0xff] }
 0x234   : > { %13998 = vst [vmem:[#allocation32_spill] sm:$0xff] %v10835_v48  ;;  %13999 = vst [vmem:[#allocation33_spill] sm:$0xff] %v10838_v31  ;;  %8228 = vmatprep.mubr.f32.mxu0 %v10838_v31  ;;  %7994 = vmatprep.mubr.f32.mxu1 %v10835_v48  ;;  %v2061_v31 = vld [vmem:[#allocation10 + $0x3a8] sm:$0xff]  ;;  %v2062_v5 = vld [vmem:[#allocation10 + $0x3b0] sm:$0xff] }
 0x235   : > { %14000 = vst [vmem:[#allocation34_spill] sm:$0xff] %v10840_v45  ;;  %1503 = vst [vmem:[#allocation2 + $0x108] sm:$0xff] %v10835_v48  ;;  %8229 = vmatmul.mubr.f32.gmra.mrb[58].mxu0 %v10840_v45  ;;  %7995 = vmatmul.mubr.f32.gmra.mrb[30].mxu1 %v10831_v32  ;;  %v2060_v48 = vld [vmem:[#allocation10 + $0x3a0] sm:$0xff] }
 0x236   : > { %8029 = vmatprep.mubr.f32.mxu1 %v14001_v39  ;;  %v8936_v52 = vpack.c.bf16 %v2061_v31, %v2060_v48  ;;  %v2065_v48 = vld [vmem:[#allocation10 + $0x3c8] sm:$0xff]  ;;  %v2883_v31 = vld [vmem:[#allocation10 + $0x320] sm:$0xff] }
 0x238   : > { %v10848_v22 = vld [vmem:[#allocation2 + $0xf7] sm:$0xff]  ;;  %v10850_v9 = vld [vmem:[#allocation2 + $0xff] sm:$0xff] }
 0x239   : > { %14002 = vst [vmem:[#allocation35_spill] sm:$0xff] %v10848_v22  ;;  %14003 = vst [vmem:[#allocation36_spill] sm:$0xff] %v10850_v9  ;;  %8231 = vmatprep.mubr.f32.mxu0 %v10848_v22  ;;  %8030 = vmatmul.mubr.f32.vlgmr.msra.gmra.mrb[0].mxu1 %v14001_v39  ;;  %v2063_v39 = vld [vmem:[#allocation10 + $0x3b8] sm:$0xff] }
 0x23a   : > { %8232 = vmatmul.mubr.f32.gmra.mrb[60].mxu0 %v10850_v9  ;;  %8931 = vmatpush3.bf16.msra.mxu1 %v10698_v1  ;;  %v2881_v9 = vld [vmem:[#allocation10 + $0x310] sm:$0xff]  ;;  %v2882_v22 = vld [vmem:[#allocation10 + $0x318] sm:$0xff] }
 0x23b   : > { %8032 = vmatprep.mubr.f32.mxu1 %v10573_v60  ;;  %8933 = vmatprep.subr.bf16.mxu1 %v8932_v55  ;;  %v4702_v1 = vld [vmem:[#allocation2 + $0xf] sm:$0xff]  ;;  %v8940_v60 = vpack.c.bf16 %v2063_v39, %v2062_v5  ;;  %v9028_v0 = vpack.c.bf16 %v2882_v22, %v2881_v9  ;;  %v2889_v9 = vld [vmem:[#allocation10 + $0x350] sm:$0xff] }
 0x23c   : > { %v10857_v32 = vld [vmem:[#allocation2 + $0x107] sm:$0xff]  ;;  %v10859_v45 = vld [vmem:[#allocation2 + $0x10f] sm:$0xff] }
 0x23d   : > { %14004 = vst [vmem:[#allocation37_spill] sm:$0xff] %v10859_v45  ;;  %8234 = vmatprep.mubr.f32.mxu0 %v10857_v32  ;;  %8033 = vmatmul.mubr.f32.gmra.mrb[2].mxu1 %v10570_v57  ;;  %v8944_v57 = vpack.c.bf16 %v2065_v48, %v2064_v16  ;;  %v2886_v22 = vld [vmem:[#allocation10 + $0x338] sm:$0xff]  ;;  %v2888_v16 = vld [vmem:[#allocation10 + $0x348] sm:$0xff] }
 0x23e   : > { %8235 = vmatmul.mubr.f32.gmra.mrb[62].mxu0 %v10859_v45  ;;  %8035 = vmatprep.mubr.f32.mxu1 %v10585_v7  ;;  %v2884_v45 = vld [vmem:[#allocation10 + $0x328] sm:$0xff]  ;;  %v2066_v7 = vld [vmem:[#allocation10 + $0x3d0] sm:$0xff]  ;;  %v2071_v5 = vld [vmem:[#allocation10 + $0x3f8] sm:$0xff] }
 0x23f   : > { %8269 = vmatprep.mubr.f32.mxu0 %v2329_v40  ;;  %8935 = vmatpush3.bf16.msra.mxu1 %v8932_v55  ;;  %v9032_v40 = vpack.c.bf16 %v2884_v45, %v2883_v31  ;;  %v2885_v55 = vld [vmem:[#allocation10 + $0x330] sm:$0xff]  ;;  %v2892_v48 = vld [vmem:[#allocation10 + $0x368] sm:$0xff]  ;;  %v3268_v31 = vld [vmem:[#allocation10 + $0x280] sm:$0xff] }
 0x240   : > { %8937 = vmatprep.subr.bf16.mxu1 %v8936_v52 }
 0x241   : > { %8036 = vmatmul.mubr.f32.gmra.mrb[4].mxu1 %v10581_v4  ;;  %v2067_v4 = vld [vmem:[#allocation10 + $0x3d8] sm:$0xff] }
 0x242   : > { %8270 = vmatmul.mubr.f32.vlgmr.msra.gmra.mrb[32].mxu0 %v4702_v1  ;;  %8038 = vmatprep.mubr.f32.mxu1 %v10597_v20  ;;  %v8948_v20 = vpack.c.bf16 %v2067_v4, %v2066_v7  ;;  %v2893_v4 = vld [vmem:[#allocation10 + $0x370] sm:$0xff] }
 0x243   : > { %8272 = vmatprep.mubr.f32.mxu0 %v10603_v24  ;;  %8939 = vmatpush3.bf16.msra.mxu1 %v8936_v52  ;;  %v9036_v24 = vpack.c.bf16 %v2886_v22, %v2885_v55  ;;  %v2890_v52 = vld [vmem:[#allocation10 + $0x358] sm:$0xff] }
 0x244   : > { %9027 = vmatpush3.bf16.msra.mxu0 %v10737_v47  ;;  %8941 = vmatprep.subr.bf16.mxu1 %v8940_v60  ;;  %v2068_v47 = vld [vmem:[#allocation10 + $0x3e0] sm:$0xff]  ;;  %v9044_v39 = vpack.c.bf16 %v2890_v52, %v2889_v9  ;;  %v2894_v55 = vld [vmem:[#allocation10 + $0x378] sm:$0xff] }
 0x245   : > { %9029 = vmatprep.subr.bf16.mxu0 %v9028_v0  ;;  %8039 = vmatmul.mubr.f32.gmra.mrb[6].mxu1 %v10593_v17  ;;  %v2887_v17 = vld [vmem:[#allocation10 + $0x340] sm:$0xff]  ;;  %v9052_v22 = vpack.c.bf16 %v2894_v55, %v2893_v4  ;;  %v14011_v9 = vld [vmem:[#allocation27_spill] sm:$0xff] }
 0x246   : > { %8273 = vmatmul.mubr.f32.gmra.mrb[34].mxu0 %v10605_v25  ;;  %8041 = vmatprep.mubr.f32.mxu1 %v10615_v36  ;;  %v2069_v25 = vld [vmem:[#allocation10 + $0x3e8] sm:$0xff]  ;;  %v9040_v45 = vpack.c.bf16 %v2888_v16, %v2887_v17  ;;  %v14009_v17 = vld [vmem:[#allocation28_spill] sm:$0xff]  ;;  %v3270_v16 = vld [vmem:[#allocation10 + $0x290] sm:$0xff] }
 0x247   : > { %8275 = vmatprep.mubr.f32.mxu0 %v10622_v41  ;;  %8943 = vmatpush3.bf16.msra.mxu1 %v8940_v60  ;;  %v2891_v60 = vld [vmem:[#allocation10 + $0x360] sm:$0xff]  ;;  %v2023_v52 = vld [vmem:[#allocation2 + $0x28] sm:$0xff] }
 0x248   : > { %9031 = vmatpush3.bf16.msra.mxu0 %v9028_v0  ;;  %8945 = vmatprep.subr.bf16.mxu1 %v8944_v57  ;;  %v8952_v0 = vpack.c.bf16 %v2069_v25, %v2068_v47  ;;  %v9048_v7 = vpack.c.bf16 %v2892_v48, %v2891_v60  ;;  %v14007_v47 = vld [vmem:[#allocation26_spill] sm:$0xff]  ;;  %v14008_v25 = vld [vmem:[#allocation29_spill] sm:$0xff]  ;;  %v3272_v60 = vld [vmem:[#allocation10 + $0x2a0] sm:$0xff] }
 0x249   : > { %9033 = vmatprep.subr.bf16.mxu0 %v9032_v40  ;;  %8042 = vmatmul.mubr.f32.gmra.mrb[8].mxu1 %v10610_v33  ;;  %v2070_v33 = vld [vmem:[#allocation10 + $0x3f0] sm:$0xff]  ;;  %v3273_v48 = vld [vmem:[#allocation10 + $0x2a8] sm:$0xff]  ;;  %v14015_v55 = vld [vmem:[#allocation36_spill] sm:$0xff] }
 0x24a   : > { %8276 = vmatmul.mubr.f32.gmra.mrb[36].mxu0 %v10624_v42  ;;  %8044 = vmatprep.mubr.f32.mxu1 %v10634_v54  ;;  %v8956_v1 = vpack.c.bf16 %v2071_v5, %v2070_v33  ;;  %v14012_v33 = vld [vmem:[#allocation33_spill] sm:$0xff]  ;;  %v9064_v4 = vpack.c.bf16 %v3273_v48, %v3272_v60 }
 0x24b   : > { %8278 = vmatprep.mubr.f32.mxu0 %v10640_v59  ;;  %8947 = vmatpush3.bf16.msra.mxu1 %v8944_v57  ;;  %v3269_v57 = vld [vmem:[#allocation10 + $0x288] sm:$0xff] }
 0x24c   : > { %9035 = vmatpush3.bf16.msra.mxu0 %v9032_v40  ;;  %8949 = vmatprep.subr.bf16.mxu1 %v8948_v20  ;;  %v9056_v40 = vpack.c.bf16 %v3269_v57, %v3268_v31  ;;  %v14014_v31 = vld [vmem:[#allocation35_spill] sm:$0xff]  ;;  %v2025_v57 = vld [vmem:[#allocation2 + $0x38] sm:$0xff] }
 0x24d   : > { %9037 = vmatprep.subr.bf16.mxu0 %v9036_v24  ;;  %8045 = vmatmul.mubr.f32.gmra.mrb[10].mxu1 %v10629_v51 }
 0x24e   : > { %8279 = vmatmul.mubr.f32.gmra.mrb[38].mxu0 %v10642_v61  ;;  %8047 = vmatprep.mubr.f32.mxu1 %v10652_v10 }
 0x24f   : > { %8281 = vmatprep.mubr.f32.mxu0 %v10658_v14  ;;  %8951 = vmatpush3.bf16.msra.mxu1 %v8948_v20  ;;  %v14005_v20 = vld [vmem:[#allocation25_spill] sm:$0xff] }
 0x250   : > { %9039 = vmatpush3.bf16.msra.mxu0 %v9036_v24  ;;  %8953 = vmatprep.subr.bf16.mxu1 %v8952_v0  ;;  %v14006_v24 = vld [vmem:[#allocation24_spill] sm:$0xff] }
 0x251   : > { %9041 = vmatprep.subr.bf16.mxu0 %v9040_v45  ;;  %8048 = vmatmul.mubr.f32.gmra.mrb[12].mxu1 %v10647_v6 }
 0x252   : > { %8282 = vmatmul.mubr.f32.gmra.mrb[40].mxu0 %v10660_v15  ;;  %8050 = vmatprep.mubr.f32.mxu1 %v10670_v30 }
 0x253   : > { %8284 = vmatprep.mubr.f32.mxu0 %v10676_v35  ;;  %8955 = vmatpush3.bf16.msra.mxu1 %v8952_v0  ;;  %v3271_v0 = vld [vmem:[#allocation10 + $0x298] sm:$0xff] }
 0x254   : > { %9043 = vmatpush3.bf16.msra.mxu0 %v9040_v45  ;;  %8957 = vmatprep.subr.bf16.mxu1 %v8956_v1  ;;  %v14010_v45 = vld [vmem:[#allocation30_spill] sm:$0xff]  ;;  %v9060_v5 = vpack.c.bf16 %v3271_v0, %v3270_v16  ;;  %v2028_v16 = vld [vmem:[#allocation2 + $0x50] sm:$0xff] }
 0x255   : > { %9045 = vmatprep.subr.bf16.mxu0 %v9044_v39  ;;  %8051 = vmatmul.mubr.f32.gmra.mrb[14].mxu1 %v10665_v27 }
 0x256   : > { %8285 = vmatmul.mubr.f32.gmra.mrb[42].mxu0 %v10678_v38  ;;  %8053 = vmatprep.mubr.f32.mxu1 %v10688_v53 }
 0x257   : > { %8287 = vmatprep.mubr.f32.mxu0 %v10693_v58  ;;  %8959 = vmatpush3.bf16.msra.mxu1 %v8956_v1  ;;  %v14013_v1 = vld [vmem:[#allocation34_spill] sm:$0xff] }
 0x258   : > { %9047 = vmatpush3.bf16.msra.mxu0 %v9044_v39  ;;  %9057 = vmatprep.subr.bf16.mxu1 %v9056_v40  ;;  %v2024_v39 = vld [vmem:[#allocation2 + $0x30] sm:$0xff] }
 0x259   : > { %9049 = vmatprep.subr.bf16.mxu0 %v9048_v7  ;;  %8054 = vmatmul.mubr.f32.gmra.mrb[16].mxu1 %v10683_v49 }
 0x25a   : > { %8288 = vmatmul.mubr.f32.gmra.mrb[44].mxu0 %v10695_v62  ;;  %8056 = vmatprep.mubr.f32.mxu1 %v10708_v12 }
 0x25b   : > { %8290 = vmatprep.mubr.f32.mxu0 %v10713_v18 }
 0x25c   : > { %9051 = vmatpush3.bf16.msra.mxu0 %v9048_v7  ;;  %v2026_v7 = vld [vmem:[#allocation2 + $0x40] sm:$0xff] }
 0x25d   : > { %9053 = vmatprep.subr.bf16.mxu0 %v9052_v22  ;;  %8057 = vmatmul.mubr.f32.gmra.mrb[18].mxu1 %v10703_v8 }
 0x25e   : > { %8291 = vmatmul.mubr.f32.gmra.mrb[46].mxu0 %v10715_v19  ;;  %8059 = vmatprep.mubr.f32.mxu1 %v10727_v34 }
 0x25f   : > { %8293 = vmatprep.mubr.f32.mxu0 %v10732_v43 }
 0x260   : > { %9055 = vmatpush3.bf16.msra.mxu0 %v9052_v22  ;;  %v3274_v22 = vld [vmem:[#allocation10 + $0x2b0] sm:$0xff] }
 0x261   : > { %8060 = vmatmul.mubr.f32.gmra.mrb[20].mxu1 %v10722_v29 }
 0x262   : > { %8294 = vmatmul.mubr.f32.gmra.mrb[48].mxu0 %v10734_v44  ;;  %8062 = vmatprep.mubr.f32.mxu1 %v10747_v56 }
 0x263   : > { %8296 = vmatprep.mubr.f32.mxu0 %v10752_v2 }
 0x265   : > { %8063 = vmatmul.mubr.f32.gmra.mrb[22].mxu1 %v10742_v50 }
 0x266   : > { %8297 = vmatmul.mubr.f32.gmra.mrb[50].mxu0 %v10754_v3  ;;  %8065 = vmatprep.mubr.f32.mxu1 %v10766_v21 }
 0x267   : > { %8299 = vmatprep.mubr.f32.mxu0 %v10771_v26 }
 0x269   : > { %8066 = vmatmul.mubr.f32.gmra.mrb[24].mxu1 %v10761_v11 }
 0x26a   : > { %8300 = vmatmul.mubr.f32.gmra.mrb[52].mxu0 %v10773_v28  ;;  %8068 = vmatprep.mubr.f32.mxu1 %v10784_v46 }
 0x26b   : > { %8302 = vmatprep.mubr.f32.mxu0 %v10789_v63 }
 0x26d   : > { %8069 = vmatmul.mubr.f32.gmra.mrb[26].mxu1 %v14006_v24 }
 0x26e   : > { %8303 = vmatmul.mubr.f32.gmra.mrb[54].mxu0 %v14005_v20  ;;  %8071 = vmatprep.mubr.f32.mxu1 %v10802_v23 }
 0x26f   : > { %8305 = vmatprep.mubr.f32.mxu0 %v14007_v47 }
 0x271   : > { %8072 = vmatmul.mubr.f32.gmra.mrb[28].mxu1 %v10797_v13 }
 0x272   : > { %8306 = vmatmul.mubr.f32.gmra.mrb[56].mxu0 %v10809_v37  ;;  %8074 = vmatprep.mubr.f32.mxu1 %v14009_v17 }
 0x273   : > { %8308 = vmatprep.mubr.f32.mxu0 %v14008_v25 }
 0x275   : > { %8075 = vmatmul.mubr.f32.gmra.mrb[30].mxu1 %v14011_v9 }
 0x276   : > { %8309 = vmatmul.mubr.f32.gmra.mrb[58].mxu0 %v14010_v45  ;;  %8109 = vmatprep.mubr.f32.mxu1 %v2023_v52  ;;  %v3275_v52 = vld [vmem:[#allocation10 + $0x2b8] sm:$0xff] }
 0x277   : > { %8311 = vmatprep.mubr.f32.mxu0 %v14012_v33  ;;  %v9068_v0 = vpack.c.bf16 %v3275_v52, %v3274_v22  ;;  %v11027_v22 = vld [vmem:[#allocation2 + $0x91] sm:$0xff]  ;;  %v11030_v52 = vld [vmem:[#allocation2 + $0x99] sm:$0xff] }
 0x279   : > { %8110 = vmatmul.mubr.f32.vlgmr.msra.gmra.mrb[0].mxu1 %v2024_v39  ;;  %v3277_v39 = vld [vmem:[#allocation10 + $0x2c8] sm:$0xff] }
 0x27a   : > { %8312 = vmatmul.mubr.f32.gmra.mrb[60].mxu0 %v14013_v1  ;;  %9059 = vmatpush3.bf16.msra.mxu1 %v9056_v40  ;;  %v3276_v40 = vld [vmem:[#allocation10 + $0x2c0] sm:$0xff] }
 0x27b   : > { %8314 = vmatprep.mubr.f32.mxu0 %v14014_v31  ;;  %8112 = vmatprep.mubr.f32.mxu1 %v2025_v57  ;;  %v9072_v60 = vpack.c.bf16 %v3277_v39, %v3276_v40  ;;  %v3767_v57 = vld [vmem:[#allocation10 + $0x400] sm:$0xff]  ;;  %v11042_v39 = vld [vmem:[#allocation2 + $0xb9] sm:$0xff] }
 0x27c   : > { %9061 = vmatprep.subr.bf16.mxu1 %v9060_v5  ;;  %v11039_v40 = vld [vmem:[#allocation2 + $0xb1] sm:$0xff] }
 0x27d   : > { %8113 = vmatmul.mubr.f32.gmra.mrb[2].mxu1 %v2026_v7  ;;  %v3768_v7 = vld [vmem:[#allocation10 + $0x408] sm:$0xff] }
 0x27e   : > { %8315 = vmatmul.mubr.f32.gmra.mrb[62].mxu0 %v14015_v55  ;;  %8115 = vmatprep.mubr.f32.mxu1 %v10615_v36  ;;  %v3278_v36 = vld [vmem:[#allocation10 + $0x2d0] sm:$0xff] }
 0x27f   : > { %8349 = vmatprep.mubr.f32.mxu0 %v10622_v41  ;;  %9063 = vmatpush3.bf16.msra.mxu1 %v9060_v5  ;;  %v3279_v41 = vld [vmem:[#allocation10 + $0x2d8] sm:$0xff] }
 0x280   : > { %9065 = vmatprep.subr.bf16.mxu1 %v9064_v4  ;;  %v3264_v5 = vld [vmem:[#allocation10 + $0x178] sm:$0xff] }
 0x281   : > { %8116 = vmatmul.mubr.f32.gmra.mrb[4].mxu1 %v2028_v16  ;;  %v11033_v16 = vld [vmem:[#allocation2 + $0xa1] sm:$0xff] }
 0x282   : > { %8350 = vmatmul.mubr.f32.vlgmr.msra.gmra.mrb[32].mxu0 %v10624_v42  ;;  %8118 = vmatprep.mubr.f32.mxu1 %v10634_v54  ;;  %v9076_v42 = vpack.c.bf16 %v3279_v41, %v3278_v36  ;;  %v3280_v54 = vld [vmem:[#allocation10 + $0x2e0] sm:$0xff] }
 0x283   : > { %8352 = vmatprep.mubr.f32.mxu0 %v10640_v59  ;;  %9067 = vmatpush3.bf16.msra.mxu1 %v9064_v4  ;;  %v3281_v59 = vld [vmem:[#allocation10 + $0x2e8] sm:$0xff]  ;;  %v11024_v4 = vld [vmem:[#allocation2 + $0x89] sm:$0xff] }
 0x284   : > { %9069 = vmatprep.subr.bf16.mxu1 %v9068_v0  ;;  %v11048_v36 = vld [vmem:[#allocation2 + $0xc9] sm:$0xff]  ;;  %v11051_v41 = vld [vmem:[#allocation2 + $0xd1] sm:$0xff] }
 0x285   : > { %8119 = vmatmul.mubr.f32.gmra.mrb[6].mxu1 %v10629_v51  ;;  %v9080_v51 = vpack.c.bf16 %v3281_v59, %v3280_v54  ;;  %v11057_v54 = vld [vmem:[#allocation2 + $0xe1] sm:$0xff]  ;;  %v11060_v59 = vld [vmem:[#allocation2 + $0xe9] sm:$0xff] }
 0x286   : > { %8353 = vmatmul.mubr.f32.gmra.mrb[34].mxu0 %v10642_v61  ;;  %8121 = vmatprep.mubr.f32.mxu1 %v10652_v10  ;;  %v3282_v61 = vld [vmem:[#allocation10 + $0x2f0] sm:$0xff]  ;;  %v3283_v10 = vld [vmem:[#allocation10 + $0x2f8] sm:$0xff] }
 0x287   : > { %8355 = vmatprep.mubr.f32.mxu0 %v10658_v14  ;;  %9071 = vmatpush3.bf16.msra.mxu1 %v9068_v0  ;;  %v3249_v14 = vld [vmem:[#allocation10 + $0x100] sm:$0xff] }
 0x288   : > { %9073 = vmatprep.subr.bf16.mxu1 %v9072_v60  ;;  %v11036_v0 = vld [vmem:[#allocation2 + $0xa9] sm:$0xff] }
 0x289   : > { %8122 = vmatmul.mubr.f32.gmra.mrb[8].mxu1 %v10647_v6  ;;  %v9084_v6 = vpack.c.bf16 %v3283_v10, %v3282_v61  ;;  %v11066_v61 = vld [vmem:[#allocation2 + $0xf9] sm:$0xff]  ;;  %v11069_v10 = vld [vmem:[#allocation2 + $0x101] sm:$0xff] }
 0x28a   : > { %8356 = vmatmul.mubr.f32.gmra.mrb[36].mxu0 %v10660_v15  ;;  %8124 = vmatprep.mubr.f32.mxu1 %v10670_v30  ;;  %v3250_v15 = vld [vmem:[#allocation10 + $0x108] sm:$0xff]  ;;  %v14016_v30 = vld [vmem:[#allocation32_spill] sm:$0xff] }
 0x28b   : > { %8358 = vmatprep.mubr.f32.mxu0 %v10676_v35  ;;  %9075 = vmatpush3.bf16.msra.mxu1 %v9072_v60  ;;  %v14017_v35 = vld [vmem:[#allocation31_spill] sm:$0xff] }
 0x28c   : > { %9077 = vmatprep.subr.bf16.mxu1 %v9076_v42  ;;  %v11045_v60 = vld [vmem:[#allocation2 + $0xc1] sm:$0xff] }
 0x28d   : > { %8125 = vmatmul.mubr.f32.gmra.mrb[10].mxu1 %v10665_v27  ;;  %v9088_v27 = vpack.c.bf16 %v3250_v15, %v3249_v14  ;;  %v4984_v14 = vld [vmem:[#allocation2 + $0x9] sm:$0xff]  ;;  %v11075_v15 = vld [vmem:[#allocation2 + $0x111] sm:$0xff] }
 0x28e   : > { %8359 = vmatmul.mubr.f32.gmra.mrb[38].mxu0 %v10678_v38  ;;  %8127 = vmatprep.mubr.f32.mxu1 %v10688_v53  ;;  %v3251_v38 = vld [vmem:[#allocation10 + $0x110] sm:$0xff] }
 0x28f   : > { %8361 = vmatprep.mubr.f32.mxu0 %v10693_v58  ;;  %9079 = vmatpush3.bf16.msra.mxu1 %v9076_v42  ;;  %v10980_v53 = vld [vmem:[#allocation2 + $0x19] sm:$0xff] }
 0x290   : > { %9081 = vmatprep.subr.bf16.mxu1 %v9080_v51  ;;  %v11054_v42 = vld [vmem:[#allocation2 + $0xd9] sm:$0xff] }
 0x291   : > { %8128 = vmatmul.mubr.f32.gmra.mrb[12].mxu1 %v10683_v49  ;;  %v3252_v49 = vld [vmem:[#allocation10 + $0x118] sm:$0xff] }
 0x292   : > { %8362 = vmatmul.mubr.f32.gmra.mrb[40].mxu0 %v10695_v62  ;;  %8130 = vmatprep.mubr.f32.mxu1 %v10708_v12  ;;  %v9092_v58 = vpack.c.bf16 %v3252_v49, %v3251_v38  ;;  %v10984_v62 = vld [vmem:[#allocation2 + $0x21] sm:$0xff]  ;;  %v3254_v12 = vld [vmem:[#allocation10 + $0x128] sm:$0xff]  ;;  %v3771_v49 = vld [vmem:[#allocation10 + $0x420] sm:$0xff] }
 0x293   : > { %8364 = vmatprep.mubr.f32.mxu0 %v10713_v18  ;;  %9083 = vmatpush3.bf16.msra.mxu1 %v9080_v51  ;;  %v14018_v18 = vld [vmem:[#allocation37_spill] sm:$0xff] }
 0x294   : > { %9085 = vmatprep.subr.bf16.mxu1 %v9084_v6  ;;  %v11063_v51 = vld [vmem:[#allocation2 + $0xf1] sm:$0xff] }
 0x295   : > { %8131 = vmatmul.mubr.f32.gmra.mrb[14].mxu1 %v10703_v8  ;;  %v3253_v8 = vld [vmem:[#allocation10 + $0x120] sm:$0xff] }
 0x296   : > { %8365 = vmatmul.mubr.f32.gmra.mrb[42].mxu0 %v10715_v19  ;;  %8133 = vmatprep.mubr.f32.mxu1 %v10727_v34  ;;  %v2876_v19 = vld [vmem:[#allocation2 + $0x117] sm:$0xff]  ;;  %v10988_v34 = vld [vmem:[#allocation2 + $0x29] sm:$0xff] }
 0x297   : > { %8367 = vmatprep.mubr.f32.mxu0 %v10732_v43  ;;  %9087 = vmatpush3.bf16.msra.mxu1 %v9084_v6  ;;  %v9096_v43 = vpack.c.bf16 %v3254_v12, %v3253_v8  ;;  %v11072_v6 = vld [vmem:[#allocation2 + $0x109] sm:$0xff]  ;;  %v3217_v38 = vld [vmem:[#allocation2 + $0x11] sm:$0xff]  ;;  %v3773_v12 = vld [vmem:[#allocation10 + $0x430] sm:$0xff] }
 0x298   : > { %9089 = vmatprep.subr.bf16.mxu1 %v9088_v27 }
 0x299   : > { %8134 = vmatmul.mubr.f32.gmra.mrb[16].mxu1 %v10722_v29  ;;  %v4847_v29 = vld [vmem:[#allocation2 + $0x11f] sm:$0xff] }
 0x29a   : > { %8368 = vmatmul.mubr.f32.gmra.mrb[44].mxu0 %v10734_v44  ;;  %8136 = vmatprep.mubr.f32.mxu1 %v10747_v56  ;;  %v10991_v44 = vld [vmem:[#allocation2 + $0x31] sm:$0xff]  ;;  %v3256_v56 = vld [vmem:[#allocation10 + $0x138] sm:$0xff] }
 0x29b   : > { %8370 = vmatprep.mubr.f32.mxu0 %v10752_v2  ;;  %v10994_v2 = vld [vmem:[#allocation2 + $0x39] sm:$0xff] }
 0x29d   : > { %8137 = vmatmul.mubr.f32.gmra.mrb[18].mxu1 %v10742_v50  ;;  %v3255_v50 = vld [vmem:[#allocation10 + $0x130] sm:$0xff] }
 0x29e   : > { %8371 = vmatmul.mubr.f32.gmra.mrb[46].mxu0 %v10754_v3  ;;  %8139 = vmatprep.mubr.f32.mxu1 %v10766_v21  ;;  %v9100_v3 = vpack.c.bf16 %v3256_v56, %v3255_v50  ;;  %v3257_v21 = vld [vmem:[#allocation10 + $0x140] sm:$0xff]  ;;  %v3777_v50 = vld [vmem:[#allocation10 + $0x450] sm:$0xff]  ;;  %v3778_v56 = vld [vmem:[#allocation10 + $0x458] sm:$0xff] }
 0x29f   : > { %8373 = vmatprep.mubr.f32.mxu0 %v10771_v26  ;;  %v3258_v26 = vld [vmem:[#allocation10 + $0x148] sm:$0xff] }
 0x2a1   : > { %8140 = vmatmul.mubr.f32.gmra.mrb[20].mxu1 %v10761_v11  ;;  %v10997_v11 = vld [vmem:[#allocation2 + $0x41] sm:$0xff] }
 0x2a2   : > { %8374 = vmatmul.mubr.f32.gmra.mrb[48].mxu0 %v10773_v28  ;;  %8142 = vmatprep.mubr.f32.mxu1 %v10784_v46  ;;  %v11000_v28 = vld [vmem:[#allocation2 + $0x49] sm:$0xff]  ;;  %v9104_v46 = vpack.c.bf16 %v3258_v26, %v3257_v21  ;;  %v3780_v21 = vld [vmem:[#allocation10 + $0x468] sm:$0xff] }
 0x2a3   : > { %8376 = vmatprep.mubr.f32.mxu0 %v10789_v63  ;;  %v11003_v63 = vld [vmem:[#allocation2 + $0x51] sm:$0xff] }
 0x2a5   : > { %8143 = vmatmul.mubr.f32.gmra.mrb[22].mxu1 %v14006_v24  ;;  %v11009_v24 = vld [vmem:[#allocation2 + $0x61] sm:$0xff] }
 0x2a6   : > { %8377 = vmatmul.mubr.f32.gmra.mrb[50].mxu0 %v14005_v20  ;;  %8145 = vmatprep.mubr.f32.mxu1 %v10802_v23  ;;  %v3260_v23 = vld [vmem:[#allocation10 + $0x158] sm:$0xff] }
 0x2a7   : > { %8379 = vmatprep.mubr.f32.mxu0 %v14007_v47  ;;  %v3261_v47 = vld [vmem:[#allocation10 + $0x160] sm:$0xff] }
 0x2a9   : > { %8146 = vmatmul.mubr.f32.gmra.mrb[24].mxu1 %v10797_v13  ;;  %v3259_v13 = vld [vmem:[#allocation10 + $0x150] sm:$0xff] }
 0x2aa   : > { %8380 = vmatmul.mubr.f32.gmra.mrb[52].mxu0 %v10809_v37  ;;  %8148 = vmatprep.mubr.f32.mxu1 %v14009_v17  ;;  %v10975_v37 = vld [vmem:[#allocation2 + $0x10] sm:$0xff]  ;;  %v9108_v20 = vpack.c.bf16 %v3260_v23, %v3259_v13  ;;  %v3782_v13 = vld [vmem:[#allocation10 + $0x478] sm:$0xff] }
 0x2ab   : > { %8382 = vmatprep.mubr.f32.mxu0 %v14008_v25  ;;  %v3262_v25 = vld [vmem:[#allocation10 + $0x168] sm:$0xff]  ;;  %v11012_v17 = vld [vmem:[#allocation2 + $0x69] sm:$0xff] }
 0x2ad   : > { %8149 = vmatmul.mubr.f32.gmra.mrb[26].mxu1 %v14011_v9  ;;  %v11015_v9 = vld [vmem:[#allocation2 + $0x71] sm:$0xff] }
 0x2ae   : > { %8383 = vmatmul.mubr.f32.gmra.mrb[54].mxu0 %v14010_v45  ;;  %8151 = vmatprep.mubr.f32.mxu1 %v14016_v30  ;;  %v9112_v45 = vpack.c.bf16 %v3262_v25, %v3261_v47  ;;  %v3770_v30 = vld [vmem:[#allocation10 + $0x418] sm:$0xff]  ;;  %v4205_v47 = vld [vmem:[#allocation12 + $0x8] sm:$0xff]  ;;  %v4206_v25 = vld [vmem:[#allocation12 + $0x10] sm:$0xff] }
 0x2af   : > { %8385 = vmatprep.mubr.f32.mxu0 %v14012_v33  ;;  %v3263_v33 = vld [vmem:[#allocation10 + $0x170] sm:$0xff] }
 0x2b0   : > { %v9116_v48 = vpack.c.bf16 %v3264_v5, %v3263_v33  ;;  %v4207_v33 = vld [vmem:[#allocation12 + $0x18] sm:$0xff] }
 0x2b1   : > { %8152 = vmatmul.mubr.f32.gmra.mrb[28].mxu1 %v14017_v35  ;;  %v9156_v5 = vpack.c.bf16 %v4207_v33, %v4206_v25 }
 0x2b2   : > { %8386 = vmatmul.mubr.f32.gmra.mrb[56].mxu0 %v14013_v1  ;;  %8154 = vmatprep.mubr.f32.mxu1 %v10975_v37  ;;  %v11018_v1 = vld [vmem:[#allocation2 + $0x79] sm:$0xff] }
 0x2b3   : > { %8388 = vmatprep.mubr.f32.mxu0 %v14014_v31  ;;  %v11021_v31 = vld [vmem:[#allocation2 + $0x81] sm:$0xff] }
 0x2b5   : > { %8155 = vmatmul.mubr.f32.gmra.mrb[30].mxu1 %v10975_v37 }
 0x2b6   : > { %8389 = vmatmul.mubr.f32.gmra.mrb[58].mxu0 %v14015_v55  ;;  %8429 = vmatprep.mubr.f32.mxu1 %v10980_v53  ;;  %v9120_v55 = vpack.c.bf16 %v3768_v7, %v3767_v57  ;;  %v4209_v57 = vld [vmem:[#allocation12 + $0x28] sm:$0xff] }
 0x2b7   : > { %8391 = vmatprep.mubr.f32.mxu0 %v10857_v32  ;;  %v11006_v32 = vld [vmem:[#allocation2 + $0x59] sm:$0xff] }
 0x2b9   : > { %8430 = vmatmul.mubr.f32.vlgmr.msra.gmra.mrb[32].mxu1 %v10984_v62 }
 0x2ba   : > { %8392 = vmatmul.mubr.f32.gmra.mrb[60].mxu0 %v14018_v18  ;;  %9091 = vmatpush3.bf16.msra.mxu1 %v9088_v27  ;;  %v3769_v27 = vld [vmem:[#allocation10 + $0x410] sm:$0xff]  ;;  %v3774_v18 = vld [vmem:[#allocation10 + $0x438] sm:$0xff] }
 0x2bb   : > { %8394 = vmatprep.mubr.f32.mxu0 %v2876_v19  ;;  %8432 = vmatprep.mubr.f32.mxu1 %v10988_v34  ;;  %v9124_v35 = vpack.c.bf16 %v3770_v30, %v3769_v27  ;;  %v9132_v19 = vpack.c.bf16 %v3774_v18, %v3773_v12  ;;  %v4212_v30 = vld [vmem:[#allocation12 + $0x40] sm:$0xff]  ;;  %v524_v12 = vlaneseq }
 0x2bc   : > { %9093 = vmatprep.subr.bf16.mxu1 %v9092_v58 }
 0x2bd   : > { %8433 = vmatmul.mubr.f32.gmra.mrb[34].mxu1 %v10991_v44  ;;  %v11117_v18 = vshrl.u32 %v524_v12, 7 }
 0x2be   : > { %8395 = vmatmul.mubr.f32.gmra.mrb[62].mxu0 %v4847_v29  ;;  %8435 = vmatprep.mubr.f32.mxu1 %v10994_v2  ;;  %v3775_v29 = vld [vmem:[#allocation10 + $0x440] sm:$0xff] }
 0x2bf   : > { %9095 = vmatpush3.bf16.msra.mxu1 %v9092_v58  ;;  %v3772_v58 = vld [vmem:[#allocation10 + $0x428] sm:$0xff]  ;;  %14019 = vst [vmem:[#allocation25_spill] sm:$0xff] %v11117_v18 }
 0x2c0   : > { %9097 = vmatprep.subr.bf16.mxu1 %v9096_v43  ;;  %v9128_v8 = vpack.c.bf16 %v3772_v58, %v3771_v49  ;;  %v4214_v49 = vld [vmem:[#allocation12 + $0x50] sm:$0xff]  ;;  %v4215_v58 = vld [vmem:[#allocation12 + $0x58] sm:$0xff] }
 0x2c1   : > { %8436 = vmatmul.mubr.f32.gmra.mrb[36].mxu1 %v10997_v11 }
 0x2c2   : > { %8438 = vmatprep.mubr.f32.mxu1 %v11000_v28 }
 0x2c3   : > { %9099 = vmatpush3.bf16.msra.mxu1 %v9096_v43  ;;  %v3776_v43 = vld [vmem:[#allocation10 + $0x448] sm:$0xff] }
 0x2c4   : > { %9101 = vmatprep.subr.bf16.mxu1 %v9100_v3 }
 0x2c5   : > { %8439 = vmatmul.mubr.f32.gmra.mrb[38].mxu1 %v11003_v63 }
 0x2c6   : > { %8441 = vmatprep.mubr.f32.mxu1 %v11006_v32 }
 0x2c7   : > { %9103 = vmatpush3.bf16.msra.mxu1 %v9100_v3  ;;  %v3779_v3 = vld [vmem:[#allocation10 + $0x460] sm:$0xff] }
 0x2c8   : > { %9105 = vmatprep.subr.bf16.mxu1 %v9104_v46  ;;  %v9144_v26 = vpack.c.bf16 %v3780_v21, %v3779_v3 }
 0x2c9   : > { %8442 = vmatmul.mubr.f32.gmra.mrb[40].mxu1 %v11009_v24 }
 0x2ca   : > { %8444 = vmatprep.mubr.f32.mxu1 %v11012_v17 }
 0x2cb   : > { %9107 = vmatpush3.bf16.msra.mxu1 %v9104_v46  ;;  %v3781_v46 = vld [vmem:[#allocation10 + $0x470] sm:$0xff] }
 0x2cc   : > { %9109 = vmatprep.subr.bf16.mxu1 %v9108_v20  ;;  %v9148_v23 = vpack.c.bf16 %v3782_v13, %v3781_v46 }
 0x2cd   : > { %8445 = vmatmul.mubr.f32.gmra.mrb[42].mxu1 %v11015_v9 }
 0x2ce   : > { %8447 = vmatprep.mubr.f32.mxu1 %v11018_v1 }
 0x2cf   : > { %9111 = vmatpush3.bf16.msra.mxu1 %v9108_v20  ;;  %v4204_v20 = vld [vmem:[#allocation12] sm:$0xff] }
 0x2d0   : > { %9113 = vmatprep.subr.bf16.mxu1 %v9112_v45 }
 0x2d1   : > { %8448 = vmatmul.mubr.f32.gmra.mrb[44].mxu1 %v11021_v31 }
 0x2d2   : > { %8450 = vmatprep.mubr.f32.mxu1 %v11024_v4 }
 0x2d3   : > { %9115 = vmatpush3.bf16.msra.mxu1 %v9112_v45  ;;  %v9152_v45 = vpack.c.bf16 %v4205_v47, %v4204_v20  ;;  %v535_v47 = vadd.s32 80, %v11117_v18 }
 0x2d4   : > { %9117 = vmatprep.subr.bf16.mxu1 %v9116_v48 }
 0x2d5   : > { %8451 = vmatmul.mubr.f32.gmra.mrb[46].mxu1 %v11027_v22  ;;  %9153 = vmatprep.subr.bf16.mxu0 %v9152_v45 }
 0x2d6   : > { %8453 = vmatprep.mubr.f32.mxu1 %v11030_v52  ;;  %9155 = vmatpush3.bf16.msra.mxu0 %v9152_v45 }
 0x2d7   : > { %9119 = vmatpush3.bf16.msra.mxu1 %v9116_v48  ;;  %v4208_v48 = vld [vmem:[#allocation12 + $0x20] sm:$0xff]  ;;  %9157 = vmatprep.subr.bf16.mxu0 %v9156_v5 }
 0x2d8   : > { %9121 = vmatprep.subr.bf16.mxu1 %v9120_v55  ;;  %v9160_v7 = vpack.c.bf16 %v4209_v57, %v4208_v48 }
 0x2d9   : > { %8454 = vmatmul.mubr.f32.gmra.mrb[48].mxu1 %v11033_v16 }
 0x2da   : > { %8456 = vmatprep.mubr.f32.mxu1 %v11036_v0  ;;  %9159 = vmatpush3.bf16.msra.mxu0 %v9156_v5 }
 0x2db   : > { %9161 = vmatprep.subr.bf16.mxu0 %v9160_v7 }
 0x2dd   : > { %8457 = vmatmul.mubr.f32.gmra.mrb[50].mxu1 %v11039_v40 }
 0x2de   : > { %8459 = vmatprep.mubr.f32.mxu1 %v11042_v39  ;;  %9163 = vmatpush3.bf16.msra.mxu0 %v9160_v7  ;;  %v631_v7 = vand.u32 15, %v535_v47 }
 0x2e0   : > { %vm951_vm5 = vcmp.ne.s32.totalorder %v631_v7, 0 }
 0x2e1   : > { %8460 = vmatmul.mubr.f32.gmra.mrb[52].mxu1 %v11045_v60 }
 0x2e2   : > { %8462 = vmatprep.mubr.f32.mxu1 %v11048_v36 }
 0x2e5   : > { %8463 = vmatmul.mubr.f32.gmra.mrb[54].mxu1 %v11051_v41 }
 0x2e6   : > { %8465 = vmatprep.mubr.f32.mxu1 %v11054_v42 }
 0x2e9   : > { %8466 = vmatmul.mubr.f32.gmra.mrb[56].mxu1 %v11057_v54 }
 0x2ea   : > { %8468 = vmatprep.mubr.f32.mxu1 %v11060_v59 }
 0x2ed   : > { %8469 = vmatmul.mubr.f32.gmra.mrb[58].mxu1 %v11063_v51 }
 0x2ee   : > { %8471 = vmatprep.mubr.f32.mxu1 %v11066_v61 }
 0x2f1   : > { %8472 = vmatmul.mubr.f32.gmra.mrb[60].mxu1 %v11069_v10 }
 0x2f2   : > { %8474 = vmatprep.mubr.f32.mxu1 %v11072_v6 }
 0x2f5   : > { %8475 = vmatmul.mubr.f32.gmra.mrb[62].mxu1 %v11075_v15 }
 0x2f6   : > { %8509 = vmatprep.mubr.f32.mxu1 %v4984_v14  ;;  %v4211_v14 = vld [vmem:[#allocation12 + $0x38] sm:$0xff] }
 0x2f9   : > { %8510 = vmatmul.mubr.f32.vlgmr.msra.gmra.mrb[32].mxu1 %v3217_v38 }
 0x2fa   : > { %9123 = vmatpush3.bf16.msra.mxu1 %v9120_v55  ;;  %8512 = vmatprep.mubr.f32.mxu1 %v10980_v53  ;;  %v9136_v53 = vpack.c.bf16 %v3776_v43, %v3775_v29  ;;  %v4210_v55 = vld [vmem:[#allocation12 + $0x30] sm:$0xff] }
 0x2fb   : > { %9125 = vmatprep.subr.bf16.mxu1 %v9124_v35  ;;  %v9164_v27 = vpack.c.bf16 %v4211_v14, %v4210_v55  ;;  %v537_v55 = vadd.s32 96, %v11117_v18 }
 0x2fd   : > { %8513 = vmatmul.mubr.f32.gmra.mrb[34].mxu1 %v10984_v62  ;;  %v9140_v62 = vpack.c.bf16 %v3778_v56, %v3777_v50  ;;  %9165 = vmatprep.subr.bf16.mxu0 %v9164_v27 }
 0x2fe   : > { %8515 = vmatprep.mubr.f32.mxu1 %v10988_v34  ;;  %9127 = vmatpush3.bf16.msra.mxu1 %v9124_v35  ;;  %v4213_v35 = vld [vmem:[#allocation12 + $0x48] sm:$0xff] }
 0x2ff   : > { %9129 = vmatprep.subr.bf16.mxu1 %v9128_v8  ;;  %v9168_v38 = vpack.c.bf16 %v4213_v35, %v4212_v30  ;;  %9167 = vmatpush3.bf16.msra.mxu0 %v9164_v27 }
 0x301   : > { %8516 = vmatmul.mubr.f32.gmra.mrb[36].mxu1 %v10991_v44  ;;  %9169 = vmatprep.subr.bf16.mxu0 %v9168_v38 }
 0x302   : > { %8518 = vmatprep.mubr.f32.mxu1 %v10994_v2  ;;  %9131 = vmatpush3.bf16.msra.mxu1 %v9128_v8  ;;  %v9172_v8 = vpack.c.bf16 %v4215_v58, %v4214_v49  ;;  %v645_v58 = vand.u32 15, %v537_v55  ;;  %v547_v55 = vadd.s32 176, %v11117_v18 }
 0x303   : > { %9133 = vmatprep.subr.bf16.mxu1 %v9132_v19  ;;  %9171 = vmatpush3.bf16.msra.mxu0 %v9168_v38 }
 0x304   : > { %9173 = vmatprep.subr.bf16.mxu0 %v9172_v8  ;;  %vm953_vm6 = vcmp.ne.s32.totalorder %v645_v58, 0 }
 0x305   : > { %8519 = vmatmul.mubr.f32.gmra.mrb[38].mxu1 %v10997_v11 }
 0x306   : > { %8521 = vmatprep.mubr.f32.mxu1 %v11000_v28  ;;  %9135 = vmatpush3.bf16.msra.mxu1 %v9132_v19 }
 0x307   : > { %9137 = vmatprep.subr.bf16.mxu1 %v9136_v53  ;;  %9175 = vmatpush3.bf16.msra.mxu0 %v9172_v8  ;;  %v539_v8 = vadd.s32 112, %v11117_v18 }
 0x309   : > { %8522 = vmatmul.mubr.f32.gmra.mrb[40].mxu1 %v11003_v63 }
 0x30a   : > { %8524 = vmatprep.mubr.f32.mxu1 %v11006_v32  ;;  %9139 = vmatpush3.bf16.msra.mxu1 %v9136_v53 }
 0x30b   : > { %9141 = vmatprep.subr.bf16.mxu1 %v9140_v62 }
 0x30d   : > { %8525 = vmatmul.mubr.f32.gmra.mrb[42].mxu1 %v11009_v24 }
 0x30e   : > { %8527 = vmatprep.mubr.f32.mxu1 %v11012_v17  ;;  %9143 = vmatpush3.bf16.msra.mxu1 %v9140_v62  ;;  %v533_v62 = vadd.s32 64, %v11117_v18 }
 0x30f   : > { %9145 = vmatprep.subr.bf16.mxu1 %v9144_v26 }
 0x310   : > { %v617_v20 = vand.u32 15, %v533_v62 }
 0x311   : > { %8528 = vmatmul.mubr.f32.gmra.mrb[44].mxu1 %v11015_v9 }
 0x312   : > { %8530 = vmatprep.mubr.f32.mxu1 %v11018_v1  ;;  %9147 = vmatpush3.bf16.msra.mxu1 %v9144_v26  ;;  %vm949_vm4 = vcmp.ne.s32.totalorder %v617_v20, 0 }
 0x313   : > { %9149 = vmatprep.subr.bf16.mxu1 %v9148_v23 }
 0x315   : > { %8531 = vmatmul.mubr.f32.gmra.mrb[46].mxu1 %v11021_v31 }
 0x316   : > { %8533 = vmatprep.mubr.f32.mxu1 %v11024_v4  ;;  %9151 = vmatpush3.bf16.msra.mxu1 %v9148_v23 }
 0x319   : > { %8534 = vmatmul.mubr.f32.gmra.mrb[48].mxu1 %v11027_v22 }
 0x31a   : > { %8536 = vmatprep.mubr.f32.mxu1 %v11030_v52 }
 0x31d   : > { %8537 = vmatmul.mubr.f32.gmra.mrb[50].mxu1 %v11033_v16 }
 0x31e   : > { %8539 = vmatprep.mubr.f32.mxu1 %v11036_v0 }
 0x321   : > { %8540 = vmatmul.mubr.f32.gmra.mrb[52].mxu1 %v11039_v40 }
 0x322   : > { %8542 = vmatprep.mubr.f32.mxu1 %v11042_v39 }
 0x325   : > { %8543 = vmatmul.mubr.f32.gmra.mrb[54].mxu1 %v11045_v60 }
 0x326   : > { %8545 = vmatprep.mubr.f32.mxu1 %v11048_v36 }
 0x329   : > { %8546 = vmatmul.mubr.f32.gmra.mrb[56].mxu1 %v11051_v41 }
 0x32a   : > { %8548 = vmatprep.mubr.f32.mxu1 %v11054_v42 }
 0x32d   : > { %8549 = vmatmul.mubr.f32.gmra.mrb[58].mxu1 %v11057_v54 }
 0x32e   : > { %8551 = vmatprep.mubr.f32.mxu1 %v11060_v59 }
 0x331   : > { %8552 = vmatmul.mubr.f32.gmra.mrb[60].mxu1 %v11063_v51 }
 0x332   : > { %8554 = vmatprep.mubr.f32.mxu1 %v11066_v61 }
 0x335   : > { %8555 = vmatmul.mubr.f32.gmra.mrb[62].mxu1 %v11069_v10 }
 0x336   : > { %8589 = vmatprep.mubr.f32.mxu1 %v10988_v34 }
 0x339   : > { %8590 = vmatmul.mubr.f32.vlgmr.msra.gmra.mrb[32].mxu1 %v10991_v44  ;;  %v561_v44 = vand.u32 15, %v11117_v18 }
 0x33a   : > { %8592 = vmatprep.mubr.f32.mxu1 %v10994_v2  ;;  %v527_v2 = vadd.s32 16, %v11117_v18 }
 0x33b   : > { %vm941_vm0 = vcmp.ne.s32.totalorder %v561_v44, 0 }
 0x33d   : > { %8593 = vmatmul.mubr.f32.gmra.mrb[34].mxu1 %v10997_v11 }
 0x33e   : > { %8595 = vmatprep.mubr.f32.mxu1 %v11000_v28 }
 0x341   : > { %8596 = vmatmul.mubr.f32.gmra.mrb[36].mxu1 %v11003_v63  ;;  %v575_v63 = vand.u32 15, %v527_v2 }
 0x342   : > { %8598 = vmatprep.mubr.f32.mxu1 %v11006_v32  ;;  %v529_v32 = vadd.s32 32, %v11117_v18 }
 0x343   : > { %vm943_vm1 = vcmp.ne.s32.totalorder %v575_v63, 0  ;;  %v659_v63 = vand.u32 15, %v539_v8 }
 0x344   : > { %v589_v19 = vand.u32 15, %v529_v32  ;;  %v541_v32 = vadd.s32 128, %v11117_v18 }
 0x345   : > { %8599 = vmatmul.mubr.f32.gmra.mrb[38].mxu1 %v11009_v24  ;;  %vm955_vm7 = vcmp.ne.s32.totalorder %v659_v63, 0 }
 0x346   : > { %8601 = vmatprep.mubr.f32.mxu1 %v11012_v17  ;;  %v11129_v17 = vsel %vm941_vm0, 1.0, %v10975_v37  ;;  %vm945_vm2 = vcmp.ne.s32.totalorder %v589_v19, 0 }
 0x347   : > { %14020 = vst [vmem:[#allocation24_spill] sm:$0xff] %v11129_v17 }
 0x349   : > { %8602 = vmatmul.mubr.f32.gmra.mrb[40].mxu1 %v11015_v9 }
 0x34a   : > { %8604 = vmatprep.mubr.f32.mxu1 %v11018_v1 }
 0x34c   : > { %v8111_v34 = vpop.f32.mrb[0].mxu1 }
 0x34d   : > { %v2138_v11 = vpop.f32.mrb[1].mxu1  ;;  %8605 = vmatmul.mubr.f32.gmra.mrb[42].mxu1 %v11021_v31  ;;  %v531_v31 = vadd.s32 48, %v11117_v18 }
 0x34e   : > { %8607 = vmatprep.mubr.f32.mxu1 %v11024_v4 }
 0x34f   : > { %v603_v56 = vand.u32 15, %v531_v31 }
 0x350   : > { %v8114_v28 = vpop.f32.mrb[2].mxu1 }
 0x351   : > { %v2148_v24 = vpop.f32.mrb[3].mxu1  ;;  %8608 = vmatmul.mubr.f32.gmra.mrb[44].mxu1 %v11027_v22  ;;  %v11138_v22 = vsel %vm943_vm1, 1.0, %v10975_v37  ;;  %vm947_vm3 = vcmp.ne.s32.totalorder %v603_v56, 0 }
 0x352   : > { %8610 = vmatprep.mubr.f32.mxu1 %v11030_v52  ;;  %14021 = vst [vmem:[#allocation26_spill] sm:$0xff] %v11138_v22 }
 0x354   : > { %v8117_v1 = vpop.f32.mrb[4].mxu1 }
 0x355   : > { %v8351_v9 = vpop.f32.mrb[32].mxu0  ;;  %v2158_v43 = vpop.f32.mrb[5].mxu1  ;;  %8611 = vmatmul.mubr.f32.gmra.mrb[46].mxu1 %v11033_v16 }
 0x356   : > { %v11132_v4 = vadd.f32 %v8351_v9, %v8111_v34  ;;  %v2961_v29 = vpop.f32.mrb[33].mxu0  ;;  %8613 = vmatprep.mubr.f32.mxu1 %v11036_v0  ;;  %v11149_v0 = vsel %vm945_vm2, 1.0, %v10975_v37 }
 0x357   : > { %v3152_v53 = vmul.f32 %v11129_v17, %v2961_v29  ;;  %14022 = vst [vmem:[#allocation29_spill] sm:$0xff] %v11149_v0 }
 0x358   : > { %v8120_v50 = vpop.f32.mrb[6].mxu1 }
 0x359   : > { %v8354_v52 = vpop.f32.mrb[34].mxu0  ;;  %v11141_v3 = vadd.f32 %v3152_v53, %v2138_v11  ;;  %v2168_v46 = vpop.f32.mrb[7].mxu1  ;;  %8614 = vmatmul.mubr.f32.gmra.mrb[48].mxu1 %v11039_v40  ;;  %v543_v53 = vadd.s32 144, %v11117_v18 }
 0x35a   : > { %v11143_v21 = vadd.f32 %v8354_v52, %v8114_v28  ;;  %v2971_v26 = vpop.f32.mrb[35].mxu0  ;;  %8616 = vmatprep.mubr.f32.mxu1 %v11042_v39  ;;  %v11160_v39 = vsel %vm947_vm3, 1.0, %v10975_v37 }
 0x35b   : > { %v3154_v16 = vmul.f32 %v11138_v22, %v2971_v26  ;;  %14023 = vst [vmem:[#allocation28_spill] sm:$0xff] %v11160_v39  ;;  %v3764_v26 = vld [vmem:[#allocation2 + $0x119] sm:$0xff] }
 0x35c   : > { %v8123_v23 = vpop.f32.mrb[8].mxu1 }
 0x35d   : > { %v8357_v13 = vpop.f32.mrb[36].mxu0  ;;  %v11152_v25 = vadd.f32 %v3154_v16, %v2148_v24  ;;  %v2178_v5 = vpop.f32.mrb[9].mxu1  ;;  %8617 = vmatmul.mubr.f32.gmra.mrb[50].mxu1 %v11045_v60 }
 0x35e   : > { %v11154_v45 = vadd.f32 %v8357_v13, %v8117_v1  ;;  %v2981_v33 = vpop.f32.mrb[37].mxu0  ;;  %8619 = vmatprep.mubr.f32.mxu1 %v11048_v36  ;;  %v11171_v36 = vsel %vm949_vm4, 1.0, %v10975_v37  ;;  %v687_v13 = vand.u32 15, %v543_v53 }
 0x35f   : > { %v3156_v40 = vmul.f32 %v11149_v0, %v2981_v33  ;;  %14024 = vst [vmem:[#allocation30_spill] sm:$0xff] %v11171_v36 }
 0x360   : > { %v8126_v57 = vpop.f32.mrb[10].mxu1  ;;  %vm959_vm9 = vcmp.ne.s32.totalorder %v687_v13, 0 }
 0x361   : > { %v8360_v48 = vpop.f32.mrb[38].mxu0  ;;  %v11163_v14 = vadd.f32 %v3156_v40, %v2158_v43  ;;  %v2188_v35 = vpop.f32.mrb[11].mxu1  ;;  %8620 = vmatmul.mubr.f32.gmra.mrb[52].mxu1 %v11051_v41  ;;  %v673_v43 = vand.u32 15, %v541_v32 }
 0x362   : > { %v11165_v27 = vadd.f32 %v8360_v48, %v8120_v50  ;;  %v2991_v30 = vpop.f32.mrb[39].mxu0  ;;  %8622 = vmatprep.mubr.f32.mxu1 %v11054_v42  ;;  %v11182_v42 = vsel %vm951_vm5, 1.0, %v10975_v37 }
 0x363   : > { %v3158_v60 = vmul.f32 %v11160_v39, %v2991_v30  ;;  %14025 = vst [vmem:[#allocation27_spill] sm:$0xff] %v11182_v42  ;;  %vm957_vm8 = vcmp.ne.s32.totalorder %v673_v43, 0 }
 0x364   : > { %v8129_v49 = vpop.f32.mrb[12].mxu1  ;;  %v11214_v40 = vsel %vm957_vm8, 1.0, %v10975_v37 }
 0x365   : > { %v8363_v38 = vpop.f32.mrb[40].mxu0  ;;  %v11174_v12 = vadd.f32 %v3158_v60, %v2168_v46  ;;  %v2198_v2 = vpop.f32.mrb[13].mxu1  ;;  %8623 = vmatmul.mubr.f32.gmra.mrb[54].mxu1 %v11057_v54  ;;  %14028 = vst [vmem:[#allocation35_spill] sm:$0xff] %v11214_v40 }
 0x366   : > { %v11176_v34 = vadd.f32 %v8363_v38, %v8123_v23  ;;  %v3001_v44 = vpop.f32.mrb[41].mxu0  ;;  %8625 = vmatprep.mubr.f32.mxu1 %v11060_v59  ;;  %v11193_v59 = vsel %vm953_vm6, 1.0, %v10975_v37  ;;  %v545_v23 = vadd.s32 160, %v11117_v18 }
 0x367   : > { %v3160_v41 = vmul.f32 %v11171_v36, %v3001_v44  ;;  %14026 = vst [vmem:[#allocation33_spill] sm:$0xff] %v11193_v59  ;;  %v715_v44 = vand.u32 15, %v547_v55  ;;  %v5606_v36 = vld [vmem:[#allocation13 + $0x8] sm:$0xff] }
 0x368   : > { %v8132_v28 = vpop.f32.mrb[14].mxu1  ;;  %v701_v7 = vand.u32 15, %v545_v23  ;;  %v553_v23 = vadd.s32 224, %v11117_v18 }
 0x369   : > { %v8366_v11 = vpop.f32.mrb[42].mxu0  ;;  %v11185_v24 = vadd.f32 %v3160_v41, %v2178_v5  ;;  %v2208_v19 = vpop.f32.mrb[15].mxu1  ;;  %8626 = vmatmul.mubr.f32.gmra.mrb[56].mxu1 %v11063_v51  ;;  %v3765_v5 = vld [vmem:[#allocation2 + $0x121] sm:$0xff]  ;;  %vm963_vm11 = vcmp.ne.s32.totalorder %v715_v44, 0 }
 0x36a   : > { %v11187_v9 = vadd.f32 %v8366_v11, %v8126_v57  ;;  %v3011_v1 = vpop.f32.mrb[43].mxu0  ;;  %8628 = vmatprep.mubr.f32.mxu1 %v11066_v61  ;;  %v11204_v61 = vsel %vm955_vm7, 1.0, %v10975_v37  ;;  %vm961_vm10 = vcmp.ne.s32.totalorder %v701_v7, 0 }
 0x36b   : > { %v3162_v54 = vmul.f32 %v11182_v42, %v3011_v1  ;;  %14027 = vst [vmem:[#allocation34_spill] sm:$0xff] %v11204_v61  ;;  %v11232_v1 = vsel %vm961_vm10, 1.0, %v10975_v37 }
 0x36c   : > { %v8135_v29 = vpop.f32.mrb[16].mxu1  ;;  %14030 = vst [vmem:[#allocation32_spill] sm:$0xff] %v11232_v1 }
 0x36d   : > { %v8369_v31 = vpop.f32.mrb[44].mxu0  ;;  %v11196_v52 = vadd.f32 %v3162_v54, %v2188_v35  ;;  %v2218_v62 = vpop.f32.mrb[17].mxu1  ;;  %8629 = vmatmul.mubr.f32.gmra.mrb[58].mxu1 %v11069_v10 }
 0x36e   : > { %v11198_v50 = vadd.f32 %v8369_v31, %v8129_v49  ;;  %v3021_v56 = vpop.f32.mrb[45].mxu0  ;;  %8631 = vmatprep.mubr.f32.mxu1 %v11072_v6  ;;  %v11223_v49 = vsel %vm959_vm9, 1.0, %v10975_v37 }
 0x36f   : > { %v3164_v51 = vmul.f32 %v11193_v59, %v3021_v56  ;;  %14029 = vst [vmem:[#allocation36_spill] sm:$0xff] %v11223_v49 }
 0x370   : > { %v8138_v16 = vpop.f32.mrb[18].mxu1 }
 0x371   : > { %v8372_v46 = vpop.f32.mrb[46].mxu0  ;;  %v11207_v20 = vadd.f32 %v3164_v51, %v2198_v2  ;;  %v2228_v10 = vpop.f32.mrb[19].mxu1  ;;  %8632 = vmatmul.mubr.f32.gmra.mrb[60].mxu1 %v11075_v15  ;;  %v549_v2 = vadd.s32 192, %v11117_v18 }
 0x372   : > { %v11209_v47 = vadd.f32 %v8372_v46, %v8132_v28  ;;  %v3031_v33 = vpop.f32.mrb[47].mxu0  ;;  %8634 = vmatprep.mubr.f32.mxu1 %v3764_v26  ;;  %v11241_v26 = vsel %vm963_vm11, 1.0, %v10975_v37 }
 0x373   : > { %v3166_v6 = vmul.f32 %v11204_v61, %v3031_v33  ;;  %v729_v31 = vand.u32 15, %v549_v2  ;;  %14031 = vst [vmem:[#allocation31_spill] sm:$0xff] %v11241_v26 }
 0x374   : > { %v8141_v57 = vpop.f32.mrb[20].mxu1 }
 0x375   : > { %v8375_v48 = vpop.f32.mrb[48].mxu0  ;;  %v11217_v30 = vadd.f32 %v3166_v6, %v2208_v19  ;;  %v2238_v38 = vpop.f32.mrb[21].mxu1  ;;  %8635 = vmatmul.mubr.f32.gmra.mrb[62].mxu1 %v3765_v5  ;;  %vm965_vm12 = vcmp.ne.s32.totalorder %v729_v31, 0 }
 0x376   : > { %v11219_v35 = vadd.f32 %v8375_v48, %v8135_v29  ;;  %v3041_v60 = vpop.f32.mrb[49].mxu0  ;;  %v551_v29 = vadd.s32 208, %v11117_v18 }
 0x377   : > { %v3168_v15 = vmul.f32 %v11214_v40, %v3041_v60  ;;  %v757_v60 = vand.u32 15, %v553_v23 }
 0x378   : > { %v8144_v8 = vpop.f32.mrb[22].mxu1  ;;  %v743_v13 = vand.u32 15, %v551_v29 }
 0x379   : > { %v8378_v58 = vpop.f32.mrb[50].mxu0  ;;  %v11226_v41 = vadd.f32 %v3168_v15, %v2218_v62  ;;  %v2248_v63 = vpop.f32.mrb[23].mxu1  ;;  %v555_v15 = vadd.s32 240, %v11117_v18  ;;  %vm969_vm14 = vcmp.ne.s32.totalorder %v757_v60, 0  ;;  %v4217_v60 = vld [vmem:[#allocation12 + $0x68] sm:$0xff] }
 0x37a   : > { %v11228_v11 = vadd.f32 %v8378_v58, %v8138_v16  ;;  %v3051_v28 = vpop.f32.mrb[51].mxu0  ;;  %vm967_vm13 = vcmp.ne.s32.totalorder %v743_v13, 0 }
 0x37b   : > { %v3170_v32 = vmul.f32 %v11223_v49, %v3051_v28  ;;  %v11259_v28 = vsel %vm967_vm13, 1.0, %v10975_v37  ;;  %v771_v31 = vand.u32 15, %v555_v15 }
 0x37c   : > { %v8147_v54 = vpop.f32.mrb[24].mxu1  ;;  %14033 = vst [vmem:[#allocation38_spill] sm:$0xff] %v11259_v28 }
 0x37d   : > { %v8381_v19 = vpop.f32.mrb[52].mxu0  ;;  %v11235_v43 = vadd.f32 %v3170_v32, %v2228_v10  ;;  %v2258_v62 = vpop.f32.mrb[25].mxu1  ;;  %vm971_vm15 = vcmp.ne.s32.totalorder %v771_v31, 0  ;;  %v4219_v31 = vld [vmem:[#allocation12 + $0x78] sm:$0xff] }
 0x37e   : > { %v11237_v53 = vadd.f32 %v8381_v19, %v8141_v57  ;;  %v3061_v56 = vpop.f32.mrb[53].mxu0  ;;  %v11250_v57 = vsel %vm965_vm12, 1.0, %v10975_v37 }
 0x37f   : > { %v3172_v51 = vmul.f32 %v11232_v1, %v3061_v56  ;;  %14032 = vst [vmem:[#allocation37_spill] sm:$0xff] %v11250_v57 }
 0x380   : > { %v8150_v16 = vpop.f32.mrb[26].mxu1 }
 0x381   : > { %v8384_v46 = vpop.f32.mrb[54].mxu0  ;;  %v11244_v33 = vadd.f32 %v3172_v51, %v2238_v38  ;;  %v2268_v5 = vpop.f32.mrb[27].mxu1 }
 0x382   : > { %v11246_v6 = vadd.f32 %v8384_v46, %v8144_v8  ;;  %v3071_v10 = vpop.f32.mrb[55].mxu0  ;;  %v11267_v46 = vsel %vm969_vm14, 1.0, %v10975_v37 }
 0x383   : > { %v3174_v48 = vmul.f32 %v11241_v26, %v3071_v10  ;;  %14034 = vst [vmem:[#allocation39_spill] sm:$0xff] %v11267_v46 }
 0x384   : > { %v8153_v55 = vpop.f32.mrb[28].mxu1 }
 0x385   : > { %v8387_v7 = vpop.f32.mrb[56].mxu0  ;;  %v11253_v58 = vadd.f32 %v3174_v48, %v2248_v63  ;;  %v2278_v8 = vpop.f32.mrb[29].mxu1 }
 0x386   : > { %v11255_v44 = vadd.f32 %v8387_v7, %v8147_v54  ;;  %v3081_v38 = vpop.f32.mrb[57].mxu0 }
 0x387   : > { %v3176_v2 = vmul.f32 %v11250_v57, %v3081_v38 }
 0x388   : > { %v8156_v19 = vpop.f32.mrb[30].mxu1 }
 0x389   : > { %v8390_v32 = vpop.f32.mrb[58].mxu0  ;;  %v11261_v29 = vadd.f32 %v3176_v2, %v2258_v62  ;;  %v2288_v63 = vpop.f32.mrb[31].mxu1  ;;  %v4216_v62 = vld [vmem:[#allocation12 + $0x60] sm:$0xff] }
 0x38a   : > { %v11263_v56 = vadd.f32 %v8390_v32, %v8150_v16  ;;  %v3091_v51 = vpop.f32.mrb[59].mxu0  ;;  %v11275_v16 = vsel %vm971_vm15, 1.0, %v10975_v37  ;;  %v9176_v15 = vpack.c.bf16 %v4217_v60, %v4216_v62  ;;  %v13843_v62 = vmov 0.0|0.0  }
 0x38b   : > { %v3178_v54 = vmul.f32 %v11259_v28, %v3091_v51  ;;  %14035 = vst [vmem:[#allocation40_spill] sm:$0xff] %v11275_v16  ;;  %9184 = vmatprep.subr.bf16.mxu1 %v13843_v62 }
 0x38c   : > { %9177 = vmatprep.subr.bf16.mxu0 %v9176_v15 }
 0x38d   : > { %v8393_v13 = vpop.f32.mrb[60].mxu0  ;;  %v11269_v23 = vadd.f32 %v3178_v54, %v2268_v5  ;;  %9179 = vmatpush3.bf16.msra.mxu0 %v9176_v15  ;;  %v5609_v15 = vld [vmem:[#allocation13 + $0x20] sm:$0xff] }
 0x38e   : > { %v11271_v10 = vadd.f32 %v8393_v13, %v8153_v55  ;;  %v3101_v48 = vpop.f32.mrb[61].mxu0  ;;  %v4218_v55 = vld [vmem:[#allocation12 + $0x70] sm:$0xff] }
 0x38f   : > { %v3180_v7 = vmul.f32 %v11267_v46, %v3101_v48  ;;  %v9180_v54 = vpack.c.bf16 %v4219_v31, %v4218_v55  ;;  %v5605_v48 = vld [vmem:[#allocation13] sm:$0xff]  ;;  %v5614_v31 = vld [vmem:[#allocation13 + $0x48] sm:$0xff] }
 0x391   : > { %v8396_v38 = vpop.f32.mrb[62].mxu0  ;;  %v11277_v2 = vadd.f32 %v3180_v7, %v2278_v8  ;;  %9181 = vmatprep.subr.bf16.mxu0 %v9180_v54  ;;  %v9185_v8 = vpack.c.bf16 %v5606_v36, %v5605_v48  ;;  %v5608_v7 = vld [vmem:[#allocation13 + $0x18] sm:$0xff]  ;;  %v5613_v36 = vld [vmem:[#allocation13 + $0x40] sm:$0xff]  ;;  %v526_v48 = vadd.s32 8, %v11117_v18 }
 0x392   : > { %v11279_v32 = vadd.f32 %v8396_v38, %v8156_v19  ;;  %v3111_v51 = vpop.f32.mrb[63].mxu0  ;;  %9183 = vmatpush3.bf16.msra.mxu0 %v9180_v54  ;;  %v5607_v19 = vld [vmem:[#allocation13 + $0x10] sm:$0xff]  ;;  %v9197_v54 = vpack.c.bf16 %v5614_v31, %v5613_v36 }
 0x393   : > { %v3182_v5 = vmul.f32 %v11275_v16, %v3111_v51  ;;  %9186 = vmatpush3.bf16.msra.mxu1 %v9185_v8  ;;  %v9188_v60 = vpack.c.bf16 %v5608_v7, %v5607_v19  ;;  %v5611_v51 = vld [vmem:[#allocation13 + $0x30] sm:$0xff]  ;;  %v568_v8 = vand.u32 15, %v526_v48  ;;  %v528_v19 = vadd.s32 24, %v11117_v18 }
 0x394   : > { %9187 = vmatprep.subr.bf16.mxu1 %v13843_v62 }
 0x395   : > { %v11282_v13 = vadd.f32 %v3182_v5, %v2288_v63  ;;  %v5610_v63 = vld [vmem:[#allocation13 + $0x28] sm:$0xff]  ;;  %v5612_v5 = vld [vmem:[#allocation13 + $0x38] sm:$0xff]  ;;  %vm1038_vm0 = vcmp.ne.s32.totalorder %v568_v8, 15  ;;  %v582_v7 = vand.u32 15, %v528_v19 }
 0x396   : > { %v9191_v38 = vpack.c.bf16 %v5610_v63, %v5609_v15  ;;  %v9194_v55 = vpack.c.bf16 %v5612_v5, %v5611_v51  ;;  %v13847_v15 = vsub.s32 0, %v11117_v18  ;;  %v11297_v63 = vld [vmem:[%s13803_s10] sm:$0xf]  ;;  %v532_v5 = vadd.s32 56, %v11117_v18 }
 0x397   : > { %9189 = vmatpush3.bf16.msra.mxu1 %v9188_v60  ;;  %v530_v60 = vadd.s32 40, %v11117_v18  ;;  %vm1040_vm1 = vcmp.ne.s32.totalorder %v582_v7, 15 }
 0x398   : > { %9190 = vmatprep.subr.bf16.mxu1 %v13843_v62  ;;  %v11306_v36 = vrot.slane %v11297_v63, %v13847_v15  ;;  %v11311_v8 = vsel %vm1040_vm1, 1.0, %v10975_v37  ;;  %v610_v7 = vand.u32 15, %v532_v5 }
 0x399   : > { %v596_v51 = vand.u32 15, %v530_v60  ;;  %14037 = vst [vmem:[#allocation42_spill] sm:$0xff] %v11311_v8  ;;  %v534_v60 = vadd.s32 72, %v11117_v18 }
 0x39a   : > { %vm1044_vm3 = vcmp.ne.s32.totalorder %v610_v7, 15 }
 0x39b   : > { %9192 = vmatpush3.bf16.msra.mxu1 %v9191_v38  ;;  %v11300_v38 = vsel %vm1038_vm0, 1.0, %v10975_v37  ;;  %vm1042_vm2 = vcmp.ne.s32.totalorder %v596_v51, 15  ;;  %v624_v51 = vand.u32 15, %v534_v60  ;;  %vm10131_vm0 = vmmov 0  }
 0x39c   : > { %9193 = vmatprep.subr.bf16.mxu1 %v13843_v62  ;;  %14036 = vst [vmem:[#allocation41_spill] sm:$0xff] %v11300_v38 }
 0x39d   : > { %vm11340_vm4 = vcmp.ne.s32.totalorder %v624_v51, 15 }
 0x39f   : > { %9195 = vmatpush3.bf16.msra.mxu1 %v9194_v55 }
 0x3a0   : > { %9196 = vmatprep.subr.bf16.mxu1 %v13843_v62 }
 0x3a3   : > { %9198 = vmatpush3.bf16.msra.mxu1 %v9197_v54 }
 0x3a4   : > { %9199 = vmatprep.subr.bf16.mxu1 %v13843_v62 }
 0x40c   : > { %v8591_v55 = vpop.f32.mrb[32].mxu1 }
 0x40d   : > { %v4041_v31 = vmul.f32 %v8591_v55, %v11300_v38  ;;  %v3849_v54 = vpop.f32.mrb[33].mxu1 }
 0x40e   : > { %v4072_v48 = vadd.f32 %v3849_v54, %v11141_v3  ;;  %v11320_v54 = vsel %vm1042_vm2, 1.0, %v10975_v37 }
 0x40f   : > { %v4073_v19 = vadd.f32 %v4041_v31, %v11132_v4  ;;  %14038 = vst [vmem:[#allocation43_spill] sm:$0xff] %v11320_v54 }
 0x410   : > { %v4108_v62 = vadd.f32 %v11306_v36, %v4072_v48  ;;  %v8594_v39 = vpop.f32.mrb[34].mxu1 }
 0x411   : > { %v4109_v15 = vadd.f32 %v11306_v36, %v4073_v19  ;;  %v4043_v0 = vmul.f32 %v8594_v39, %v11311_v8  ;;  %v3859_v55 = vpop.f32.mrb[35].mxu1  ;;  %v536_v19 = vadd.s32 88, %v11117_v18 }
 0x412   : > { %v4140_v38 = vmax.f32 %v4108_v62, 0.0  ;;  %v4074_v3 = vadd.f32 %v3859_v55, %v11152_v25 }
 0x413   : > { %v4141_v22 = vmax.f32 %v4109_v15, 0.0  ;;  %v4075_v4 = vadd.f32 %v4043_v0, %v11143_v21  ;;  %v538_v15 = vadd.s32 104, %v11117_v18 }
 0x414   : > { %v11323_v5 = vmin.f32 %v4140_v38, 6.0  ;;  %v4110_v31 = vadd.f32 %v11306_v36, %v4074_v3  ;;  %v8597_v48 = vpop.f32.mrb[36].mxu1  ;;  %v11336_v38 = vsel %vm1044_vm3, 1.0, %v10975_v37 }
 0x415   : > { %v11327_v39 = vmin.f32 %v4141_v22, 6.0  ;;  %v4111_v62 = vadd.f32 %v11306_v36, %v4075_v4  ;;  %v4045_v25 = vmul.f32 %v8597_v48, %v11320_v54  ;;  %v3869_v55 = vpop.f32.mrb[37].mxu1  ;;  %14039 = vst [vmem:[#allocation44_spill] sm:$0xff] %v11336_v38 }
 0x416   : > { %4449 = vst [vmem:[#allocation2 + $0x18] sm:$0xff] %v11323_v5  ;;  %v4142_v21 = vmax.f32 %v4110_v31, 0.0  ;;  %v4076_v0 = vadd.f32 %v3869_v55, %v11163_v14  ;;  %8669 = vmatprep.mubr.f32.mxu0 %v11323_v5  ;;  %v638_v31 = vand.u32 15, %v536_v19 }
 0x417   : > { %4450 = vst [vmem:[#allocation2 + $0x20] sm:$0xff] %v11327_v39  ;;  %v4143_v22 = vmax.f32 %v4111_v62, 0.0  ;;  %8670 = vmatmul.mubr.f32.vlgmr.msra.gmra.mrb[64].mxu0 %v11327_v39  ;;  %v4077_v3 = vadd.f32 %v4045_v25, %v11154_v45  ;;  %v652_v62 = vand.u32 15, %v538_v15  ;;  %v540_v45 = vadd.s32 120, %v11117_v18  ;;  %v11359_v25 = vld [vmem:[#allocation2 + $0x10] sm:$0xff] }
 0x418   : > { %v11344_v60 = vmin.f32 %v4142_v21, 6.0  ;;  %v4112_v14 = vadd.f32 %v11306_v36, %v4076_v0  ;;  %v8600_v4 = vpop.f32.mrb[38].mxu1  ;;  %v11364_v15 = vsel %vm11340_vm4, 1.0, %v11359_v25  ;;  %vm1048_vm5 = vcmp.ne.s32.totalorder %v638_v31, 15  ;;  %8749 = vmatprep.mubr.msk.f32.mxu1 %vm10131_vm0, %v11359_v25 }
 0x419   : > { %v11348_v48 = vmin.f32 %v4143_v22, 6.0  ;;  %v4047_v37 = vmul.f32 %v8600_v4, %v11336_v38  ;;  %v3879_v55 = vpop.f32.mrb[39].mxu1  ;;  %v4113_v51 = vadd.f32 %v11306_v36, %v4077_v3  ;;  %14042 = vst [vmem:[#allocation45_spill] sm:$0xff] %v11364_v15  ;;  %vm1050_vm6 = vcmp.ne.s32.totalorder %v652_v62, 15 }
 0x41a   : > { %4451 = vst [vmem:[#allocation2 + $0x28] sm:$0xff] %v11344_v60  ;;  %v4144_v54 = vmax.f32 %v4112_v14, 0.0  ;;  %v4078_v21 = vadd.f32 %v3879_v55, %v11174_v12  ;;  %8672 = vmatprep.mubr.f32.mxu0 %v11344_v60  ;;  %v666_v7 = vand.u32 15, %v540_v45  ;;  %v542_v31 = vadd.s32 136, %v11117_v18 }
 0x41b   : > { %4452 = vst [vmem:[#allocation2 + $0x30] sm:$0xff] %v11348_v48  ;;  %v4079_v19 = vadd.f32 %v4047_v37, %v11165_v27  ;;  %8673 = vmatmul.mubr.f32.gmra.mrb[66].mxu0 %v11348_v48  ;;  %v4145_v0 = vmax.f32 %v4113_v51, 0.0 }
 0x41c   : > { %v11366_v22 = vmin.f32 %v4144_v54, 6.0  ;;  %v8603_v12 = vpop.f32.mrb[40].mxu1  ;;  %v4114_v14 = vadd.f32 %v11306_v36, %v4078_v21  ;;  %v11376_v54 = vsel %vm1048_vm5, 1.0, %v11359_v25  ;;  %vm1052_vm7 = vcmp.ne.s32.totalorder %v666_v7, 15 }
 0x41d   : > { %v4115_v3 = vadd.f32 %v11306_v36, %v4079_v19  ;;  %v3889_v4 = vpop.f32.mrb[41].mxu1  ;;  %v11370_v27 = vmin.f32 %v4145_v0, 6.0  ;;  %v4049_v37 = vmul.f32 %v8603_v12, %v11364_v15  ;;  %14043 = vst [vmem:[#allocation46_spill] sm:$0xff] %v11376_v54  ;;  %v11382_v0 = vsel %vm1050_vm6, 1.0, %v11359_v25 }
 0x41e   : > { %4453 = vst [vmem:[#allocation2 + $0x38] sm:$0xff] %v11366_v22  ;;  %8675 = vmatprep.mubr.f32.mxu0 %v11366_v22  ;;  %v4146_v21 = vmax.f32 %v4114_v14, 0.0  ;;  %14044 = vst [vmem:[#allocation47_spill] sm:$0xff] %v11382_v0  ;;  %v4080_v62 = vadd.f32 %v3889_v4, %v11185_v24  ;;  %v680_v17 = vand.u32 15, %v542_v31  ;;  %v11400_v4 = vsel %vm1052_vm7, 1.0, %v11359_v25 }
 0x41f   : > { %4454 = vst [vmem:[#allocation2 + $0x40] sm:$0xff] %v11370_v27  ;;  %8676 = vmatmul.mubr.f32.gmra.mrb[68].mxu0 %v11370_v27  ;;  %v4147_v51 = vmax.f32 %v4115_v3, 0.0  ;;  %v4081_v12 = vadd.f32 %v4049_v37, %v11176_v34  ;;  %14045 = vst [vmem:[#allocation48_spill] sm:$0xff] %v11400_v4 }
 0x420   : > { %v8606_v55 = vpop.f32.mrb[42].mxu1  ;;  %v11389_v38 = vmin.f32 %v4146_v21, 6.0  ;;  %v4116_v14 = vadd.f32 %v11306_v36, %v4080_v62  ;;  %vm11406_vm8 = vcmp.ne.s32.totalorder %v680_v17, 15 }
 0x421   : > { %v3899_v19 = vpop.f32.mrb[43].mxu1  ;;  %v4051_v45 = vmul.f32 %v8606_v55, %v11376_v54  ;;  %v11387_v15 = vmin.f32 %v4147_v51, 6.0  ;;  %v4117_v3 = vadd.f32 %v11306_v36, %v4081_v12  ;;  %v544_v51 = vadd.s32 152, %v11117_v18 }
 0x422   : > { %v4082_v8 = vadd.f32 %v3899_v19, %v11196_v52  ;;  %4455 = vst [vmem:[#allocation2 + $0x48] sm:$0xff] %v11389_v38  ;;  %8678 = vmatprep.mubr.f32.mxu0 %v11389_v38  ;;  %v4148_v37 = vmax.f32 %v4116_v14, 0.0 }
 0x423   : > { %v4083_v16 = vadd.f32 %v4051_v45, %v11187_v9  ;;  %4456 = vst [vmem:[#allocation2 + $0x50] sm:$0xff] %v11387_v15  ;;  %v4149_v52 = vmax.f32 %v4117_v3, 0.0  ;;  %8679 = vmatmul.mubr.f32.gmra.mrb[70].mxu0 %v11387_v15 }
 0x424   : > { %v8609_v46 = vpop.f32.mrb[44].mxu1  ;;  %v4118_v34 = vadd.f32 %v11306_v36, %v4082_v8  ;;  %v11412_v21 = vmin.f32 %v4148_v37, 6.0 }
 0x425   : > { %v3909_v24 = vpop.f32.mrb[45].mxu1  ;;  %v4119_v7 = vadd.f32 %v11306_v36, %v4083_v16  ;;  %v4053_v9 = vmul.f32 %v8609_v46, %v11382_v0  ;;  %v11410_v8 = vmin.f32 %v4149_v52, 6.0 }
 0x426   : > { %v4150_v31 = vmax.f32 %v4118_v34, 0.0  ;;  %v4084_v55 = vadd.f32 %v3909_v24, %v11207_v20  ;;  %14048 = vst [vmem:[#allocation49_spill] sm:$0xff] %v11412_v21  ;;  %4457 = vst [vmem:[#allocation2 + $0x58] sm:$0xff] %v11412_v21  ;;  %8681 = vmatprep.mubr.f32.mxu0 %v11412_v21  ;;  %v11431_v34 = vsel %vm11406_vm8, 1.0, %v11359_v25 }
 0x427   : > { %v4151_v19 = vmax.f32 %v4119_v7, 0.0  ;;  %v4085_v12 = vadd.f32 %v4053_v9, %v11198_v50  ;;  %4458 = vst [vmem:[#allocation2 + $0x60] sm:$0xff] %v11410_v8  ;;  %8682 = vmatmul.mubr.f32.gmra.mrb[72].mxu0 %v11410_v8  ;;  %14050 = vst [vmem:[#allocation51_spill] sm:$0xff] %v11431_v34 }
 0x428   : > { %v8612_v62 = vpop.f32.mrb[46].mxu1  ;;  %v11415_v16 = vmin.f32 %v4150_v31, 6.0  ;;  %v4120_v45 = vadd.f32 %v11306_v36, %v4084_v55 }
 0x429   : > { %v4055_v46 = vmul.f32 %v8612_v62, %v11400_v4  ;;  %v3919_v3 = vpop.f32.mrb[47].mxu1  ;;  %v11421_v17 = vmin.f32 %v4151_v19, 6.0  ;;  %v4121_v50 = vadd.f32 %v11306_v36, %v4085_v12  ;;  %v546_v62 = vadd.s32 168, %v11117_v18 }
 0x42a   : > { %4459 = vst [vmem:[#allocation2 + $0x68] sm:$0xff] %v11415_v16  ;;  %v4152_v20 = vmax.f32 %v4120_v45, 0.0  ;;  %8684 = vmatprep.mubr.f32.mxu0 %v11415_v16  ;;  %v4086_v31 = vadd.f32 %v3919_v3, %v11217_v30  ;;  %v548_v45 = vadd.s32 184, %v11117_v18 }
 0x42b   : > { %14049 = vst [vmem:[#allocation50_spill] sm:$0xff] %v11421_v17  ;;  %v4087_v14 = vadd.f32 %v4055_v46, %v11209_v47  ;;  %4460 = vst [vmem:[#allocation2 + $0x70] sm:$0xff] %v11421_v17  ;;  %v4153_v52 = vmax.f32 %v4121_v50, 0.0  ;;  %8685 = vmatmul.mubr.f32.gmra.mrb[74].mxu0 %v11421_v17 }
 0x42c   : > { %v8615_v24 = vpop.f32.mrb[48].mxu1  ;;  %v11435_v37 = vmin.f32 %v4152_v20, 6.0  ;;  %v4122_v46 = vadd.f32 %v11306_v36, %v4086_v31  ;;  %v694_v20 = vand.u32 15, %v544_v51 }
 0x42d   : > { %v4123_v7 = vadd.f32 %v11306_v36, %v4087_v14  ;;  %v3929_v9 = vpop.f32.mrb[49].mxu1  ;;  %v4057_v47 = vmul.f32 %v8615_v24, %v11431_v34  ;;  %v11442_v19 = vmin.f32 %v4153_v52, 6.0  ;;  %v708_v52 = vand.u32 15, %v546_v62 }
 0x42e   : > { %v4088_v55 = vadd.f32 %v3929_v9, %v11226_v41  ;;  %4461 = vst [vmem:[#allocation2 + $0x78] sm:$0xff] %v11435_v37  ;;  %8687 = vmatprep.mubr.f32.mxu0 %v11435_v37  ;;  %v4154_v14 = vmax.f32 %v4122_v46, 0.0  ;;  %vm1056_vm9 = vcmp.ne.s32.totalorder %v694_v20, 15 }
 0x42f   : > { %14051 = vst [vmem:[#allocation52_spill] sm:$0xff] %v11442_v19  ;;  %v4155_v12 = vmax.f32 %v4123_v7, 0.0  ;;  %v4089_v30 = vadd.f32 %v4057_v47, %v11219_v35  ;;  %4462 = vst [vmem:[#allocation2 + $0x80] sm:$0xff] %v11442_v19  ;;  %8688 = vmatmul.mubr.f32.gmra.mrb[76].mxu0 %v11442_v19  ;;  %v722_v7 = vand.u32 15, %v548_v45  ;;  %vm1058_vm10 = vcmp.ne.s32.totalorder %v708_v52, 15 }
 0x430   : > { %v8618_v41 = vpop.f32.mrb[50].mxu1  ;;  %v11457_v31 = vmin.f32 %v4154_v14, 6.0  ;;  %v4124_v54 = vadd.f32 %v11306_v36, %v4088_v55  ;;  %v11465_v62 = vsel %vm1056_vm9, 1.0, %v11359_v25  ;;  %v11470_v55 = vsel %vm1058_vm10, 1.0, %v11359_v25 }
 0x431   : > { %v3939_v3 = vpop.f32.mrb[51].mxu1  ;;  %v11452_v50 = vmin.f32 %v4155_v12, 6.0  ;;  %v4125_v24 = vadd.f32 %v11306_v36, %v4089_v30  ;;  %vm1060_vm11 = vcmp.ne.s32.totalorder %v722_v7, 15  ;;  %14053 = vst [vmem:[#allocation54_spill] sm:$0xff] %v11465_v62  ;;  %14054 = vst [vmem:[#allocation55_spill] sm:$0xff] %v11470_v55  ;;  %v4059_v14 = vmul.f32 %v8618_v41, %v11465_v62 }
 0x432   : > { %14052 = vst [vmem:[#allocation53_spill] sm:$0xff] %v11457_v31  ;;  %4463 = vst [vmem:[#allocation2 + $0x88] sm:$0xff] %v11457_v31  ;;  %8690 = vmatprep.mubr.f32.mxu0 %v11457_v31  ;;  %v4156_v46 = vmax.f32 %v4124_v54, 0.0  ;;  %v11473_v30 = vsel %vm1060_vm11, 1.0, %v11359_v25  ;;  %v4090_v52 = vadd.f32 %v3939_v3, %v11235_v43 }
 0x433   : > { %4464 = vst [vmem:[#allocation2 + $0x90] sm:$0xff] %v11452_v50  ;;  %v4157_v47 = vmax.f32 %v4125_v24, 0.0  ;;  %8691 = vmatmul.mubr.f32.gmra.mrb[78].mxu0 %v11452_v50  ;;  %14055 = vst [vmem:[#allocation56_spill] sm:$0xff] %v11473_v30  ;;  %v4091_v57 = vadd.f32 %v4059_v14, %v11228_v11 }
 0x434   : > { %v8621_v9 = vpop.f32.mrb[52].mxu1  ;;  %v11475_v20 = vmin.f32 %v4156_v46, 6.0  ;;  %v4126_v41 = vadd.f32 %v11306_v36, %v4090_v52 }
 0x435   : > { %v3949_v35 = vpop.f32.mrb[53].mxu1  ;;  %v11461_v51 = vmin.f32 %v4157_v47, 6.0  ;;  %v4061_v7 = vmul.f32 %v8621_v9, %v11470_v55  ;;  %v4127_v9 = vadd.f32 %v11306_v36, %v4091_v57 }
 0x436   : > { %14056 = vst [vmem:[#allocation57_spill] sm:$0xff] %v11475_v20  ;;  %v4092_v47 = vadd.f32 %v3949_v35, %v11244_v33  ;;  %4465 = vst [vmem:[#allocation2 + $0x98] sm:$0xff] %v11475_v20  ;;  %8693 = vmatprep.mubr.f32.mxu0 %v11475_v20  ;;  %v4158_v35 = vmax.f32 %v4126_v41, 0.0 }
 0x437   : > { %4466 = vst [vmem:[#allocation2 + $0xa0] sm:$0xff] %v11461_v51  ;;  %v4093_v26 = vadd.f32 %v4061_v7, %v11237_v53  ;;  %8694 = vmatmul.mubr.f32.gmra.mrb[80].mxu0 %v11461_v51  ;;  %v4159_v14 = vmax.f32 %v4127_v9, 0.0  ;;  %v5528_v9 = vadd.f32 %v11327_v39, %v11323_v5 }
 0x438   : > { %v8624_v12 = vpop.f32.mrb[54].mxu1  ;;  %v4128_v43 = vadd.f32 %v11306_v36, %v4092_v47  ;;  %v11493_v1 = vmin.f32 %v4158_v35, 6.0  ;;  %v552_v35 = vadd.s32 216, %v11117_v18 }
 0x439   : > { %v3959_v45 = vpop.f32.mrb[55].mxu1  ;;  %v4063_v28 = vmul.f32 %v8624_v12, %v11473_v30  ;;  %v4129_v11 = vadd.f32 %v11306_v36, %v4093_v26  ;;  %v11495_v52 = vmin.f32 %v4159_v14, 6.0 }
 0x43a   : > { %v4094_v46 = vadd.f32 %v3959_v45, %v11253_v58  ;;  %14057 = vst [vmem:[#allocation58_spill] sm:$0xff] %v11493_v1  ;;  %v4160_v58 = vmax.f32 %v4128_v43, 0.0  ;;  %4467 = vst [vmem:[#allocation2 + $0xa8] sm:$0xff] %v11493_v1  ;;  %8696 = vmatprep.mubr.f32.mxu0 %v11493_v1 }
 0x43b   : > { %v4095_v33 = vadd.f32 %v4063_v28, %v11246_v6  ;;  %v4161_v53 = vmax.f32 %v4129_v11, 0.0  ;;  %v550_v6 = vadd.s32 200, %v11117_v18  ;;  %4468 = vst [vmem:[#allocation2 + $0xb0] sm:$0xff] %v11495_v52  ;;  %8697 = vmatmul.mubr.f32.gmra.mrb[82].mxu0 %v11495_v52 }
 0x43c   : > { %v8627_v24 = vpop.f32.mrb[56].mxu1  ;;  %v11498_v7 = vmin.f32 %v4160_v58, 6.0  ;;  %v4130_v14 = vadd.f32 %v11306_v36, %v4094_v46  ;;  %v556_v46 = vadd.s32 248, %v11117_v18 }
 0x43d   : > { %v3969_v54 = vpop.f32.mrb[57].mxu1  ;;  %v4131_v26 = vadd.f32 %v11306_v36, %v4095_v33  ;;  %v11507_v47 = vmin.f32 %v4161_v53, 6.0  ;;  %v736_v41 = vand.u32 15, %v550_v6  ;;  %v554_v33 = vadd.s32 232, %v11117_v18 }
 0x43e   : > { %14058 = vst [vmem:[#allocation59_spill] sm:$0xff] %v11498_v7  ;;  %4469 = vst [vmem:[#allocation2 + $0xb8] sm:$0xff] %v11498_v7  ;;  %8699 = vmatprep.mubr.f32.mxu0 %v11498_v7  ;;  %v5529_v53 = vadd.f32 %v5528_v9, %v11344_v60  ;;  %v750_v6 = vand.u32 15, %v552_v35  ;;  %v4162_v61 = vmax.f32 %v4130_v14, 0.0 }
 0x43f   : > { %4470 = vst [vmem:[#allocation2 + $0xc0] sm:$0xff] %v11507_v47  ;;  %8700 = vmatmul.mubr.f32.gmra.mrb[84].mxu0 %v11507_v47  ;;  %v4163_v11 = vmax.f32 %v4131_v26, 0.0  ;;  %vm1062_vm12 = vcmp.ne.s32.totalorder %v736_v41, 15  ;;  %v764_v40 = vand.u32 15, %v554_v33 }
 0x440   : > { %v8630_v3 = vpop.f32.mrb[58].mxu1  ;;  %v11523_v49 = vsel %vm1062_vm12, 1.0, %v11359_v25  ;;  %v5530_v59 = vadd.f32 %v5529_v53, %v11348_v48  ;;  %vm1064_vm13 = vcmp.ne.s32.totalorder %v750_v6, 15  ;;  %v11528_v41 = vmin.f32 %v4162_v61, 6.0 }
 0x441   : > { %v3979_v12 = vpop.f32.mrb[59].mxu1  ;;  %v11518_v58 = vmin.f32 %v4163_v11, 6.0  ;;  %14059 = vst [vmem:[#allocation60_spill] sm:$0xff] %v11523_v49  ;;  %v4065_v26 = vmul.f32 %v8627_v24, %v11523_v49  ;;  %vm1066_vm14 = vcmp.ne.s32.totalorder %v764_v40, 15  ;;  %v11531_v9 = vsel %vm1064_vm13, 1.0, %v11359_v25 }
 0x442   : > { %14060 = vst [vmem:[#allocation61_spill] sm:$0xff] %v11528_v41  ;;  %14061 = vst [vmem:[#allocation62_spill] sm:$0xff] %v11531_v9  ;;  %v5531_v35 = vadd.f32 %v5530_v59, %v11366_v22  ;;  %8702 = vmatprep.mubr.f32.mxu0 %v11528_v41  ;;  %v11538_v33 = vsel %vm1066_vm14, 1.0, %v11359_v25  ;;  %v4096_v40 = vadd.f32 %v3969_v54, %v11261_v29  ;;  %v778_v61 = vand.u32 15, %v556_v46 }
 0x443   : > { %4472 = vst [vmem:[#allocation2 + $0xd0] sm:$0xff] %v11518_v58  ;;  %4471 = vst [vmem:[#allocation2 + $0xc8] sm:$0xff] %v11528_v41  ;;  %v4097_v11 = vadd.f32 %v4065_v26, %v11255_v44  ;;  %8703 = vmatmul.mubr.f32.gmra.mrb[86].mxu0 %v11518_v58  ;;  %v4067_v14 = vmul.f32 %v8630_v3, %v11531_v9  ;;  %v4098_v59 = vadd.f32 %v3979_v12, %v11269_v23 }
 0x444   : > { %v8633_v45 = vpop.f32.mrb[60].mxu1  ;;  %14062 = vst [vmem:[#allocation63_spill] sm:$0xff] %v11538_v33  ;;  %v4132_v53 = vadd.f32 %v11306_v36, %v4096_v40  ;;  %v5532_v6 = vadd.f32 %v5531_v35, %v11370_v27  ;;  %vm1068_vm15 = vcmp.ne.s32.totalorder %v778_v61, 15 }
 0x445   : > { %v3989_v57 = vpop.f32.mrb[61].mxu1  ;;  %v4133_v24 = vadd.f32 %v11306_v36, %v4097_v11  ;;  %v4069_v44 = vmul.f32 %v8633_v45, %v11538_v33  ;;  %v4099_v42 = vadd.f32 %v4067_v14, %v11263_v56  ;;  %v4134_v46 = vadd.f32 %v11306_v36, %v4098_v59 }
 0x446   : > { %v4100_v29 = vadd.f32 %v3989_v57, %v11277_v2  ;;  %v4164_v54 = vmax.f32 %v4132_v53, 0.0  ;;  %v5533_v12 = vadd.f32 %v5532_v6, %v11389_v38  ;;  %v11560_v56 = vsel %vm1068_vm15, 1.0, %v11359_v25 }
 0x447   : > { %v4165_v26 = vmax.f32 %v4133_v24, 0.0  ;;  %v4101_v11 = vadd.f32 %v4069_v44, %v11271_v10  ;;  %v4135_v45 = vadd.f32 %v11306_v36, %v4099_v42  ;;  %14064 = vst [vmem:[#allocation65_spill] sm:$0xff] %v11560_v56  ;;  %v4166_v2 = vmax.f32 %v4134_v46, 0.0 }
 0x448   : > { %v8636_v28 = vpop.f32.mrb[62].mxu1  ;;  %v11554_v23 = vmin.f32 %v4164_v54, 6.0  ;;  %v4136_v10 = vadd.f32 %v11306_v36, %v4100_v29  ;;  %v5534_v40 = vadd.f32 %v5533_v12, %v11387_v15  ;;  %v5568_v29 = vmax.f32 %v11327_v39, %v11370_v27 }
 0x449   : > { %v11509_v43 = vpop.f32.mrb[63].mxu1  ;;  %v11552_v3 = vmin.f32 %v4165_v26, 6.0  ;;  %v4137_v57 = vadd.f32 %v11306_v36, %v4101_v11  ;;  %v4071_v35 = vmul.f32 %v8636_v28, %v11560_v56  ;;  %v4167_v61 = vmax.f32 %v4135_v45, 0.0 }
 0x44a   : > { %14063 = vst [vmem:[#allocation64_spill] sm:$0xff] %v11554_v23  ;;  %4473 = vst [vmem:[#allocation2 + $0xd8] sm:$0xff] %v11554_v23  ;;  %8705 = vmatprep.mubr.f32.mxu0 %v11554_v23  ;;  %v11569_v42 = vmin.f32 %v4166_v2, 6.0  ;;  %v4168_v59 = vmax.f32 %v4136_v10, 0.0  ;;  %v4102_v6 = vadd.f32 %v11509_v43, %v11282_v13  ;;  %v5535_v28 = vadd.f32 %v5534_v40, %v11412_v21 }
 0x44b   : > { %4474 = vst [vmem:[#allocation2 + $0xe0] sm:$0xff] %v11552_v3  ;;  %8706 = vmatmul.mubr.f32.gmra.mrb[88].mxu0 %v11552_v3  ;;  %v4169_v24 = vmax.f32 %v4137_v57, 0.0  ;;  %v11571_v14 = vmin.f32 %v4167_v61, 6.0  ;;  %v4103_v44 = vadd.f32 %v4071_v35, %v11279_v32  ;;  %v5570_v54 = vmax.f32 %v11348_v48, %v11387_v15 }
 0x44c   : > { %14065 = vst [vmem:[#allocation66_spill] sm:$0xff] %v11569_v42  ;;  %4475 = vst [vmem:[#allocation2 + $0xe8] sm:$0xff] %v11569_v42  ;;  %8708 = vmatprep.mubr.f32.mxu0 %v11569_v42  ;;  %v11582_v26 = vmin.f32 %v4168_v59, 6.0  ;;  %v5569_v32 = vmax.f32 %v11344_v60, %v11389_v38  ;;  %v5572_v13 = vmax.f32 %v5568_v29, %v11410_v8 }
 0x44d   : > { %14066 = vst [vmem:[#allocation67_spill] sm:$0xff] %v11571_v14  ;;  %v11574_v53 = vmin.f32 %v4169_v24, 6.0  ;;  %4476 = vst [vmem:[#allocation2 + $0xf0] sm:$0xff] %v11571_v14  ;;  %v5574_v43 = vmax.f32 %v5570_v54, %v11421_v17  ;;  %v5536_v27 = vadd.f32 %v5535_v28, %v11410_v8  ;;  %v4139_v38 = vadd.f32 %v11306_v36, %v4103_v44 }
 0x44e   : > { %14068 = vst [vmem:[#allocation69_spill] sm:$0xff] %v11582_v26  ;;  %4477 = vst [vmem:[#allocation2 + $0xf8] sm:$0xff] %v11582_v26  ;;  %v5573_v46 = vmax.f32 %v5569_v32, %v11415_v16  ;;  %v5576_v48 = vmax.f32 %v5572_v13, %v11442_v19  ;;  %v5567_v60 = vmax.f32 %v11323_v5, %v11366_v22 }
 0x44f   : > { %14067 = vst [vmem:[#allocation68_spill] sm:$0xff] %v11574_v53  ;;  %8709 = vmatmul.mubr.f32.gmra.mrb[90].mxu0 %v11571_v14  ;;  %4478 = vst [vmem:[#allocation2 + $0x100] sm:$0xff] %v11574_v53  ;;  %v5537_v11 = vadd.f32 %v5536_v27, %v11415_v16  ;;  %v4171_v2 = vmax.f32 %v4139_v38, 0.0  ;;  %v4138_v61 = vadd.f32 %v11306_v36, %v4102_v6 }
 0x450   : > { %8711 = vmatprep.mubr.f32.mxu0 %v11582_v26  ;;  %v5578_v15 = vmax.f32 %v5574_v43, %v5573_v46  ;;  %v5571_v12 = vmax.f32 %v5567_v60, %v11412_v21 }
 0x451   : > { %v5538_v8 = vadd.f32 %v5537_v11, %v11421_v17  ;;  %v11607_v35 = vmin.f32 %v4171_v2, 6.0  ;;  %v4170_v24 = vmax.f32 %v4138_v61, 0.0 }
 0x452   : > { %v5577_v45 = vmax.f32 %v5576_v48, %v5578_v15  ;;  %v5575_v57 = vmax.f32 %v5571_v12, %v11435_v37 }
 0x453   : > { %8712 = vmatmul.mubr.f32.gmra.mrb[92].mxu0 %v11574_v53  ;;  %14069 = vst [vmem:[#allocation70_spill] sm:$0xff] %v11607_v35  ;;  %4480 = vst [vmem:[#allocation2 + $0x110] sm:$0xff] %v11607_v35  ;;  %v5539_v40 = vadd.f32 %v5538_v8, %v11435_v37  ;;  %v11615_v44 = vmin.f32 %v4170_v24, 6.0 }
 0x454   : > { %v5580_v10 = vmax.f32 %v5575_v57, %v5577_v45 }
 0x455   : > { %v5540_v16 = vadd.f32 %v5539_v40, %v11442_v19  ;;  %14070 = vst [vmem:[#allocation71_spill] sm:$0xff] %v11615_v44  ;;  %4479 = vst [vmem:[#allocation2 + $0x108] sm:$0xff] %v11615_v44  ;;  %8714 = vmatprep.mubr.f32.mxu0 %v11615_v44 }
 0x456   : > { %v5579_v22 = vmax.f32 %v11452_v50, %v5580_v10 }
 0x457   : > { %v5541_v28 = vadd.f32 %v5540_v16, %v11457_v31  ;;  %8715 = vmatmul.mubr.f32.gmra.mrb[94].mxu0 %v11607_v35 }
 0x458   : > { %v5582_v59 = vmax.f32 %v11457_v31, %v5579_v22 }
 0x459   : > { %v5542_v37 = vadd.f32 %v5541_v28, %v11452_v50 }
 0x45a   : > { %v5581_v29 = vmax.f32 %v11461_v51, %v5582_v59 }
 0x45b   : > { %v5543_v6 = vadd.f32 %v5542_v37, %v11475_v20 }
 0x45c   : > { %v5584_v36 = vmax.f32 %v11475_v20, %v5581_v29 }
 0x45d   : > { %v5544_v32 = vadd.f32 %v5543_v6, %v11461_v51  ;;  %v5615_v6 = vld [vmem:[#allocation13 + $0x50] sm:$0xff] }
 0x45e   : > { %v5583_v54 = vmax.f32 %v11495_v52, %v5584_v36 }
 0x45f   : > { %v5545_v43 = vadd.f32 %v5544_v32, %v11493_v1  ;;  %v5617_v32 = vld [vmem:[#allocation13 + $0x60] sm:$0xff] }
 0x460   : > { %v5586_v13 = vmax.f32 %v11493_v1, %v5583_v54  ;;  %v5616_v54 = vld [vmem:[#allocation13 + $0x58] sm:$0xff] }
 0x461   : > { %v5546_v27 = vadd.f32 %v5545_v43, %v11495_v52  ;;  %v6584_v43 = vld [vmem:[#allocation15] sm:$0xff] }
 0x462   : > { %v5585_v46 = vmax.f32 %v11507_v47, %v5586_v13  ;;  %v5618_v13 = vld [vmem:[#allocation13 + $0x68] sm:$0xff] }
 0x463   : > { %v5547_v38 = vadd.f32 %v5546_v27, %v11498_v7  ;;  %v6585_v27 = vld [vmem:[#allocation15 + $0x8] sm:$0xff] }
 0x464   : > { %v5588_v48 = vmax.f32 %v11498_v7, %v5585_v46 }
 0x465   : > { %v5548_v15 = vadd.f32 %v5547_v38, %v11507_v47  ;;  %v6587_v38 = vld [vmem:[#allocation15 + $0x18] sm:$0xff] }
 0x466   : > { %v5587_v60 = vmax.f32 %v11518_v58, %v5588_v48  ;;  %v6586_v48 = vld [vmem:[#allocation15 + $0x10] sm:$0xff] }
 0x467   : > { %v5549_v12 = vadd.f32 %v5548_v15, %v11528_v41 }
 0x468   : > { %v5590_v11 = vmax.f32 %v11528_v41, %v5587_v60  ;;  %v9200_v60 = vpack.c.bf16 %v5616_v54, %v5615_v6 }
 0x469   : > { %v5550_v2 = vadd.f32 %v5549_v12, %v11518_v58  ;;  %v9203_v12 = vpack.c.bf16 %v5618_v13, %v5617_v32 }
 0x46a   : > { %v5589_v45 = vmax.f32 %v11552_v3, %v5590_v11  ;;  %9201 = vmatpush3.bf16.msra.mxu1 %v9200_v60  ;;  %v4999_v60 = vld [vmem:[#allocation2 + $0x81] sm:$0xff] }
 0x46b   : > { %v5551_v8 = vadd.f32 %v5550_v2, %v11554_v23  ;;  %v9212_v2 = vpack.c.bf16 %v6587_v38, %v6586_v48  ;;  %v11672_v48 = vld [vmem:[%s13800_s7] ss:$0 sm:$0xff]  ;;  %v11674_v38 = vld [vmem:[#allocation2 + $0x6f] sm:$0xff] }
 0x46c   : > { %v5592_v57 = vmax.f32 %v11554_v23, %v5589_v45  ;;  %v9208_v45 = vpack.c.bf16 %v6585_v27, %v6584_v43  ;;  %v11660_v43 = vld [vmem:[%s13800_s7 + $0x4] ss:$0 sm:$0xff]  ;;  %14072 = vst [vmem:[#allocation72_spill] sm:$0xff] %v11674_v38 }
 0x46d   : > { %v5552_v40 = vadd.f32 %v5551_v8, %v11552_v3  ;;  %v5619_v8 = vld [vmem:[#allocation13 + $0x70] sm:$0xff]  ;;  %v4576_v27 = vmul.f32 %v11660_v43, %v11442_v19  ;;  %v4580_v56 = vmul.f32 %v11660_v43, %v11461_v51 }
 0x46e   : > { %v5591_v10 = vmax.f32 %v11571_v14, %v5592_v57  ;;  %v14071_v57 = vmov 0.0|0.0   ;;  %9209 = vmatprep.subr.bf16.mxu0 %v9208_v45 }
 0x46f   : > { %v5553_v61 = vadd.f32 %v5552_v40, %v11569_v42  ;;  %9202 = vmatprep.subr.bf16.mxu1 %v14071_v57  ;;  %9211 = vmatpush3.bf16.msra.mxu0 %v9208_v45  ;;  %v5001_v45 = vld [vmem:[#allocation2 + $0x91] sm:$0xff] }
 0x470   : > { %v5594_v22 = vmax.f32 %v11569_v42, %v5591_v10  ;;  %v5620_v10 = vld [vmem:[#allocation13 + $0x78] sm:$0xff]  ;;  %9204 = vmatpush3.bf16.msra.mxu1 %v9203_v12  ;;  %9213 = vmatprep.subr.bf16.mxu0 %v9212_v2  ;;  %v4997_v12 = vld [vmem:[#allocation2 + $0x71] sm:$0xff] }
 0x471   : > { %v5554_v24 = vadd.f32 %v5553_v61, %v11571_v14  ;;  %9205 = vmatprep.subr.bf16.mxu1 %v14071_v57  ;;  %v11686_v57 = vld [vmem:[%s13800_s7 + $0x5] ss:$0 sm:$0xff]  ;;  %v11730_v42 = vld [vmem:[#allocation2 + $0xaf] sm:$0xff] }
 0x472   : > { %v5593_v16 = vmax.f32 %v11574_v53, %v5594_v22  ;;  %14074 = vst [vmem:[#allocation74_spill] sm:$0xff] %v11686_v57 }
 0x473   : > { %v5555_v28 = vadd.f32 %v5554_v24, %v11582_v26  ;;  %v9206_v24 = vpack.c.bf16 %v5620_v10, %v5619_v8  ;;  %9215 = vmatpush3.bf16.msra.mxu0 %v9212_v2  ;;  %v11681_v2 = vld [vmem:[%s13800_s7 + $0x2] ss:$0 sm:$0xff] }
 0x474   : > { %v5595_v59 = vmax.f32 %v11582_v26, %v5593_v16  ;;  %14073 = vst [vmem:[#allocation73_spill] sm:$0xff] %v11681_v2  ;;  %v5003_v10 = vld [vmem:[#allocation2 + $0xa1] sm:$0xff]  ;;  %v5039_v26 = vmul.f32 %v11681_v2, %v4999_v60  ;;  %v5041_v7 = vmul.f32 %v11681_v2, %v5001_v45 }
 0x475   : > { %v5556_v37 = vadd.f32 %v5555_v28, %v11574_v53  ;;  %9207 = vmatpush3.bf16.msra.mxu1 %v9206_v24  ;;  %v4578_v24 = vmul.f32 %v11660_v43, %v11452_v50  ;;  %v5083_v33 = vmul.f32 %v11686_v57, %v5003_v10 }
 0x476   : > { %v5596_v29 = vmax.f32 %v11607_v35, %v5595_v59 }
 0x477   : > { %v5557_v46 = vadd.f32 %v5556_v37, %v11615_v44 }
 0x478   : > { %v5597_v36 = vmax.f32 %v11615_v44, %v5596_v29 }
 0x479   : > { %v5558_v15 = vadd.f32 %v5557_v46, %v11607_v35  ;;  %v11665_v46 = vld [vmem:[%s13800_s7 + $0x1] ss:$0 sm:$0xff] }
 0x47a   : > { %v5598_v11 = vrot.slane %v5597_v36, 4  ;;  %v4536_v8 = vmul.f32 %v11665_v46, %v11442_v19 }
 0x47b   : > { %v5559_v40 = vrot.slane %v5558_v15, 4 }
 0x47c   : > { %v5599_v22 = vmax.f32 %v5597_v36, %v5598_v11  ;;  %v4716_v11 = vld [vmem:[#allocation2 + $0x7f] sm:$0xff] }
 0x47d   : > { %v5560_v61 = vadd.f32 %v5559_v40, %v5558_v15  ;;  %v4534_v15 = vmul.f32 %v11665_v46, %v11421_v17  ;;  %v11693_v40 = vld [vmem:[%s13800_s7 + $0x7] ss:$0 sm:$0xff] }
 0x47e   : > { %v5600_v16 = vrot.slane %v5599_v22, 2  ;;  %v4652_v31 = vmul.f32 %v11693_v40, %v11461_v51  ;;  %v4654_v17 = vmul.f32 %v11693_v40, %v11495_v52 }
 0x47f   : > { %v5561_v59 = vrot.slane %v5560_v61, 2 }
 0x480   : > { %v5601_v28 = vmax.f32 %v5599_v22, %v5600_v16  ;;  %v11698_v22 = vld [vmem:[%s13800_s7 + $0x3] ss:$0 sm:$0xff]  ;;  %v4608_v16 = vadd.f32 %v4576_v27, %v4534_v15  ;;  %v11720_v27 = vld [vmem:[%s13800_s7 + $0x6] ss:$0 sm:$0xff]  ;;  %v4755_v15 = vmul.f32 %v11672_v48, %v4716_v11 }
 0x481   : > { %v5562_v29 = vadd.f32 %v5561_v59, %v5560_v61  ;;  %v4753_v61 = vmul.f32 %v11672_v48, %v11674_v38  ;;  %v4718_v59 = vld [vmem:[#allocation2 + $0x8f] sm:$0xff]  ;;  %v4610_v38 = vadd.f32 %v4578_v24, %v4536_v8 }
 0x482   : > { %v5602_v37 = vrot.slane %v5601_v28, 1  ;;  %v4797_v9 = vmul.f32 %v11698_v22, %v4718_v59  ;;  %v4869_v44 = vmul.f32 %v11720_v27, %v4718_v59 }
 0x483   : > { %v5563_v6 = vrot.slane %v5562_v29, 1 }
 0x484   : > { %v5603_v32 = vmax.f32 %v5601_v28, %v5602_v37  ;;  %v5079_v28 = vmul.f32 %v11686_v57, %v4999_v60  ;;  %v4795_v37 = vmul.f32 %v11698_v22, %v4716_v11  ;;  %v4757_v60 = vmul.f32 %v11672_v48, %v4718_v59 }
 0x485   : > { %v5564_v54 = vadd.f32 %v5563_v6, %v5562_v29  ;;  %v11708_v29 = vld [vmem:[%s13800_s7 + $0x8] ss:$0 sm:$0xff]  ;;  %v5037_v6 = vmul.f32 %v11681_v2, %v4997_v12  ;;  %v4829_v21 = vadd.f32 %v4797_v9, %v4755_v15 }
 0x486   : > { %14075 = vst [vmem:[#allocation75_spill] sm:$0xff] %v11708_v29  ;;  %v5153_v12 = vmul.f32 %v11708_v29, %v5001_v45  ;;  %v5155_v23 = vmul.f32 %v11708_v29, %v5003_v10  ;;  %v4827_v20 = vadd.f32 %v4795_v37, %v4753_v61 }
 0x487   : > { %v5566_v13 = vmul.f32 0.00390625, %v5564_v54  ;;  %v4650_v54 = vmul.f32 %v11693_v40, %v11452_v50  ;;  %v5111_v41 = vadd.f32 %v5079_v28, %v5037_v6  ;;  %v4873_v28 = vmul.f32 %v11720_v27, %v11730_v42 }
 0x488   : > { %v5115_v6 = vadd.f32 %v5083_v33, %v5041_v7  ;;  %v4901_v61 = vadd.f32 %v4869_v44, %v4827_v20  ;;  %v11753_v20 = vld [vmem:[#allocation2 + $0xbf] sm:$0xff] }
 0x489   : > { %v5604_v36 = vadd.f32 %v5603_v32, %v5566_v13  ;;  %v4720_v32 = vld [vmem:[#allocation2 + $0x9f] sm:$0xff]  ;;  %v5081_v13 = vmul.f32 %v11686_v57, %v5001_v45  ;;  %v5185_v49 = vadd.f32 %v5153_v12, %v5111_v41  ;;  %v4538_v45 = vmul.f32 %v11665_v46, %v11452_v50 }
 0x48a   : > { %v4799_v11 = vmul.f32 %v11698_v22, %v4720_v32  ;;  %v4871_v53 = vmul.f32 %v11720_v27, %v4720_v32  ;;  %v5270_v41 = vsub.s32 2, %v11117_v18  ;;  %v4682_v59 = vadd.f32 %v4650_v54, %v4608_v16 }
 0x48b   : > { %8750 = vmatmul.mubr.f32.vlgmr.msra.gmra.mrb[64].mxu1 %v5604_v36  ;;  %v11715_v36 = vld [vmem:[#allocation2 + $0xb1] sm:$0xff]  ;;  %v5113_v35 = vadd.f32 %v5081_v13, %v5039_v26  ;;  %v11747_v26 = vld [vmem:[#allocation2 + $0xc1] sm:$0xff]  ;;  %v4612_v33 = vadd.f32 %v4580_v56, %v4538_v45  ;;  %v4684_v50 = vadd.f32 %v4652_v31, %v4610_v38  ;;  %v5217_v9 = vmul.f32 %v11382_v0, %v5185_v49 }
 0x48c   : > { %v5157_v1 = vmul.f32 %v11708_v29, %v11715_v36  ;;  %v4831_v37 = vadd.f32 %v4799_v11, %v4757_v60  ;;  %v4903_v13 = vadd.f32 %v4871_v53, %v4829_v21  ;;  %v5085_v7 = vmul.f32 %v11686_v57, %v11715_v36  ;;  %v9771_v45 = vld [vmem:[#allocation2 + $0xf] sm:$0xff] }
 0x48d   : > { %v5187_v19 = vadd.f32 %v5155_v23, %v5113_v35  ;;  %v4801_v35 = vmul.f32 %v11698_v22, %v11730_v42  ;;  %v5159_v21 = vmul.f32 %v11708_v29, %v11747_v26  ;;  %v4965_v53 = vadd.f32 %v4901_v61, %v4682_v59  ;;  %v4703_v59 = vld [vmem:[#allocation2 + $0x17] sm:$0xff]  ;;  %v14097_v0 = vld [vmem:[#allocation67_spill] sm:$0xff] }
 0x48e   : > { %v5189_v14 = vadd.f32 %v5157_v1, %v5115_v6  ;;  %v4905_v23 = vadd.f32 %v4873_v28, %v4831_v37  ;;  %v5043_v1 = vmul.f32 %v11681_v2, %v5003_v10  ;;  %v4759_v8 = vmul.f32 %v11672_v48, %v4720_v32 }
 0x48f   : > { %v5219_v44 = vmul.f32 %v11400_v4, %v5187_v19  ;;  %v4686_v56 = vadd.f32 %v4654_v17, %v4612_v33  ;;  %v4967_v49 = vadd.f32 %v4903_v13, %v4684_v50  ;;  %v4582_v38 = vmul.f32 %v11660_v43, %v11495_v52 }
 0x490   : > { %v5221_v31 = vmul.f32 %v11431_v34, %v5189_v14  ;;  %v4875_v16 = vmul.f32 %v11720_v27, %v11753_v20  ;;  %v5117_v24 = vadd.f32 %v5085_v7, %v5043_v1  ;;  %v4540_v19 = vmul.f32 %v11665_v46, %v11461_v51  ;;  %v9774_v1 = vld [vmem:[#allocation2 + $0x11f] sm:$0xff] }
 0x491   : > { %v5249_v10 = vadd.f32 %v5217_v9, %v4965_v53  ;;  %v4969_v54 = vadd.f32 %v4905_v23, %v4686_v56  ;;  %v4833_v15 = vadd.f32 %v4801_v35, %v4759_v8  ;;  %v5251_v12 = vadd.f32 %v5219_v44, %v4967_v49  ;;  %v9773_v9 = vld [vmem:[#allocation2 + $0x7] sm:$0xff] }
 0x492   : > { %v4656_v17 = vmul.f32 %v11693_v40, %v11507_v47  ;;  %v5191_v32 = vadd.f32 %v5159_v21, %v5117_v24  ;;  %v11772_v14 = vrot.slane %v11297_v63, %v5270_v41  ;;  %v4522_v60 = vmul.f32 %v11359_v25, %v11665_v46  ;;  %v9772_v41 = vld [vmem:[#allocation2 + $0x9] sm:$0xff]  ;;  %v9775_v53 = vld [vmem:[#allocation2 + $0x121] sm:$0xff] }
 0x493   : > { %v5253_v11 = vadd.f32 %v5221_v31, %v4969_v54  ;;  %v4614_v28 = vadd.f32 %v4582_v38, %v4540_v19  ;;  %v4907_v6 = vadd.f32 %v4875_v16, %v4833_v15  ;;  %v11777_v51 = vmul.f32 %v9771_v45, %v11672_v48  ;;  %v4704_v31 = vld [vmem:[#allocation2 + $0x1f] sm:$0xff]  ;;  %v4985_v38 = vld [vmem:[#allocation2 + $0x11] sm:$0xff] }
 0x494   : > { %14076 = vst [vmem:[#allocation76_spill] sm:$0xff] %v11772_v14  ;;  %v4564_v61 = vmul.f32 %v11660_v43, %v11327_v39  ;;  %v4563_v37 = vmul.f32 %v11660_v43, %v11323_v5  ;;  %v5285_v63 = vadd.f32 %v11772_v14, %v5249_v10  ;;  %v11785_v13 = vmul.f32 %v9772_v41, %v11681_v2  ;;  %v4986_v10 = vld [vmem:[#allocation2 + $0x19] sm:$0xff] }
 0x495   : > { %v5287_v7 = vadd.f32 %v11772_v14, %v5251_v12  ;;  %v4688_v33 = vadd.f32 %v4656_v17, %v4614_v28  ;;  %v5223_v50 = vmul.f32 %v11465_v62, %v5191_v32  ;;  %v4740_v23 = vmul.f32 %v9773_v9, %v11672_v48  ;;  %v5009_v28 = vld [vmem:[#allocation2 + $0xd1] sm:$0xff] }
 0x496   : > { %v11792_v35 = vmul.f32 %v11359_v25, %v11693_v40  ;;  %v11795_v44 = vmul.f32 %v9774_v1, %v11720_v27  ;;  %v5289_v21 = vadd.f32 %v11772_v14, %v5253_v11  ;;  %v11799_v8 = vmul.f32 %v9775_v53, %v11708_v29 }
 0x497   : > { %v11803_v56 = vmul.f32 %v11665_v46, %v11323_v5  ;;  %v4782_v49 = vmul.f32 %v11698_v22, %v4703_v59  ;;  %v4971_v25 = vadd.f32 %v4907_v6, %v4688_v33  ;;  %v11808_v16 = vmul.f32 %v11665_v46, %v11327_v39 }
 0x498   : > { %14077 = vst [vmem:[#allocation77_spill] sm:$0xff] %v11799_v8  ;;  %v11810_v24 = vadd.f32 %v4564_v61, %v4522_v60  ;;  %v11812_v19 = vadd.f32 %v4563_v37, %v4522_v60  ;;  %v7199_v54 = vmul.f32 -1.442695, %v5285_v63  ;;  %v11815_v15 = vmul.f32 %v11672_v48, %v4703_v59  ;;  %v4726_v61 = vld [vmem:[#allocation2 + $0xcf] sm:$0xff] }
 0x499   : > { %14078 = vst [vmem:[#allocation78_spill] sm:$0xff] %v11803_v56  ;;  %14079 = vst [vmem:[#allocation79_spill] sm:$0xff] %v11808_v16  ;;  %v7201_v5 = vmul.f32 -1.442695, %v5287_v7  ;;  %v5255_v12 = vadd.f32 %v5223_v50, %v4971_v25  ;;  %v11818_v17 = vmul.f32 %v11672_v48, %v4704_v31  ;;  %v4783_v32 = vmul.f32 %v11698_v22, %v4704_v31  ;;  %v11838_v7 = vld [vmem:[#allocation2 + $0xe1] sm:$0xff] }
 0x49a   : > { %14080 = vst [vmem:[#allocation80_spill] sm:$0xff] %v11810_v24  ;;  %14081 = vst [vmem:[#allocation81_spill] sm:$0xff] %v11812_v19  ;;  %v11822_v11 = vmul.f32 %v11681_v2, %v4985_v38  ;;  %v7203_v39 = vmul.f32 -1.442695, %v5289_v21  ;;  %v11824_v6 = vadd.f32 %v4782_v49, %v4740_v23  ;;  %v11827_v60 = vmul.f32 %v11681_v2, %v4986_v10  ;;  %v11848_v21 = vld [vmem:[#allocation2 + $0xdf] sm:$0xff] }
 0x49b   : > { %14082 = vst [vmem:[#allocation82_spill] sm:$0xff] %v11815_v15  ;;  %14083 = vst [vmem:[#allocation83_spill] sm:$0xff] %v11818_v17  ;;  %v5066_v45 = vmul.f32 %v11686_v57, %v4986_v10  ;;  %v5087_v37 = vmul.f32 %v11686_v57, %v11747_v26  ;;  %9637 = vpow2.f32 %v7199_v54  ;;  %v4542_v59 = vmul.f32 %v11665_v46, %v11495_v52  ;;  %v14126_v17 = vld [vmem:[#allocation66_spill] sm:$0xff]  ;;  %v14127_v15 = vld [vmem:[#allocation69_spill] sm:$0xff] }
 0x49c   : > { %14084 = vst [vmem:[#allocation84_spill] sm:$0xff] %v11822_v11  ;;  %14085 = vst [vmem:[#allocation85_spill] sm:$0xff] %v11824_v6  ;;  %v4803_v63 = vmul.f32 %v11698_v22, %v11753_v20  ;;  %v5045_v41 = vmul.f32 %v11681_v2, %v11715_v36  ;;  %9639 = vpow2.f32 %v7201_v5  ;;  %v5291_v33 = vadd.f32 %v11772_v14, %v5255_v12 }
 0x49d   : > { %14086 = vst [vmem:[#allocation86_spill] sm:$0xff] %v11827_v60  ;;  %v5089_v50 = vmul.f32 %v11686_v57, %v5009_v28  ;;  %v5161_v9 = vmul.f32 %v11708_v29, %v5009_v28  ;;  %v4761_v23 = vmul.f32 %v11672_v48, %v11730_v42  ;;  %v4584_v52 = vmul.f32 %v11660_v43, %v11507_v47 }
 0x49e   : > { %9641 = vpow2.f32 %v7203_v39  ;;  %v4805_v1 = vmul.f32 %v11698_v22, %v4726_v61  ;;  %v4877_v36 = vmul.f32 %v11720_v27, %v4726_v61  ;;  %v5047_v53 = vmul.f32 %v11681_v2, %v11747_v26  ;;  %v11863_v39 = vld [vmem:[#allocation2 + $0x28] sm:$0xff] }
 0x49f   : > { %v5119_v31 = vadd.f32 %v5087_v37, %v5045_v41  ;;  %v5163_v49 = vmul.f32 %v11708_v29, %v11838_v7  ;;  %v4763_v42 = vmul.f32 %v11672_v48, %v11753_v20  ;;  %v4835_v38 = vadd.f32 %v4803_v63, %v4761_v23  ;;  %14087 = vst [vmem:[#allocation87_spill] sm:$0xff] %v11863_v39  ;;  %v11865_v37 = vld [vmem:[#allocation2 + $0x30] sm:$0xff] }
 0x4a0   : > { %v4586_v25 = vmul.f32 %v11660_v43, %v11518_v58  ;;  %v4658_v10 = vmul.f32 %v11693_v40, %v11518_v58  ;;  %v7205_v54 = vmul.f32 -1.442695, %v5291_v33  ;;  %v4879_v5 = vmul.f32 %v11720_v27, %v11848_v21  ;;  %14088 = vst [vmem:[#allocation88_spill] sm:$0xff] %v11865_v37 }
 0x4a1   : > { %v5121_v12 = vadd.f32 %v5089_v50, %v5047_v53  ;;  %v5193_v26 = vadd.f32 %v5161_v9, %v5119_v31  ;;  %v11868_v41 = vadd.f32 %v4783_v32, %v11777_v51  ;;  %v11871_v20 = vadd.f32 %v5066_v45, %v11785_v13  ;;  %v11877_v53 = vld [vmem:[#allocation2 + $0xf1] sm:$0xff]  ;;  %v11883_v13 = vld [vmem:[#allocation2 + $0x40] sm:$0xff] }
 0x4a2   : > { %v4544_v63 = vmul.f32 %v11665_v46, %v11507_v47  ;;  %v4616_v23 = vadd.f32 %v4584_v52, %v4542_v59  ;;  %v4837_v33 = vadd.f32 %v4805_v1, %v4763_v42  ;;  %v4909_v62 = vadd.f32 %v4877_v36, %v4835_v38  ;;  %v11879_v31 = vld [vmem:[#allocation2 + $0x38] sm:$0xff]  ;;  %14092 = vst [vmem:[#allocation92_spill] sm:$0xff] %v11883_v13  ;;  %v4730_v1 = vld [vmem:[#allocation2 + $0xef] sm:$0xff] }
 0x4a3   : > { %14089 = vst [vmem:[#allocation89_spill] sm:$0xff] %v11868_v41  ;;  %14090 = vst [vmem:[#allocation90_spill] sm:$0xff] %v11871_v20  ;;  %v4660_v50 = vmul.f32 %v11693_v40, %v11552_v3  ;;  %v5195_v9 = vadd.f32 %v5163_v49, %v5121_v12  ;;  %v5091_v51 = vmul.f32 %v11686_v57, %v11838_v7  ;;  %9643 = vpow2.f32 %v7205_v54  ;;  %v14098_v20 = vld [vmem:[#allocation50_spill] sm:$0xff] }
 0x4a4   : > { %14091 = vst [vmem:[#allocation91_spill] sm:$0xff] %v11879_v31  ;;  %v4618_v34 = vadd.f32 %v4586_v25, %v4544_v63  ;;  %v11887_v47 = vmul.f32 %v11665_v46, %v11863_v39  ;;  %v11891_v32 = vmul.f32 %v11665_v46, %v11865_v37  ;;  %v4690_v45 = vadd.f32 %v4658_v10, %v4616_v23  ;;  %v9778_v37 = vld [vmem:[#allocation2 + $0x88] sm:$0xff] }
 0x4a5   : > { %v4911_v59 = vadd.f32 %v4879_v5, %v4837_v33  ;;  %v5225_v52 = vmul.f32 %v11470_v55, %v5193_v26  ;;  %v9638_v36 = vpop.eup %9637  ;;  %v4807_v49 = vmul.f32 %v11698_v22, %v11848_v21  ;;  %v5049_v42 = vmul.f32 %v11681_v2, %v5009_v28 }
 0x4a6   : > { %14093 = vst [vmem:[#allocation93_spill] sm:$0xff] %v11887_v47  ;;  %14094 = vst [vmem:[#allocation94_spill] sm:$0xff] %v11891_v32  ;;  %v5165_v38 = vmul.f32 %v11708_v29, %v11877_v53  ;;  %v11901_v25 = vmul.f32 %v11665_v46, %v11879_v31  ;;  %v9640_v12 = vpop.eup %9639  ;;  %v4973_v10 = vadd.f32 %v4909_v62, %v4690_v45  ;;  %v5413_v4 = vadd.f32 1.0, %v9638_v36 }
 0x4a7   : > { %v4692_v54 = vadd.f32 %v4660_v50, %v4618_v34  ;;  %v5227_v5 = vmul.f32 %v11473_v30, %v5195_v9  ;;  %v11906_v26 = vmul.f32 %v11665_v46, %v11883_v13  ;;  %v4765_v23 = vmul.f32 %v11672_v48, %v4726_v61 }
 0x4a8   : > { %14095 = vst [vmem:[#allocation95_spill] sm:$0xff] %v11901_v25  ;;  %v9642_v63 = vpop.eup %9641  ;;  %v4588_v28 = vmul.f32 %v11660_v43, %v11552_v3  ;;  %v4881_v33 = vmul.f32 %v11720_v27, %v4730_v1  ;;  %v5123_v55 = vadd.f32 %v5091_v51, %v5049_v42  ;;  %v4546_v62 = vmul.f32 %v11665_v46, %v11518_v58  ;;  %v14101_v42 = vld [vmem:[#allocation52_spill] sm:$0xff] }
 0x4a9   : > { %14096 = vst [vmem:[#allocation96_spill] sm:$0xff] %v11906_v26  ;;  %v4975_v34 = vadd.f32 %v4911_v59, %v4692_v54  ;;  %v5257_v50 = vadd.f32 %v5225_v52, %v4973_v10  ;;  %v5415_v9 = vadd.f32 1.0, %v9640_v12  ;;  %v4839_v45 = vadd.f32 %v4807_v49, %v4765_v23  ;;  %v4732_v54 = vld [vmem:[#allocation2 + $0xff] sm:$0xff]  ;;  %v14128_v26 = vld [vmem:[#allocation71_spill] sm:$0xff] }
 0x4aa   : > { %v5197_v30 = vadd.f32 %v5165_v38, %v5123_v55  ;;  %v4662_v18 = vmul.f32 %v11693_v40, %v14097_v0  ;;  %v11918_v61 = vmul.f32 %v11660_v43, %v14098_v20  ;;  %v11922_v60 = vmul.f32 %v11693_v40, %v14098_v20  ;;  %v14103_v55 = vld [vmem:[#allocation49_spill] sm:$0xff]  ;;  %v14104_v38 = vld [vmem:[#allocation72_spill] sm:$0xff] }
 0x4ab   : > { %v5417_v51 = vadd.f32 1.0, %v9642_v63  ;;  %v5259_v36 = vadd.f32 %v5227_v5, %v4975_v34  ;;  %v11926_v58 = vmul.f32 %v11693_v40, %v14101_v42  ;;  %v4620_v59 = vadd.f32 %v4588_v28, %v4546_v62  ;;  %v14106_v63 = vld [vmem:[#allocation60_spill] sm:$0xff] }
 0x4ac   : > { %14099 = vst [vmem:[#allocation67_spill] sm:$0xff] %v11918_v61  ;;  %14100 = vst [vmem:[#allocation50_spill] sm:$0xff] %v11922_v60  ;;  %v4913_v52 = vadd.f32 %v4881_v33, %v4839_v45  ;;  %v11930_v49 = vmul.f32 %v11665_v46, %v14103_v55  ;;  %v11934_v12 = vmul.f32 %v11698_v22, %v14104_v38  ;;  %9645 = vrcp.f32 %v5413_v4  ;;  %v14107_v4 = vld [vmem:[#allocation70_spill] sm:$0xff] }
 0x4ad   : > { %14102 = vst [vmem:[#allocation52_spill] sm:$0xff] %v11926_v58  ;;  %v5293_v20 = vadd.f32 %v11772_v14, %v5257_v50  ;;  %v4809_v10 = vmul.f32 %v11698_v22, %v4730_v1  ;;  %9647 = vrcp.f32 %v5415_v9  ;;  %v4548_v5 = vmul.f32 %v11665_v46, %v11552_v3  ;;  %v9644_v33 = vpop.eup %9643 }
 0x4ae   : > { %14105 = vst [vmem:[#allocation49_spill] sm:$0xff] %v11934_v12  ;;  %v5229_v23 = vmul.f32 %v14106_v63, %v5197_v30  ;;  %v4694_v28 = vadd.f32 %v4662_v18, %v4620_v59  ;;  %9649 = vrcp.f32 %v5417_v51  ;;  %v4767_v62 = vmul.f32 %v11672_v48, %v11848_v21  ;;  %v14108_v51 = vld [vmem:[#allocation68_spill] sm:$0xff] }
 0x4af   : > { %v5295_v34 = vadd.f32 %v11772_v14, %v5259_v36  ;;  %v4594_v50 = vmul.f32 %v11660_v43, %v14107_v4  ;;  %v4883_v45 = vmul.f32 %v11720_v27, %v4732_v54  ;;  %v4550_v9 = vmul.f32 %v11665_v46, %v14097_v0 }
 0x4b0   : > { %v4590_v3 = vmul.f32 %v11660_v43, %v14097_v0  ;;  %v4977_v30 = vadd.f32 %v4913_v52, %v4694_v28  ;;  %v7207_v18 = vmul.f32 -1.442695, %v5293_v20  ;;  %v4841_v42 = vadd.f32 %v4809_v10, %v4767_v62 }
 0x4b1   : > { %v4552_v59 = vmul.f32 %v11665_v46, %v14108_v51  ;;  %v4592_v21 = vmul.f32 %v11660_v43, %v14108_v51  ;;  %v5419_v36 = vadd.f32 1.0, %v9644_v33  ;;  %v5093_v55 = vmul.f32 %v11686_v57, %v11877_v53 }
 0x4b2   : > { %v4664_v38 = vmul.f32 %v11693_v40, %v14108_v51  ;;  %v5261_v63 = vadd.f32 %v5229_v23, %v4977_v30  ;;  %v5051_v0 = vmul.f32 %v11681_v2, %v11838_v7  ;;  %v7209_v52 = vmul.f32 -1.442695, %v5295_v34  ;;  %v9777_v30 = vld [vmem:[#allocation2 + $0x78] sm:$0xff] }
 0x4b3   : > { %v4626_v20 = vadd.f32 %v4594_v50, %v4552_v59  ;;  %v4666_v10 = vmul.f32 %v11693_v40, %v14107_v4  ;;  %v11964_v28 = vmul.f32 %v11672_v48, %v4730_v1  ;;  %v11967_v33 = vmul.f32 %v11672_v48, %v4732_v54  ;;  %v14118_v59 = vld [vmem:[#allocation57_spill] sm:$0xff] }
 0x4b4   : > { %v4915_v62 = vadd.f32 %v4883_v45, %v4841_v42  ;;  %v4622_v11 = vadd.f32 %v4590_v3, %v4548_v5  ;;  %9651 = vpow2.f32 %v7207_v18  ;;  %v11970_v51 = vmul.f32 %v11698_v22, %v4732_v54  ;;  %v11986_v54 = vld [vmem:[#allocation2 + $0x68] sm:$0xff]  ;;  %v14117_v18 = vld [vmem:[#allocation53_spill] sm:$0xff] }
 0x4b5   : > { %v11974_v7 = vmul.f32 %v11681_v2, %v11877_v53  ;;  %v4624_v23 = vadd.f32 %v4592_v21, %v4550_v9  ;;  %9653 = vrcp.f32 %v5419_v36  ;;  %v11976_v34 = vadd.f32 %v5093_v55, %v5051_v0  ;;  %14114 = vst [vmem:[#allocation99_spill] sm:$0xff] %v11986_v54  ;;  %v14120_v55 = vld [vmem:[#allocation58_spill] sm:$0xff]  ;;  %v14121_v0 = vld [vmem:[#allocation59_spill] sm:$0xff] }
 0x4b6   : > { %v4696_v4 = vadd.f32 %v4664_v38, %v4622_v11  ;;  %v5297_v1 = vadd.f32 %v11772_v14, %v5261_v63  ;;  %v11979_v50 = vpop.eup %9645  ;;  %9655 = vpow2.f32 %v7209_v52  ;;  %v11984_v5 = vadd.f32 %v11792_v35, %v4626_v20  ;;  %v5057_v11 = vld [vmem:[#allocation2 + $0x111] sm:$0xff] }
 0x4b7   : > { %14109 = vst [vmem:[#allocation72_spill] sm:$0xff] %v11974_v7  ;;  %14110 = vst [vmem:[#allocation70_spill] sm:$0xff] %v11976_v34  ;;  %v11981_v45 = vadd.f32 %v4666_v10, %v4624_v23  ;;  %v4533_v53 = vmul.f32 %v11986_v54, %v11665_v46  ;;  %v11990_v9 = vpop.eup %9647  ;;  %v4535_v63 = vmul.f32 %v9777_v30, %v11665_v46  ;;  %v14122_v20 = vld [vmem:[#allocation61_spill] sm:$0xff] }
 0x4b8   : > { %14111 = vst [vmem:[#allocation68_spill] sm:$0xff] %v11979_v50  ;;  %14113 = vst [vmem:[#allocation98_spill] sm:$0xff] %v11984_v5  ;;  %v11992_v3 = vadd.f32 %v4915_v62, %v4696_v4  ;;  %v4537_v42 = vmul.f32 %v11665_v46, %v14117_v18  ;;  %v4539_v21 = vmul.f32 %v11665_v46, %v14118_v59  ;;  %v11999_v36 = vpop.eup %9649  ;;  %v14123_v62 = vld [vmem:[#allocation64_spill] sm:$0xff]  ;;  %v7211_v4 = vmul.f32 -1.442695, %v5297_v1 }
 0x4b9   : > { %14112 = vst [vmem:[#allocation97_spill] sm:$0xff] %v11981_v45  ;;  %14115 = vst [vmem:[#allocation100_spill] sm:$0xff] %v11990_v9  ;;  %v4541_v38 = vmul.f32 %v11665_v46, %v14120_v55  ;;  %v4543_v52 = vmul.f32 %v11665_v46, %v14121_v0  ;;  %v4545_v10 = vmul.f32 %v11665_v46, %v14122_v20  ;;  %v4846_v45 = vld [vmem:[#allocation2 + $0x117] sm:$0xff] }
 0x4ba   : > { %14116 = vst [vmem:[#allocation101_spill] sm:$0xff] %v11992_v3  ;;  %14119 = vst [vmem:[#allocation53_spill] sm:$0xff] %v11999_v36  ;;  %v4547_v23 = vmul.f32 %v11665_v46, %v14123_v62  ;;  %v4573_v9 = vmul.f32 %v11986_v54, %v11660_v43  ;;  %v4575_v50 = vmul.f32 %v9777_v30, %v11660_v43  ;;  %9657 = vpow2.f32 %v7211_v4  ;;  %v4729_v4 = vld [vmem:[#allocation2 + $0xe7] sm:$0xff] }
 0x4bb   : > { %v4577_v36 = vmul.f32 %v11660_v43, %v14117_v18  ;;  %v12015_v58 = vmul.f32 %v11686_v57, %v5057_v11  ;;  %v12018_v60 = vmul.f32 %v11708_v29, %v5057_v11  ;;  %v4579_v41 = vmul.f32 %v11660_v43, %v14118_v59 }
 0x4bc   : > { %v4581_v1 = vmul.f32 %v11660_v43, %v14120_v55  ;;  %v4549_v6 = vmul.f32 %v11665_v46, %v14126_v17  ;;  %v4551_v24 = vmul.f32 %v11665_v46, %v14127_v15  ;;  %v4583_v18 = vmul.f32 %v11660_v43, %v14121_v0 }
 0x4bd   : > { %14124 = vst [vmem:[#allocation57_spill] sm:$0xff] %v12015_v58  ;;  %14125 = vst [vmem:[#allocation58_spill] sm:$0xff] %v12018_v60  ;;  %v4585_v19 = vmul.f32 %v11660_v43, %v14122_v20  ;;  %v4587_v11 = vmul.f32 %v11660_v43, %v14123_v62  ;;  %v4589_v54 = vmul.f32 %v11660_v43, %v14126_v17 }
 0x4be   : > { %v4591_v61 = vmul.f32 %v11660_v43, %v14127_v15  ;;  %v4593_v25 = vmul.f32 %v11660_v43, %v14128_v26  ;;  %v4605_v46 = vadd.f32 %v4573_v9, %v11930_v49  ;;  %v4607_v32 = vadd.f32 %v4575_v50, %v4533_v53  ;;  %v12041_v16 = vpop.eup %9651  ;;  %v12057_v53 = vld [vmem:[#allocation2 + $0x57] sm:$0xff] }
 0x4bf   : > { %v4609_v47 = vadd.f32 %v4577_v36, %v4535_v63  ;;  %14129 = vst [vmem:[#allocation59_spill] sm:$0xff] %v12041_v16  ;;  %v4611_v56 = vadd.f32 %v4579_v41, %v4537_v42  ;;  %v4613_v13 = vadd.f32 %v4581_v1, %v4539_v21  ;;  %v4647_v31 = vmul.f32 %v9777_v30, %v11693_v40  ;;  %v12045_v12 = vpop.eup %9653  ;;  %v12065_v42 = vld [vmem:[#allocation2 + $0x67] sm:$0xff] }
 0x4c0   : > { %v4649_v39 = vmul.f32 %v9778_v37, %v11693_v40  ;;  %14130 = vst [vmem:[#allocation61_spill] sm:$0xff] %v12045_v12  ;;  %v4651_v3 = vmul.f32 %v11693_v40, %v14118_v59  ;;  %v4653_v43 = vmul.f32 %v11693_v40, %v14120_v55  ;;  %v4655_v49 = vmul.f32 %v11693_v40, %v14121_v0  ;;  %v12055_v50 = vpop.eup %9655  ;;  %v4721_v0 = vld [vmem:[#allocation2 + $0xa7] sm:$0xff] }
 0x4c1   : > { %v4657_v41 = vmul.f32 %v11693_v40, %v14122_v20  ;;  %14131 = vst [vmem:[#allocation64_spill] sm:$0xff] %v12055_v50  ;;  %14132 = vst [vmem:[#allocation66_spill] sm:$0xff] %v12057_v53  ;;  %v4615_v9 = vadd.f32 %v4583_v18, %v4541_v38  ;;  %v12059_v37 = vadd.f32 %v4585_v19, %v4543_v52  ;;  %v4715_v19 = vld [vmem:[#allocation2 + $0x77] sm:$0xff]  ;;  %v4717_v38 = vld [vmem:[#allocation2 + $0x87] sm:$0xff] }
 0x4c2   : > { %v12061_v30 = vadd.f32 %v4587_v11, %v4545_v10  ;;  %v12063_v63 = vadd.f32 %v4589_v54, %v4547_v23  ;;  %14133 = vst [vmem:[#allocation69_spill] sm:$0xff] %v12065_v42  ;;  %v12067_v59 = vadd.f32 %v4591_v61, %v4549_v6  ;;  %v12069_v21 = vadd.f32 %v4593_v25, %v4551_v24  ;;  %v4719_v61 = vld [vmem:[#allocation2 + $0x97] sm:$0xff]  ;;  %v4772_v1 = vld [vmem:[#allocation2 + $0x107] sm:$0xff]  ;;  %v4773_v18 = vld [vmem:[#allocation2 + $0x10f] sm:$0xff] }
 0x4c3   : > { %v12073_v36 = vmul.f32 %v11693_v40, %v14123_v62  ;;  %v12077_v55 = vmul.f32 %v11693_v40, %v14126_v17  ;;  %v12081_v54 = vmul.f32 %v11693_v40, %v14127_v15  ;;  %v12085_v6 = vmul.f32 %v11693_v40, %v14128_v26  ;;  %v4723_v52 = vld [vmem:[#allocation2 + $0xb7] sm:$0xff]  ;;  %v4725_v15 = vld [vmem:[#allocation2 + $0xc7] sm:$0xff] }
 0x4c4   : > { %v12087_v24 = vadd.f32 %v4647_v31, %v4605_v46  ;;  %v12089_v25 = vadd.f32 %v4649_v39, %v4607_v32  ;;  %v12091_v20 = vadd.f32 %v4651_v3, %v4609_v47  ;;  %v12093_v17 = vadd.f32 %v4653_v43, %v4611_v56  ;;  %v4727_v23 = vld [vmem:[#allocation2 + $0xd7] sm:$0xff] }
 0x4c5   : > { %v12095_v10 = vadd.f32 %v4655_v49, %v4613_v13  ;;  %v12097_v62 = vadd.f32 %v4657_v41, %v4615_v9  ;;  %v4750_v40 = vmul.f32 %v11672_v48, %v12057_v53  ;;  %v4752_v39 = vmul.f32 %v11672_v48, %v12065_v42  ;;  %v4731_v32 = vld [vmem:[#allocation2 + $0xf7] sm:$0xff]  ;;  %v12114_v41 = vpop.eup %9657 }
 0x4c6   : > { %14134 = vst [vmem:[#allocation71_spill] sm:$0xff] %v12089_v25  ;;  %14135 = vst [vmem:[#allocation102_spill] sm:$0xff] %v12091_v20  ;;  %v4754_v31 = vmul.f32 %v11672_v48, %v4715_v19  ;;  %v4756_v47 = vmul.f32 %v11672_v48, %v4717_v38  ;;  %v4758_v56 = vmul.f32 %v11672_v48, %v4719_v61 }
 0x4c7   : > { %14136 = vst [vmem:[#allocation103_spill] sm:$0xff] %v12093_v17  ;;  %14137 = vst [vmem:[#allocation104_spill] sm:$0xff] %v12095_v10  ;;  %v4760_v13 = vmul.f32 %v11672_v48, %v4721_v0  ;;  %v4762_v26 = vmul.f32 %v11672_v48, %v4723_v52  ;;  %v4792_v3 = vmul.f32 %v11698_v22, %v12065_v42 }
 0x4c8   : > { %14138 = vst [vmem:[#allocation105_spill] sm:$0xff] %v12097_v62  ;;  %v4794_v11 = vmul.f32 %v11698_v22, %v4715_v19  ;;  %v4796_v46 = vmul.f32 %v11698_v22, %v4717_v38  ;;  %v4798_v43 = vmul.f32 %v11698_v22, %v4719_v61  ;;  %v4800_v49 = vmul.f32 %v11698_v22, %v4721_v0 }
 0x4c9   : > { %14139 = vst [vmem:[#allocation106_spill] sm:$0xff] %v12114_v41  ;;  %v4764_v9 = vmul.f32 %v11672_v48, %v4725_v15  ;;  %v4766_v12 = vmul.f32 %v11672_v48, %v4727_v23  ;;  %v4768_v53 = vmul.f32 %v11672_v48, %v4729_v4  ;;  %v4802_v42 = vmul.f32 %v11698_v22, %v4723_v52 }
 0x4ca   : > { %v4770_v50 = vmul.f32 %v11672_v48, %v4731_v32  ;;  %v4804_v16 = vmul.f32 %v11698_v22, %v4725_v15  ;;  %v4806_v8 = vmul.f32 %v11698_v22, %v4727_v23  ;;  %v4808_v60 = vmul.f32 %v11698_v22, %v4729_v4 }
 0x4cb   : > { %v4810_v14 = vmul.f32 %v11698_v22, %v4731_v32  ;;  %v4812_v41 = vmul.f32 %v11698_v22, %v4772_v1  ;;  %v4813_v34 = vmul.f32 %v11698_v22, %v4773_v18  ;;  %v4824_v58 = vadd.f32 %v4792_v3, %v4750_v40 }
 0x4cc   : > { %v4826_v7 = vadd.f32 %v4794_v11, %v4752_v39  ;;  %v4828_v29 = vadd.f32 %v4796_v46, %v4754_v31  ;;  %v4830_v57 = vadd.f32 %v4798_v43, %v4756_v47  ;;  %v4832_v2 = vadd.f32 %v4800_v49, %v4758_v56  ;;  %v14151_v43 = vld [vmem:[#allocation40_spill] sm:$0xff] }
 0x4cd   : > { %v4834_v5 = vadd.f32 %v4802_v42, %v4760_v13  ;;  %v4866_v48 = vmul.f32 %v11720_v27, %v4715_v19  ;;  %v4868_v62 = vmul.f32 %v11720_v27, %v4717_v38  ;;  %v4870_v10 = vmul.f32 %v11720_v27, %v4719_v61 }
 0x4ce   : > { %v4872_v17 = vmul.f32 %v11720_v27, %v4721_v0  ;;  %v4874_v20 = vmul.f32 %v11720_v27, %v4723_v52  ;;  %v4876_v25 = vmul.f32 %v11720_v27, %v4725_v15  ;;  %v4878_v22 = vmul.f32 %v11720_v27, %v4727_v23 }
 0x4cf   : > { %v4836_v40 = vadd.f32 %v4804_v16, %v4762_v26  ;;  %v4880_v39 = vmul.f32 %v11720_v27, %v4729_v4  ;;  %v4882_v42 = vmul.f32 %v11720_v27, %v4731_v32  ;;  %v4884_v31 = vmul.f32 %v11720_v27, %v4772_v1 }
 0x4d0   : > { %v4838_v19 = vadd.f32 %v4806_v8, %v4764_v9  ;;  %v4840_v47 = vadd.f32 %v4808_v60, %v4766_v12  ;;  %v4844_v38 = vadd.f32 %v4812_v41, %v4770_v50  ;;  %v4886_v61 = vmul.f32 %v11720_v27, %v4846_v45  ;;  %v14141_v12 = vld [vmem:[#allocation33_spill] sm:$0xff]  ;;  %v12164_v41 = vld [vmem:[#allocation2 + $0x69] sm:$0xff] }
 0x4d1   : > { %v4842_v56 = vadd.f32 %v4810_v14, %v4768_v53  ;;  %v4898_v0 = vadd.f32 %v4866_v48, %v4824_v58  ;;  %v4900_v13 = vadd.f32 %v4868_v62, %v4826_v7  ;;  %v4902_v52 = vadd.f32 %v4870_v10, %v4828_v29  ;;  %v14144_v53 = vld [vmem:[#allocation36_spill] sm:$0xff]  ;;  %v12156_v62 = vld [vmem:[#allocation2 + $0x59] sm:$0xff]  ;;  %14152 = vst [vmem:[#allocation108_spill] sm:$0xff] %v12164_v41 }
 0x4d2   : > { %v4904_v3 = vadd.f32 %v4872_v17, %v4830_v57  ;;  %v4906_v15 = vadd.f32 %v4874_v20, %v4832_v2  ;;  %v4908_v11 = vadd.f32 %v4876_v25, %v4834_v5  ;;  %v4910_v23 = vadd.f32 %v4878_v22, %v4836_v40  ;;  %v14140_v2 = vld [vmem:[#allocation27_spill] sm:$0xff]  ;;  %v14148_v17 = vld [vmem:[#allocation38_spill] sm:$0xff]  ;;  %14150 = vst [vmem:[#allocation107_spill] sm:$0xff] %v12156_v62 }
 0x4d3   : > { %v4885_v16 = vmul.f32 %v11720_v27, %v4773_v18  ;;  %v4912_v4 = vadd.f32 %v4880_v39, %v4838_v19  ;;  %v4914_v26 = vadd.f32 %v4882_v42, %v4840_v47  ;;  %v4916_v32 = vadd.f32 %v4884_v31, %v4842_v56  ;;  %v14142_v27 = vld [vmem:[#allocation34_spill] sm:$0xff]  ;;  %v14143_v5 = vld [vmem:[#allocation35_spill] sm:$0xff]  ;;  %v14156_v42 = vld [vmem:[#allocation104_spill] sm:$0xff] }
 0x4d4   : > { %v4691_v8 = vadd.f32 %v12073_v36, %v12059_v37  ;;  %v4693_v60 = vadd.f32 %v12077_v55, %v12061_v30  ;;  %v4845_v14 = vadd.f32 %v4813_v34, %v11967_v33  ;;  %v4918_v58 = vadd.f32 %v4886_v61, %v4844_v38  ;;  %v14145_v37 = vld [vmem:[#allocation32_spill] sm:$0xff]  ;;  %v14146_v20 = vld [vmem:[#allocation31_spill] sm:$0xff]  ;;  %v14147_v33 = vld [vmem:[#allocation37_spill] sm:$0xff] }
 0x4d5   : > { %v4843_v57 = vadd.f32 %v11970_v51, %v11964_v28  ;;  %v4930_v29 = vmul.f32 %v14140_v2, %v4898_v0  ;;  %v4932_v7 = vmul.f32 %v14141_v12, %v4900_v13  ;;  %v4934_v45 = vmul.f32 %v14142_v27, %v4902_v52  ;;  %v14149_v28 = vld [vmem:[#allocation39_spill] sm:$0xff]  ;;  %v14154_v39 = vld [vmem:[#allocation102_spill] sm:$0xff]  ;;  %v14157_v19 = vld [vmem:[#allocation105_spill] sm:$0xff] }
 0x4d6   : > { %v4936_v50 = vmul.f32 %v14143_v5, %v4904_v3  ;;  %v4938_v25 = vmul.f32 %v14144_v53, %v4906_v15  ;;  %v4940_v36 = vmul.f32 %v14145_v37, %v4908_v11  ;;  %v4942_v30 = vmul.f32 %v14146_v20, %v4910_v23  ;;  %v14153_v22 = vld [vmem:[#allocation71_spill] sm:$0xff]  ;;  %v5006_v38 = vld [vmem:[#allocation2 + $0xb9] sm:$0xff] }
 0x4d7   : > { %v4917_v55 = vadd.f32 %v4885_v16, %v4843_v57  ;;  %v4944_v34 = vmul.f32 %v14147_v33, %v4912_v4  ;;  %v4946_v10 = vmul.f32 %v14148_v17, %v4914_v26  ;;  %v4948_v51 = vmul.f32 %v14149_v28, %v4916_v32  ;;  %v14158_v13 = vld [vmem:[#allocation97_spill] sm:$0xff]  ;;  %v5008_v3 = vld [vmem:[#allocation2 + $0xc9] sm:$0xff]  ;;  %v14159_v16 = vld [vmem:[#allocation98_spill] sm:$0xff] }
 0x4d8   : > { %v4695_v1 = vadd.f32 %v12081_v54, %v12063_v63  ;;  %v4697_v18 = vadd.f32 %v12085_v6, %v12067_v59  ;;  %v4919_v46 = vadd.f32 %v11795_v44, %v4845_v14  ;;  %v4950_v49 = vmul.f32 %v14151_v43, %v4918_v58  ;;  %v4998_v54 = vld [vmem:[#allocation2 + $0x79] sm:$0xff]  ;;  %v5000_v59 = vld [vmem:[#allocation2 + $0x89] sm:$0xff]  ;;  %v5015_v14 = vld [vmem:[#allocation2 + $0x101] sm:$0xff] }
 0x4d9   : > { %v4699_v9 = vadd.f32 %v11792_v35, %v12069_v21  ;;  %v12169_v48 = vadd.f32 %v4930_v29, %v12087_v24  ;;  %v12172_v40 = vadd.f32 %v4932_v7, %v14153_v22  ;;  %v12175_v63 = vadd.f32 %v4934_v45, %v14154_v39  ;;  %v14155_v6 = vld [vmem:[#allocation103_spill] sm:$0xff]  ;;  %v5002_v21 = vld [vmem:[#allocation2 + $0x99] sm:$0xff] }
 0x4da   : > { %v12178_v44 = vadd.f32 %v4936_v50, %v14155_v6  ;;  %v12181_v31 = vadd.f32 %v4938_v25, %v14156_v42  ;;  %v12184_v47 = vadd.f32 %v4940_v36, %v14157_v19  ;;  %v12186_v35 = vadd.f32 %v4942_v30, %v4691_v8  ;;  %v5004_v24 = vld [vmem:[#allocation2 + $0xa9] sm:$0xff]  ;;  %v5010_v15 = vld [vmem:[#allocation2 + $0xd9] sm:$0xff] }
 0x4db   : > { %v12188_v61 = vadd.f32 %v4944_v34, %v4693_v60  ;;  %v12190_v56 = vadd.f32 %v4946_v10, %v4695_v1  ;;  %v12192_v0 = vadd.f32 %v4948_v51, %v4697_v18  ;;  %v12195_v52 = vadd.f32 %v4917_v55, %v14158_v13  ;;  %v5012_v11 = vld [vmem:[#allocation2 + $0xe9] sm:$0xff]  ;;  %v5014_v26 = vld [vmem:[#allocation2 + $0xf9] sm:$0xff] }
 0x4dc   : > { %v12197_v23 = vadd.f32 %v4950_v49, %v4699_v9  ;;  %v12200_v4 = vadd.f32 %v4919_v46, %v14159_v16  ;;  %v14160_v32 = vld [vmem:[#allocation73_spill] sm:$0xff]  ;;  %v5056_v55 = vld [vmem:[#allocation2 + $0x109] sm:$0xff]  ;;  %v14161_v34 = vld [vmem:[#allocation74_spill] sm:$0xff] }
 0x4dd   : > { %v5034_v8 = vmul.f32 %v14160_v32, %v12156_v62  ;;  %v5036_v60 = vmul.f32 %v14160_v32, %v12164_v41  ;;  %v5038_v58 = vmul.f32 %v14160_v32, %v4998_v54  ;;  %v5040_v57 = vmul.f32 %v14160_v32, %v5000_v59  ;;  %v14162_v42 = vld [vmem:[#allocation75_spill] sm:$0xff] }
 0x4de   : > { %v5042_v29 = vmul.f32 %v14160_v32, %v5002_v21  ;;  %v5044_v7 = vmul.f32 %v14160_v32, %v5004_v24  ;;  %v5046_v45 = vmul.f32 %v14160_v32, %v5006_v38  ;;  %v5048_v50 = vmul.f32 %v14160_v32, %v5008_v3 }
 0x4df   : > { %v5050_v25 = vmul.f32 %v14160_v32, %v5010_v15  ;;  %v12214_v36 = vmul.f32 %v14160_v32, %v5012_v11  ;;  %v5054_v30 = vmul.f32 %v14160_v32, %v5014_v26  ;;  %v5076_v10 = vmul.f32 %v14161_v34, %v12164_v41 }
 0x4e0   : > { %v5078_v51 = vmul.f32 %v14161_v34, %v4998_v54  ;;  %v5080_v1 = vmul.f32 %v14161_v34, %v5000_v59  ;;  %v5055_v18 = vmul.f32 %v14160_v32, %v5015_v14  ;;  %v5082_v46 = vmul.f32 %v14161_v34, %v5002_v21 }
 0x4e1   : > { %v5084_v49 = vmul.f32 %v14161_v34, %v5004_v24  ;;  %v5086_v9 = vmul.f32 %v14161_v34, %v5006_v38  ;;  %v5088_v22 = vmul.f32 %v14161_v34, %v5008_v3  ;;  %v5090_v39 = vmul.f32 %v14161_v34, %v5010_v15 }
 0x4e2   : > { %v5092_v6 = vmul.f32 %v14161_v34, %v5012_v11  ;;  %v5150_v19 = vmul.f32 %v14162_v42, %v4998_v54  ;;  %v12230_v13 = vmul.f32 %v14161_v34, %v5014_v26  ;;  %v5095_v16 = vmul.f32 %v14161_v34, %v5015_v14 }
 0x4e3   : > { %v5096_v32 = vmul.f32 %v14161_v34, %v5056_v55  ;;  %v5152_v43 = vmul.f32 %v14162_v42, %v5000_v59  ;;  %v5108_v28 = vadd.f32 %v5076_v10, %v5034_v8  ;;  %v5110_v17 = vadd.f32 %v5078_v51, %v5036_v60  ;;  %v6588_v60 = vld [vmem:[#allocation15 + $0x20] sm:$0xff] }
 0x4e4   : > { %v5112_v33 = vadd.f32 %v5080_v1, %v5038_v58  ;;  %v5154_v20 = vmul.f32 %v14162_v42, %v5002_v21  ;;  %v5114_v37 = vadd.f32 %v5082_v46, %v5040_v57  ;;  %v5116_v53 = vadd.f32 %v5084_v49, %v5042_v29  ;;  %v6589_v58 = vld [vmem:[#allocation15 + $0x28] sm:$0xff]  ;;  %v6594_v49 = vld [vmem:[#allocation15 + $0x50] sm:$0xff] }
 0x4e5   : > { %v5118_v5 = vadd.f32 %v5086_v9, %v5044_v7  ;;  %v5156_v27 = vmul.f32 %v14162_v42, %v5004_v24  ;;  %v5120_v54 = vadd.f32 %v5088_v22, %v5046_v45  ;;  %v5122_v12 = vadd.f32 %v5090_v39, %v5048_v50  ;;  %v14163_v24 = vld [vmem:[#allocation72_spill] sm:$0xff]  ;;  %v14164_v50 = vld [vmem:[#allocation57_spill] sm:$0xff]  ;;  %v14167_v22 = vld [vmem:[#allocation58_spill] sm:$0xff] }
 0x4e6   : > { %v5158_v2 = vmul.f32 %v14162_v42, %v5006_v38  ;;  %v5182_v41 = vadd.f32 %v5150_v19, %v5108_v28  ;;  %v5124_v62 = vadd.f32 %v5092_v6, %v5050_v25  ;;  %v5160_v34 = vmul.f32 %v14162_v42, %v5008_v3 }
 0x4e7   : > { %v5162_v59 = vmul.f32 %v14162_v42, %v5010_v15  ;;  %v5184_v8 = vadd.f32 %v5152_v43, %v5110_v17  ;;  %v5167_v21 = vmul.f32 %v14162_v42, %v5015_v14  ;;  %v5186_v57 = vadd.f32 %v5154_v20, %v5112_v33  ;;  %v6590_v14 = vld [vmem:[#allocation15 + $0x30] sm:$0xff]  ;;  %v6591_v20 = vld [vmem:[#allocation15 + $0x38] sm:$0xff]  ;;  %v6592_v33 = vld [vmem:[#allocation15 + $0x40] sm:$0xff] }
 0x4e8   : > { %v5246_v29 = vadd.f32 %v5182_v41, %v12169_v48  ;;  %v9216_v7 = vpack.c.bf16 %v6589_v58, %v6588_v60  ;;  %v5127_v45 = vadd.f32 %v5095_v16, %v14163_v24  ;;  %v5129_v10 = vadd.f32 %v14164_v50, %v5055_v18  ;;  %v5130_v41 = vld [vmem:[#allocation2 + $0x119] sm:$0xff]  ;;  %v6596_v60 = vld [vmem:[#allocation15 + $0x60] sm:$0xff] }
 0x4e9   : > { %v5188_v38 = vadd.f32 %v5156_v27, %v5114_v37  ;;  %v5248_v28 = vadd.f32 %v5184_v8, %v12172_v40  ;;  %v5164_v3 = vmul.f32 %v14162_v42, %v5012_v11  ;;  %v5166_v15 = vmul.f32 %v14162_v42, %v5014_v26  ;;  %v6593_v37 = vld [vmem:[#allocation15 + $0x48] sm:$0xff]  ;;  %v14165_v40 = vld [vmem:[#allocation70_spill] sm:$0xff]  ;;  %v14166_v26 = vld [vmem:[#allocation76_spill] sm:$0xff] }
 0x4ea   : > { %v5190_v17 = vadd.f32 %v5158_v2, %v5116_v53  ;;  %v5250_v43 = vadd.f32 %v5186_v57, %v12175_v63  ;;  %9217 = vmatprep.subr.bf16.mxu0 %v9216_v7  ;;  %v5192_v48 = vadd.f32 %v5160_v34, %v5118_v5  ;;  %v5194_v25 = vadd.f32 %v5162_v59, %v5120_v54  ;;  %v6597_v58 = vld [vmem:[#allocation15 + $0x68] sm:$0xff] }
 0x4eb   : > { %v5252_v51 = vadd.f32 %v5188_v38, %v12178_v44  ;;  %9219 = vmatpush3.bf16.msra.mxu0 %v9216_v7  ;;  %v9220_v27 = vpack.c.bf16 %v6591_v20, %v6590_v14  ;;  %v5199_v1 = vadd.f32 %v5167_v21, %v14165_v40  ;;  %v5282_v2 = vadd.f32 %v14166_v26, %v5246_v29  ;;  %v6595_v44 = vld [vmem:[#allocation15 + $0x58] sm:$0xff]  ;;  %v12274_v20 = vld [vmem:[#allocation2 + $0x5f] sm:$0xff] }
 0x4ec   : > { %v5254_v11 = vadd.f32 %v5190_v17, %v12181_v31  ;;  %v9224_v53 = vpack.c.bf16 %v6593_v37, %v6592_v33  ;;  %v5128_v63 = vadd.f32 %v5096_v32, %v5054_v30  ;;  %v5168_v18 = vmul.f32 %v14162_v42, %v5056_v55  ;;  %v14168_v30 = vld [vmem:[#allocation77_spill] sm:$0xff]  ;;  %v14170_v21 = vld [vmem:[#allocation63_spill] sm:$0xff]  ;;  %v14174_v37 = vld [vmem:[#allocation64_spill] sm:$0xff] }
 0x4ed   : > { %v5256_v46 = vadd.f32 %v5192_v48, %v12184_v47  ;;  %v5284_v5 = vadd.f32 %v14166_v26, %v5248_v28  ;;  %9221 = vmatprep.subr.bf16.mxu0 %v9220_v27  ;;  %v5170_v9 = vmul.f32 %v14162_v42, %v5130_v41  ;;  %v5201_v39 = vadd.f32 %v14167_v22, %v5127_v45  ;;  %v14169_v47 = vld [vmem:[#allocation62_spill] sm:$0xff]  ;;  %v6599_v14 = vld [vmem:[#allocation15 + $0x78] sm:$0xff] }
 0x4ee   : > { %v5258_v6 = vadd.f32 %v5194_v25, %v12186_v35  ;;  %v5286_v31 = vadd.f32 %v14166_v26, %v5250_v43  ;;  %v5196_v19 = vadd.f32 %v5164_v3, %v5122_v12  ;;  %v5198_v16 = vadd.f32 %v5166_v15, %v5124_v62  ;;  %v6598_v43 = vld [vmem:[#allocation15 + $0x70] sm:$0xff]  ;;  %v14173_v25 = vld [vmem:[#allocation59_spill] sm:$0xff] }
 0x4ef   : > { %v5203_v32 = vadd.f32 %v14168_v30, %v5129_v10  ;;  %v5288_v55 = vadd.f32 %v14166_v26, %v5252_v51  ;;  %9223 = vmatpush3.bf16.msra.mxu0 %v9220_v27  ;;  %v5231_v54 = vmul.f32 %v14169_v47, %v5199_v1  ;;  %v5290_v34 = vadd.f32 %v14166_v26, %v5254_v11  ;;  %v14171_v10 = vld [vmem:[#allocation65_spill] sm:$0xff]  ;;  %v9783_v30 = vld [vmem:[#allocation2 + $0x6f] sm:$0xff] }
 0x4f0   : > { %v7196_v59 = vmul.f32 -1.442695, %v5282_v2  ;;  %9225 = vmatprep.subr.bf16.mxu0 %v9224_v53  ;;  %v9228_v42 = vpack.c.bf16 %v6595_v44, %v6594_v49  ;;  %v5126_v8 = vadd.f32 %v12230_v13, %v12214_v36  ;;  %v5260_v35 = vadd.f32 %v5196_v19, %v12188_v61  ;;  %v14172_v36 = vld [vmem:[#allocation101_spill] sm:$0xff]  ;;  %v14175_v49 = vld [vmem:[#allocation106_spill] sm:$0xff] }
 0x4f1   : > { %v5292_v12 = vadd.f32 %v14166_v26, %v5256_v46  ;;  %v7198_v62 = vmul.f32 -1.442695, %v5284_v5  ;;  %v5233_v57 = vmul.f32 %v14170_v21, %v5201_v39  ;;  %v5262_v29 = vadd.f32 %v5198_v16, %v12190_v56  ;;  %v12304_v39 = vld [vmem:[%s13800_s7 + $0x3] ss:$0 sm:$0xff] }
 0x4f2   : > { %v5294_v7 = vadd.f32 %v14166_v26, %v5258_v6  ;;  %v7200_v24 = vmul.f32 -1.442695, %v5286_v31  ;;  %v5200_v45 = vadd.f32 %v5168_v18, %v5126_v8  ;;  %v5202_v50 = vadd.f32 %v5170_v9, %v5128_v63  ;;  %v12294_v63 = vld [vmem:[%s13800_s7 + $0x6] ss:$0 sm:$0xff]  ;;  %v14176_v31 = vld [vmem:[#allocation49_spill] sm:$0xff]  ;;  %v12324_v8 = vld [vmem:[#allocation2 + $0x50] sm:$0xff] }
 0x4f3   : > { %v5235_v38 = vmul.f32 %v14171_v10, %v5203_v32  ;;  %v7202_v28 = vmul.f32 -1.442695, %v5288_v55  ;;  %9227 = vmatpush3.bf16.msra.mxu0 %v9224_v53  ;;  %v5263_v61 = vadd.f32 %v5231_v54, %v14172_v36  ;;  %9659 = vpow2.f32 %v7196_v59  ;;  %v9780_v53 = vld [vmem:[#allocation2 + $0x7f] sm:$0xff]  ;;  %v9784_v55 = vld [vmem:[#allocation2 + $0x71] sm:$0xff] }
 0x4f4   : > { %v7204_v13 = vmul.f32 -1.442695, %v5290_v34  ;;  %9229 = vmatprep.subr.bf16.mxu0 %v9228_v42  ;;  %v9232_v3 = vpack.c.bf16 %v6597_v58, %v6596_v60  ;;  %v5264_v15 = vadd.f32 %v5200_v45, %v12192_v0  ;;  %v5296_v17 = vadd.f32 %v14166_v26, %v5260_v35  ;;  %v12317_v54 = vld [vmem:[%s13800_s7 + $0x5] ss:$0 sm:$0xff] }
 0x4f5   : > { %9661 = vpow2.f32 %v7198_v62  ;;  %v7206_v56 = vmul.f32 -1.442695, %v5292_v12  ;;  %v5265_v33 = vadd.f32 %v5233_v57, %v12195_v52  ;;  %v5298_v41 = vadd.f32 %v14166_v26, %v5262_v29  ;;  %v12286_v52 = vld [vmem:[%s13800_s7] ss:$0 sm:$0xff]  ;;  %v12331_v62 = vld [vmem:[%s13800_s7 + $0x8] ss:$0 sm:$0xff] }
 0x4f6   : > { %9663 = vpow2.f32 %v7200_v24  ;;  %v7208_v48 = vmul.f32 -1.442695, %v5294_v7  ;;  %v5421_v51 = vadd.f32 1.0, %v14173_v25  ;;  %v5266_v27 = vadd.f32 %v5202_v50, %v12197_v23  ;;  %v9787_v29 = vld [vmem:[#allocation2 + $0x81] sm:$0xff] }
 0x4f7   : > { %v5267_v0 = vadd.f32 %v5235_v38, %v12200_v4  ;;  %9665 = vpow2.f32 %v7202_v28  ;;  %9231 = vmatpush3.bf16.msra.mxu0 %v9228_v42  ;;  %v5423_v40 = vadd.f32 1.0, %v14174_v37  ;;  %v5299_v1 = vadd.f32 %v14166_v26, %v5263_v61  ;;  %v12322_v42 = vld [vmem:[#allocation2 + $0x48] sm:$0xff]  ;;  %v4492_v38 = vld [vmem:[#allocation2 + $0x60] sm:$0xff] }
 0x4f8   : > { %9667 = vpow2.f32 %v7204_v13  ;;  %9233 = vmatprep.subr.bf16.mxu0 %v9232_v3  ;;  %v9236_v11 = vpack.c.bf16 %v6599_v14, %v6598_v43  ;;  %v4751_v2 = vmul.f32 %v12286_v52, %v12274_v20  ;;  %v5300_v23 = vadd.f32 %v14166_v26, %v5264_v15  ;;  %v9788_v28 = vld [vmem:[%s13800_s7 + $0x1] ss:$0 sm:$0xff]  ;;  %v9789_v13 = vld [vmem:[%s13800_s7 + $0x4] ss:$0 sm:$0xff]  ;;  %v14178_v43 = vld [vmem:[#allocation88_spill] sm:$0xff] }
 0x4f9   : > { %9669 = vpow2.f32 %v7206_v56  ;;  %v7210_v4 = vmul.f32 -1.442695, %v5296_v17  ;;  %v4867_v18 = vmul.f32 %v12294_v63, %v9780_v53  ;;  %v5301_v46 = vadd.f32 %v14166_v26, %v5265_v33  ;;  %v14179_v33 = vld [vmem:[#allocation91_spill] sm:$0xff] }
 0x4fa   : > { %9671 = vpow2.f32 %v7208_v48  ;;  %v7212_v5 = vmul.f32 -1.442695, %v5298_v41  ;;  %v5425_v44 = vadd.f32 1.0, %v14175_v49  ;;  %v5302_v9 = vadd.f32 %v14166_v26, %v5266_v27 }
 0x4fb   : > { %9673 = vrcp.f32 %v5421_v51  ;;  %v5303_v22 = vadd.f32 %v14166_v26, %v5267_v0  ;;  %9235 = vmatpush3.bf16.msra.mxu0 %v9232_v3  ;;  %v12308_v6 = vmul.f32 %v12304_v39, %v12274_v20  ;;  %v4825_v19 = vadd.f32 %v14176_v31, %v4751_v2  ;;  %v14177_v3 = vld [vmem:[#allocation87_spill] sm:$0xff]  ;;  %v14180_v51 = vld [vmem:[#allocation92_spill] sm:$0xff] }
 0x4fc   : > { %9675 = vrcp.f32 %v5423_v40  ;;  %v7213_v16 = vmul.f32 -1.442695, %v5299_v1  ;;  %9237 = vmatprep.subr.bf16.mxu0 %v9236_v11  ;;  %v12312_v32 = vmul.f32 %v9783_v30, %v12294_v63  ;;  %v12320_v34 = vmul.f32 %v12317_v54, %v9784_v55  ;;  %v14187_v30 = vld [vmem:[#allocation94_spill] sm:$0xff] }
 0x4fd   : > { %9677 = vpow2.f32 %v7210_v4  ;;  %v7214_v59 = vmul.f32 -1.442695, %v5300_v23  ;;  %v9660_v35 = vpop.eup %9659  ;;  %v12326_v12 = vadd.f32 %v4867_v18, %v4825_v19  ;;  %v12334_v60 = vmul.f32 %v12331_v62, %v9784_v55  ;;  %v12353_v23 = vld [vmem:[#allocation2 + $0x58] sm:$0xff]  ;;  %v14182_v18 = vld [vmem:[#allocation78_spill] sm:$0xff] }
 0x4fe   : > { %9679 = vpow2.f32 %v7212_v5  ;;  %v7215_v58 = vmul.f32 -1.442695, %v5301_v46  ;;  %v12337_v7 = vmul.f32 %v9787_v29, %v12331_v62  ;;  %v7216_v24 = vmul.f32 -1.442695, %v5302_v9  ;;  %14181 = vst [vmem:[#allocation71_spill] sm:$0xff] %v12353_v23 }
 0x4ff   : > { %v9662_v57 = vpop.eup %9661  ;;  %9681 = vrcp.f32 %v5425_v44  ;;  %v7217_v45 = vmul.f32 -1.442695, %v5303_v22  ;;  %9239 = vmatpush3.bf16.msra.mxu0 %v9236_v11  ;;  %v4529_v36 = vmul.f32 %v9788_v28, %v12322_v42  ;;  %v4530_v61 = vmul.f32 %v9788_v28, %v12324_v8  ;;  %v14184_v44 = vld [vmem:[#allocation79_spill] sm:$0xff]  ;;  %v14185_v22 = vld [vmem:[#allocation93_spill] sm:$0xff] }
 0x500   : > { %v9664_v50 = vpop.eup %9663  ;;  %9683 = vpow2.f32 %v7213_v16  ;;  %v4565_v15 = vmul.f32 %v9789_v13, %v14177_v3  ;;  %v5410_v56 = vadd.f32 1.0, %v9660_v35  ;;  %v4566_v14 = vmul.f32 %v9789_v13, %v14178_v43 }
 0x501   : > { %v9666_v17 = vpop.eup %9665  ;;  %9685 = vpow2.f32 %v7214_v59  ;;  %v4567_v41 = vmul.f32 %v9789_v13, %v14179_v33  ;;  %v5412_v25 = vadd.f32 1.0, %v9662_v57  ;;  %v4568_v27 = vmul.f32 %v9789_v13, %v14180_v51  ;;  %v14188_v59 = vld [vmem:[#allocation95_spill] sm:$0xff] }
 0x502   : > { %v9668_v48 = vpop.eup %9667  ;;  %9687 = vpow2.f32 %v7215_v58  ;;  %v4569_v0 = vmul.f32 %v9789_v13, %v12322_v42  ;;  %v5414_v40 = vadd.f32 1.0, %v9664_v50  ;;  %v4532_v1 = vmul.f32 %v9788_v28, %v4492_v38  ;;  %v9791_v28 = vld [vmem:[%s13800_s7 + $0x7] ss:$0 sm:$0xff] }
 0x503   : > { %v9670_v37 = vpop.eup %9669  ;;  %9689 = vpow2.f32 %v7216_v24  ;;  %v4570_v11 = vmul.f32 %v9789_v13, %v12324_v8  ;;  %v4571_v4 = vmul.f32 %v12353_v23, %v9789_v13  ;;  %v4572_v53 = vmul.f32 %v9789_v13, %v4492_v38  ;;  %v14189_v24 = vld [vmem:[#allocation96_spill] sm:$0xff] }
 0x504   : > { %v9672_v2 = vpop.eup %9671  ;;  %9691 = vpow2.f32 %v7217_v45  ;;  %v4597_v46 = vadd.f32 %v4565_v15, %v14182_v18  ;;  %v5416_v49 = vadd.f32 1.0, %v9666_v17  ;;  %v4598_v9 = vadd.f32 %v4566_v14, %v14184_v44 }
 0x505   : > { %v12357_v5 = vpop.eup %9673  ;;  %9693 = vrcp.f32 %v5410_v56  ;;  %v4599_v31 = vadd.f32 %v4567_v41, %v14185_v22  ;;  %v5418_v16 = vadd.f32 1.0, %v9668_v48  ;;  %v4600_v55 = vadd.f32 %v4568_v27, %v14187_v30 }
 0x506   : > { %14183 = vst [vmem:[#allocation102_spill] sm:$0xff] %v12357_v5  ;;  %v12361_v19 = vpop.eup %9675  ;;  %9695 = vrcp.f32 %v5412_v25  ;;  %v4601_v35 = vadd.f32 %v4569_v0, %v14188_v59  ;;  %v12365_v57 = vadd.f32 1.0, %v9670_v37  ;;  %v12367_v29 = vadd.f32 1.0, %v9672_v2  ;;  %v4707_v37 = vld [vmem:[#allocation2 + $0x37] sm:$0xff] }
 0x507   : > { %14186 = vst [vmem:[#allocation103_spill] sm:$0xff] %v12361_v19  ;;  %v9678_v58 = vpop.eup %9677  ;;  %9697 = vrcp.f32 %v5414_v40  ;;  %v4602_v45 = vadd.f32 %v4570_v11, %v14189_v24  ;;  %v4637_v13 = vmul.f32 %v9791_v28, %v14177_v3  ;;  %v4638_v15 = vmul.f32 %v9791_v28, %v14178_v43  ;;  %v14205_v19 = vld [vmem:[#allocation85_spill] sm:$0xff] }
 0x508   : > { %v9680_v50 = vpop.eup %9679  ;;  %v4639_v17 = vmul.f32 %v9791_v28, %v14179_v33  ;;  %v4640_v56 = vmul.f32 %v9791_v28, %v14180_v51  ;;  %9699 = vrcp.f32 %v5416_v49  ;;  %v12379_v41 = vadd.f32 %v4571_v4, %v4529_v36  ;;  %v4705_v33 = vld [vmem:[#allocation2 + $0x27] sm:$0xff] }
 0x509   : > { %v12377_v14 = vpop.eup %9681  ;;  %v4641_v48 = vmul.f32 %v9791_v28, %v12322_v42  ;;  %v4642_v25 = vmul.f32 %v9791_v28, %v12324_v8  ;;  %v12385_v0 = vadd.f32 1.0, %v9678_v58  ;;  %9701 = vrcp.f32 %v5418_v16  ;;  %v14191_v36 = vld [vmem:[#allocation67_spill] sm:$0xff]  ;;  %v4708_v58 = vld [vmem:[#allocation2 + $0x3f] sm:$0xff] }
 0x50a   : > { %14190 = vst [vmem:[#allocation104_spill] sm:$0xff] %v12377_v14  ;;  %v12383_v27 = vpop.eup %9683  ;;  %v12387_v3 = vadd.f32 %v4572_v53, %v4530_v61  ;;  %v4644_v43 = vmul.f32 %v9791_v28, %v4492_v38  ;;  %v12391_v40 = vadd.f32 1.0, %v9680_v50  ;;  %v12394_v11 = vadd.f32 %v14191_v36, %v4532_v1  ;;  %v14192_v8 = vld [vmem:[#allocation99_spill] sm:$0xff]  ;;  %v14194_v61 = vld [vmem:[#allocation81_spill] sm:$0xff]  ;;  %v14195_v38 = vld [vmem:[#allocation80_spill] sm:$0xff] }
 0x50b   : > { %v12389_v51 = vpop.eup %9685  ;;  %v4643_v42 = vmul.f32 %v9791_v28, %v12353_v23  ;;  %v12398_v2 = vmul.f32 %v9791_v28, %v14192_v8  ;;  %v4709_v4 = vld [vmem:[#allocation2 + $0x47] sm:$0xff]  ;;  %v12403_v53 = vadd.f32 %v4637_v13, %v14194_v61  ;;  %v12406_v49 = vadd.f32 %v4638_v15, %v14195_v38  ;;  %v4706_v1 = vld [vmem:[#allocation2 + $0x2f] sm:$0xff]  ;;  %v14204_v14 = vld [vmem:[#allocation69_spill] sm:$0xff] }
 0x50c   : > { %v12400_v18 = vpop.eup %9687  ;;  %v12408_v44 = vadd.f32 %v4639_v17, %v4597_v46  ;;  %v12410_v22 = vadd.f32 %v4640_v56, %v4598_v9  ;;  %v12414_v30 = vadd.f32 %v4641_v48, %v4599_v31  ;;  %v12416_v59 = vadd.f32 %v4642_v25, %v4600_v55  ;;  %v4710_v31 = vld [vmem:[#allocation2 + $0x4f] sm:$0xff]  ;;  %v14201_v61 = vld [vmem:[#allocation66_spill] sm:$0xff] }
 0x50d   : > { %14193 = vst [vmem:[#allocation105_spill] sm:$0xff] %v12400_v18  ;;  %v12412_v16 = vpop.eup %9689  ;;  %v4784_v24 = vmul.f32 %v12304_v39, %v4705_v33  ;;  %v4786_v50 = vmul.f32 %v12304_v39, %v4707_v37  ;;  %v12422_v13 = vadd.f32 %v4643_v42, %v4601_v35  ;;  %v12424_v46 = vadd.f32 %v4644_v43, %v4602_v45 }
 0x50e   : > { %14196 = vst [vmem:[#allocation97_spill] sm:$0xff] %v12412_v16  ;;  %v12420_v28 = vpop.eup %9691  ;;  %v4744_v9 = vmul.f32 %v12286_v52, %v4705_v33  ;;  %v4788_v15 = vmul.f32 %v12304_v39, %v4709_v4  ;;  %v4745_v55 = vmul.f32 %v12286_v52, %v4706_v1  ;;  %v4856_v56 = vmul.f32 %v12294_v63, %v4705_v33  ;;  %v14202_v33 = vld [vmem:[#allocation82_spill] sm:$0xff] }
 0x50f   : > { %14197 = vst [vmem:[#allocation98_spill] sm:$0xff] %v12420_v28  ;;  %v12428_v17 = vpop.eup %9693  ;;  %v4858_v48 = vmul.f32 %v12294_v63, %v4707_v37  ;;  %v4860_v25 = vmul.f32 %v12294_v63, %v4709_v4  ;;  %v4746_v35 = vmul.f32 %v12286_v52, %v4707_v37  ;;  %v4748_v45 = vmul.f32 %v12286_v52, %v4709_v4  ;;  %v4987_v16 = vld [vmem:[#allocation2 + $0x21] sm:$0xff] }
 0x510   : > { %14198 = vst [vmem:[#allocation73_spill] sm:$0xff] %v12428_v17  ;;  %v12434_v36 = vpop.eup %9695  ;;  %v4785_v43 = vmul.f32 %v12304_v39, %v4706_v1  ;;  %v4787_v42 = vmul.f32 %v12304_v39, %v4708_v58  ;;  %v4790_v38 = vmul.f32 %v12304_v39, %v14201_v61  ;;  %v4816_v10 = vadd.f32 %v4784_v24, %v14202_v33 }
 0x511   : > { %14199 = vst [vmem:[#allocation74_spill] sm:$0xff] %v12434_v36  ;;  %v12440_v8 = vpop.eup %9697  ;;  %v4818_v21 = vadd.f32 %v4786_v50, %v4744_v9  ;;  %v4862_v47 = vmul.f32 %v12294_v63, %v14201_v61  ;;  %v4789_v23 = vmul.f32 %v12304_v39, %v4710_v31  ;;  %v4820_v37 = vadd.f32 %v4788_v15, %v4746_v35  ;;  %v14207_v15 = vld [vmem:[#allocation83_spill] sm:$0xff] }
 0x512   : > { %14200 = vst [vmem:[#allocation75_spill] sm:$0xff] %v12440_v8  ;;  %v4857_v4 = vmul.f32 %v12294_v63, %v4706_v1  ;;  %v4859_v36 = vmul.f32 %v12294_v63, %v4708_v58  ;;  %v12450_v17 = vpop.eup %9699  ;;  %v4864_v8 = vmul.f32 %v12294_v63, %v14204_v14  ;;  %v4888_v5 = vadd.f32 %v4856_v56, %v14205_v19 }
 0x513   : > { %14203 = vst [vmem:[#allocation72_spill] sm:$0xff] %v12450_v17  ;;  %v4890_v28 = vadd.f32 %v4858_v48, %v4816_v10  ;;  %v4892_v24 = vadd.f32 %v4860_v25, %v4818_v21  ;;  %v12455_v50 = vpop.eup %9701  ;;  %v4747_v9 = vmul.f32 %v12286_v52, %v4708_v58  ;;  %v4749_v39 = vmul.f32 %v12286_v52, %v4710_v31  ;;  %v14208_v10 = vld [vmem:[#allocation89_spill] sm:$0xff]  ;;  %v14209_v25 = vld [vmem:[#allocation24_spill] sm:$0xff] }
 0x514   : > { %14206 = vst [vmem:[#allocation57_spill] sm:$0xff] %v12455_v50  ;;  %v4817_v35 = vadd.f32 %v4785_v43, %v14207_v15  ;;  %v4819_v1 = vadd.f32 %v4787_v42, %v4745_v55  ;;  %v4822_v61 = vadd.f32 %v4790_v38, %v4748_v45  ;;  %v4861_v33 = vmul.f32 %v12294_v63, %v4710_v31  ;;  %v14210_v50 = vld [vmem:[#allocation26_spill] sm:$0xff]  ;;  %v14211_v55 = vld [vmem:[#allocation29_spill] sm:$0xff] }
 0x515   : > { %v4863_v17 = vmul.f32 %v12294_v63, %v12274_v20  ;;  %v4894_v14 = vadd.f32 %v4862_v47, %v4820_v37  ;;  %v4821_v19 = vadd.f32 %v4789_v23, %v4747_v9  ;;  %v4823_v21 = vadd.f32 %v12308_v6, %v4749_v39  ;;  %v4989_v42 = vld [vmem:[#allocation2 + $0x31] sm:$0xff]  ;;  %v14212_v47 = vld [vmem:[#allocation50_spill] sm:$0xff]  ;;  %v4988_v37 = vld [vmem:[#allocation2 + $0x29] sm:$0xff] }
 0x516   : > { %v4889_v56 = vadd.f32 %v4857_v4, %v14208_v10  ;;  %v4891_v48 = vadd.f32 %v4859_v36, %v4817_v35  ;;  %v4896_v58 = vadd.f32 %v4864_v8, %v4822_v61  ;;  %v4920_v52 = vmul.f32 %v14209_v25, %v4888_v5  ;;  %v14213_v63 = vld [vmem:[#allocation52_spill] sm:$0xff]  ;;  %v14215_v9 = vld [vmem:[#allocation30_spill] sm:$0xff] }
 0x517   : > { %v4922_v43 = vmul.f32 %v14210_v50, %v4890_v28  ;;  %v4924_v45 = vmul.f32 %v14211_v55, %v4892_v24  ;;  %v12470_v31 = vadd.f32 %v12398_v2, %v12379_v41  ;;  %v12474_v20 = vadd.f32 %v14212_v47, %v12387_v3  ;;  %v14214_v8 = vld [vmem:[#allocation28_spill] sm:$0xff]  ;;  %v4991_v2 = vld [vmem:[#allocation2 + $0x41] sm:$0xff] }
 0x518   : > { %v12478_v6 = vadd.f32 %v14213_v63, %v12394_v11  ;;  %v5067_v23 = vmul.f32 %v12317_v54, %v4987_v16  ;;  %v12481_v5 = vadd.f32 %v4861_v33, %v4819_v1  ;;  %v12483_v28 = vadd.f32 %v4863_v17, %v4821_v19  ;;  %v4990_v11 = vld [vmem:[#allocation2 + $0x39] sm:$0xff]  ;;  %v4993_v35 = vld [vmem:[#allocation2 + $0x51] sm:$0xff]  ;;  %v14218_v55 = vld [vmem:[#allocation107_spill] sm:$0xff] }
 0x519   : > { %v12486_v36 = vadd.f32 %v12312_v32, %v4823_v21  ;;  %v4926_v41 = vmul.f32 %v14214_v8, %v4894_v14  ;;  %v4953_v38 = vadd.f32 %v4889_v56, %v12406_v49  ;;  %v12491_v3 = vadd.f32 %v4891_v48, %v12410_v22  ;;  %v9792_v49 = vld [vmem:[%s13800_s7 + $0x2] ss:$0 sm:$0xff]  ;;  %v14216_v61 = vld [vmem:[#allocation84_spill] sm:$0xff] }
 0x51a   : > { %v5069_v4 = vmul.f32 %v12317_v54, %v4989_v42  ;;  %v5141_v24 = vmul.f32 %v12331_v62, %v4989_v42  ;;  %v4928_v17 = vmul.f32 %v14215_v9, %v4896_v58  ;;  %v4952_v39 = vadd.f32 %v4920_v52, %v12403_v53  ;;  %v4995_v21 = vld [vmem:[#allocation2 + $0x61] sm:$0xff]  ;;  %v4992_v56 = vld [vmem:[#allocation2 + $0x49] sm:$0xff] }
 0x51b   : > { %v4954_v32 = vadd.f32 %v4922_v43, %v12408_v44  ;;  %v4956_v15 = vadd.f32 %v4924_v45, %v12414_v30  ;;  %v5027_v22 = vmul.f32 %v9792_v49, %v4987_v16  ;;  %v5071_v1 = vmul.f32 %v12317_v54, %v4991_v2  ;;  %v14219_v50 = vld [vmem:[#allocation86_spill] sm:$0xff] }
 0x51c   : > { %v5099_v33 = vadd.f32 %v5067_v23, %v14216_v61  ;;  %v5143_v14 = vmul.f32 %v12331_v62, %v4991_v2  ;;  %v4958_v19 = vadd.f32 %v4926_v41, %v12422_v13  ;;  %v5028_v53 = vmul.f32 %v9792_v49, %v4988_v37 }
 0x51d   : > { %v5029_v10 = vmul.f32 %v9792_v49, %v4989_v42  ;;  %v5030_v44 = vmul.f32 %v9792_v49, %v4990_v11  ;;  %v5073_v30 = vmul.f32 %v12317_v54, %v4993_v35  ;;  %v5101_v48 = vadd.f32 %v5069_v4, %v5027_v22 }
 0x51e   : > { %v5145_v58 = vmul.f32 %v12331_v62, %v4993_v35  ;;  %v5173_v52 = vadd.f32 %v5141_v24, %v5099_v33  ;;  %v5031_v16 = vmul.f32 %v9792_v49, %v4991_v2  ;;  %v5068_v43 = vmul.f32 %v12317_v54, %v4988_v37  ;;  %v14217_v33 = vld [vmem:[#allocation41_spill] sm:$0xff] }
 0x51f   : > { %v5070_v45 = vmul.f32 %v12317_v54, %v4990_v11  ;;  %v5140_v47 = vmul.f32 %v12331_v62, %v4988_v37  ;;  %v5075_v13 = vmul.f32 %v12317_v54, %v4995_v21  ;;  %v5103_v63 = vadd.f32 %v5071_v1, %v5029_v10  ;;  %v14220_v10 = vld [vmem:[#allocation90_spill] sm:$0xff] }
 0x520   : > { %v5147_v42 = vmul.f32 %v12331_v62, %v4995_v21  ;;  %v5175_v23 = vadd.f32 %v5143_v14, %v5101_v48  ;;  %v5032_v41 = vmul.f32 %v9792_v49, %v4992_v56  ;;  %v5033_v61 = vmul.f32 %v9792_v49, %v4993_v35 }
 0x521   : > { %v5035_v9 = vmul.f32 %v9792_v49, %v4995_v21  ;;  %v5142_v4 = vmul.f32 %v12331_v62, %v4990_v11  ;;  %v5072_v24 = vmul.f32 %v12317_v54, %v4992_v56  ;;  %v5105_v2 = vadd.f32 %v5073_v30, %v5031_v16  ;;  %v14221_v21 = vld [vmem:[#allocation42_spill] sm:$0xff] }
 0x522   : > { %v5177_v22 = vadd.f32 %v5145_v58, %v5103_v63  ;;  %v5205_v8 = vmul.f32 %v14217_v33, %v5173_v52  ;;  %v5074_v37 = vmul.f32 %v12317_v54, %v14218_v55  ;;  %v5100_v25 = vadd.f32 %v5068_v43, %v14219_v50  ;;  %v14222_v50 = vld [vmem:[#allocation43_spill] sm:$0xff]  ;;  %v14223_v63 = vld [vmem:[#allocation108_spill] sm:$0xff] }
 0x523   : > { %v5144_v1 = vmul.f32 %v12331_v62, %v4992_v56  ;;  %v5172_v14 = vadd.f32 %v5140_v47, %v14220_v10  ;;  %v5102_v48 = vadd.f32 %v5070_v45, %v5028_v53  ;;  %v5107_v35 = vadd.f32 %v5075_v13, %v5033_v61 }
 0x524   : > { %v5179_v49 = vadd.f32 %v5147_v42, %v5105_v2  ;;  %v5207_v11 = vmul.f32 %v14221_v21, %v5175_v23  ;;  %v5109_v18 = vadd.f32 %v12320_v34, %v5035_v9  ;;  %v5146_v30 = vmul.f32 %v12331_v62, %v14218_v55  ;;  %v9817_v21 = vld [vmem:[#allocation2 + $0x30] sm:$0xff] }
 0x525   : > { %v5174_v58 = vadd.f32 %v5142_v4, %v5100_v25  ;;  %v5236_v52 = vadd.f32 %v5172_v14, %v4952_v39  ;;  %v5104_v16 = vadd.f32 %v5072_v24, %v5030_v44  ;;  %v5181_v54 = vadd.f32 %v12334_v60, %v5107_v35  ;;  %v14224_v25 = vld [vmem:[#allocation44_spill] sm:$0xff] }
 0x526   : > { %v5209_v43 = vmul.f32 %v14222_v50, %v5177_v22  ;;  %v5237_v56 = vadd.f32 %v5205_v8, %v4953_v38  ;;  %v5148_v53 = vmul.f32 %v12331_v62, %v14223_v63  ;;  %v5176_v45 = vadd.f32 %v5144_v1, %v5102_v48  ;;  %v14225_v38 = vld [vmem:[#allocation45_spill] sm:$0xff]  ;;  %v9816_v50 = vld [vmem:[#allocation2 + $0x28] sm:$0xff] }
 0x527   : > { %v5183_v47 = vadd.f32 %v12337_v7, %v5109_v18  ;;  %v5238_v13 = vadd.f32 %v5174_v58, %v4954_v32  ;;  %v4957_v34 = vadd.f32 %v12481_v5, %v12416_v59  ;;  %v4960_v55 = vadd.f32 %v4928_v17, %v12470_v31  ;;  %v14226_v5 = vld [vmem:[#allocation46_spill] sm:$0xff] }
 0x528   : > { %v5211_v9 = vmul.f32 %v14224_v25, %v5179_v49  ;;  %v5239_v39 = vadd.f32 %v5207_v11, %v12491_v3  ;;  %v5106_v60 = vadd.f32 %v5074_v37, %v5032_v41  ;;  %v5178_v44 = vadd.f32 %v5146_v30, %v5104_v16  ;;  %v14227_v16 = vld [vmem:[#allocation105_spill] sm:$0xff] }
 0x529   : > { %v5240_v42 = vadd.f32 %v5176_v45, %v4956_v15  ;;  %v5272_v8 = vadd.f32 %v14166_v26, %v5236_v52  ;;  %v4959_v62 = vadd.f32 %v12483_v28, %v12424_v46  ;;  %v5213_v7 = vmul.f32 %v14225_v38, %v5181_v54  ;;  %v14229_v45 = vld [vmem:[#allocation98_spill] sm:$0xff] }
 0x52a   : > { %v5241_v18 = vadd.f32 %v5209_v43, %v4957_v34  ;;  %v5273_v32 = vadd.f32 %v14166_v26, %v5237_v56  ;;  %v5180_v59 = vadd.f32 %v5148_v53, %v5106_v60  ;;  %v5215_v31 = vmul.f32 %v14226_v5, %v5183_v47  ;;  %v14228_v56 = vld [vmem:[#allocation97_spill] sm:$0xff] }
 0x52b   : > { %v5242_v17 = vadd.f32 %v5178_v44, %v4958_v19  ;;  %v5274_v23 = vadd.f32 %v14166_v26, %v5238_v13  ;;  %9703 = vrcp.f32 %v12365_v57  ;;  %v4961_v3 = vadd.f32 %v12486_v36, %v12474_v20  ;;  %v9814_v5 = vld [vmem:[#allocation2 + $0x18] sm:$0xff] }
 0x52c   : > { %v5243_v15 = vadd.f32 %v5211_v9, %v4959_v62  ;;  %v5275_v41 = vadd.f32 %v14166_v26, %v5239_v39  ;;  %v4963_v46 = vadd.f32 %v12326_v12, %v12478_v6  ;;  %v5244_v28 = vadd.f32 %v5180_v59, %v4960_v55 }
 0x52d   : > { %v5276_v61 = vadd.f32 %v14166_v26, %v5240_v42  ;;  %v7186_v4 = vmul.f32 -1.442695, %v5272_v8  ;;  %9705 = vrcp.f32 %v12367_v29  ;;  %v5245_v19 = vadd.f32 %v5213_v7, %v4961_v3 }
 0x52e   : > { %v5277_v24 = vadd.f32 %v14166_v26, %v5241_v18  ;;  %v7187_v2 = vmul.f32 -1.442695, %v5273_v32  ;;  %9707 = vrcp.f32 %v12385_v0  ;;  %v5247_v57 = vadd.f32 %v5215_v31, %v4963_v46 }
 0x52f   : > { %v5278_v20 = vadd.f32 %v14166_v26, %v5242_v17  ;;  %v7188_v36 = vmul.f32 -1.442695, %v5274_v23  ;;  %9709 = vrcp.f32 %v12391_v40  ;;  %v5279_v12 = vadd.f32 %v14166_v26, %v5243_v15 }
 0x530   : > { %v7189_v6 = vmul.f32 -1.442695, %v5275_v41  ;;  %v5280_v22 = vadd.f32 %v14166_v26, %v5244_v28  ;;  %9711 = vpow2.f32 %v7186_v4  ;;  %v7190_v37 = vmul.f32 -1.442695, %v5276_v61 }
 0x531   : > { %v5281_v29 = vadd.f32 %v14166_v26, %v5245_v19  ;;  %9713 = vpow2.f32 %v7187_v2  ;;  %v7191_v1 = vmul.f32 -1.442695, %v5277_v24  ;;  %v5283_v10 = vadd.f32 %v14166_v26, %v5247_v57 }
 0x532   : > { %9715 = vpow2.f32 %v7188_v36  ;;  %v7192_v0 = vmul.f32 -1.442695, %v5278_v20  ;;  %v7193_v14 = vmul.f32 -1.442695, %v5279_v12  ;;  %v7194_v48 = vmul.f32 -1.442695, %v5280_v22 }
 0x533   : > { %9717 = vpow2.f32 %v7189_v6  ;;  %v7195_v35 = vmul.f32 -1.442695, %v5281_v29  ;;  %v7197_v49 = vmul.f32 -1.442695, %v5283_v10  ;;  %v5427_v30 = vadd.f32 1.0, %v12383_v27  ;;  %v12575_v29 = vld [vmem:[#allocation2 + $0x80] sm:$0xff] }
 0x534   : > { %9719 = vpow2.f32 %v7190_v37  ;;  %v5428_v26 = vadd.f32 1.0, %v12389_v51  ;;  %v5429_v54 = vadd.f32 1.0, %v14227_v16  ;;  %v5430_v63 = vadd.f32 1.0, %v14228_v56  ;;  %v12595_v16 = vld [vmem:[#allocation2 + $0xb0] sm:$0xff]  ;;  %v12601_v56 = vld [vmem:[#allocation2 + $0xc0] sm:$0xff] }
 0x535   : > { %v12558_v40 = vpop.eup %9703  ;;  %9721 = vpow2.f32 %v7191_v1  ;;  %v5431_v47 = vadd.f32 1.0, %v14229_v45  ;;  %v14230_v1 = vld [vmem:[#allocation68_spill] sm:$0xff] }
 0x536   : > { %9723 = vpow2.f32 %v7192_v0  ;;  %v12579_v10 = vmul.f32 %v12575_v29, %v14230_v1 }
 0x537   : > { %v12560_v11 = vpop.eup %9705  ;;  %9725 = vpow2.f32 %v7193_v14  ;;  %v12583_v14 = vld [vmem:[#allocation2 + $0x90] sm:$0xff] }
 0x538   : > { %v12563_v58 = vpop.eup %9707  ;;  %9727 = vpow2.f32 %v7194_v48  ;;  %v14231_v48 = vld [vmem:[#allocation100_spill] sm:$0xff] }
 0x539   : > { %v12566_v52 = vpop.eup %9709  ;;  %9729 = vpow2.f32 %v7195_v35  ;;  %v12587_v35 = vmul.f32 %v12583_v14, %v14231_v48  ;;  %v12661_v48 = vld [vmem:[#allocation2 + $0xd8] sm:$0xff] }
 0x53a   : > { %v9712_v43 = vpop.eup %9711  ;;  %9731 = vpow2.f32 %v7197_v49  ;;  %v12589_v49 = vld [vmem:[#allocation2 + $0xa0] sm:$0xff] }
 0x53b   : > { %v9714_v53 = vpop.eup %9713  ;;  %9733 = vrcp.f32 %v5427_v30  ;;  %v5400_v51 = vadd.f32 1.0, %v9712_v43  ;;  %v14232_v30 = vld [vmem:[#allocation53_spill] sm:$0xff] }
 0x53c   : > { %v9716_v27 = vpop.eup %9715  ;;  %9735 = vrcp.f32 %v5428_v26  ;;  %v5401_v60 = vadd.f32 1.0, %v9714_v53  ;;  %v12593_v26 = vmul.f32 %v12589_v49, %v14232_v30  ;;  %v12665_v30 = vmul.f32 %v12661_v48, %v12563_v58 }
 0x53d   : > { %v9718_v13 = vpop.eup %9717  ;;  %9737 = vrcp.f32 %v5429_v54  ;;  %v5402_v42 = vadd.f32 1.0, %v9716_v27  ;;  %v14233_v54 = vld [vmem:[#allocation61_spill] sm:$0xff]  ;;  %v14236_v27 = vld [vmem:[#allocation103_spill] sm:$0xff] }
 0x53e   : > { %v9720_v55 = vpop.eup %9719  ;;  %9739 = vrcp.f32 %v5430_v63  ;;  %v5403_v62 = vadd.f32 1.0, %v9718_v13  ;;  %v12599_v43 = vmul.f32 %v12595_v16, %v14233_v54  ;;  %v14234_v63 = vld [vmem:[#allocation102_spill] sm:$0xff]  ;;  %14246 = vst [vmem:[#allocation101_spill] sm:$0xff] %v12665_v30  ;;  %v12667_v54 = vld [vmem:[#allocation2 + $0xe8] sm:$0xff] }
 0x53f   : > { %v9722_v44 = vpop.eup %9721  ;;  %9741 = vrcp.f32 %v5431_v47  ;;  %v5404_v18 = vadd.f32 1.0, %v9720_v55  ;;  %v12605_v53 = vmul.f32 %v12601_v56, %v14234_v63  ;;  %v12607_v47 = vld [vmem:[#allocation2 + $0xd0] sm:$0xff]  ;;  %v12671_v63 = vmul.f32 %v12667_v54, %v12566_v52  ;;  %v14262_v30 = vld [vmem:[#allocation71_spill] sm:$0xff] }
 0x540   : > { %v9724_v8 = vpop.eup %9723  ;;  %v5405_v59 = vadd.f32 1.0, %v9722_v44  ;;  %v12611_v13 = vmul.f32 %v12607_v47, %v14236_v27  ;;  %v12625_v44 = vld [vmem:[#allocation2 + $0x78] sm:$0xff] }
 0x541   : > { %v9726_v7 = vpop.eup %9725  ;;  %v5406_v17 = vadd.f32 1.0, %v9724_v8  ;;  %14235 = vst [vmem:[#allocation70_spill] sm:$0xff] %v12605_v53  ;;  %14247 = vst [vmem:[#allocation59_spill] sm:$0xff] %v12671_v63 }
 0x542   : > { %v9728_v32 = vpop.eup %9727  ;;  %v5407_v3 = vadd.f32 1.0, %v9726_v7  ;;  %14237 = vst [vmem:[#allocation76_spill] sm:$0xff] %v12611_v13  ;;  %v12631_v7 = vld [vmem:[#allocation2 + $0x88] sm:$0xff] }
 0x543   : > { %v9730_v31 = vpop.eup %9729  ;;  %v5408_v41 = vadd.f32 1.0, %v9728_v32 }
 0x544   : > { %v9732_v23 = vpop.eup %9731  ;;  %v5409_v28 = vadd.f32 1.0, %v9730_v31  ;;  %v14243_v31 = vld [vmem:[#allocation72_spill] sm:$0xff] }
 0x545   : > { %v9734_v15 = vpop.eup %9733  ;;  %v5411_v4 = vadd.f32 1.0, %v9732_v23  ;;  %v12643_v23 = vld [vmem:[#allocation2 + $0xa8] sm:$0xff] }
 0x546   : > { %v9736_v46 = vpop.eup %9735 }
 0x547   : > { %v9738_v61 = vpop.eup %9737 }
 0x548   : > { %v9740_v19 = vpop.eup %9739 }
 0x549   : > { %v9742_v24 = vpop.eup %9741 }
 0x55e   : > { %v5687_v34 = vpop.f32.mrb[64].mxu1 }
 0x55f   : > { %v7218_v9 = vmul.f32 -1.442695, %v5687_v34  ;;  %v8751_v39 = vpop.f32.mrb[65].mxu1  ;;  %v12613_v34 = vld [vmem:[#allocation2 + $0xe0] sm:$0xff] }
 0x560   : > { %v14240_v39 = vld [vmem:[#allocation73_spill] sm:$0xff] }
 0x561   : > { %9743 = vpow2.f32 %v7218_v9  ;;  %v12619_v9 = vld [vmem:[#allocation2 + $0x68] sm:$0xff] }
 0x562   : > { %9745 = vrcp.f32 %v5400_v51  ;;  %v14238_v51 = vld [vmem:[#allocation104_spill] sm:$0xff] }
 0x563   : > { %9747 = vrcp.f32 %v5401_v60  ;;  %v12617_v55 = vmul.f32 %v12613_v34, %v14238_v51  ;;  %v12623_v60 = vmul.f32 %v12619_v9, %v14240_v39 }
 0x564   : > { %9749 = vrcp.f32 %v5402_v42  ;;  %v14241_v42 = vld [vmem:[#allocation74_spill] sm:$0xff] }
 0x565   : > { %9751 = vrcp.f32 %v5403_v62  ;;  %14239 = vst [vmem:[#allocation58_spill] sm:$0xff] %v12617_v55  ;;  %v12629_v8 = vmul.f32 %v12625_v44, %v14241_v42  ;;  %v12683_v42 = vld [vmem:[#allocation2 + $0x100] sm:$0xff] }
 0x566   : > { %9753 = vrcp.f32 %v5404_v18  ;;  %v14242_v18 = vld [vmem:[#allocation75_spill] sm:$0xff]  ;;  %v12686_v58 = vmul.f32 %v12683_v42, %v9738_v61  ;;  %v12706_v61 = vld [vmem:[%s14253_s29] ss:$0 sm:$0xff] }
 0x567   : > { %9755 = vrcp.f32 %v5405_v59  ;;  %v12635_v32 = vmul.f32 %v12631_v7, %v14242_v18  ;;  %v12637_v59 = vld [vmem:[#allocation2 + $0x98] sm:$0xff]  ;;  %v12688_v18 = vld [vmem:[#allocation2 + $0x108] sm:$0xff] }
 0x568   : > { %9757 = vrcp.f32 %v5406_v17  ;;  %v12641_v17 = vmul.f32 %v12637_v59, %v14243_v31  ;;  %14250 = vst [vmem:[#allocation49_spill] sm:$0xff] %v12686_v58  ;;  %v12691_v52 = vmul.f32 %v12688_v18, %v9740_v19  ;;  %v12693_v31 = vld [vmem:[#allocation2 + $0x110] sm:$0xff]  ;;  %v9815_v19 = vld [vmem:[#allocation2 + $0x20] sm:$0xff] }
 0x569   : > { %9759 = vrcp.f32 %v5407_v3  ;;  %v14244_v3 = vld [vmem:[#allocation57_spill] sm:$0xff]  ;;  %v6018_v58 = vld [vmem:[#allocation2 + $0xf] sm:$0xff] }
 0x56a   : > { %9761 = vrcp.f32 %v5408_v41  ;;  %v12647_v41 = vmul.f32 %v12643_v23, %v14244_v3  ;;  %14251 = vst [vmem:[#allocation87_spill] sm:$0xff] %v12691_v52  ;;  %v6017_v3 = vld [vmem:[#allocation2 + $0x7] sm:$0xff]  ;;  %v12719_v52 = vld [vmem:[%s14253_s29 + $0x2] ss:$0 sm:$0xff] }
 0x56b   : > { %v9744_v2 = vpop.eup %9743  ;;  %9763 = vrcp.f32 %v5409_v28  ;;  %v12649_v28 = vld [vmem:[#allocation2 + $0xb8] sm:$0xff] }
 0x56c   : > { %v9746_v57 = vpop.eup %9745  ;;  %v5694_v20 = vadd.f32 1.0, %v9744_v2  ;;  %9765 = vrcp.f32 %v5411_v4  ;;  %v12653_v4 = vmul.f32 %v12649_v28, %v12558_v40  ;;  %v12673_v40 = vld [vmem:[#allocation2 + $0xf0] sm:$0xff] }
 0x56d   : > { %v9748_v36 = vpop.eup %9747  ;;  %v12676_v27 = vmul.f32 %v12673_v40, %v9734_v15  ;;  %v12696_v15 = vmul.f32 %v12693_v31, %v9742_v24  ;;  %v12708_v38 = vmul.f32 %v9814_v5, %v9746_v57 }
 0x56e   : > { %v9750_v12 = vpop.eup %9749  ;;  %9767 = vrcp.f32 %v5694_v20  ;;  %v12655_v20 = vld [vmem:[#allocation2 + $0xc8] sm:$0xff]  ;;  %v12710_v25 = vmul.f32 %v9815_v19, %v9748_v36  ;;  %v9819_v36 = vld [vmem:[#allocation2 + $0x40] sm:$0xff] }
 0x56f   : > { %v9752_v6 = vpop.eup %9751  ;;  %v12659_v1 = vmul.f32 %v12655_v20, %v12560_v11  ;;  %14248 = vst [vmem:[#allocation64_spill] sm:$0xff] %v12676_v27  ;;  %v12678_v11 = vld [vmem:[#allocation2 + $0xf8] sm:$0xff]  ;;  %14252 = vst [vmem:[#allocation88_spill] sm:$0xff] %v12696_v15  ;;  %v12712_v24 = vmul.f32 %v9816_v50, %v9750_v12  ;;  %v6300_v15 = vld [vmem:[#allocation2 + $0x9] sm:$0xff] }
 0x570   : > { %v12571_v22 = vpop.eup %9753  ;;  %v12681_v39 = vmul.f32 %v12678_v11, %v9736_v46  ;;  %v12701_v46 = vld [vmem:[%s14253_s29 + $0x1] ss:$0 sm:$0xff]  ;;  %14254 = vst [vmem:[#allocation91_spill] sm:$0xff] %v12708_v38  ;;  %14255 = vst [vmem:[#allocation92_spill] sm:$0xff] %v12710_v25  ;;  %v12714_v33 = vmul.f32 %v9817_v21, %v9752_v6  ;;  %v9818_v27 = vld [vmem:[#allocation2 + $0x38] sm:$0xff] }
 0x571   : > { %v12573_v37 = vpop.eup %9755  ;;  %14245 = vst [vmem:[#allocation77_spill] sm:$0xff] %v12659_v1  ;;  %14256 = vst [vmem:[#allocation78_spill] sm:$0xff] %v12712_v24  ;;  %v12722_v57 = vmul.f32 %v9818_v27, %v12571_v22  ;;  %v9820_v12 = vld [vmem:[#allocation2 + $0x48] sm:$0xff]  ;;  %v14260_v38 = vld [vmem:[#allocation25_spill] sm:$0xff] }
 0x572   : > { %v12581_v0 = vpop.eup %9757  ;;  %14249 = vst [vmem:[#allocation106_spill] sm:$0xff] %v12681_v39  ;;  %14257 = vst [vmem:[#allocation79_spill] sm:$0xff] %v12714_v33  ;;  %v12725_v25 = vmul.f32 %v9819_v36, %v12573_v37  ;;  %v9821_v33 = vld [vmem:[#allocation2 + $0x50] sm:$0xff]  ;;  %v14261_v63 = vsub.s32 0, %v14260_v38  ;;  %v9822_v1 = vld [vmem:[#allocation2 + $0x60] sm:$0xff] }
 0x573   : > { %v9760_v45 = vpop.eup %9759  ;;  %14258 = vst [vmem:[#allocation93_spill] sm:$0xff] %v12722_v57  ;;  %v12728_v6 = vmul.f32 %v9820_v12, %v12581_v0  ;;  %v9823_v57 = vld [vmem:[#allocation2 + $0x70] sm:$0xff]  ;;  %v12745_v0 = vmul.f32 %v12706_v61, %v6017_v3 }
 0x574   : > { %v9762_v62 = vpop.eup %9761  ;;  %14259 = vst [vmem:[#allocation94_spill] sm:$0xff] %v12725_v25  ;;  %v12730_v24 = vmul.f32 %v9821_v33, %v9760_v45  ;;  %v9824_v37 = vld [vmem:[#allocation2 + $0x10] sm:$0xff]  ;;  %v12748_v45 = vmul.f32 %v12719_v52, %v6300_v15 }
 0x575   : > { %v9764_v2 = vpop.eup %9763  ;;  %v12735_v13 = vmul.f32 %v14262_v30, %v9762_v62  ;;  %v12742_v25 = vmul.f32 %v9824_v37, %v12701_v46  ;;  %14263 = vst [vmem:[#allocation95_spill] sm:$0xff] %v12745_v0 }
 0x576   : > { %v9766_v51 = vpop.eup %9765  ;;  %v12737_v22 = vmul.f32 %v9822_v1, %v9764_v2 }
 0x577   : > { %v12739_v53 = vmul.f32 %v9823_v57, %v9766_v51 }
 0x578   : > { %v9768_v39 = vpop.eup %9767 }
 0x579   : > { %v5700_v55 = vrot.slane %v9768_v39, %v14261_v63  ;;  %v12751_v63 = vmul.f32 %v12706_v61, %v6018_v58 }
 0x57b   : > { %v12753_v62 = vmul.f32 %v9814_v5, %v5700_v55  ;;  %v12755_v2 = vmul.f32 %v9815_v19, %v5700_v55  ;;  %v12757_v39 = vmul.f32 %v9816_v50, %v5700_v55  ;;  %v12759_v51 = vmul.f32 %v9817_v21, %v5700_v55 }
 0x57c   : > { %v12761_v38 = vmul.f32 %v9818_v27, %v5700_v55  ;;  %v12763_v37 = vmul.f32 %v9819_v36, %v5700_v55  ;;  %v12765_v3 = vmul.f32 %v9820_v12, %v5700_v55  ;;  %v12767_v0 = vmul.f32 %v9821_v33, %v5700_v55 }
 0x57d   : > { %v12770_v15 = vmul.f32 %v14262_v30, %v5700_v55  ;;  %v12772_v58 = vmul.f32 %v9822_v1, %v5700_v55  ;;  %v5711_v5 = vmul.f32 %v12619_v9, %v5700_v55  ;;  %v12775_v19 = vmul.f32 %v9823_v57, %v5700_v55 }
 0x57e   : > { %v5713_v21 = vmul.f32 %v12625_v44, %v5700_v55  ;;  %v5714_v50 = vmul.f32 %v12575_v29, %v5700_v55  ;;  %v5715_v27 = vmul.f32 %v12631_v7, %v5700_v55  ;;  %v5716_v36 = vmul.f32 %v12583_v14, %v5700_v55 }
 0x57f   : > { %v5717_v33 = vmul.f32 %v12637_v59, %v5700_v55  ;;  %v5718_v12 = vmul.f32 %v12589_v49, %v5700_v55  ;;  %v5719_v30 = vmul.f32 %v12643_v23, %v5700_v55  ;;  %v5720_v1 = vmul.f32 %v12595_v16, %v5700_v55 }
 0x580   : > { %v5721_v9 = vmul.f32 %v12649_v28, %v5700_v55  ;;  %v5722_v57 = vmul.f32 %v12601_v56, %v5700_v55  ;;  %v5723_v44 = vmul.f32 %v12655_v20, %v5700_v55  ;;  %v5724_v29 = vmul.f32 %v12607_v47, %v5700_v55 }
 0x581   : > { %v5725_v7 = vmul.f32 %v12661_v48, %v5700_v55  ;;  %v5726_v14 = vmul.f32 %v12613_v34, %v5700_v55  ;;  %v5727_v59 = vmul.f32 %v12667_v54, %v5700_v55  ;;  %v5728_v49 = vmul.f32 %v12673_v40, %v5700_v55 }
 0x582   : > { %v5729_v23 = vmul.f32 %v12678_v11, %v5700_v55  ;;  %v5730_v16 = vmul.f32 %v12683_v42, %v5700_v55  ;;  %v5731_v28 = vmul.f32 %v12688_v18, %v5700_v55  ;;  %v5732_v56 = vmul.f32 %v12693_v31, %v5700_v55 }
 0x583   : > { %v12798_v20 = vadd.f32 %v5711_v5, %v12623_v60  ;;  %v5745_v47 = vadd.f32 %v5713_v21, %v12629_v8  ;;  %v5746_v48 = vadd.f32 %v5714_v50, %v12579_v10  ;;  %v5747_v34 = vadd.f32 %v5715_v27, %v12635_v32  ;;  %v14264_v60 = vld [vmem:[#allocation70_spill] sm:$0xff]  ;;  %v14265_v5 = vld [vmem:[#allocation77_spill] sm:$0xff]  ;;  %v14266_v10 = vld [vmem:[#allocation76_spill] sm:$0xff] }
 0x584   : > { %v5748_v54 = vadd.f32 %v5716_v36, %v12587_v35  ;;  %v5749_v40 = vadd.f32 %v5717_v33, %v12641_v17  ;;  %v5750_v11 = vadd.f32 %v5718_v12, %v12593_v26  ;;  %v5751_v42 = vadd.f32 %v5719_v30, %v12647_v41  ;;  %v14267_v32 = vld [vmem:[#allocation101_spill] sm:$0xff]  ;;  %v14268_v26 = vld [vmem:[#allocation58_spill] sm:$0xff]  ;;  %v14269_v41 = vld [vmem:[#allocation59_spill] sm:$0xff] }
 0x585   : > { %v5752_v18 = vadd.f32 %v5720_v1, %v12599_v43  ;;  %v5753_v55 = vadd.f32 %v5721_v9, %v12653_v4  ;;  %v5754_v31 = vadd.f32 %v5722_v57, %v14264_v60  ;;  %v5755_v8 = vadd.f32 %v5723_v44, %v14265_v5  ;;  %5777 = vst [vmem:[#allocation2 + $0x78] sm:$0xff] %v5745_v47  ;;  %v14270_v43 = vld [vmem:[#allocation64_spill] sm:$0xff]  ;;  %v14271_v27 = vld [vmem:[#allocation106_spill] sm:$0xff]  ;;  %v14272_v33 = vld [vmem:[#allocation49_spill] sm:$0xff] }
 0x586   : > { %5778 = vst [vmem:[#allocation2 + $0x80] sm:$0xff] %v5746_v48  ;;  %5779 = vst [vmem:[#allocation2 + $0x88] sm:$0xff] %v5747_v34  ;;  %v5756_v35 = vadd.f32 %v5724_v29, %v14266_v10  ;;  %v5757_v17 = vadd.f32 %v5725_v7, %v14267_v32  ;;  %v5758_v21 = vadd.f32 %v5726_v14, %v14268_v26  ;;  %v14273_v30 = vld [vmem:[#allocation87_spill] sm:$0xff]  ;;  %v14274_v9 = vld [vmem:[#allocation88_spill] sm:$0xff] }
 0x587   : > { %5775 = vst [vmem:[#allocation2 + $0x68] sm:$0xff] %v12798_v20  ;;  %v5759_v50 = vadd.f32 %v5727_v59, %v14269_v41  ;;  %5780 = vst [vmem:[#allocation2 + $0x90] sm:$0xff] %v5748_v54  ;;  %v5760_v4 = vadd.f32 %v5728_v49, %v14270_v43  ;;  %v5761_v36 = vadd.f32 %v5729_v23, %v14271_v27  ;;  %v14275_v44 = vld [vmem:[#allocation91_spill] sm:$0xff]  ;;  %v14276_v7 = vld [vmem:[#allocation92_spill] sm:$0xff] }
 0x588   : > { %5781 = vst [vmem:[#allocation2 + $0x98] sm:$0xff] %v5749_v40  ;;  %5782 = vst [vmem:[#allocation2 + $0xa0] sm:$0xff] %v5750_v11  ;;  %v5762_v12 = vadd.f32 %v5730_v16, %v14272_v33  ;;  %v5763_v1 = vadd.f32 %v5731_v28, %v14273_v30  ;;  %v5764_v57 = vadd.f32 %v5732_v56, %v14274_v9  ;;  %v14277_v59 = vld [vmem:[#allocation78_spill] sm:$0xff]  ;;  %v14279_v28 = vld [vmem:[#allocation93_spill] sm:$0xff] }
 0x589   : > { %5783 = vst [vmem:[#allocation2 + $0xa8] sm:$0xff] %v5751_v42  ;;  %5784 = vst [vmem:[#allocation2 + $0xb0] sm:$0xff] %v5752_v18  ;;  %v5733_v29 = vadd.f32 %v12753_v62, %v14275_v44  ;;  %v5734_v14 = vadd.f32 %v12755_v2, %v14276_v7  ;;  %v5735_v49 = vadd.f32 %v12757_v39, %v14277_v59  ;;  %v12830_v23 = vld [vmem:[%s14253_s29 + $0x4] ss:$0 sm:$0xff]  ;;  %v12835_v16 = vld [vmem:[%s14253_s29 + $0x7] ss:$0 sm:$0xff] }
 0x58a   : > { %5785 = vst [vmem:[#allocation2 + $0xb8] sm:$0xff] %v5753_v55  ;;  %5786 = vst [vmem:[#allocation2 + $0xc0] sm:$0xff] %v5754_v31  ;;  %v14278_v62 = vld [vmem:[#allocation79_spill] sm:$0xff]  ;;  %v5737_v39 = vadd.f32 %v12761_v38, %v14279_v28  ;;  %v14280_v56 = vld [vmem:[#allocation94_spill] sm:$0xff]  ;;  %v12847_v48 = vadd.f32 %v12765_v3, %v12728_v6  ;;  %v12851_v34 = vadd.f32 %v12767_v0, %v12730_v24 }
 0x58b   : > { %5787 = vst [vmem:[#allocation2 + $0xc8] sm:$0xff] %v5755_v8  ;;  %5788 = vst [vmem:[#allocation2 + $0xd0] sm:$0xff] %v5756_v35  ;;  %v5736_v2 = vadd.f32 %v12759_v51, %v14278_v62  ;;  %v12843_v47 = vadd.f32 %v12763_v37, %v14280_v56  ;;  %v12855_v54 = vadd.f32 %v12770_v15, %v12735_v13  ;;  %v12893_v31 = vld [vmem:[%s14253_s29 + $0x3] ss:$0 sm:$0xff]  ;;  %v12903_v5 = vld [vmem:[%s14253_s29 + $0x5] ss:$0 sm:$0xff] }
 0x58c   : > { %5789 = vst [vmem:[#allocation2 + $0xd8] sm:$0xff] %v5757_v17  ;;  %5790 = vst [vmem:[#allocation2 + $0xe0] sm:$0xff] %v5758_v21  ;;  %v12859_v38 = vadd.f32 %v12772_v58, %v12737_v22  ;;  %v12863_v51 = vadd.f32 %v12775_v19, %v12739_v53  ;;  %v5879_v6 = vmul.f32 %v12830_v23, %v5733_v29  ;;  %v12911_v32 = vld [vmem:[%s14253_s29 + $0x8] ss:$0 sm:$0xff] }
 0x58d   : > { %5791 = vst [vmem:[#allocation2 + $0xe8] sm:$0xff] %v5759_v50  ;;  %5792 = vst [vmem:[#allocation2 + $0xf0] sm:$0xff] %v5760_v4  ;;  %v5953_v24 = vmul.f32 %v12835_v16, %v5735_v49  ;;  %v5880_v13 = vmul.f32 %v12830_v23, %v5734_v14  ;;  %v5954_v22 = vmul.f32 %v12835_v16, %v5736_v2  ;;  %v14281_v56 = vld [vmem:[#allocation95_spill] sm:$0xff] }
 0x58e   : > { %5793 = vst [vmem:[#allocation2 + $0xf8] sm:$0xff] %v5761_v36  ;;  %5794 = vst [vmem:[#allocation2 + $0x100] sm:$0xff] %v5762_v12  ;;  %v5839_v53 = vmul.f32 %v12701_v46, %v5733_v29  ;;  %v5881_v0 = vmul.f32 %v12830_v23, %v5735_v49  ;;  %v5955_v37 = vmul.f32 %v12835_v16, %v5737_v39 }
 0x58f   : > { %5795 = vst [vmem:[#allocation2 + $0x108] sm:$0xff] %v5763_v1  ;;  %5796 = vst [vmem:[#allocation2 + $0x110] sm:$0xff] %v5764_v57  ;;  %v5840_v3 = vmul.f32 %v12701_v46, %v5734_v14  ;;  %v5911_v15 = vadd.f32 %v5879_v6, %v12742_v25  ;;  %v5912_v58 = vadd.f32 %v5880_v13, %v12742_v25  ;;  %v12898_v25 = vld [vmem:[%s14253_s29 + $0x6] ss:$0 sm:$0xff] }
 0x590   : > { %5765 = vst [vmem:[#allocation2 + $0x18] sm:$0xff] %v5733_v29  ;;  %5766 = vst [vmem:[#allocation2 + $0x20] sm:$0xff] %v5734_v14  ;;  %v5882_v19 = vmul.f32 %v12830_v23, %v5736_v2  ;;  %v5956_v40 = vmul.f32 %v12835_v16, %v12843_v47  ;;  %v5913_v11 = vadd.f32 %v5881_v0, %v5839_v53 }
 0x591   : > { %5767 = vst [vmem:[#allocation2 + $0x28] sm:$0xff] %v5735_v49  ;;  %5768 = vst [vmem:[#allocation2 + $0x30] sm:$0xff] %v5736_v2  ;;  %v5841_v42 = vmul.f32 %v12701_v46, %v5735_v49  ;;  %v5883_v18 = vmul.f32 %v12830_v23, %v5737_v39  ;;  %v12888_v55 = vmul.f32 %v12835_v16, %v12847_v48 }
 0x592   : > { %5769 = vst [vmem:[#allocation2 + $0x38] sm:$0xff] %v5737_v39  ;;  %5770 = vst [vmem:[#allocation2 + $0x40] sm:$0xff] %v12843_v47  ;;  %v5985_v60 = vadd.f32 %v5953_v24, %v5911_v15  ;;  %v5986_v8 = vadd.f32 %v5954_v22, %v5912_v58  ;;  %v5914_v10 = vadd.f32 %v5882_v19, %v5840_v3 }
 0x593   : > { %5771 = vst [vmem:[#allocation2 + $0x48] sm:$0xff] %v12847_v48  ;;  %5772 = vst [vmem:[#allocation2 + $0x50] sm:$0xff] %v12851_v34  ;;  %v12906_v35 = vmul.f32 %v12701_v46, %v5736_v2  ;;  %v5987_v17 = vadd.f32 %v5955_v37, %v5913_v11  ;;  %v12913_v26 = vadd.f32 %v5883_v18, %v5841_v42 }
 0x594   : > { %5773 = vst [vmem:[#allocation2 + $0x58] sm:$0xff] %v12855_v54  ;;  %5774 = vst [vmem:[#allocation2 + $0x60] sm:$0xff] %v12859_v38  ;;  %v12917_v21 = vmul.f32 %v12830_v23, %v12843_v47  ;;  %v12921_v41 = vmul.f32 %v12835_v16, %v12851_v34  ;;  %v12925_v27 = vadd.f32 %v5956_v40, %v5914_v10 }
 0x595   : > { %5776 = vst [vmem:[#allocation2 + $0x70] sm:$0xff] %v12863_v51  ;;  %v12928_v36 = vmul.f32 %v12701_v46, %v5737_v39  ;;  %v12932_v33 = vmul.f32 %v12830_v23, %v12847_v48  ;;  %v12936_v12 = vmul.f32 %v12835_v16, %v12855_v54 }
 0x597   : > { %v6019_v50 = vld [vmem:[#allocation2 + $0x17] sm:$0xff]  ;;  %v6020_v44 = vld [vmem:[#allocation2 + $0x1f] sm:$0xff] }
 0x598   : > { %v12923_v43 = vld [vmem:[#allocation2 + $0x27] sm:$0xff]  ;;  %v6302_v4 = vld [vmem:[#allocation2 + $0x19] sm:$0xff]  ;;  %v6098_v30 = vmul.f32 %v12893_v31, %v6019_v50  ;;  %v12942_v29 = vld [vmem:[#allocation2 + $0x2f] sm:$0xff]  ;;  %v6058_v7 = vmul.f32 %v12706_v61, %v6019_v50  ;;  %v6099_v59 = vmul.f32 %v12893_v31, %v6020_v44 }
 0x599   : > { %v6172_v1 = vmul.f32 %v12898_v25, %v12923_v43  ;;  %v6304_v9 = vld [vmem:[#allocation2 + $0x29] sm:$0xff]  ;;  %v6382_v57 = vmul.f32 %v12903_v5, %v6302_v4  ;;  %v6173_v49 = vmul.f32 %v12898_v25, %v12942_v29  ;;  %v6301_v62 = vld [vmem:[#allocation2 + $0x11] sm:$0xff]  ;;  %v6303_v2 = vld [vmem:[#allocation2 + $0x21] sm:$0xff]  ;;  %v6100_v39 = vmul.f32 %v12893_v31, %v12923_v43 }
 0x59a   : > { %v6456_v14 = vmul.f32 %v12911_v32, %v6304_v9  ;;  %v12949_v28 = vld [vmem:[#allocation2 + $0x31] sm:$0xff]  ;;  %v6130_v6 = vadd.f32 %v6098_v30, %v14281_v56  ;;  %v6341_v13 = vmul.f32 %v12719_v52, %v6301_v62  ;;  %v6383_v22 = vmul.f32 %v12903_v5, %v6303_v2  ;;  %v12959_v0 = vld [vmem:[#allocation2 + $0x39] sm:$0xff] }
 0x59b   : > { %v6414_v24 = vadd.f32 %v6382_v57, %v12748_v45  ;;  %v12957_v53 = vld [vmem:[#allocation2 + $0x37] sm:$0xff]  ;;  %v6131_v37 = vadd.f32 %v6099_v59, %v12751_v63  ;;  %v6457_v3 = vmul.f32 %v12911_v32, %v12949_v28  ;;  %v6132_v15 = vadd.f32 %v6100_v39, %v6058_v7  ;;  %v12967_v42 = vld [vmem:[#allocation2 + $0x3f] sm:$0xff] }
 0x59c   : > { %v6174_v58 = vmul.f32 %v12898_v25, %v12957_v53  ;;  %v6204_v19 = vadd.f32 %v6172_v1, %v6130_v6  ;;  %v6415_v45 = vadd.f32 %v6383_v22, %v6341_v13  ;;  %v6342_v11 = vmul.f32 %v12719_v52, %v6302_v4  ;;  %v14282_v30 = vld [vmem:[#allocation24_spill] sm:$0xff]  ;;  %v14283_v62 = vld [vmem:[#allocation26_spill] sm:$0xff] }
 0x59d   : > { %v6488_v40 = vadd.f32 %v6456_v14, %v6414_v24  ;;  %v6205_v18 = vadd.f32 %v6173_v49, %v6131_v37  ;;  %v6384_v50 = vmul.f32 %v12903_v5, %v6304_v9  ;;  %v6458_v63 = vmul.f32 %v12911_v32, %v12959_v0  ;;  %v12976_v14 = vld [vmem:[#allocation2 + $0x41] sm:$0xff]  ;;  %v14284_v24 = vld [vmem:[#allocation41_spill] sm:$0xff] }
 0x59e   : > { %v6206_v10 = vadd.f32 %v6174_v58, %v6132_v15  ;;  %v6236_v57 = vmul.f32 %v14282_v30, %v6204_v19  ;;  %v6489_v7 = vadd.f32 %v6457_v3, %v6415_v45  ;;  %v6059_v59 = vmul.f32 %v12706_v61, %v6020_v44  ;;  %v12987_v58 = vld [vmem:[#allocation2 + $0x47] sm:$0xff] }
 0x59f   : > { %v6101_v1 = vmul.f32 %v12893_v31, %v12942_v29  ;;  %v6269_v4 = vadd.f32 %v6205_v18, %v5986_v8  ;;  %v6416_v49 = vadd.f32 %v6384_v50, %v6342_v11  ;;  %v6175_v56 = vmul.f32 %v12898_v25, %v12967_v42  ;;  %v12991_v18 = vld [vmem:[#allocation2 + $0x49] sm:$0xff] }
 0x5a0   : > { %v6238_v39 = vmul.f32 %v14283_v62, %v6206_v10  ;;  %v6268_v6 = vadd.f32 %v6236_v57, %v5985_v60  ;;  %v6521_v13 = vmul.f32 %v14284_v24, %v6489_v7  ;;  %v6343_v37 = vmul.f32 %v12719_v52, %v6303_v2 }
 0x5a1   : > { %v6133_v22 = vadd.f32 %v6101_v1, %v6059_v59  ;;  %v6490_v44 = vadd.f32 %v6458_v63, %v6416_v49  ;;  %v6385_v15 = vmul.f32 %v12903_v5, %v12949_v28  ;;  %v6459_v8 = vmul.f32 %v12911_v32, %v12976_v14  ;;  %v12997_v63 = vld [vmem:[#allocation2 + $0x4f] sm:$0xff] }
 0x5a2   : > { %v6270_v3 = vadd.f32 %v6238_v39, %v5987_v17  ;;  %v6552_v19 = vadd.f32 %v6488_v40, %v6268_v6  ;;  %v6553_v45 = vadd.f32 %v6521_v13, %v6269_v4  ;;  %v5989_v60 = vadd.f32 %v12888_v55, %v12913_v26  ;;  %v13009_v1 = vld [vmem:[#allocation2 + $0x51] sm:$0xff]  ;;  %v14285_v39 = vld [vmem:[#allocation42_spill] sm:$0xff] }
 0x5a3   : > { %v6207_v11 = vadd.f32 %v6175_v56, %v6133_v22  ;;  %v6417_v2 = vadd.f32 %v6385_v15, %v6343_v37  ;;  %v6060_v17 = vmul.f32 %v12706_v61, %v12923_v43  ;;  %v6102_v50 = vmul.f32 %v12893_v31, %v12957_v53 }
 0x5a4   : > { %v6554_v10 = vadd.f32 %v6490_v44, %v6270_v3  ;;  %8784 = vmatprep.mubr.f32.mxu0 %v6552_v19  ;;  %v6176_v30 = vmul.f32 %v12898_v25, %v12987_v58  ;;  %v6344_v55 = vmul.f32 %v12719_v52, %v6304_v9  ;;  %v6386_v26 = vmul.f32 %v12903_v5, %v12959_v0  ;;  %v14286_v3 = vld [vmem:[#allocation29_spill] sm:$0xff] }
 0x5a5   : > { %v6271_v40 = vadd.f32 %v6207_v11, %v12925_v27  ;;  %8785 = vmatmul.mubr.f32.vlgmr.msra.gmra.mrb[64].mxu0 %v6553_v45  ;;  %v6491_v57 = vadd.f32 %v6459_v8, %v6417_v2  ;;  %v6134_v7 = vadd.f32 %v6102_v50, %v6060_v17  ;;  %v6460_v43 = vmul.f32 %v12911_v32, %v12991_v18 }
 0x5a6   : > { %v5916_v59 = vadd.f32 %v12917_v21, %v12906_v35  ;;  %8787 = vmatprep.mubr.f32.mxu0 %v6554_v10  ;;  %v6418_v27 = vadd.f32 %v6386_v26, %v6344_v55  ;;  %v6061_v4 = vmul.f32 %v12706_v61, %v12942_v29  ;;  %v6103_v9 = vmul.f32 %v12893_v31, %v12967_v42  ;;  %v13021_v21 = vld [vmem:[#allocation2 + $0x57] sm:$0xff] }
 0x5a7   : > { %v6177_v62 = vmul.f32 %v12898_v25, %v12997_v63  ;;  %v6523_v49 = vmul.f32 %v14285_v39, %v6491_v57  ;;  %v6208_v56 = vadd.f32 %v6176_v30, %v6134_v7  ;;  %v6345_v35 = vmul.f32 %v12719_v52, %v12949_v28  ;;  %v13032_v28 = vld [vmem:[#allocation2 + $0x59] sm:$0xff]  ;;  %v14288_v39 = vld [vmem:[#allocation28_spill] sm:$0xff] }
 0x5a8   : > { %v5990_v6 = vadd.f32 %v12921_v41, %v5916_v59  ;;  %v6492_v24 = vadd.f32 %v6460_v43, %v6418_v27  ;;  %v6135_v13 = vadd.f32 %v6103_v9, %v6061_v4  ;;  %v6387_v29 = vmul.f32 %v12903_v5, %v12976_v14  ;;  %v13050_v7 = vld [vmem:[#allocation2 + $0x5f] sm:$0xff] }
 0x5a9   : > { %v6461_v22 = vmul.f32 %v12911_v32, %v13009_v1  ;;  %v6555_v37 = vadd.f32 %v6523_v49, %v6271_v40  ;;  %v6240_v44 = vmul.f32 %v14286_v3, %v6208_v56  ;;  %v5917_v15 = vadd.f32 %v12932_v33, %v12928_v36  ;;  %v13058_v9 = vld [vmem:[#allocation2 + $0x61] sm:$0xff] }
 0x5aa   : > { %v6062_v41 = vmul.f32 %v12706_v61, %v12957_v53  ;;  %v6209_v8 = vadd.f32 %v6177_v62, %v6135_v13  ;;  %v6419_v19 = vadd.f32 %v6387_v29, %v6345_v35  ;;  %v6104_v45 = vmul.f32 %v12893_v31, %v12987_v58  ;;  %v13073_v3 = vld [vmem:[#allocation2 + $0x67] sm:$0xff] }
 0x5ab   : > { %v6178_v11 = vmul.f32 %v12898_v25, %v13021_v21  ;;  %8788 = vmatmul.mubr.f32.gmra.mrb[66].mxu0 %v6555_v37  ;;  %v6272_v10 = vadd.f32 %v6240_v44, %v5989_v60  ;;  %v5991_v2 = vadd.f32 %v12936_v12, %v5917_v15  ;;  %v6346_v36 = vmul.f32 %v12719_v52, %v12959_v0  ;;  %v14287_v60 = vld [vmem:[#allocation43_spill] sm:$0xff] }
 0x5ac   : > { %v6388_v33 = vmul.f32 %v12903_v5, %v12991_v18  ;;  %v6273_v53 = vadd.f32 %v6209_v8, %v5990_v6  ;;  %v6493_v17 = vadd.f32 %v6461_v22, %v6419_v19  ;;  %v6136_v50 = vadd.f32 %v6104_v45, %v6062_v41 }
 0x5ad   : > { %v6462_v40 = vmul.f32 %v12911_v32, %v13032_v28  ;;  %v6556_v30 = vadd.f32 %v6492_v24, %v6272_v10  ;;  %v5844_v26 = vmul.f32 %v12701_v46, %v12843_v47  ;;  %v5886_v12 = vmul.f32 %v12830_v23, %v12851_v34 }
 0x5ae   : > { %v6420_v55 = vadd.f32 %v6388_v33, %v6346_v36  ;;  %v6525_v57 = vmul.f32 %v14287_v60, %v6493_v17  ;;  %v6210_v0 = vadd.f32 %v6178_v11, %v6136_v50  ;;  %v6063_v43 = vmul.f32 %v12706_v61, %v12967_v42  ;;  %v13081_v11 = vld [vmem:[#allocation2 + $0x69] sm:$0xff] }
 0x5af   : > { %8790 = vmatprep.mubr.f32.mxu0 %v6556_v30  ;;  %v5918_v27 = vadd.f32 %v5886_v12, %v5844_v26  ;;  %v5960_v4 = vmul.f32 %v12835_v16, %v12859_v38  ;;  %v6105_v47 = vmul.f32 %v12893_v31, %v12997_v63  ;;  %v6347_v56 = vmul.f32 %v12719_v52, %v12976_v14 }
 0x5b0   : > { %v6494_v59 = vadd.f32 %v6462_v40, %v6420_v55  ;;  %v6557_v62 = vadd.f32 %v6525_v57, %v6273_v53  ;;  %v6242_v49 = vmul.f32 %v14288_v39, %v6210_v0  ;;  %v6389_v42 = vmul.f32 %v12903_v5, %v13009_v1  ;;  %v13094_v55 = vld [vmem:[#allocation2 + $0x6f] sm:$0xff]  ;;  %v13113_v39 = vld [vmem:[#allocation2 + $0x78] sm:$0xff] }
 0x5b1   : > { %v5992_v6 = vadd.f32 %v5960_v4, %v5918_v27  ;;  %v6137_v35 = vadd.f32 %v6105_v47, %v6063_v43  ;;  %v6179_v24 = vmul.f32 %v12898_v25, %v13050_v7  ;;  %v5845_v13 = vmul.f32 %v12701_v46, %v12847_v48  ;;  %v14290_v27 = vld [vmem:[#allocation30_spill] sm:$0xff] }
 0x5b2   : > { %8791 = vmatmul.mubr.f32.gmra.mrb[68].mxu0 %v6557_v62  ;;  %v6274_v29 = vadd.f32 %v6242_v49, %v5991_v2  ;;  %v6421_v22 = vadd.f32 %v6389_v42, %v6347_v56  ;;  %v6463_v37 = vmul.f32 %v12911_v32, %v13058_v9  ;;  %v5887_v14 = vmul.f32 %v12830_v23, %v12855_v54 }
 0x5b3   : > { %v6211_v44 = vadd.f32 %v6179_v24, %v6137_v35  ;;  %v5961_v15 = vmul.f32 %v12835_v16, %v12798_v20  ;;  %v6064_v41 = vmul.f32 %v12706_v61, %v12987_v58  ;;  %v6106_v48 = vmul.f32 %v12893_v31, %v13021_v21  ;;  %v14289_v58 = vld [vmem:[#allocation44_spill] sm:$0xff] }
 0x5b4   : > { %v6558_v8 = vadd.f32 %v6494_v59, %v6274_v29  ;;  %v6495_v19 = vadd.f32 %v6463_v37, %v6421_v22  ;;  %v5919_v45 = vadd.f32 %v5887_v14, %v5845_v13  ;;  %v6348_v10 = vmul.f32 %v12719_v52, %v12991_v18  ;;  %v13104_v59 = vld [vmem:[#allocation2 + $0x71] sm:$0xff] }
 0x5b5   : > { %v6275_v2 = vadd.f32 %v6211_v44, %v5992_v6  ;;  %v6138_v36 = vadd.f32 %v6106_v48, %v6064_v41  ;;  %v6180_v33 = vmul.f32 %v12898_v25, %v13073_v3  ;;  %v6390_v53 = vmul.f32 %v12903_v5, %v13032_v28  ;;  %v13121_v29 = vld [vmem:[#allocation2 + $0x77] sm:$0xff] }
 0x5b6   : > { %8793 = vmatprep.mubr.f32.mxu0 %v6558_v8  ;;  %v6527_v17 = vmul.f32 %v14289_v58, %v6495_v19  ;;  %v5993_v50 = vadd.f32 %v5961_v15, %v5919_v45  ;;  %v5846_v40 = vmul.f32 %v12701_v46, %v12851_v34  ;;  %v5888_v30 = vmul.f32 %v12830_v23, %v12859_v38  ;;  %v13129_v44 = vld [vmem:[#allocation2 + $0x79] sm:$0xff] }
 0x5b7   : > { %v6212_v18 = vadd.f32 %v6180_v33, %v6138_v36  ;;  %v6422_v26 = vadd.f32 %v6390_v53, %v6348_v10  ;;  %v6464_v12 = vmul.f32 %v12911_v32, %v13081_v11  ;;  %v6065_v60 = vmul.f32 %v12706_v61, %v12997_v63  ;;  %v13133_v19 = vld [vmem:[#allocation2 + $0x80] sm:$0xff]  ;;  %v14291_v36 = vld [vmem:[#allocation45_spill] sm:$0xff] }
 0x5b8   : > { %v6559_v57 = vadd.f32 %v6527_v17, %v6275_v2  ;;  %v5920_v0 = vadd.f32 %v5888_v30, %v5846_v40  ;;  %v5962_v43 = vmul.f32 %v12835_v16, %v12863_v51  ;;  %v6107_v34 = vmul.f32 %v12893_v31, %v13050_v7  ;;  %v13146_v17 = vld [vmem:[#allocation2 + $0x7f] sm:$0xff] }
 0x5b9   : > { %v6244_v4 = vmul.f32 %v14290_v27, %v6212_v18  ;;  %v6181_v47 = vmul.f32 %v12898_v25, %v13094_v55  ;;  %v6349_v62 = vmul.f32 %v12719_v52, %v13009_v1  ;;  %v6391_v63 = vmul.f32 %v12903_v5, %v13058_v9 }
 0x5ba   : > { %8794 = vmatmul.mubr.f32.gmra.mrb[70].mxu0 %v6559_v57  ;;  %v6496_v49 = vadd.f32 %v6464_v12, %v6422_v26  ;;  %v5994_v56 = vadd.f32 %v5962_v43, %v5920_v0  ;;  %v6139_v42 = vadd.f32 %v6107_v34, %v6065_v60  ;;  %v5847_v6 = vmul.f32 %v12701_v46, %v12855_v54  ;;  %v13152_v26 = vld [vmem:[#allocation2 + $0x81] sm:$0xff] }
 0x5bb   : > { %v6276_v35 = vadd.f32 %v6244_v4, %v5993_v50  ;;  %v6423_v24 = vadd.f32 %v6391_v63, %v6349_v62  ;;  %v6465_v13 = vmul.f32 %v12911_v32, %v13104_v59  ;;  %v5889_v1 = vmul.f32 %v12830_v23, %v12798_v20  ;;  %v14292_v0 = vld [vmem:[#allocation27_spill] sm:$0xff] }
 0x5bc   : > { %v6213_v22 = vadd.f32 %v6181_v47, %v6139_v42  ;;  %v5963_v37 = vmul.f32 %v12835_v16, %v13113_v39  ;;  %v6066_v14 = vmul.f32 %v12706_v61, %v13021_v21  ;;  %v6108_v54 = vmul.f32 %v12893_v31, %v13073_v3 }
 0x5bd   : > { %v6560_v15 = vadd.f32 %v6496_v49, %v6276_v35  ;;  %v6497_v41 = vadd.f32 %v6465_v13, %v6423_v24  ;;  %v5921_v48 = vadd.f32 %v5889_v1, %v5847_v6  ;;  %v6350_v8 = vmul.f32 %v12719_v52, %v13032_v28  ;;  %v13171_v35 = vld [vmem:[#allocation2 + $0x87] sm:$0xff] }
 0x5be   : > { %v6277_v45 = vadd.f32 %v6213_v22, %v5994_v56  ;;  %v6140_v10 = vadd.f32 %v6108_v54, %v6066_v14  ;;  %v6182_v2 = vmul.f32 %v12898_v25, %v13121_v29  ;;  %v6392_v21 = vmul.f32 %v12903_v5, %v13081_v11 }
 0x5bf   : > { %8796 = vmatprep.mubr.f32.mxu0 %v6560_v15  ;;  %v6529_v33 = vmul.f32 %v14291_v36, %v6497_v41  ;;  %v6466_v53 = vmul.f32 %v12911_v32, %v13129_v44  ;;  %v5848_v58 = vmul.f32 %v12701_v46, %v12859_v38  ;;  %v5890_v28 = vmul.f32 %v12830_v23, %v12863_v51 }
 0x5c0   : > { %v6214_v50 = vadd.f32 %v6182_v2, %v6140_v10  ;;  %v6424_v40 = vadd.f32 %v6392_v21, %v6350_v8  ;;  %v5964_v30 = vmul.f32 %v12835_v16, %v13133_v19  ;;  %v6067_v18 = vmul.f32 %v12706_v61, %v13050_v7  ;;  %v13163_v7 = vld [vmem:[#allocation2 + $0x88] sm:$0xff]  ;;  %v14293_v10 = vld [vmem:[#allocation46_spill] sm:$0xff] }
 0x5c1   : > { %v6561_v12 = vadd.f32 %v6529_v33, %v6277_v45  ;;  %v5995_v60 = vadd.f32 %v5963_v37, %v5921_v48  ;;  %v5922_v57 = vadd.f32 %v5890_v28, %v5848_v58  ;;  %v6109_v38 = vmul.f32 %v12893_v31, %v13094_v55  ;;  %v13179_v37 = vld [vmem:[#allocation2 + $0x89] sm:$0xff] }
 0x5c2   : > { %v6246_v43 = vmul.f32 %v14292_v0, %v6214_v50  ;;  %v6183_v34 = vmul.f32 %v12898_v25, %v13146_v17  ;;  %v6351_v27 = vmul.f32 %v12719_v52, %v13058_v9  ;;  %v6393_v4 = vmul.f32 %v12903_v5, %v13104_v59  ;;  %v13196_v33 = vld [vmem:[#allocation2 + $0x8f] sm:$0xff] }
 0x5c3   : > { %8797 = vmatmul.mubr.f32.gmra.mrb[72].mxu0 %v6561_v12  ;;  %v6498_v47 = vadd.f32 %v6466_v53, %v6424_v40  ;;  %v5996_v62 = vadd.f32 %v5964_v30, %v5922_v57  ;;  %v6141_v63 = vadd.f32 %v6109_v38, %v6067_v18  ;;  %v6467_v49 = vmul.f32 %v12911_v32, %v13152_v26 }
 0x5c4   : > { %v6278_v56 = vadd.f32 %v6246_v43, %v5995_v60  ;;  %v6425_v42 = vadd.f32 %v6393_v4, %v6351_v27  ;;  %v5849_v6 = vmul.f32 %v12701_v46, %v12798_v20  ;;  %v5891_v9 = vmul.f32 %v12830_v23, %v13113_v39  ;;  %v14294_v60 = vld [vmem:[#allocation33_spill] sm:$0xff] }
 0x5c5   : > { %v6215_v24 = vadd.f32 %v6183_v34, %v6141_v63  ;;  %v5965_v13 = vmul.f32 %v12835_v16, %v13163_v7  ;;  %v6068_v1 = vmul.f32 %v12706_v61, %v13073_v3  ;;  %v6110_v22 = vmul.f32 %v12893_v31, %v13121_v29  ;;  %v13187_v3 = vld [vmem:[#allocation2 + $0x90] sm:$0xff]  ;;  %v13213_v43 = vld [vmem:[#allocation2 + $0x98] sm:$0xff] }
 0x5c6   : > { %v6562_v14 = vadd.f32 %v6498_v47, %v6278_v56  ;;  %v6499_v54 = vadd.f32 %v6467_v49, %v6425_v42  ;;  %v5923_v20 = vadd.f32 %v5891_v9, %v5849_v6  ;;  %v6352_v15 = vmul.f32 %v12719_v52, %v13081_v11  ;;  %v13221_v56 = vld [vmem:[#allocation2 + $0x97] sm:$0xff] }
 0x5c7   : > { %v6279_v41 = vadd.f32 %v6215_v24, %v5996_v62  ;;  %v6142_v48 = vadd.f32 %v6110_v22, %v6068_v1  ;;  %v6184_v8 = vmul.f32 %v12898_v25, %v13171_v35  ;;  %v6394_v45 = vmul.f32 %v12903_v5, %v13129_v44  ;;  %v13229_v24 = vld [vmem:[#allocation2 + $0x99] sm:$0xff] }
 0x5c8   : > { %8799 = vmatprep.mubr.f32.mxu0 %v6562_v14  ;;  %v6531_v2 = vmul.f32 %v14293_v10, %v6499_v54  ;;  %v6468_v21 = vmul.f32 %v12911_v32, %v13179_v37  ;;  %v5850_v36 = vmul.f32 %v12701_v46, %v12863_v51  ;;  %v5892_v11 = vmul.f32 %v12830_v23, %v13133_v19  ;;  %v13204_v51 = vld [vmem:[#allocation2 + $0x91] sm:$0xff] }
 0x5c9   : > { %v5997_v53 = vadd.f32 %v5965_v13, %v5923_v20  ;;  %v6216_v58 = vadd.f32 %v6184_v8, %v6142_v48  ;;  %v6426_v28 = vadd.f32 %v6394_v45, %v6352_v15  ;;  %v6069_v50 = vmul.f32 %v12706_v61, %v13094_v55  ;;  %v14295_v48 = vld [vmem:[#allocation47_spill] sm:$0xff] }
 0x5ca   : > { %v6563_v40 = vadd.f32 %v6531_v2, %v6279_v41  ;;  %v5924_v30 = vadd.f32 %v5892_v11, %v5850_v36  ;;  %v5966_v18 = vmul.f32 %v12835_v16, %v13187_v3  ;;  %v6111_v12 = vmul.f32 %v12893_v31, %v13146_v17  ;;  %v13246_v2 = vld [vmem:[#allocation2 + $0x9f] sm:$0xff] }
 0x5cb   : > { %v6248_v57 = vmul.f32 %v14294_v60, %v6216_v58  ;;  %v6185_v38 = vmul.f32 %v12898_v25, %v13196_v33  ;;  %v6353_v0 = vmul.f32 %v12719_v52, %v13104_v59  ;;  %v6395_v55 = vmul.f32 %v12903_v5, %v13152_v26 }
 0x5cc   : > { %8800 = vmatmul.mubr.f32.gmra.mrb[74].mxu0 %v6563_v40  ;;  %v6500_v34 = vadd.f32 %v6468_v21, %v6426_v28  ;;  %v5998_v27 = vadd.f32 %v5966_v18, %v5924_v30  ;;  %v6143_v4 = vadd.f32 %v6111_v12, %v6069_v50  ;;  %v5851_v47 = vmul.f32 %v12701_v46, %v13113_v39  ;;  %v14296_v30 = vld [vmem:[#allocation34_spill] sm:$0xff] }
 0x5cd   : > { %v6280_v62 = vadd.f32 %v6248_v57, %v5997_v53  ;;  %v6427_v63 = vadd.f32 %v6395_v55, %v6353_v0  ;;  %v6469_v49 = vmul.f32 %v12911_v32, %v13204_v51  ;;  %v5893_v59 = vmul.f32 %v12830_v23, %v13163_v7  ;;  %v13263_v57 = vld [vmem:[#allocation2 + $0xa8] sm:$0xff] }
 0x5ce   : > { %v6217_v42 = vadd.f32 %v6185_v38, %v6143_v4  ;;  %v5967_v6 = vmul.f32 %v12835_v16, %v13213_v43  ;;  %v6070_v9 = vmul.f32 %v12706_v61, %v13121_v29  ;;  %v6112_v39 = vmul.f32 %v12893_v31, %v13171_v35  ;;  %v13237_v29 = vld [vmem:[#allocation2 + $0xa0] sm:$0xff] }
 0x5cf   : > { %v6564_v13 = vadd.f32 %v6500_v34, %v6280_v62  ;;  %v6501_v1 = vadd.f32 %v6469_v49, %v6427_v63  ;;  %v5925_v22 = vadd.f32 %v5893_v59, %v5851_v47  ;;  %v6354_v14 = vmul.f32 %v12719_v52, %v13129_v44  ;;  %v13271_v62 = vld [vmem:[#allocation2 + $0xa7] sm:$0xff] }
 0x5d0   : > { %v6281_v54 = vadd.f32 %v6217_v42, %v5998_v27  ;;  %v6144_v20 = vadd.f32 %v6112_v39, %v6070_v9  ;;  %v6186_v15 = vmul.f32 %v12898_v25, %v13221_v56  ;;  %v6396_v41 = vmul.f32 %v12903_v5, %v13179_v37  ;;  %v13279_v42 = vld [vmem:[#allocation2 + $0xa9] sm:$0xff] }
 0x5d1   : > { %8802 = vmatprep.mubr.f32.mxu0 %v6564_v13  ;;  %v6533_v8 = vmul.f32 %v14295_v48, %v6501_v1  ;;  %v6470_v45 = vmul.f32 %v12911_v32, %v13229_v24  ;;  %v5852_v10 = vmul.f32 %v12701_v46, %v13133_v19  ;;  %v5894_v44 = vmul.f32 %v12830_v23, %v13187_v3  ;;  %v13254_v19 = vld [vmem:[#allocation2 + $0xa1] sm:$0xff] }
 0x5d2   : > { %v5999_v21 = vadd.f32 %v5967_v6, %v5925_v22  ;;  %v6218_v36 = vadd.f32 %v6186_v15, %v6144_v20  ;;  %v6428_v11 = vadd.f32 %v6396_v41, %v6354_v14  ;;  %v6071_v53 = vmul.f32 %v12706_v61, %v13146_v17  ;;  %v14297_v20 = vld [vmem:[#allocation48_spill] sm:$0xff] }
 0x5d3   : > { %v6565_v58 = vadd.f32 %v6533_v8, %v6281_v54  ;;  %v5926_v28 = vadd.f32 %v5894_v44, %v5852_v10  ;;  %v5968_v50 = vmul.f32 %v12835_v16, %v13237_v29  ;;  %v6113_v40 = vmul.f32 %v12893_v31, %v13196_v33  ;;  %v13296_v8 = vld [vmem:[#allocation2 + $0xaf] sm:$0xff] }
 0x5d4   : > { %v6250_v18 = vmul.f32 %v14296_v30, %v6218_v36  ;;  %v6187_v12 = vmul.f32 %v12898_v25, %v13246_v2  ;;  %v6355_v60 = vmul.f32 %v12719_v52, %v13152_v26  ;;  %v6397_v17 = vmul.f32 %v12903_v5, %v13204_v51 }
 0x5d5   : > { %8803 = vmatmul.mubr.f32.gmra.mrb[76].mxu0 %v6565_v58  ;;  %v6502_v38 = vadd.f32 %v6470_v45, %v6428_v11  ;;  %v6000_v0 = vadd.f32 %v5968_v50, %v5926_v28  ;;  %v6145_v55 = vadd.f32 %v6113_v40, %v6071_v53  ;;  %v5853_v34 = vmul.f32 %v12701_v46, %v13163_v7  ;;  %v14298_v28 = vld [vmem:[#allocation35_spill] sm:$0xff] }
 0x5d6   : > { %v6282_v27 = vadd.f32 %v6250_v18, %v5999_v21  ;;  %v6429_v4 = vadd.f32 %v6397_v17, %v6355_v60  ;;  %v6471_v47 = vmul.f32 %v12911_v32, %v13254_v19  ;;  %v5895_v26 = vmul.f32 %v12830_v23, %v13213_v43  ;;  %v13313_v18 = vld [vmem:[#allocation2 + $0xb8] sm:$0xff] }
 0x5d7   : > { %v6219_v63 = vadd.f32 %v6187_v12, %v6145_v55  ;;  %v5969_v49 = vmul.f32 %v12835_v16, %v13263_v57  ;;  %v6072_v59 = vmul.f32 %v12706_v61, %v13171_v35  ;;  %v6114_v7 = vmul.f32 %v12893_v31, %v13221_v56  ;;  %v13287_v35 = vld [vmem:[#allocation2 + $0xb0] sm:$0xff] }
 0x5d8   : > { %v6566_v6 = vadd.f32 %v6502_v38, %v6282_v27  ;;  %v6503_v9 = vadd.f32 %v6471_v47, %v6429_v4  ;;  %v5927_v39 = vadd.f32 %v5895_v26, %v5853_v34  ;;  %v6356_v13 = vmul.f32 %v12719_v52, %v13179_v37  ;;  %v13321_v27 = vld [vmem:[#allocation2 + $0xb7] sm:$0xff] }
 0x5d9   : > { %v6283_v1 = vadd.f32 %v6219_v63, %v6000_v0  ;;  %v6146_v22 = vadd.f32 %v6114_v7, %v6072_v59  ;;  %v6188_v14 = vmul.f32 %v12898_v25, %v13271_v62  ;;  %v6398_v54 = vmul.f32 %v12903_v5, %v13229_v24 }
 0x5da   : > { %8805 = vmatprep.mubr.f32.mxu0 %v6566_v6  ;;  %v6535_v15 = vmul.f32 %v14297_v20, %v6503_v9  ;;  %v6472_v41 = vmul.f32 %v12911_v32, %v13279_v42  ;;  %v5854_v48 = vmul.f32 %v12701_v46, %v13187_v3  ;;  %v5896_v37 = vmul.f32 %v12830_v23, %v13237_v29  ;;  %v13304_v3 = vld [vmem:[#allocation2 + $0xb1] sm:$0xff] }
 0x5db   : > { %v6001_v45 = vadd.f32 %v5969_v49, %v5927_v39  ;;  %v6220_v10 = vadd.f32 %v6188_v14, %v6146_v22  ;;  %v6430_v44 = vadd.f32 %v6398_v54, %v6356_v13  ;;  %v6073_v21 = vmul.f32 %v12706_v61, %v13196_v33  ;;  %v13351_v54 = vld [vmem:[#allocation2 + $0xbf] sm:$0xff] }
 0x5dc   : > { %v6567_v36 = vadd.f32 %v6535_v15, %v6283_v1  ;;  %v5928_v11 = vadd.f32 %v5896_v37, %v5854_v48  ;;  %v5970_v53 = vmul.f32 %v12835_v16, %v13287_v35  ;;  %v6115_v58 = vmul.f32 %v12893_v31, %v13246_v2  ;;  %v13356_v48 = vld [vmem:[%s14253_s29] ss:$0 sm:$0xff] }
 0x5dd   : > { %v6252_v50 = vmul.f32 %v14298_v28, %v6220_v10  ;;  %v6189_v40 = vmul.f32 %v12898_v25, %v13296_v8  ;;  %v6357_v30 = vmul.f32 %v12719_v52, %v13204_v51  ;;  %v6399_v33 = vmul.f32 %v12903_v5, %v13254_v19 }
 0x5de   : > { %8806 = vmatmul.mubr.f32.gmra.mrb[78].mxu0 %v6567_v36  ;;  %v6504_v12 = vadd.f32 %v6472_v41, %v6430_v44  ;;  %v6002_v60 = vadd.f32 %v5970_v53, %v5928_v11  ;;  %v6147_v17 = vadd.f32 %v6115_v58, %v6073_v21  ;;  %v5855_v38 = vmul.f32 %v12701_v46, %v13213_v43  ;;  %v13329_v43 = vld [vmem:[#allocation2 + $0xb9] sm:$0xff]  ;;  %v13364_v21 = vld [vmem:[#allocation2 + $0xc1] sm:$0xff]  ;;  %v14300_v36 = vld [vmem:[#allocation36_spill] sm:$0xff] }
 0x5df   : > { %v6284_v0 = vadd.f32 %v6252_v50, %v6001_v45  ;;  %v6431_v55 = vadd.f32 %v6399_v33, %v6357_v30  ;;  %v6473_v34 = vmul.f32 %v12911_v32, %v13304_v3  ;;  %v5897_v51 = vmul.f32 %v12830_v23, %v13263_v57  ;;  %v13372_v58 = vld [vmem:[%s14253_s29 + $0x2] ss:$0 sm:$0xff]  ;;  %v13378_v50 = vld [vmem:[#allocation2 + $0xc8] sm:$0xff] }
 0x5e0   : > { %v6221_v4 = vadd.f32 %v6189_v40, %v6147_v17  ;;  %v5971_v47 = vmul.f32 %v12835_v16, %v13313_v18  ;;  %v6074_v26 = vmul.f32 %v12706_v61, %v13221_v56  ;;  %v6116_v46 = vmul.f32 %v12893_v31, %v13271_v62  ;;  %v13337_v61 = vld [vmem:[#allocation2 + $0xc0] sm:$0xff]  ;;  %v14299_v56 = vld [vmem:[#allocation51_spill] sm:$0xff] }
 0x5e1   : > { %v6568_v63 = vadd.f32 %v6504_v12, %v6284_v0  ;;  %v6505_v49 = vadd.f32 %v6473_v34, %v6431_v55  ;;  %v5929_v59 = vadd.f32 %v5897_v51, %v5855_v38  ;;  %v6358_v7 = vmul.f32 %v12719_v52, %v13229_v24  ;;  %v13345_v52 = vld [vmem:[%s14253_s29 + $0x1] ss:$0 sm:$0xff]  ;;  %v13386_v0 = vld [vmem:[#allocation2 + $0xc7] sm:$0xff] }
 0x5e2   : > { %v6285_v6 = vadd.f32 %v6221_v4, %v6002_v60  ;;  %v6148_v9 = vadd.f32 %v6116_v46, %v6074_v26  ;;  %v6190_v39 = vmul.f32 %v12898_v25, %v13321_v27  ;;  %v6400_v13 = vmul.f32 %v12903_v5, %v13279_v42  ;;  %v13394_v4 = vld [vmem:[#allocation2 + $0xc9] sm:$0xff] }
 0x5e3   : > { %8808 = vmatprep.mubr.f32.mxu0 %v6568_v63  ;;  %v6537_v1 = vmul.f32 %v14299_v56, %v6505_v49  ;;  %v6474_v22 = vmul.f32 %v12911_v32, %v13329_v43  ;;  %v5856_v24 = vmul.f32 %v13345_v52, %v13237_v29  ;;  %v5898_v14 = vmul.f32 %v12830_v23, %v13287_v35 }
 0x5e4   : > { %v6003_v20 = vadd.f32 %v5971_v47, %v5929_v59  ;;  %v6222_v15 = vadd.f32 %v6190_v39, %v6148_v9  ;;  %v6432_v41 = vadd.f32 %v6400_v13, %v6358_v7  ;;  %v6075_v37 = vmul.f32 %v13356_v48, %v13246_v2  ;;  %v14301_v9 = vld [vmem:[#allocation54_spill] sm:$0xff] }
 0x5e5   : > { %v6569_v45 = vadd.f32 %v6537_v1, %v6285_v6  ;;  %v5930_v10 = vadd.f32 %v5898_v14, %v5856_v24  ;;  %v5972_v29 = vmul.f32 %v12835_v16, %v13337_v61  ;;  %v6117_v44 = vmul.f32 %v12893_v31, %v13296_v8  ;;  %v13411_v1 = vld [vmem:[#allocation2 + $0xcf] sm:$0xff] }
 0x5e6   : > { %v6254_v11 = vmul.f32 %v14300_v36, %v6222_v15  ;;  %v6191_v53 = vmul.f32 %v12898_v25, %v13351_v54  ;;  %v6359_v2 = vmul.f32 %v13372_v58, %v13254_v19  ;;  %v6401_v28 = vmul.f32 %v12903_v5, %v13304_v3 }
 0x5e7   : > { %8809 = vmatmul.mubr.f32.gmra.mrb[80].mxu0 %v6569_v45  ;;  %v6506_v40 = vadd.f32 %v6474_v22, %v6432_v41  ;;  %v6004_v30 = vadd.f32 %v5972_v29, %v5930_v10  ;;  %v6149_v33 = vadd.f32 %v6117_v44, %v6075_v37  ;;  %v5857_v12 = vmul.f32 %v13345_v52, %v13263_v57  ;;  %v14302_v10 = vld [vmem:[#allocation32_spill] sm:$0xff] }
 0x5e8   : > { %v6286_v60 = vadd.f32 %v6254_v11, %v6003_v20  ;;  %v6433_v17 = vadd.f32 %v6401_v28, %v6359_v2  ;;  %v6475_v38 = vmul.f32 %v12911_v32, %v13364_v21  ;;  %v5899_v19 = vmul.f32 %v12830_v23, %v13313_v18  ;;  %v13428_v11 = vld [vmem:[#allocation2 + $0xd8] sm:$0xff] }
 0x5e9   : > { %v6223_v55 = vadd.f32 %v6191_v53, %v6149_v33  ;;  %v5973_v34 = vmul.f32 %v12835_v16, %v13378_v50  ;;  %v6076_v51 = vmul.f32 %v13356_v48, %v13271_v62  ;;  %v6118_v57 = vmul.f32 %v12893_v31, %v13321_v27  ;;  %v13402_v62 = vld [vmem:[#allocation2 + $0xd0] sm:$0xff] }
 0x5ea   : > { %v6570_v47 = vadd.f32 %v6506_v40, %v6286_v60  ;;  %v6507_v26 = vadd.f32 %v6475_v38, %v6433_v17  ;;  %v5931_v46 = vadd.f32 %v5899_v19, %v5857_v12  ;;  %v6360_v63 = vmul.f32 %v13372_v58, %v13279_v42  ;;  %v13436_v60 = vld [vmem:[#allocation2 + $0xd7] sm:$0xff] }
 0x5eb   : > { %v6287_v49 = vadd.f32 %v6223_v55, %v6004_v30  ;;  %v6150_v59 = vadd.f32 %v6118_v57, %v6076_v51  ;;  %v6192_v7 = vmul.f32 %v12898_v25, %v13386_v0  ;;  %v6402_v6 = vmul.f32 %v12903_v5, %v13329_v43  ;;  %v13444_v55 = vld [vmem:[#allocation2 + $0xd9] sm:$0xff] }
 0x5ec   : > { %8811 = vmatprep.mubr.f32.mxu0 %v6570_v47  ;;  %v6539_v39 = vmul.f32 %v14301_v9, %v6507_v26  ;;  %v6476_v13 = vmul.f32 %v12911_v32, %v13394_v4  ;;  %v5858_v56 = vmul.f32 %v13345_v52, %v13287_v35  ;;  %v5900_v42 = vmul.f32 %v12830_v23, %v13337_v61  ;;  %v13419_v35 = vld [vmem:[#allocation2 + $0xd1] sm:$0xff]  ;;  %v13466_v9 = vld [vmem:[#allocation2 + $0xdf] sm:$0xff] }
 0x5ed   : > { %v6005_v22 = vadd.f32 %v5973_v34, %v5931_v46  ;;  %v6224_v24 = vadd.f32 %v6192_v7, %v6150_v59  ;;  %v6434_v14 = vadd.f32 %v6402_v6, %v6360_v63  ;;  %v6077_v20 = vmul.f32 %v13356_v48, %v13296_v8  ;;  %v14303_v63 = vld [vmem:[#allocation55_spill] sm:$0xff] }
 0x5ee   : > { %v6571_v15 = vadd.f32 %v6539_v39, %v6287_v49  ;;  %v5932_v41 = vadd.f32 %v5900_v42, %v5858_v56  ;;  %v5974_v37 = vmul.f32 %v12835_v16, %v13402_v62  ;;  %v6119_v45 = vmul.f32 %v12893_v31, %v13351_v54 }
 0x5ef   : > { %v6256_v29 = vmul.f32 %v14302_v10, %v6224_v24  ;;  %v6193_v44 = vmul.f32 %v12898_v25, %v13411_v1  ;;  %v6361_v36 = vmul.f32 %v13372_v58, %v13304_v3  ;;  %v6403_v8 = vmul.f32 %v12903_v5, %v13364_v21 }
 0x5f0   : > { %8812 = vmatmul.mubr.f32.gmra.mrb[82].mxu0 %v6571_v15  ;;  %v6508_v53 = vadd.f32 %v6476_v13, %v6434_v14  ;;  %v6006_v2 = vadd.f32 %v5974_v37, %v5932_v41  ;;  %v6151_v28 = vadd.f32 %v6119_v45, %v6077_v20  ;;  %v5859_v40 = vmul.f32 %v13345_v52, %v13313_v18  ;;  %v13479_v15 = vld [vmem:[#allocation2 + $0xe1] sm:$0xff] }
 0x5f1   : > { %v6288_v30 = vadd.f32 %v6256_v29, %v6005_v22  ;;  %v6435_v33 = vadd.f32 %v6403_v8, %v6361_v36  ;;  %v6477_v12 = vmul.f32 %v12911_v32, %v13419_v35  ;;  %v5901_v3 = vmul.f32 %v12830_v23, %v13378_v50  ;;  %v14304_v41 = vld [vmem:[#allocation31_spill] sm:$0xff] }
 0x5f2   : > { %v6225_v17 = vadd.f32 %v6193_v44, %v6151_v28  ;;  %v5975_v38 = vmul.f32 %v12835_v16, %v13428_v11  ;;  %v6078_v19 = vmul.f32 %v13356_v48, %v13321_v27  ;;  %v6120_v18 = vmul.f32 %v12893_v31, %v13386_v0  ;;  %v13452_v27 = vld [vmem:[#allocation2 + $0xe0] sm:$0xff]  ;;  %v13488_v29 = vld [vmem:[#allocation2 + $0xe8] sm:$0xff] }
 0x5f3   : > { %v6572_v34 = vadd.f32 %v6508_v53, %v6288_v30  ;;  %v6509_v51 = vadd.f32 %v6477_v12, %v6435_v33  ;;  %v5933_v57 = vadd.f32 %v5901_v3, %v5859_v40  ;;  %v6362_v23 = vmul.f32 %v13372_v58, %v13329_v43  ;;  %v13462_v43 = vld [vmem:[%s14253_s29 + $0x4] ss:$0 sm:$0xff]  ;;  %v13496_v30 = vld [vmem:[#allocation2 + $0xe7] sm:$0xff] }
 0x5f4   : > { %v6289_v47 = vadd.f32 %v6225_v17, %v6006_v2  ;;  %v6152_v26 = vadd.f32 %v6120_v18, %v6078_v19  ;;  %v6194_v46 = vmul.f32 %v12898_v25, %v13436_v60  ;;  %v6404_v16 = vmul.f32 %v12903_v5, %v13394_v4  ;;  %v13504_v17 = vld [vmem:[#allocation2 + $0xe9] sm:$0xff] }
 0x5f5   : > { %8814 = vmatprep.mubr.f32.mxu0 %v6572_v34  ;;  %v6541_v49 = vmul.f32 %v14303_v63, %v6509_v51  ;;  %v6478_v59 = vmul.f32 %v12911_v32, %v13444_v55  ;;  %v5860_v7 = vmul.f32 %v13345_v52, %v13337_v61  ;;  %v5902_v6 = vmul.f32 %v13462_v43, %v13402_v62  ;;  %v13473_v61 = vld [vmem:[%s14253_s29 + $0x7] ss:$0 sm:$0xff]  ;;  %v13521_v63 = vld [vmem:[#allocation2 + $0xef] sm:$0xff] }
 0x5f6   : > { %v6007_v39 = vadd.f32 %v5975_v38, %v5933_v57  ;;  %v6226_v13 = vadd.f32 %v6194_v46, %v6152_v26  ;;  %v6436_v56 = vadd.f32 %v6404_v16, %v6362_v23  ;;  %v6079_v42 = vmul.f32 %v13356_v48, %v13351_v54 }
 0x5f7   : > { %v6573_v22 = vadd.f32 %v6541_v49, %v6289_v47  ;;  %v5934_v24 = vadd.f32 %v5902_v6, %v5860_v7  ;;  %v5976_v14 = vmul.f32 %v13473_v61, %v13452_v27  ;;  %v6121_v20 = vmul.f32 %v12893_v31, %v13411_v1 }
 0x5f8   : > { %v6258_v37 = vmul.f32 %v14304_v41, %v6226_v13  ;;  %v6195_v54 = vmul.f32 %v12898_v25, %v13466_v9  ;;  %v6363_v45 = vmul.f32 %v13372_v58, %v13364_v21  ;;  %v6405_v10 = vmul.f32 %v12903_v5, %v13419_v35  ;;  %v13534_v13 = vld [vmem:[#allocation2 + $0xf1] sm:$0xff] }
 0x5f9   : > { %8815 = vmatmul.mubr.f32.gmra.mrb[84].mxu0 %v6573_v22  ;;  %v6510_v44 = vadd.f32 %v6478_v59, %v6436_v56  ;;  %v6008_v36 = vadd.f32 %v5976_v14, %v5934_v24  ;;  %v6153_v8 = vadd.f32 %v6121_v20, %v6079_v42  ;;  %v5861_v53 = vmul.f32 %v13345_v52, %v13378_v50  ;;  %v14306_v56 = vld [vmem:[#allocation37_spill] sm:$0xff]  ;;  %v13549_v14 = vld [vmem:[%s14253_s29 + $0x5] ss:$0 sm:$0xff] }
 0x5fa   : > { %v6290_v2 = vadd.f32 %v6258_v37, %v6007_v39  ;;  %v6437_v28 = vadd.f32 %v6405_v10, %v6363_v45  ;;  %v6479_v40 = vmul.f32 %v12911_v32, %v13479_v15  ;;  %v5903_v21 = vmul.f32 %v13462_v43, %v13428_v11  ;;  %v13553_v41 = vld [vmem:[#allocation2 + $0xf8] sm:$0xff] }
 0x5fb   : > { %v6227_v33 = vadd.f32 %v6195_v54, %v6153_v8  ;;  %v5977_v12 = vmul.f32 %v13473_v61, %v13488_v29  ;;  %v6080_v3 = vmul.f32 %v13356_v48, %v13386_v0  ;;  %v6122_v50 = vmul.f32 %v12893_v31, %v13436_v60  ;;  %v13512_v0 = vld [vmem:[#allocation2 + $0xf0] sm:$0xff] }
 0x5fc   : > { %v6574_v38 = vadd.f32 %v6510_v44, %v6290_v2  ;;  %v6511_v19 = vadd.f32 %v6479_v40, %v6437_v28  ;;  %v5935_v18 = vadd.f32 %v5903_v21, %v5861_v53  ;;  %v6364_v34 = vmul.f32 %v13372_v58, %v13394_v4  ;;  %v14305_v31 = vld [vmem:[#allocation56_spill] sm:$0xff] }
 0x5fd   : > { %v6291_v51 = vadd.f32 %v6227_v33, %v6008_v36  ;;  %v6154_v57 = vadd.f32 %v6122_v50, %v6080_v3  ;;  %v6196_v23 = vmul.f32 %v12898_v25, %v13496_v30  ;;  %v6406_v47 = vmul.f32 %v12903_v5, %v13444_v55  ;;  %v13566_v2 = vld [vmem:[#allocation2 + $0xf7] sm:$0xff] }
 0x5fe   : > { %8817 = vmatprep.mubr.f32.mxu0 %v6574_v38  ;;  %v6543_v26 = vmul.f32 %v14305_v31, %v6511_v19  ;;  %v6480_v46 = vmul.f32 %v12911_v32, %v13504_v17  ;;  %v5862_v16 = vmul.f32 %v13345_v52, %v13402_v62  ;;  %v5904_v4 = vmul.f32 %v13462_v43, %v13452_v27  ;;  %v13530_v32 = vld [vmem:[%s14253_s29 + $0x3] ss:$0 sm:$0xff]  ;;  %v13574_v33 = vld [vmem:[#allocation2 + $0xf9] sm:$0xff] }
 0x5ff   : > { %v6009_v25 = vadd.f32 %v5977_v12, %v5935_v18  ;;  %v6228_v49 = vadd.f32 %v6196_v23, %v6154_v57  ;;  %v6438_v59 = vadd.f32 %v6406_v47, %v6364_v34  ;;  %v6081_v5 = vmul.f32 %v13356_v48, %v13411_v1  ;;  %v13540_v1 = vld [vmem:[%s14253_s29 + $0x6] ss:$0 sm:$0xff]  ;;  %v14307_v57 = vld [vmem:[#allocation60_spill] sm:$0xff] }
 0x600   : > { %v6575_v7 = vadd.f32 %v6543_v26, %v6291_v51  ;;  %v5936_v6 = vadd.f32 %v5904_v4, %v5862_v16  ;;  %v5978_v39 = vmul.f32 %v13473_v61, %v13512_v0  ;;  %v6123_v62 = vmul.f32 %v13530_v32, %v13466_v9  ;;  %v13591_v26 = vld [vmem:[#allocation2 + $0xff] sm:$0xff] }
 0x601   : > { %v6260_v42 = vmul.f32 %v14306_v56, %v6228_v49  ;;  %v6197_v22 = vmul.f32 %v13540_v1, %v13521_v63  ;;  %v6365_v24 = vmul.f32 %v13372_v58, %v13419_v35  ;;  %v6407_v20 = vmul.f32 %v13549_v14, %v13479_v15  ;;  %v13560_v35 = vld [vmem:[%s14253_s29 + $0x8] ss:$0 sm:$0xff] }
 0x602   : > { %8818 = vmatmul.mubr.f32.gmra.mrb[86].mxu0 %v6575_v7  ;;  %v6512_v37 = vadd.f32 %v6480_v46, %v6438_v59  ;;  %v6010_v54 = vadd.f32 %v5978_v39, %v5936_v6  ;;  %v6155_v45 = vadd.f32 %v6123_v62, %v6081_v5  ;;  %v5863_v10 = vmul.f32 %v13345_v52, %v13428_v11  ;;  %v14308_v6 = vld [vmem:[#allocation38_spill] sm:$0xff] }
 0x603   : > { %v6292_v44 = vadd.f32 %v6260_v42, %v6009_v25  ;;  %v6439_v36 = vadd.f32 %v6407_v20, %v6365_v24  ;;  %v6481_v8 = vmul.f32 %v13560_v35, %v13534_v13  ;;  %v5905_v53 = vmul.f32 %v13462_v43, %v13488_v29  ;;  %v5869_v42 = vld [vmem:[#allocation2 + $0x108] sm:$0xff] }
 0x604   : > { %v6229_v28 = vadd.f32 %v6197_v22, %v6155_v45  ;;  %v5979_v40 = vmul.f32 %v13473_v61, %v13553_v41  ;;  %v6082_v11 = vmul.f32 %v13356_v48, %v13436_v60  ;;  %v6124_v21 = vmul.f32 %v13530_v32, %v13496_v30  ;;  %v13582_v60 = vld [vmem:[#allocation2 + $0x100] sm:$0xff] }
 0x605   : > { %v6576_v12 = vadd.f32 %v6512_v37, %v6292_v44  ;;  %v6513_v3 = vadd.f32 %v6481_v8, %v6439_v36  ;;  %v5937_v50 = vadd.f32 %v5905_v53, %v5863_v10  ;;  %v6366_v38 = vmul.f32 %v13372_v58, %v13444_v55 }
 0x606   : > { %v6293_v19 = vadd.f32 %v6229_v28, %v6010_v54  ;;  %v6156_v18 = vadd.f32 %v6124_v21, %v6082_v11  ;;  %v6198_v34 = vmul.f32 %v13540_v1, %v13566_v2  ;;  %v6408_v51 = vmul.f32 %v13549_v14, %v13504_v17 }
 0x607   : > { %8820 = vmatprep.mubr.f32.mxu0 %v6576_v12  ;;  %v6545_v23 = vmul.f32 %v14307_v57, %v6513_v3  ;;  %v6482_v47 = vmul.f32 %v13560_v35, %v13574_v33  ;;  %v5864_v31 = vmul.f32 %v13345_v52, %v13452_v27  ;;  %v5906_v55 = vmul.f32 %v13462_v43, %v13512_v0  ;;  %v13599_v27 = vld [vmem:[#allocation2 + $0x101] sm:$0xff] }
 0x608   : > { %v6011_v46 = vadd.f32 %v5979_v40, %v5937_v50  ;;  %v6230_v16 = vadd.f32 %v6198_v34, %v6156_v18  ;;  %v6440_v4 = vadd.f32 %v6408_v51, %v6366_v38  ;;  %v6083_v25 = vmul.f32 %v13356_v48, %v13466_v9  ;;  %v6372_v40 = vld [vmem:[#allocation2 + $0x109] sm:$0xff] }
 0x609   : > { %v6577_v49 = vadd.f32 %v6545_v23, %v6293_v19  ;;  %v5938_v59 = vadd.f32 %v5906_v55, %v5864_v31  ;;  %v5980_v5 = vmul.f32 %v13473_v61, %v13582_v60  ;;  %v6125_v7 = vmul.f32 %v13530_v32, %v13521_v63  ;;  %v5870_v18 = vld [vmem:[#allocation2 + $0x110] sm:$0xff] }
 0x60a   : > { %v6262_v39 = vmul.f32 %v14308_v6, %v6230_v16  ;;  %v6199_v62 = vmul.f32 %v13540_v1, %v13591_v26  ;;  %v6367_v56 = vmul.f32 %v13372_v58, %v13479_v15  ;;  %v6409_v9 = vmul.f32 %v13549_v14, %v13534_v13  ;;  %v6088_v15 = vld [vmem:[#allocation2 + $0x107] sm:$0xff] }
 0x60b   : > { %8821 = vmatmul.mubr.f32.gmra.mrb[88].mxu0 %v6577_v49  ;;  %v6514_v22 = vadd.f32 %v6482_v47, %v6440_v4  ;;  %v6012_v24 = vadd.f32 %v5980_v5, %v5938_v59  ;;  %v6157_v20 = vadd.f32 %v6125_v7, %v6083_v25  ;;  %v5865_v37 = vmul.f32 %v13345_v52, %v13488_v29  ;;  %v6373_v59 = vld [vmem:[#allocation2 + $0x111] sm:$0xff]  ;;  %v14310_v5 = vld [vmem:[#allocation39_spill] sm:$0xff] }
 0x60c   : > { %v6294_v54 = vadd.f32 %v6262_v39, %v6011_v46  ;;  %v6441_v45 = vadd.f32 %v6409_v9, %v6367_v56  ;;  %v6483_v10 = vmul.f32 %v13560_v35, %v13599_v27  ;;  %v5907_v44 = vmul.f32 %v13462_v43, %v13553_v41 }
 0x60d   : > { %v6231_v36 = vadd.f32 %v6199_v62, %v6157_v20  ;;  %v5981_v8 = vmul.f32 %v13473_v61, %v5869_v42  ;;  %v6084_v53 = vmul.f32 %v13356_v48, %v13496_v30  ;;  %v6126_v28 = vmul.f32 %v13530_v32, %v13566_v2  ;;  %v14309_v30 = vld [vmem:[#allocation62_spill] sm:$0xff] }
 0x60e   : > { %v6578_v29 = vadd.f32 %v6514_v22, %v6294_v54  ;;  %v6515_v11 = vadd.f32 %v6483_v10, %v6441_v45  ;;  %v5939_v21 = vadd.f32 %v5907_v44, %v5865_v37  ;;  %v6368_v12 = vmul.f32 %v13372_v58, %v13504_v17  ;;  %v6089_v17 = vld [vmem:[#allocation2 + $0x10f] sm:$0xff]  ;;  %v6162_v22 = vld [vmem:[#allocation2 + $0x117] sm:$0xff] }
 0x60f   : > { %v6295_v3 = vadd.f32 %v6231_v36, %v6012_v24  ;;  %v6158_v50 = vadd.f32 %v6126_v28, %v6084_v53  ;;  %v6200_v38 = vmul.f32 %v13540_v1, %v6088_v15  ;;  %v6410_v19 = vmul.f32 %v13549_v14, %v13574_v33  ;;  %v9834_v10 = vld [vmem:[#allocation2 + $0x10] sm:$0xff] }
 0x610   : > { %8823 = vmatprep.mubr.f32.mxu0 %v6578_v29  ;;  %v6547_v34 = vmul.f32 %v14309_v30, %v6515_v11  ;;  %v6484_v51 = vmul.f32 %v13560_v35, %v6372_v40  ;;  %v5866_v57 = vmul.f32 %v13345_v52, %v13512_v0  ;;  %v5908_v23 = vmul.f32 %v13462_v43, %v13582_v60 }
 0x611   : > { %v6013_v47 = vadd.f32 %v5981_v8, %v5939_v21  ;;  %v6232_v31 = vadd.f32 %v6200_v38, %v6158_v50  ;;  %v6442_v55 = vadd.f32 %v6410_v19, %v6368_v12  ;;  %v6085_v46 = vmul.f32 %v13356_v48, %v13521_v63  ;;  %v6446_v8 = vld [vmem:[#allocation2 + $0x119] sm:$0xff] }
 0x612   : > { %v6579_v16 = vadd.f32 %v6547_v34, %v6295_v3  ;;  %v5940_v4 = vadd.f32 %v5908_v23, %v5866_v57  ;;  %v5982_v25 = vmul.f32 %v13473_v61, %v5870_v18  ;;  %v6127_v49 = vmul.f32 %v13530_v32, %v13591_v26  ;;  %v6163_v3 = vld [vmem:[#allocation2 + $0x11f] sm:$0xff] }
 0x613   : > { %v6264_v0 = vmul.f32 %v14310_v5, %v6232_v31  ;;  %v6201_v7 = vmul.f32 %v13540_v1, %v6089_v17  ;;  %v6369_v6 = vmul.f32 %v13372_v58, %v13534_v13  ;;  %v6411_v39 = vmul.f32 %v13549_v14, %v13599_v27 }
 0x614   : > { %8824 = vmatmul.mubr.f32.gmra.mrb[90].mxu0 %v6579_v16  ;;  %v6516_v63 = vadd.f32 %v6484_v51, %v6442_v55  ;;  %v6014_v62 = vadd.f32 %v5982_v25, %v5940_v4  ;;  %v6159_v56 = vadd.f32 %v6127_v49, %v6085_v46  ;;  %v5867_v9 = vmul.f32 %v13345_v52, %v13553_v41  ;;  %v6447_v51 = vld [vmem:[#allocation2 + $0x121] sm:$0xff]  ;;  %v14312_v55 = vld [vmem:[#allocation40_spill] sm:$0xff]  ;;  %v14313_v25 = vld [vmem:[#allocation65_spill] sm:$0xff] }
 0x615   : > { %v6296_v24 = vadd.f32 %v6264_v0, %v6013_v47  ;;  %v6443_v20 = vadd.f32 %v6411_v39, %v6369_v6  ;;  %v6485_v37 = vmul.f32 %v13560_v35, %v6373_v59  ;;  %v5909_v54 = vmul.f32 %v13462_v43, %v5869_v42  ;;  %v14314_v49 = vld [vmem:[#allocation25_spill] sm:$0xff] }
 0x616   : > { %v6233_v45 = vadd.f32 %v6201_v7, %v6159_v56  ;;  %v5983_v13 = vmul.f32 %v9834_v10, %v13473_v61  ;;  %v6086_v44 = vmul.f32 %v13356_v48, %v13566_v2  ;;  %v6128_v36 = vmul.f32 %v13530_v32, %v6088_v15  ;;  %v14311_v61 = vld [vmem:[#allocation63_spill] sm:$0xff] }
 0x617   : > { %v6580_v53 = vadd.f32 %v6516_v63, %v6296_v24  ;;  %v6517_v28 = vadd.f32 %v6485_v37, %v6443_v20  ;;  %v6202_v41 = vmul.f32 %v13540_v1, %v6162_v22  ;;  %v6370_v29 = vmul.f32 %v13372_v58, %v13574_v33 }
 0x618   : > { %v6297_v11 = vadd.f32 %v6233_v45, %v6014_v62  ;;  %v5941_v21 = vadd.f32 %v5909_v54, %v5867_v9  ;;  %v6160_v42 = vadd.f32 %v6128_v36, %v6086_v44  ;;  %v6412_v12 = vmul.f32 %v13549_v14, %v6372_v40 }
 0x619   : > { %8826 = vmatprep.mubr.f32.mxu0 %v6580_v53  ;;  %v6549_v50 = vmul.f32 %v14311_v61, %v6517_v28  ;;  %v6486_v2 = vmul.f32 %v13560_v35, %v6446_v8  ;;  %v5868_v15 = vmul.f32 %v13345_v52, %v13582_v60  ;;  %v5910_v38 = vmul.f32 %v13462_v43, %v5870_v18 }
 0x61a   : > { %v6234_v19 = vadd.f32 %v6202_v41, %v6160_v42  ;;  %v6444_v30 = vadd.f32 %v6412_v12, %v6370_v29  ;;  %v6087_v33 = vmul.f32 %v13356_v48, %v13591_v26  ;;  %v6129_v34 = vmul.f32 %v13530_v32, %v6089_v17 }
 0x61b   : > { %v6581_v40 = vadd.f32 %v6549_v50, %v6297_v11  ;;  %v5942_v57 = vadd.f32 %v5910_v38, %v5868_v15  ;;  %v6203_v23 = vmul.f32 %v13540_v1, %v6163_v3  ;;  %v6371_v47 = vmul.f32 %v13372_v58, %v13599_v27 }
 0x61c   : > { %v6015_v31 = vadd.f32 %v5983_v13, %v5941_v21  ;;  %v6266_v52 = vmul.f32 %v14312_v55, %v6234_v19  ;;  %v6161_v60 = vadd.f32 %v6129_v34, %v6087_v33  ;;  %v6413_v43 = vmul.f32 %v13549_v14, %v6373_v59 }
 0x61d   : > { %8827 = vmatmul.mubr.f32.gmra.mrb[92].mxu0 %v6581_v40  ;;  %v6016_v18 = vadd.f32 %v5983_v13, %v5942_v57  ;;  %v6487_v48 = vmul.f32 %v13560_v35, %v6447_v51  ;;  %v6518_v32 = vadd.f32 %v6486_v2, %v6444_v30  ;;  %v4222_v5 = vsub.s32 1, %v14314_v49  ;;  %v9835_v35 = vld [vmem:[%s13803_s10] sm:$0xf] }
 0x61e   : > { %v6298_v26 = vadd.f32 %v6266_v52, %v6015_v31  ;;  %v6235_v17 = vadd.f32 %v6203_v23, %v6161_v60  ;;  %v6445_v46 = vadd.f32 %v6413_v43, %v6371_v47  ;;  %v6602_v14 = vsub.s32 3, %v14314_v49 }
 0x61f   : > { %v4223_v59 = vrot.slane %v9835_v35, %v4222_v5 }
 0x620   : > { %v6582_v16 = vadd.f32 %v6518_v32, %v6298_v26  ;;  %v6299_v4 = vadd.f32 %v6235_v17, %v6016_v18  ;;  %v6519_v1 = vadd.f32 %v6487_v48, %v6445_v46  ;;  %v6603_v0 = vrot.slane %v9835_v35, %v6602_v14 }
 0x622   : > { %8829 = vmatprep.mubr.f32.mxu0 %v6582_v16  ;;  %v6551_v58 = vmul.f32 %v14313_v25, %v6519_v1  ;;  %v13673_v7 = vadd.f32 %v6603_v0, %v4223_v59 }
 0x624   : > { %v6583_v27 = vadd.f32 %v6551_v58, %v6299_v4 }
 0x626   : > { %8830 = vmatmul.mubr.f32.gmra.mrb[94].mxu0 %v6583_v27 }
 0x678   : > { %v8786_v6 = vpop.f32.mrb[64].mxu0 }
 0x679   : > { %v9241_v39 = vadd.f32 %v13673_v7, %v8786_v6  ;;  %v6670_v63 = vpop.f32.mrb[65].mxu0 }
 0x67a   : > { %v9243_v62 = vadd.f32 %v13673_v7, %v6670_v63 }
 0x67b   : > { %v6862_v56 = vmax.f32 %v9241_v39, 0.0 }
 0x67c   : > { %v6861_v9 = vmax.f32 %v9243_v62, 0.0 }
 0x67d   : > { %v6894_v22 = vmin.f32 %v6862_v56, 6.0 }
 0x67e   : > { %v6893_v24 = vmin.f32 %v6861_v9, 6.0  ;;  %v8789_v20 = vpop.f32.mrb[66].mxu0 }
 0x67f   : > { %6926 = vst [vmem:[%s13678_s6 + $0x8] sm:$0xff] %v6894_v22  ;;  %v9245_v37 = vadd.f32 %v13673_v7, %v8789_v20  ;;  %v6680_v54 = vpop.f32.mrb[67].mxu0 }
 0x680   : > { %6925 = vst [vmem:[%s13678_s6] sm:$0xff] %v6893_v24  ;;  %v9247_v45 = vadd.f32 %v13673_v7, %v6680_v54 }
 0x681   : > { %v6864_v10 = vmax.f32 %v9245_v37, 0.0 }
 0x682   : > { %v6863_v13 = vmax.f32 %v9247_v45, 0.0 }
 0x683   : > { %v6896_v44 = vmin.f32 %v6864_v10, 6.0 }
 0x684   : > { %v6895_v36 = vmin.f32 %v6863_v13, 6.0 }
 0x685   : > { %6928 = vst [vmem:[%s13678_s6 + $0x18] sm:$0xff] %v6896_v44  ;;  %v8792_v8 = vpop.f32.mrb[68].mxu0 }
 0x686   : > { %6927 = vst [vmem:[%s13678_s6 + $0x10] sm:$0xff] %v6895_v36  ;;  %v9249_v53 = vadd.f32 %v13673_v7, %v8792_v8  ;;  %v6690_v28 = vpop.f32.mrb[69].mxu0 }
 0x687   : > { %v9251_v41 = vadd.f32 %v13673_v7, %v6690_v28 }
 0x688   : > { %v6866_v29 = vmax.f32 %v9249_v53, 0.0 }
 0x689   : > { %v6865_v11 = vmax.f32 %v9251_v41, 0.0 }
 0x68a   : > { %v6898_v21 = vmin.f32 %v6866_v29, 6.0 }
 0x68b   : > { %v6897_v42 = vmin.f32 %v6865_v11, 6.0 }
 0x68c   : > { %6930 = vst [vmem:[%s13678_s6 + $0x28] sm:$0xff] %v6898_v21 }
 0x68d   : > { %6929 = vst [vmem:[%s13678_s6 + $0x20] sm:$0xff] %v6897_v42  ;;  %v8795_v12 = vpop.f32.mrb[70].mxu0 }
 0x68e   : > { %v9253_v3 = vadd.f32 %v13673_v7, %v8795_v12  ;;  %v6700_v61 = vpop.f32.mrb[71].mxu0 }
 0x68f   : > { %v9255_v50 = vadd.f32 %v13673_v7, %v6700_v61 }
 0x690   : > { %v6868_v2 = vmax.f32 %v9253_v3, 0.0 }
 0x691   : > { %v6867_v15 = vmax.f32 %v9255_v50, 0.0 }
 0x692   : > { %v6900_v38 = vmin.f32 %v6868_v2, 6.0 }
 0x693   : > { %v6899_v19 = vmin.f32 %v6867_v15, 6.0 }
 0x694   : > { %6932 = vst [vmem:[%s13678_s6 + $0x38] sm:$0xff] %v6900_v38 }
 0x695   : > { %6931 = vst [vmem:[%s13678_s6 + $0x30] sm:$0xff] %v6899_v19 }
 0x696   : > { %v8798_v30 = vpop.f32.mrb[72].mxu0 }
 0x697   : > { %v9257_v33 = vadd.f32 %v13673_v7, %v8798_v30  ;;  %v6710_v34 = vpop.f32.mrb[73].mxu0 }
 0x698   : > { %v9259_v51 = vadd.f32 %v13673_v7, %v6710_v34 }
 0x699   : > { %v6870_v40 = vmax.f32 %v9257_v33, 0.0 }
 0x69a   : > { %v6869_v57 = vmax.f32 %v9259_v51, 0.0 }
 0x69b   : > { %v6902_v23 = vmin.f32 %v6870_v40, 6.0 }
 0x69c   : > { %v6901_v47 = vmin.f32 %v6869_v57, 6.0 }
 0x69d   : > { %6934 = vst [vmem:[%s13678_s6 + $0x48] sm:$0xff] %v6902_v23 }
 0x69e   : > { %6933 = vst [vmem:[%s13678_s6 + $0x40] sm:$0xff] %v6901_v47 }
 0x69f   : > { %v8801_v31 = vpop.f32.mrb[74].mxu0 }
 0x6a0   : > { %v9261_v55 = vadd.f32 %v13673_v7, %v8801_v31  ;;  %v6720_v52 = vpop.f32.mrb[75].mxu0 }
 0x6a1   : > { %v9263_v60 = vadd.f32 %v13673_v7, %v6720_v52 }
 0x6a2   : > { %v6872_v43 = vmax.f32 %v9261_v55, 0.0 }
 0x6a3   : > { %v6871_v18 = vmax.f32 %v9263_v60, 0.0 }
 0x6a4   : > { %v6904_v48 = vmin.f32 %v6872_v43, 6.0 }
 0x6a5   : > { %v6903_v26 = vmin.f32 %v6871_v18, 6.0 }
 0x6a6   : > { %6936 = vst [vmem:[%s13678_s6 + $0x58] sm:$0xff] %v6904_v48 }
 0x6a7   : > { %6935 = vst [vmem:[%s13678_s6 + $0x50] sm:$0xff] %v6903_v26 }
 0x6a8   : > { %v8804_v32 = vpop.f32.mrb[76].mxu0 }
 0x6a9   : > { %v9265_v17 = vadd.f32 %v13673_v7, %v8804_v32  ;;  %v6730_v46 = vpop.f32.mrb[77].mxu0 }
 0x6aa   : > { %v9267_v16 = vadd.f32 %v13673_v7, %v6730_v46 }
 0x6ab   : > { %v6874_v4 = vmax.f32 %v9265_v17, 0.0 }
 0x6ac   : > { %v6873_v1 = vmax.f32 %v9267_v16, 0.0 }
 0x6ad   : > { %v6906_v25 = vmin.f32 %v6874_v4, 6.0 }
 0x6ae   : > { %v6905_v58 = vmin.f32 %v6873_v1, 6.0 }
 0x6af   : > { %6938 = vst [vmem:[%s13678_s6 + $0x68] sm:$0xff] %v6906_v25 }
 0x6b0   : > { %6937 = vst [vmem:[%s13678_s6 + $0x60] sm:$0xff] %v6905_v58 }
 0x6b1   : > { %v8807_v27 = vpop.f32.mrb[78].mxu0 }
 0x6b2   : > { %v9269_v49 = vadd.f32 %v13673_v7, %v8807_v27  ;;  %v6740_v5 = vpop.f32.mrb[79].mxu0 }
 0x6b3   : > { %v9271_v14 = vadd.f32 %v13673_v7, %v6740_v5 }
 0x6b4   : > { %v6876_v35 = vmax.f32 %v9269_v49, 0.0 }
 0x6b5   : > { %v6875_v59 = vmax.f32 %v9271_v14, 0.0 }
 0x6b6   : > { %v6908_v0 = vmin.f32 %v6876_v35, 6.0 }
 0x6b7   : > { %v6907_v6 = vmin.f32 %v6875_v59, 6.0 }
 0x6b8   : > { %6940 = vst [vmem:[%s13678_s6 + $0x78] sm:$0xff] %v6908_v0 }
 0x6b9   : > { %6939 = vst [vmem:[%s13678_s6 + $0x70] sm:$0xff] %v6907_v6 }
 0x6ba   : > { %v8810_v39 = vpop.f32.mrb[80].mxu0 }
 0x6bb   : > { %v9273_v63 = vadd.f32 %v13673_v7, %v8810_v39  ;;  %v6750_v62 = vpop.f32.mrb[81].mxu0 }
 0x6bc   : > { %v9275_v56 = vadd.f32 %v13673_v7, %v6750_v62 }
 0x6bd   : > { %v6878_v9 = vmax.f32 %v9273_v63, 0.0 }
 0x6be   : > { %v6877_v22 = vmax.f32 %v9275_v56, 0.0 }
 0x6bf   : > { %v6910_v24 = vmin.f32 %v6878_v9, 6.0 }
 0x6c0   : > { %v6909_v20 = vmin.f32 %v6877_v22, 6.0 }
 0x6c1   : > { %6942 = vst [vmem:[%s13678_s6 + $0x88] sm:$0xff] %v6910_v24 }
 0x6c2   : > { %6941 = vst [vmem:[%s13678_s6 + $0x80] sm:$0xff] %v6909_v20 }
 0x6c3   : > { %v8813_v37 = vpop.f32.mrb[82].mxu0 }
 0x6c4   : > { %v9277_v54 = vadd.f32 %v13673_v7, %v8813_v37  ;;  %v6760_v45 = vpop.f32.mrb[83].mxu0 }
 0x6c5   : > { %v9279_v10 = vadd.f32 %v13673_v7, %v6760_v45 }
 0x6c6   : > { %v6880_v13 = vmax.f32 %v9277_v54, 0.0 }
 0x6c7   : > { %v6879_v44 = vmax.f32 %v9279_v10, 0.0 }
 0x6c8   : > { %v6912_v36 = vmin.f32 %v6880_v13, 6.0 }
 0x6c9   : > { %v6911_v8 = vmin.f32 %v6879_v44, 6.0 }
 0x6ca   : > { %6944 = vst [vmem:[%s13678_s6 + $0x98] sm:$0xff] %v6912_v36 }
 0x6cb   : > { %6943 = vst [vmem:[%s13678_s6 + $0x90] sm:$0xff] %v6911_v8 }
 0x6cc   : > { %v8816_v53 = vpop.f32.mrb[84].mxu0 }
 0x6cd   : > { %v9281_v28 = vadd.f32 %v13673_v7, %v8816_v53  ;;  %v6770_v41 = vpop.f32.mrb[85].mxu0 }
 0x6ce   : > { %v9283_v29 = vadd.f32 %v13673_v7, %v6770_v41 }
 0x6cf   : > { %v6882_v11 = vmax.f32 %v9281_v28, 0.0 }
 0x6d0   : > { %v6881_v21 = vmax.f32 %v9283_v29, 0.0 }
 0x6d1   : > { %v6914_v42 = vmin.f32 %v6882_v11, 6.0 }
 0x6d2   : > { %v6913_v12 = vmin.f32 %v6881_v21, 6.0 }
 0x6d3   : > { %6946 = vst [vmem:[%s13678_s6 + $0xa8] sm:$0xff] %v6914_v42 }
 0x6d4   : > { %6945 = vst [vmem:[%s13678_s6 + $0xa0] sm:$0xff] %v6913_v12 }
 0x6d5   : > { %v8819_v3 = vpop.f32.mrb[86].mxu0 }
 0x6d6   : > { %v9285_v61 = vadd.f32 %v13673_v7, %v8819_v3  ;;  %v6780_v50 = vpop.f32.mrb[87].mxu0 }
 0x6d7   : > { %v9287_v2 = vadd.f32 %v13673_v7, %v6780_v50 }
 0x6d8   : > { %v6884_v15 = vmax.f32 %v9285_v61, 0.0 }
 0x6d9   : > { %v6883_v38 = vmax.f32 %v9287_v2, 0.0 }
 0x6da   : > { %v6916_v19 = vmin.f32 %v6884_v15, 6.0 }
 0x6db   : > { %v6915_v30 = vmin.f32 %v6883_v38, 6.0 }
 0x6dc   : > { %6948 = vst [vmem:[%s13678_s6 + $0xb8] sm:$0xff] %v6916_v19 }
 0x6dd   : > { %6947 = vst [vmem:[%s13678_s6 + $0xb0] sm:$0xff] %v6915_v30 }
 0x6de   : > { %v8822_v33 = vpop.f32.mrb[88].mxu0 }
 0x6df   : > { %v9289_v34 = vadd.f32 %v13673_v7, %v8822_v33  ;;  %v6790_v51 = vpop.f32.mrb[89].mxu0 }
 0x6e0   : > { %v9291_v40 = vadd.f32 %v13673_v7, %v6790_v51 }
 0x6e1   : > { %v6886_v57 = vmax.f32 %v9289_v34, 0.0 }
 0x6e2   : > { %v6885_v23 = vmax.f32 %v9291_v40, 0.0 }
 0x6e3   : > { %v6918_v47 = vmin.f32 %v6886_v57, 6.0 }
 0x6e4   : > { %v6917_v31 = vmin.f32 %v6885_v23, 6.0 }
 0x6e5   : > { %6950 = vst [vmem:[%s13678_s6 + $0xc8] sm:$0xff] %v6918_v47 }
 0x6e6   : > { %6949 = vst [vmem:[%s13678_s6 + $0xc0] sm:$0xff] %v6917_v31 }
 0x6e7   : > { %v8825_v55 = vpop.f32.mrb[90].mxu0 }
 0x6e8   : > { %v9293_v52 = vadd.f32 %v13673_v7, %v8825_v55  ;;  %v6800_v60 = vpop.f32.mrb[91].mxu0 }
 0x6e9   : > { %v9295_v43 = vadd.f32 %v13673_v7, %v6800_v60 }
 0x6ea   : > { %v6888_v18 = vmax.f32 %v9293_v52, 0.0 }
 0x6eb   : > { %v6887_v48 = vmax.f32 %v9295_v43, 0.0 }
 0x6ec   : > { %v6920_v26 = vmin.f32 %v6888_v18, 6.0 }
 0x6ed   : > { %v6919_v32 = vmin.f32 %v6887_v48, 6.0 }
 0x6ee   : > { %6952 = vst [vmem:[%s13678_s6 + $0xd8] sm:$0xff] %v6920_v26 }
 0x6ef   : > { %6951 = vst [vmem:[%s13678_s6 + $0xd0] sm:$0xff] %v6919_v32 }
 0x6f0   : > { %v8828_v17 = vpop.f32.mrb[92].mxu0 }
 0x6f1   : > { %v9297_v46 = vadd.f32 %v13673_v7, %v8828_v17  ;;  %v6810_v16 = vpop.f32.mrb[93].mxu0 }
 0x6f2   : > { %v9299_v4 = vadd.f32 %v13673_v7, %v6810_v16 }
 0x6f3   : > { %v6890_v1 = vmax.f32 %v9297_v46, 0.0 }
 0x6f4   : > { %v6889_v25 = vmax.f32 %v9299_v4, 0.0 }
 0x6f5   : > { %v6922_v58 = vmin.f32 %v6890_v1, 6.0 }
 0x6f6   : > { %v6921_v27 = vmin.f32 %v6889_v25, 6.0 }
 0x6f7   : > { %6954 = vst [vmem:[%s13678_s6 + $0xe8] sm:$0xff] %v6922_v58 }
 0x6f8   : > { %6953 = vst [vmem:[%s13678_s6 + $0xe0] sm:$0xff] %v6921_v27 }
 0x6f9   : > { %v8831_v49 = vpop.f32.mrb[94].mxu0 }
 0x6fa   : > { %v9301_v5 = vadd.f32 %v13673_v7, %v8831_v49  ;;  %v6820_v14 = vpop.f32.mrb[95].mxu0 }
 0x6fb   : > { %v9303_v35 = vadd.f32 %v13673_v7, %v6820_v14 }
 0x6fc   : > { %v6892_v59 = vmax.f32 %v9301_v5, 0.0 }
 0x6fd   : > { %v6891_v0 = vmax.f32 %v9303_v35, 0.0 }
 0x6fe   : > { %v6924_v6 = vmin.f32 %v6892_v59, 6.0 }
 0x6ff   : > { %v6923_v39 = vmin.f32 %v6891_v0, 6.0 }
 0x700   : > { %6956 = vst [vmem:[%s13678_s6 + $0xf8] sm:$0xff] %v6924_v6 }
 0x701   : > { %6955 = vst [vmem:[%s13678_s6 + $0xf0] sm:$0xff] %v6923_v39 }
 0x702   : > { %10049 = shalt.err (!%p10046_p8)
}
 0x703   : > { %s10050_s14 = scalar_lea.hbm %s13745_s3, 4096  ;;  %s10054_s8 = scalar_lea.hbm %s14315_s1, 8192 }
 0x704   : > { %p10051_p11 = scmp.ne.s32.totalorder %s13745_s3, %s10050_s14  ;;  %p10055_p1 = scmp.lt.u32.totalorder %s13745_s3, %s14315_s1 }
 0x705   : > { %p10056_p13 = scmp.lt.u32.totalorder %s10054_s8, %s10050_s14  ;;  %p10058_p7 = scmp.lt.u32.totalorder %s10050_s14, %s13745_s3 }
 0x706   : > { %p10052_p3 = pnand %p10051_p11, %p14316_p2 }
 0x707   : > { %p10057_p0 = por %p10056_p13, %p10055_p1 }
 0x708   : > { %p10053_p12 = pneg %p10052_p3 }
 0x709   : > { %p10059_p6 = por %p10058_p7, %p10057_p0 }
 0x70b   : > { %p10060_p10 = pnand %p10059_p6, %p10053_p12 }
 0x70d   : > { %10063 = shalt.err (!%p10060_p10)
}
 0x70e   : > { %s10133_s16 = smov 128   ;;  %s10134_s6 = smov 8  }
 0x70f   : > { %9552 = dma.vmem_to_hbm [thread:$0]  (%p14316_p2), %s13747_s0, 4096, %s13745_s3, %s6958_s12, %s10133_s16, %s10133_s16, %s10134_s6  }
 0x710 PF: > { %s6986_s23 = sand.u32 1, %s10106_s19   ;;  %p14317_p5 = scmp.ne.s32.totalorder %s13978_s18, 0 }
 0x711   : > { %p14318_p9 = scmp.ge.s32.totalorder %s10118_s22, 2  ;;  %s6987_s13 = scalar_lea.sflag [#allocation6], %s6986_s23 }
 0x713   : > { %p9578_p4 = pnand %p14318_p9, %p14317_p5 }
 0x715   : > { %10101 = dma.done.wait (!%p9578_p4), %s6987_s13, 4096  }
 0x716   : > { %10103 = vsyncadd (!%p9578_p4), %s6987_s13, 4294963200  ;;  %s14319_s28 = sld [smem:[#allocation23_spill]]  ;;  %p30_p8 = scmp.ge.s32.totalorder %s10371_s17, 4  }
 0x717   : > { %s14320_s19 = smov %s10110_s20  ;;  %s14321_s20 = smov %s10114_s21 }
 0x718   : > { %s14323_s22 = smov %s10371_s17  ;;  %32 = sbr.rel (!%p30_p8) target bundleno = 19 (0x13), region = 166 }
 0x71c   : > { %s14322_s21 = smov %s14319_s28 }
 0x71f   :  { %6992 = vsyncpa [#allocation5], 1 }
 0x720   :  { %6994 = vsyncpa [#allocation5 + $0x1], 1 }
 0x721   :  { %6995 = vsyncpa [#allocation8], 1 }
 0x722   :  { %6997 = vsyncpa [#allocation8 + $0x1], 1 }
 0x723   :  { %6998 = vsyncpa [#allocation11], 1 }
 0x724   :  { %6999 = vsyncpa [#allocation14], 1 }
 0x725   :  { %7000 = vsyncpa [#allocation6], 1 }
 0x726   :  { %7002 = vsyncpa [#allocation6 + $0x1], 1 }

</bundles_post_ra>
